<compile_context>
chip_gen: v7x
topology: tpu7x:2x2x1
jax: 0.10.0
libtpu: 0.0.40
codegen_flags: <defaults>
</compile_context>

<pallas_src>
import jax
import jax.numpy as jnp
from jax import lax
from jax.experimental import pallas as pl
from jax.experimental.pallas import tpu as pltpu

NF = 16          # conv channels
HID = 128        # LSTM hidden size
NEG = 0.2        # LeakyReLU slope
BN_EPS = 1e-5
DILATIONS = (1, 3, 9)


def _leaky(x):
    # max(x, 0.2*x) == LeakyReLU(0.2) for slope in (0,1)
    return jnp.maximum(x, NEG * x)


# ----------------------------- fused Pallas kernel -------------------------

def _make_kernel(B, T, unroll):
    NB = B * T
    H = HID
    U = unroll
    CH = U * B                 # scratch rows consumed per chunk
    n_chunks = T // U

    def kernel(xtap_ref, w0s_ref, shift0_ref,
               w3s_ref, shr_ref, w1r_ref, b1r_ref,
               wih1_ref, b1l_ref,
               whh1_ref, wfused_ref, wcat2_ref, b2l_ref,
               wfc_ref, bfc_ref,
               o_ref, xp_ref):
        # ---- stem: ReflectionPad(1) + Conv1d(1, NF, 3) + BN + LeakyReLU ----
        # Cin = 1, so 3 VPU broadcast MACs (no tiny-K MXU pushes).
        xt = xtap_ref[...]                                   # (NB, 3), rows t*B+b
        acc = (xt[:, 0:1] * w0s_ref[0:1, :]
               + xt[:, 1:2] * w0s_ref[1:2, :]
               + xt[:, 2:3] * w0s_ref[2:3, :]
               + shift0_ref[...])                            # BN shift (scale folded)
        h = _leaky(acc)                                      # (NB, NF) f32

        # ---- ResBlocks (dilations 1,3,9): reflection taps, taps concatenated
        #      along channels -> single K=48 bf16 matmul + 1x1 bf16 matmul. ---
        for r, d in enumerate(DILATIONS):
            sh = d * B
            # tap0[t] = h[t-d] (reflect h[d-t] for t < d)
            left = [h[tt * B:(tt + 1) * B, :] for tt in range(d, 0, -1)]
            tap0 = jnp.concatenate(left + [h[0:NB - sh, :]], axis=0)
            # tap2[t] = h[t+d] (reflect h[2T-2-d-t] for t >= T-d)
            right = [h[(T - 2 - j) * B:(T - 1 - j) * B, :] for j in range(d)]
            tap2 = jnp.concatenate([h[sh:NB, :]] + right, axis=0)
            tcat = jnp.concatenate([tap0, h, tap2], axis=1).astype(jnp.bfloat16)

            y = jnp.dot(tcat, w3s_ref[r],
                        preferred_element_type=jnp.float32)  # BN scale folded in w3s
            y = _leaky(y + shr_ref[r])                       # BN shift + LeakyReLU
            y = jnp.dot(y.astype(jnp.bfloat16), w1r_ref[r],
                        preferred_element_type=jnp.float32) + b1r_ref[r]   # 1x1 conv
            h = h + y                                        # residual (f32)

        # ---- hoist LSTM layer-1 input projection out of the recurrence -----
        # Stored in bf16 to halve the scratch footprint (v7x VMEM).
        xp_ref[...] = (jnp.dot(h.astype(jnp.bfloat16), wih1_ref[...],
                               preferred_element_type=jnp.float32)
                       + b1l_ref[...]).astype(jnp.bfloat16)  # (NB, 4H)

        def gate_tail(g, c):                                 # PyTorch gate order i,f,g,o
            i = jax.nn.sigmoid(g[:, 0:H])
            f = jax.nn.sigmoid(g[:, H:2 * H])
            gg = jnp.tanh(g[:, 2 * H:3 * H])
            o = jax.nn.sigmoid(g[:, 3 * H:4 * H])
            c_new = f * c + i * gg
            return o * jnp.tanh(c_new), c_new

        def chunk_body(ci, carry):
            # carry at chunk entry (t0 = ci*U): states at time t0-1
            h1, c1, h2, c2 = carry
            base = pl.multiple_of(ci * CH, CH)
            xg_all = xp_ref[pl.ds(base, CH), :]              # (CH, 4H) bf16, t0..t0+U-1

            # -- first step of chunk (t = t0): layer-1 only (needs xg(t0)) --
            g1 = (xg_all[0:B, :].astype(jnp.float32)
                  + jnp.dot(h1.astype(jnp.bfloat16), whh1_ref[...],
                            preferred_element_type=jnp.float32))
            h1, c1 = gate_tail(g1, c1)                       # h1 = h1(t0)

            # -- pipelined steps t = t0..t0+U-2: one fused MXU push per step --
            #    fused = [h1(t) | h2(t-1)] @ [[Whh1, Wih2],[0, Whh2]]
            #          = [ g1_rec(t+1) | g2_pre(t) ]
            for j in range(U - 1):                           # fully unrolled
                lhs = jnp.concatenate([h1, h2], axis=1).astype(jnp.bfloat16)
                fused = jnp.dot(lhs, wfused_ref[...],
                                preferred_element_type=jnp.float32)     # (B, 8H)
                g1n = (fused[:, 0:4 * H]
                       + xg_all[(j + 1) * B:(j + 2) * B, :].astype(jnp.float32))
                g2 = fused[:, 4 * H:8 * H] + b2l_ref[...]
                # stacked gate tail: layer-1 @ t+1 (rows 0:B), layer-2 @ t (rows B:2B)
                gst = jnp.concatenate([g1n, g2], axis=0)     # (2B, 4H)
                cst = jnp.concatenate([c1, c2], axis=0)      # (2B, H)
                hst, cst = gate_tail(gst, cst)
                h1, c1 = hst[0:B, :], cst[0:B, :]            # h1(t+1), c1(t+1)
                h2, c2 = hst[B:2 * B, :], cst[B:2 * B, :]    # h2(t),   c2(t)

            # -- last step of chunk (t = t0+U-1): layer-2 only --
            lhs = jnp.concatenate([h1, h2], axis=1).astype(jnp.bfloat16)
            g2 = jnp.dot(lhs, wcat2_ref[...],
                         preferred_element_type=jnp.float32) + b2l_ref[...]
            h2, c2 = gate_tail(g2, c2)                       # h2 = h2(t0+U-1)
            return h1, c1, h2, c2

        z = jnp.zeros((B, H), jnp.float32)
        _, _, h2, _ = lax.fori_loop(0, n_chunks, chunk_body, (z, z, z, z))

        # ---- FC head on last-step hidden: lane reduction (avoid N=1 MXU op) -
        o_ref[...] = (jnp.sum(h2 * wfc_ref[...], axis=-1, keepdims=True)
                      + bfc_ref[...])

    return kernel


# ------------------------- host-side parameter prep ------------------------

def _bn_fold(gamma, beta, mean, var):
    scale = gamma * lax.rsqrt(var + BN_EPS)
    shift = beta - mean * scale
    return scale, shift


def prepare_params(params):
    """Fold BN into conv weights, build fused LSTM RHS, cast MXU weights to bf16."""
    p = {}
    scale0, shift0 = _bn_fold(**params["bn0"])
    p["w0s"] = jnp.transpose(params["conv0_w"][:, 0, :], (1, 0)) * scale0[None, :]
    p["shift0"] = shift0.reshape(1, NF)

    w3s, shr, w1r, b1r = [], [], [], []
    for r in range(3):
        pr = params[f"res{r}"]
        sc, sh = _bn_fold(pr["gamma"], pr["beta"], pr["mean"], pr["var"])
        w3 = jnp.transpose(pr["conv3_w"], (2, 1, 0)).reshape(3 * NF, NF)   # (k*ci, co)
        w3s.append((w3 * sc[None, :]).astype(jnp.bfloat16))
        shr.append(sh.reshape(1, NF))
        w1r.append(jnp.transpose(pr["conv1_w"][:, :, 0], (1, 0)).astype(jnp.bfloat16))
        b1r.append(pr["conv1_b"].reshape(1, NF))
    p["w3s"] = jnp.stack(w3s)        # (3, 3*NF, NF) bf16
    p["shiftr"] = jnp.stack(shr)     # (3, 1, NF) f32
    p["w1r"] = jnp.stack(w1r)        # (3, NF, NF) bf16
    p["b1r"] = jnp.stack(b1r)        # (3, 1, NF) f32

    l = params["lstm"]
    wih1 = jnp.transpose(l["w_ih_l0"])                       # (NF, 4H)
    whh1 = jnp.transpose(l["w_hh_l0"])                       # (H, 4H)
    wih2 = jnp.transpose(l["w_ih_l1"])                       # (H, 4H)
    whh2 = jnp.transpose(l["w_hh_l1"])                       # (H, 4H)
    # PyTorch LSTM has b_ih and b_hh per layer -> fold b = b_ih + b_hh.
    p["wih1"] = wih1.astype(jnp.bfloat16)
    p["b1l"] = (l["b_ih_l0"] + l["b_hh_l0"]).reshape(1, 4 * HID)
    p["whh1"] = whh1.astype(jnp.bfloat16)
    # Cross-step fused RHS: [h1(t) | h2(t-1)] @ wfused = [g1_rec(t+1) | g2_pre(t)]
    top = jnp.concatenate([whh1, wih2], axis=1)              # (H, 8H)
    bot = jnp.concatenate([jnp.zeros_like(whh2), whh2], axis=1)
    p["wfused"] = jnp.concatenate([top, bot], axis=0).astype(jnp.bfloat16)   # (2H, 8H)
    p["wcat2"] = jnp.concatenate([wih2, whh2], axis=0).astype(jnp.bfloat16)  # (2H, 4H)
    p["b2l"] = (l["b_ih_l1"] + l["b_hh_l1"]).reshape(1, 4 * HID)

    p["wfc"] = params["fc_w"]                                # (1, H)
    p["bfc"] = params["fc_b"].reshape(1, 1)
    return p


def init_params(key):
    keys = iter(jax.random.split(key, 48))

    def rnd(shape, s=0.1):
        return (s * jax.random.normal(next(keys), shape)).astype(jnp.float32)

    params = {
        "conv0_w": rnd((NF, 1, 3)),                          # Conv1d(1, nf, 3, bias=False)
        "bn0": dict(gamma=rnd((NF,)) + 1.0, beta=rnd((NF,)),
                    mean=jnp.zeros((NF,), jnp.float32),
                    var=jnp.ones((NF,), jnp.float32)),
    }
    for r in range(3):
        params[f"res{r}"] = dict(
            conv3_w=rnd((NF, NF, 3)),                        # Conv1d(nf, nf, 3, bias=False)
            gamma=rnd((NF,)) + 1.0, beta=rnd((NF,)),
            mean=jnp.zeros((NF,), jnp.float32),
            var=jnp.ones((NF,), jnp.float32),
            conv1_w=rnd((NF, NF, 1)), conv1_b=rnd((NF,)),    # Conv1d(nf, nf, 1)
        )
    params["lstm"] = dict(
        w_ih_l0=rnd((4 * HID, NF)), w_hh_l0=rnd((4 * HID, HID)),
        b_ih_l0=rnd((4 * HID,)), b_hh_l0=rnd((4 * HID,)),
        w_ih_l1=rnd((4 * HID, HID)), w_hh_l1=rnd((4 * HID, HID)),
        b_ih_l1=rnd((4 * HID,)), b_hh_l1=rnd((4 * HID,)),
    )
    params["fc_w"] = rnd((1, HID))                           # Linear(128, 1)
    params["fc_b"] = rnd((1,))
    return params


# --------------------------------- forward ---------------------------------

def _pick_unroll(B, T):
    # Prefer CH = unroll*B a multiple of 8 (sublane-aligned scratch reads).
    u = next((u for u in (8, 4, 2, 1) if T % u == 0 and (u * B) % 8 == 0), None)
    if u is None:
        u = next(u for u in (8, 4, 2, 1) if T % u == 0)
    return u


def lstemo2_forward(prep, x):
    """x: (B, 1, T) float32 (PyTorch NCL).  Returns (B, 1)."""
    B, C, T = x.shape
    assert C == 1
    assert T >= 10, "reflection padding with dilation 9 requires T >= 10"
    unroll = _pick_unroll(B, T)
    n_chunks = T // unroll

    # Host-side prep of the raw input only: stem taps in time-major order.
    x2 = x[:, 0, :]                                          # (B, T)
    xp = jnp.pad(x2, ((0, 0), (1, 1)), mode="reflect")       # ReflectionPad1d(1)
    taps = jnp.stack([xp[:, 0:T], xp[:, 1:T + 1], xp[:, 2:T + 2]], axis=-1)
    x_taps = jnp.transpose(taps, (1, 0, 2)).reshape(T * B, 3)  # rows = t*B + b

    args = (x_taps, prep["w0s"], prep["shift0"],
            prep["w3s"], prep["shiftr"], prep["w1r"], prep["b1r"],
            prep["wih1"], prep["b1l"],
            prep["whh1"], prep["wfused"], prep["wcat2"], prep["b2l"],
            prep["wfc"], prep["bfc"])

    flops = int(2 * B * (n_chunks * (HID * 4 * HID + 2 * HID * 4 * HID)
                         + (unroll - 1) * n_chunks * 2 * HID * 8 * HID)  # recurrence
                + 2 * T * B * NF * 4 * HID                               # hoisted proj
                + 3 * 2 * T * B * (3 * NF * NF + NF * NF)                # resblocks
                + 2 * T * B * 3 * NF)                                    # stem
    transc = int(T * B * 2 * 6 * HID)
    nbytes = int(sum(a.size * a.dtype.itemsize for a in args) + B * 4)
    scratch_bytes = T * B * 4 * HID * 2                      # bf16 projection scratch
    vmem_limit = int(max(32 * 1024 * 1024,
                         nbytes + scratch_bytes + 8 * 1024 * 1024))

    vmem = pl.BlockSpec(memory_space=pltpu.MemorySpace.VMEM)
    return pl.pallas_call(
        _make_kernel(B, T, unroll),
        out_shape=jax.ShapeDtypeStruct((B, 1), jnp.float32),
        in_specs=[vmem] * len(args),
        out_specs=vmem,
        scratch_shapes=[pltpu.VMEM((T * B, 4 * HID), jnp.bfloat16)],
        compiler_params=pltpu.CompilerParams(vmem_limit_bytes=vmem_limit),
        cost_estimate=pl.CostEstimate(flops=flops, transcendentals=transc,
                                      bytes_accessed=nbytes),
    )(*args)


if __name__ == "__main__":
    key = jax.random.PRNGKey(0)
    pkey, xkey = jax.random.split(key)
    params = init_params(pkey)
    prep = prepare_params(params)          # one-time host-side weight prep

    B, T = 2, 64
    x = jax.random.normal(xkey, (B, 1, T), dtype=jnp.float32)

    y = jax.jit(lstemo2_forward)(prep, x)
    jax.block_until_ready(y)
    assert y.shape == (B, 1) and y.dtype == jnp.float32
    print("KERNEL_OK")
</pallas_src>

<mosaic_0001>
module attributes {stable_mosaic.version = 11 : i64} {
  func.func @kernel(%arg0: memref<128x3xf32, #tpu.memory_space<vmem>>, %arg1: memref<3x16xf32, #tpu.memory_space<vmem>>, %arg2: memref<1x16xf32, #tpu.memory_space<vmem>>, %arg3: memref<3x48x16xbf16, #tpu.memory_space<vmem>>, %arg4: memref<3x1x16xf32, #tpu.memory_space<vmem>>, %arg5: memref<3x16x16xbf16, #tpu.memory_space<vmem>>, %arg6: memref<3x1x16xf32, #tpu.memory_space<vmem>>, %arg7: memref<16x512xbf16, #tpu.memory_space<vmem>>, %arg8: memref<1x512xf32, #tpu.memory_space<vmem>>, %arg9: memref<128x512xbf16, #tpu.memory_space<vmem>>, %arg10: memref<256x1024xbf16, #tpu.memory_space<vmem>>, %arg11: memref<256x512xbf16, #tpu.memory_space<vmem>>, %arg12: memref<1x512xf32, #tpu.memory_space<vmem>>, %arg13: memref<1x128xf32, #tpu.memory_space<vmem>>, %arg14: memref<1x1xf32, #tpu.memory_space<vmem>>, %arg15: memref<2x1xf32, #tpu.memory_space<vmem>>, %arg16: memref<128x512xbf16, #tpu.memory_space<vmem>>) attributes {dimension_semantics = [], scalar_prefetch = 0 : i64, scratch_operands = 1 : i64, tpu.core_type = #tpu.core_type<tc>} {
    %c0 = arith.constant 0 : index
    %c0_0 = arith.constant 0 : index
    %0 = vector.load %arg0[%c0, %c0_0] : memref<128x3xf32, #tpu.memory_space<vmem>>, vector<128x3xf32>
    %1 = vector.extract_strided_slice %0 {offsets = [0, 0], sizes = [128, 1], strides = [1, 1]} : vector<128x3xf32> to vector<128x1xf32>
    %c0_1 = arith.constant 0 : index
    %c0_2 = arith.constant 0 : index
    %2 = vector.load %arg1[%c0_1, %c0_2] : memref<3x16xf32, #tpu.memory_space<vmem>>, vector<1x16xf32>
    %3 = vector.broadcast %1 : vector<128x1xf32> to vector<128x16xf32>
    %4 = vector.broadcast %2 : vector<1x16xf32> to vector<128x16xf32>
    %5 = arith.mulf %3, %4 : vector<128x16xf32>
    %6 = vector.extract_strided_slice %0 {offsets = [0, 1], sizes = [128, 1], strides = [1, 1]} : vector<128x3xf32> to vector<128x1xf32>
    %c1 = arith.constant 1 : index
    %c0_3 = arith.constant 0 : index
    %7 = vector.load %arg1[%c1, %c0_3] : memref<3x16xf32, #tpu.memory_space<vmem>>, vector<1x16xf32>
    %8 = vector.broadcast %6 : vector<128x1xf32> to vector<128x16xf32>
    %9 = vector.broadcast %7 : vector<1x16xf32> to vector<128x16xf32>
    %10 = arith.mulf %8, %9 : vector<128x16xf32>
    %11 = arith.addf %5, %10 : vector<128x16xf32>
    %12 = vector.extract_strided_slice %0 {offsets = [0, 2], sizes = [128, 1], strides = [1, 1]} : vector<128x3xf32> to vector<128x1xf32>
    %c2 = arith.constant 2 : index
    %c0_4 = arith.constant 0 : index
    %13 = vector.load %arg1[%c2, %c0_4] : memref<3x16xf32, #tpu.memory_space<vmem>>, vector<1x16xf32>
    %14 = vector.broadcast %12 : vector<128x1xf32> to vector<128x16xf32>
    %15 = vector.broadcast %13 : vector<1x16xf32> to vector<128x16xf32>
    %16 = arith.mulf %14, %15 : vector<128x16xf32>
    %17 = arith.addf %11, %16 : vector<128x16xf32>
    %c0_5 = arith.constant 0 : index
    %c0_6 = arith.constant 0 : index
    %18 = vector.load %arg2[%c0_5, %c0_6] : memref<1x16xf32, #tpu.memory_space<vmem>>, vector<1x16xf32>
    %19 = vector.broadcast %18 : vector<1x16xf32> to vector<128x16xf32>
    %20 = arith.addf %17, %19 : vector<128x16xf32>
    %cst = arith.constant 2.000000e-01 : f32
    %21 = vector.broadcast %cst : f32 to vector<128x16xf32>
    %22 = arith.mulf %21, %20 : vector<128x16xf32>
    %23 = arith.maximumf %20, %22 : vector<128x16xf32>
    %24 = vector.extract_strided_slice %23 {offsets = [2, 0], sizes = [2, 16], strides = [1, 1]} : vector<128x16xf32> to vector<2x16xf32>
    %25 = vector.extract_strided_slice %23 {offsets = [0, 0], sizes = [126, 16], strides = [1, 1]} : vector<128x16xf32> to vector<126x16xf32>
    %26 = tpu.concatenate %24, %25 in 0 : vector<2x16xf32>, vector<126x16xf32> -> vector<128x16xf32>
    %27 = vector.extract_strided_slice %23 {offsets = [124, 0], sizes = [2, 16], strides = [1, 1]} : vector<128x16xf32> to vector<2x16xf32>
    %28 = vector.extract_strided_slice %23 {offsets = [2, 0], sizes = [126, 16], strides = [1, 1]} : vector<128x16xf32> to vector<126x16xf32>
    %29 = tpu.concatenate %28, %27 in 0 : vector<126x16xf32>, vector<2x16xf32> -> vector<128x16xf32>
    %30 = tpu.concatenate %26, %23, %29 in 1 : vector<128x16xf32>, vector<128x16xf32>, vector<128x16xf32> -> vector<128x48xf32>
    %31 = arith.truncf %30 : vector<128x48xf32> to vector<128x48xbf16>
    %c0_7 = arith.constant 0 : index
    %c0_8 = arith.constant 0 : index
    %c0_9 = arith.constant 0 : index
    %32 = vector.load %arg3[%c0_7, %c0_8, %c0_9] : memref<3x48x16xbf16, #tpu.memory_space<vmem>>, vector<1x48x16xbf16>
    %33 = vector.shape_cast %32 : vector<1x48x16xbf16> to vector<48x16xbf16>
    %cst_10 = arith.constant dense<0.000000e+00> : vector<128x16xf32>
    %34 = tpu.matmul %31, %33, %cst_10 {dimension_numbers = #tpu.dot_dimension_numbers<[1], [0], [0], [1], [0, 0, 1, 1], [], []>} : vector<128x48xbf16>, vector<48x16xbf16>, vector<128x16xf32> -> vector<128x16xf32>
    %c0_11 = arith.constant 0 : index
    %c0_12 = arith.constant 0 : index
    %c0_13 = arith.constant 0 : index
    %35 = vector.load %arg4[%c0_11, %c0_12, %c0_13] : memref<3x1x16xf32, #tpu.memory_space<vmem>>, vector<1x1x16xf32>
    %36 = vector.shape_cast %35 : vector<1x1x16xf32> to vector<1x16xf32>
    %37 = vector.broadcast %36 : vector<1x16xf32> to vector<128x16xf32>
    %38 = arith.addf %34, %37 : vector<128x16xf32>
    %cst_14 = arith.constant 2.000000e-01 : f32
    %39 = vector.broadcast %cst_14 : f32 to vector<128x16xf32>
    %40 = arith.mulf %39, %38 : vector<128x16xf32>
    %41 = arith.maximumf %38, %40 : vector<128x16xf32>
    %42 = arith.truncf %41 : vector<128x16xf32> to vector<128x16xbf16>
    %c0_15 = arith.constant 0 : index
    %c0_16 = arith.constant 0 : index
    %c0_17 = arith.constant 0 : index
    %43 = vector.load %arg5[%c0_15, %c0_16, %c0_17] : memref<3x16x16xbf16, #tpu.memory_space<vmem>>, vector<1x16x16xbf16>
    %44 = vector.shape_cast %43 : vector<1x16x16xbf16> to vector<16x16xbf16>
    %cst_18 = arith.constant dense<0.000000e+00> : vector<128x16xf32>
    %45 = tpu.matmul %42, %44, %cst_18 {dimension_numbers = #tpu.dot_dimension_numbers<[1], [0], [0], [1], [0, 0, 1, 1], [], []>} : vector<128x16xbf16>, vector<16x16xbf16>, vector<128x16xf32> -> vector<128x16xf32>
    %c0_19 = arith.constant 0 : index
    %c0_20 = arith.constant 0 : index
    %c0_21 = arith.constant 0 : index
    %46 = vector.load %arg6[%c0_19, %c0_20, %c0_21] : memref<3x1x16xf32, #tpu.memory_space<vmem>>, vector<1x1x16xf32>
    %47 = vector.shape_cast %46 : vector<1x1x16xf32> to vector<1x16xf32>
    %48 = vector.broadcast %47 : vector<1x16xf32> to vector<128x16xf32>
    %49 = arith.addf %45, %48 : vector<128x16xf32>
    %50 = arith.addf %23, %49 : vector<128x16xf32>
    %51 = vector.extract_strided_slice %50 {offsets = [6, 0], sizes = [2, 16], strides = [1, 1]} : vector<128x16xf32> to vector<2x16xf32>
    %52 = vector.extract_strided_slice %50 {offsets = [4, 0], sizes = [2, 16], strides = [1, 1]} : vector<128x16xf32> to vector<2x16xf32>
    %53 = vector.extract_strided_slice %50 {offsets = [2, 0], sizes = [2, 16], strides = [1, 1]} : vector<128x16xf32> to vector<2x16xf32>
    %54 = vector.extract_strided_slice %50 {offsets = [0, 0], sizes = [122, 16], strides = [1, 1]} : vector<128x16xf32> to vector<122x16xf32>
    %55 = tpu.concatenate %51, %52, %53, %54 in 0 : vector<2x16xf32>, vector<2x16xf32>, vector<2x16xf32>, vector<122x16xf32> -> vector<128x16xf32>
    %56 = vector.extract_strided_slice %50 {offsets = [124, 0], sizes = [2, 16], strides = [1, 1]} : vector<128x16xf32> to vector<2x16xf32>
    %57 = vector.extract_strided_slice %50 {offsets = [122, 0], sizes = [2, 16], strides = [1, 1]} : vector<128x16xf32> to vector<2x16xf32>
    %58 = vector.extract_strided_slice %50 {offsets = [120, 0], sizes = [2, 16], strides = [1, 1]} : vector<128x16xf32> to vector<2x16xf32>
    %59 = vector.extract_strided_slice %50 {offsets = [6, 0], sizes = [122, 16], strides = [1, 1]} : vector<128x16xf32> to vector<122x16xf32>
    %60 = tpu.concatenate %59, %56, %57, %58 in 0 : vector<122x16xf32>, vector<2x16xf32>, vector<2x16xf32>, vector<2x16xf32> -> vector<128x16xf32>
    %61 = tpu.concatenate %55, %50, %60 in 1 : vector<128x16xf32>, vector<128x16xf32>, vector<128x16xf32> -> vector<128x48xf32>
    %62 = arith.truncf %61 : vector<128x48xf32> to vector<128x48xbf16>
    %c1_22 = arith.constant 1 : index
    %c0_23 = arith.constant 0 : index
    %c0_24 = arith.constant 0 : index
    %63 = vector.load %arg3[%c1_22, %c0_23, %c0_24] : memref<3x48x16xbf16, #tpu.memory_space<vmem>>, vector<1x48x16xbf16>
    %64 = vector.shape_cast %63 : vector<1x48x16xbf16> to vector<48x16xbf16>
    %cst_25 = arith.constant dense<0.000000e+00> : vector<128x16xf32>
    %65 = tpu.matmul %62, %64, %cst_25 {dimension_numbers = #tpu.dot_dimension_numbers<[1], [0], [0], [1], [0, 0, 1, 1], [], []>} : vector<128x48xbf16>, vector<48x16xbf16>, vector<128x16xf32> -> vector<128x16xf32>
    %c1_26 = arith.constant 1 : index
    %c0_27 = arith.constant 0 : index
    %c0_28 = arith.constant 0 : index
    %66 = vector.load %arg4[%c1_26, %c0_27, %c0_28] : memref<3x1x16xf32, #tpu.memory_space<vmem>>, vector<1x1x16xf32>
    %67 = vector.shape_cast %66 : vector<1x1x16xf32> to vector<1x16xf32>
    %68 = vector.broadcast %67 : vector<1x16xf32> to vector<128x16xf32>
    %69 = arith.addf %65, %68 : vector<128x16xf32>
    %cst_29 = arith.constant 2.000000e-01 : f32
    %70 = vector.broadcast %cst_29 : f32 to vector<128x16xf32>
    %71 = arith.mulf %70, %69 : vector<128x16xf32>
    %72 = arith.maximumf %69, %71 : vector<128x16xf32>
    %73 = arith.truncf %72 : vector<128x16xf32> to vector<128x16xbf16>
    %c1_30 = arith.constant 1 : index
    %c0_31 = arith.constant 0 : index
    %c0_32 = arith.constant 0 : index
    %74 = vector.load %arg5[%c1_30, %c0_31, %c0_32] : memref<3x16x16xbf16, #tpu.memory_space<vmem>>, vector<1x16x16xbf16>
    %75 = vector.shape_cast %74 : vector<1x16x16xbf16> to vector<16x16xbf16>
    %cst_33 = arith.constant dense<0.000000e+00> : vector<128x16xf32>
    %76 = tpu.matmul %73, %75, %cst_33 {dimension_numbers = #tpu.dot_dimension_numbers<[1], [0], [0], [1], [0, 0, 1, 1], [], []>} : vector<128x16xbf16>, vector<16x16xbf16>, vector<128x16xf32> -> vector<128x16xf32>
    %c1_34 = arith.constant 1 : index
    %c0_35 = arith.constant 0 : index
    %c0_36 = arith.constant 0 : index
    %77 = vector.load %arg6[%c1_34, %c0_35, %c0_36] : memref<3x1x16xf32, #tpu.memory_space<vmem>>, vector<1x1x16xf32>
    %78 = vector.shape_cast %77 : vector<1x1x16xf32> to vector<1x16xf32>
    %79 = vector.broadcast %78 : vector<1x16xf32> to vector<128x16xf32>
    %80 = arith.addf %76, %79 : vector<128x16xf32>
    %81 = arith.addf %50, %80 : vector<128x16xf32>
    %82 = vector.extract_strided_slice %81 {offsets = [18, 0], sizes = [2, 16], strides = [1, 1]} : vector<128x16xf32> to vector<2x16xf32>
    %83 = vector.extract_strided_slice %81 {offsets = [16, 0], sizes = [2, 16], strides = [1, 1]} : vector<128x16xf32> to vector<2x16xf32>
    %84 = vector.extract_strided_slice %81 {offsets = [14, 0], sizes = [2, 16], strides = [1, 1]} : vector<128x16xf32> to vector<2x16xf32>
    %85 = vector.extract_strided_slice %81 {offsets = [12, 0], sizes = [2, 16], strides = [1, 1]} : vector<128x16xf32> to vector<2x16xf32>
    %86 = vector.extract_strided_slice %81 {offsets = [10, 0], sizes = [2, 16], strides = [1, 1]} : vector<128x16xf32> to vector<2x16xf32>
    %87 = vector.extract_strided_slice %81 {offsets = [8, 0], sizes = [2, 16], strides = [1, 1]} : vector<128x16xf32> to vector<2x16xf32>
    %88 = vector.extract_strided_slice %81 {offsets = [6, 0], sizes = [2, 16], strides = [1, 1]} : vector<128x16xf32> to vector<2x16xf32>
    %89 = vector.extract_strided_slice %81 {offsets = [4, 0], sizes = [2, 16], strides = [1, 1]} : vector<128x16xf32> to vector<2x16xf32>
    %90 = vector.extract_strided_slice %81 {offsets = [2, 0], sizes = [2, 16], strides = [1, 1]} : vector<128x16xf32> to vector<2x16xf32>
    %91 = vector.extract_strided_slice %81 {offsets = [0, 0], sizes = [110, 16], strides = [1, 1]} : vector<128x16xf32> to vector<110x16xf32>
    %92 = tpu.concatenate %82, %83, %84, %85, %86, %87, %88, %89, %90, %91 in 0 : vector<2x16xf32>, vector<2x16xf32>, vector<2x16xf32>, vector<2x16xf32>, vector<2x16xf32>, vector<2x16xf32>, vector<2x16xf32>, vector<2x16xf32>, vector<2x16xf32>, vector<110x16xf32> -> vector<128x16xf32>
    %93 = vector.extract_strided_slice %81 {offsets = [124, 0], sizes = [2, 16], strides = [1, 1]} : vector<128x16xf32> to vector<2x16xf32>
    %94 = vector.extract_strided_slice %81 {offsets = [122, 0], sizes = [2, 16], strides = [1, 1]} : vector<128x16xf32> to vector<2x16xf32>
    %95 = vector.extract_strided_slice %81 {offsets = [120, 0], sizes = [2, 16], strides = [1, 1]} : vector<128x16xf32> to vector<2x16xf32>
    %96 = vector.extract_strided_slice %81 {offsets = [118, 0], sizes = [2, 16], strides = [1, 1]} : vector<128x16xf32> to vector<2x16xf32>
    %97 = vector.extract_strided_slice %81 {offsets = [116, 0], sizes = [2, 16], strides = [1, 1]} : vector<128x16xf32> to vector<2x16xf32>
    %98 = vector.extract_strided_slice %81 {offsets = [114, 0], sizes = [2, 16], strides = [1, 1]} : vector<128x16xf32> to vector<2x16xf32>
    %99 = vector.extract_strided_slice %81 {offsets = [112, 0], sizes = [2, 16], strides = [1, 1]} : vector<128x16xf32> to vector<2x16xf32>
    %100 = vector.extract_strided_slice %81 {offsets = [110, 0], sizes = [2, 16], strides = [1, 1]} : vector<128x16xf32> to vector<2x16xf32>
    %101 = vector.extract_strided_slice %81 {offsets = [108, 0], sizes = [2, 16], strides = [1, 1]} : vector<128x16xf32> to vector<2x16xf32>
    %102 = vector.extract_strided_slice %81 {offsets = [18, 0], sizes = [110, 16], strides = [1, 1]} : vector<128x16xf32> to vector<110x16xf32>
    %103 = tpu.concatenate %102, %93, %94, %95, %96, %97, %98, %99, %100, %101 in 0 : vector<110x16xf32>, vector<2x16xf32>, vector<2x16xf32>, vector<2x16xf32>, vector<2x16xf32>, vector<2x16xf32>, vector<2x16xf32>, vector<2x16xf32>, vector<2x16xf32>, vector<2x16xf32> -> vector<128x16xf32>
    %104 = tpu.concatenate %92, %81, %103 in 1 : vector<128x16xf32>, vector<128x16xf32>, vector<128x16xf32> -> vector<128x48xf32>
    %105 = arith.truncf %104 : vector<128x48xf32> to vector<128x48xbf16>
    %c2_37 = arith.constant 2 : index
    %c0_38 = arith.constant 0 : index
    %c0_39 = arith.constant 0 : index
    %106 = vector.load %arg3[%c2_37, %c0_38, %c0_39] : memref<3x48x16xbf16, #tpu.memory_space<vmem>>, vector<1x48x16xbf16>
    %107 = vector.shape_cast %106 : vector<1x48x16xbf16> to vector<48x16xbf16>
    %cst_40 = arith.constant dense<0.000000e+00> : vector<128x16xf32>
    %108 = tpu.matmul %105, %107, %cst_40 {dimension_numbers = #tpu.dot_dimension_numbers<[1], [0], [0], [1], [0, 0, 1, 1], [], []>} : vector<128x48xbf16>, vector<48x16xbf16>, vector<128x16xf32> -> vector<128x16xf32>
    %c2_41 = arith.constant 2 : index
    %c0_42 = arith.constant 0 : index
    %c0_43 = arith.constant 0 : index
    %109 = vector.load %arg4[%c2_41, %c0_42, %c0_43] : memref<3x1x16xf32, #tpu.memory_space<vmem>>, vector<1x1x16xf32>
    %110 = vector.shape_cast %109 : vector<1x1x16xf32> to vector<1x16xf32>
    %111 = vector.broadcast %110 : vector<1x16xf32> to vector<128x16xf32>
    %112 = arith.addf %108, %111 : vector<128x16xf32>
    %cst_44 = arith.constant 2.000000e-01 : f32
    %113 = vector.broadcast %cst_44 : f32 to vector<128x16xf32>
    %114 = arith.mulf %113, %112 : vector<128x16xf32>
    %115 = arith.maximumf %112, %114 : vector<128x16xf32>
    %116 = arith.truncf %115 : vector<128x16xf32> to vector<128x16xbf16>
    %c2_45 = arith.constant 2 : index
    %c0_46 = arith.constant 0 : index
    %c0_47 = arith.constant 0 : index
    %117 = vector.load %arg5[%c2_45, %c0_46, %c0_47] : memref<3x16x16xbf16, #tpu.memory_space<vmem>>, vector<1x16x16xbf16>
    %118 = vector.shape_cast %117 : vector<1x16x16xbf16> to vector<16x16xbf16>
    %cst_48 = arith.constant dense<0.000000e+00> : vector<128x16xf32>
    %119 = tpu.matmul %116, %118, %cst_48 {dimension_numbers = #tpu.dot_dimension_numbers<[1], [0], [0], [1], [0, 0, 1, 1], [], []>} : vector<128x16xbf16>, vector<16x16xbf16>, vector<128x16xf32> -> vector<128x16xf32>
    %c2_49 = arith.constant 2 : index
    %c0_50 = arith.constant 0 : index
    %c0_51 = arith.constant 0 : index
    %120 = vector.load %arg6[%c2_49, %c0_50, %c0_51] : memref<3x1x16xf32, #tpu.memory_space<vmem>>, vector<1x1x16xf32>
    %121 = vector.shape_cast %120 : vector<1x1x16xf32> to vector<1x16xf32>
    %122 = vector.broadcast %121 : vector<1x16xf32> to vector<128x16xf32>
    %123 = arith.addf %119, %122 : vector<128x16xf32>
    %124 = arith.addf %81, %123 : vector<128x16xf32>
    %125 = arith.truncf %124 : vector<128x16xf32> to vector<128x16xbf16>
    %c0_52 = arith.constant 0 : index
    %c0_53 = arith.constant 0 : index
    %126 = vector.load %arg7[%c0_52, %c0_53] : memref<16x512xbf16, #tpu.memory_space<vmem>>, vector<16x512xbf16>
    %cst_54 = arith.constant dense<0.000000e+00> : vector<128x512xf32>
    %127 = tpu.matmul %125, %126, %cst_54 {dimension_numbers = #tpu.dot_dimension_numbers<[1], [0], [0], [1], [0, 0, 1, 1], [], []>} : vector<128x16xbf16>, vector<16x512xbf16>, vector<128x512xf32> -> vector<128x512xf32>
    %c0_55 = arith.constant 0 : index
    %c0_56 = arith.constant 0 : index
    %128 = vector.load %arg8[%c0_55, %c0_56] : memref<1x512xf32, #tpu.memory_space<vmem>>, vector<1x512xf32>
    %129 = vector.broadcast %128 : vector<1x512xf32> to vector<128x512xf32>
    %130 = arith.addf %127, %129 : vector<128x512xf32>
    %131 = arith.truncf %130 : vector<128x512xf32> to vector<128x512xbf16>
    %c0_57 = arith.constant 0 : index
    %c0_58 = arith.constant 0 : index
    %132 = vector.load %arg16[%c0_57, %c0_58] : memref<128x512xbf16, #tpu.memory_space<vmem>>, vector<128x512xbf16>
    tpu.vector_store %arg16[%c0_57, %c0_58], %131 {strides = array<i32>} : memref<128x512xbf16, #tpu.memory_space<vmem>>, vector<128x512xbf16>,
    %cst_59 = arith.constant 0.000000e+00 : f32
    %133 = vector.broadcast %cst_59 : f32 to vector<2x128xf32>
    %c0_i32 = arith.constant 0 : i32
    %c8_i32 = arith.constant 8 : i32
    %134 = arith.addi %c0_i32, %c8_i32 : i32
    %c1_i32 = arith.constant 1 : i32
    %135:4 = scf.for %arg17 = %c0_i32 to %134 step %c1_i32 iter_args(%arg18 = %133, %arg19 = %133, %arg20 = %133, %arg21 = %133) -> (vector<2x128xf32>, vector<2x128xf32>, vector<2x128xf32>, vector<2x128xf32>)  : i32 {
      %c16_i32 = arith.constant 16 : i32
      %145 = arith.muli %arg17, %c16_i32 : i32
      %146 = tpu.assume_multiple %145, 16 : i32
      %147 = arith.index_cast %146 : i32 to index
      %c0_68 = arith.constant 0 : index
      %148 = vector.load %arg16[%147, %c0_68] : memref<128x512xbf16, #tpu.memory_space<vmem>>, vector<16x512xbf16>
      %149 = vector.extract_strided_slice %148 {offsets = [0, 0], sizes = [2, 512], strides = [1, 1]} : vector<16x512xbf16> to vector<2x512xbf16>
      %150 = arith.extf %149 : vector<2x512xbf16> to vector<2x512xf32>
      %151 = arith.truncf %arg18 : vector<2x128xf32> to vector<2x128xbf16>
      %c0_69 = arith.constant 0 : index
      %c0_70 = arith.constant 0 : index
      %152 = vector.load %arg9[%c0_69, %c0_70] : memref<128x512xbf16, #tpu.memory_space<vmem>>, vector<128x512xbf16>
      %cst_71 = arith.constant dense<0.000000e+00> : vector<2x512xf32>
      %153 = tpu.matmul %151, %152, %cst_71 {dimension_numbers = #tpu.dot_dimension_numbers<[1], [0], [0], [1], [0, 0, 1, 1], [], []>} : vector<2x128xbf16>, vector<128x512xbf16>, vector<2x512xf32> -> vector<2x512xf32>
      %154 = arith.addf %150, %153 : vector<2x512xf32>
      %155 = vector.extract_strided_slice %154 {offsets = [0, 0], sizes = [2, 128], strides = [1, 1]} : vector<2x512xf32> to vector<2x128xf32>
      %156 = arith.negf %155 : vector<2x128xf32>
      %157 = math.exp %156 : vector<2x128xf32>
      %cst_72 = arith.constant 1.000000e+00 : f32
      %158 = vector.broadcast %cst_72 : f32 to vector<2x128xf32>
      %159 = arith.addf %158, %157 : vector<2x128xf32>
      %160 = arith.divf %158, %159 : vector<2x128xf32>
      %161 = vector.extract_strided_slice %154 {offsets = [0, 128], sizes = [2, 128], strides = [1, 1]} : vector<2x512xf32> to vector<2x128xf32>
      %162 = arith.negf %161 : vector<2x128xf32>
      %163 = math.exp %162 : vector<2x128xf32>
      %cst_73 = arith.constant 1.000000e+00 : f32
      %164 = vector.broadcast %cst_73 : f32 to vector<2x128xf32>
      %165 = arith.addf %164, %163 : vector<2x128xf32>
      %166 = arith.divf %164, %165 : vector<2x128xf32>
      %167 = vector.extract_strided_slice %154 {offsets = [0, 256], sizes = [2, 128], strides = [1, 1]} : vector<2x512xf32> to vector<2x128xf32>
      %168 = math.tanh %167 : vector<2x128xf32>
      %169 = vector.extract_strided_slice %154 {offsets = [0, 384], sizes = [2, 128], strides = [1, 1]} : vector<2x512xf32> to vector<2x128xf32>
      %170 = arith.negf %169 : vector<2x128xf32>
      %171 = math.exp %170 : vector<2x128xf32>
      %cst_74 = arith.constant 1.000000e+00 : f32
      %172 = vector.broadcast %cst_74 : f32 to vector<2x128xf32>
      %173 = arith.addf %172, %171 : vector<2x128xf32>
      %174 = arith.divf %172, %173 : vector<2x128xf32>
      %175 = arith.mulf %166, %arg19 : vector<2x128xf32>
      %176 = arith.mulf %160, %168 : vector<2x128xf32>
      %177 = arith.addf %175, %176 : vector<2x128xf32>
      %178 = math.tanh %177 : vector<2x128xf32>
      %179 = arith.mulf %174, %178 : vector<2x128xf32>
      %180 = tpu.concatenate %179, %arg20 in 1 : vector<2x128xf32>, vector<2x128xf32> -> vector<2x256xf32>
      %181 = arith.truncf %180 : vector<2x256xf32> to vector<2x256xbf16>
      %c0_75 = arith.constant 0 : index
      %c0_76 = arith.constant 0 : index
      %182 = vector.load %arg10[%c0_75, %c0_76] : memref<256x1024xbf16, #tpu.memory_space<vmem>>, vector<256x1024xbf16>
      %cst_77 = arith.constant dense<0.000000e+00> : vector<2x1024xf32>
      %183 = tpu.matmul %181, %182, %cst_77 {dimension_numbers = #tpu.dot_dimension_numbers<[1], [0], [0], [1], [0, 0, 1, 1], [], []>} : vector<2x256xbf16>, vector<256x1024xbf16>, vector<2x1024xf32> -> vector<2x1024xf32>
      %184 = vector.extract_strided_slice %183 {offsets = [0, 0], sizes = [2, 512], strides = [1, 1]} : vector<2x1024xf32> to vector<2x512xf32>
      %185 = vector.extract_strided_slice %148 {offsets = [2, 0], sizes = [2, 512], strides = [1, 1]} : vector<16x512xbf16> to vector<2x512xbf16>
      %186 = arith.extf %185 : vector<2x512xbf16> to vector<2x512xf32>
      %187 = arith.addf %184, %186 : vector<2x512xf32>
      %188 = vector.extract_strided_slice %183 {offsets = [0, 512], sizes = [2, 512], strides = [1, 1]} : vector<2x1024xf32> to vector<2x512xf32>
      %c0_78 = arith.constant 0 : index
      %c0_79 = arith.constant 0 : index
      %189 = vector.load %arg12[%c0_78, %c0_79] : memref<1x512xf32, #tpu.memory_space<vmem>>, vector<1x512xf32>
      %190 = vector.broadcast %189 : vector<1x512xf32> to vector<2x512xf32>
      %191 = arith.addf %188, %190 : vector<2x512xf32>
      %192 = tpu.concatenate %187, %191 in 0 : vector<2x512xf32>, vector<2x512xf32> -> vector<4x512xf32>
      %193 = tpu.concatenate %177, %arg21 in 0 : vector<2x128xf32>, vector<2x128xf32> -> vector<4x128xf32>
      %194 = vector.extract_strided_slice %192 {offsets = [0, 0], sizes = [4, 128], strides = [1, 1]} : vector<4x512xf32> to vector<4x128xf32>
      %195 = arith.negf %194 : vector<4x128xf32>
      %196 = math.exp %195 : vector<4x128xf32>
      %cst_80 = arith.constant 1.000000e+00 : f32
      %197 = vector.broadcast %cst_80 : f32 to vector<4x128xf32>
      %198 = arith.addf %197, %196 : vector<4x128xf32>
      %199 = arith.divf %197, %198 : vector<4x128xf32>
      %200 = vector.extract_strided_slice %192 {offsets = [0, 128], sizes = [4, 128], strides = [1, 1]} : vector<4x512xf32> to vector<4x128xf32>
      %201 = arith.negf %200 : vector<4x128xf32>
      %202 = math.exp %201 : vector<4x128xf32>
      %cst_81 = arith.constant 1.000000e+00 : f32
      %203 = vector.broadcast %cst_81 : f32 to vector<4x128xf32>
      %204 = arith.addf %203, %202 : vector<4x128xf32>
      %205 = arith.divf %203, %204 : vector<4x128xf32>
      %206 = vector.extract_strided_slice %192 {offsets = [0, 256], sizes = [4, 128], strides = [1, 1]} : vector<4x512xf32> to vector<4x128xf32>
      %207 = math.tanh %206 : vector<4x128xf32>
      %208 = vector.extract_strided_slice %192 {offsets = [0, 384], sizes = [4, 128], strides = [1, 1]} : vector<4x512xf32> to vector<4x128xf32>
      %209 = arith.negf %208 : vector<4x128xf32>
      %210 = math.exp %209 : vector<4x128xf32>
      %cst_82 = arith.constant 1.000000e+00 : f32
      %211 = vector.broadcast %cst_82 : f32 to vector<4x128xf32>
      %212 = arith.addf %211, %210 : vector<4x128xf32>
      %213 = arith.divf %211, %212 : vector<4x128xf32>
      %214 = arith.mulf %205, %193 : vector<4x128xf32>
      %215 = arith.mulf %199, %207 : vector<4x128xf32>
      %216 = arith.addf %214, %215 : vector<4x128xf32>
      %217 = math.tanh %216 : vector<4x128xf32>
      %218 = arith.mulf %213, %217 : vector<4x128xf32>
      %219 = vector.extract_strided_slice %218 {offsets = [0, 0], sizes = [2, 128], strides = [1, 1]} : vector<4x128xf32> to vector<2x128xf32>
      %220 = vector.extract_strided_slice %216 {offsets = [0, 0], sizes = [2, 128], strides = [1, 1]} : vector<4x128xf32> to vector<2x128xf32>
      %221 = vector.extract_strided_slice %218 {offsets = [2, 0], sizes = [2, 128], strides = [1, 1]} : vector<4x128xf32> to vector<2x128xf32>
      %222 = vector.extract_strided_slice %216 {offsets = [2, 0], sizes = [2, 128], strides = [1, 1]} : vector<4x128xf32> to vector<2x128xf32>
      %223 = tpu.concatenate %219, %221 in 1 : vector<2x128xf32>, vector<2x128xf32> -> vector<2x256xf32>
      %224 = arith.truncf %223 : vector<2x256xf32> to vector<2x256xbf16>
      %c0_83 = arith.constant 0 : index
      %c0_84 = arith.constant 0 : index
      %225 = vector.load %arg10[%c0_83, %c0_84] : memref<256x1024xbf16, #tpu.memory_space<vmem>>, vector<256x1024xbf16>
      %cst_85 = arith.constant dense<0.000000e+00> : vector<2x1024xf32>
      %226 = tpu.matmul %224, %225, %cst_85 {dimension_numbers = #tpu.dot_dimension_numbers<[1], [0], [0], [1], [0, 0, 1, 1], [], []>} : vector<2x256xbf16>, vector<256x1024xbf16>, vector<2x1024xf32> -> vector<2x1024xf32>
      %227 = vector.extract_strided_slice %226 {offsets = [0, 0], sizes = [2, 512], strides = [1, 1]} : vector<2x1024xf32> to vector<2x512xf32>
      %228 = vector.extract_strided_slice %148 {offsets = [4, 0], sizes = [2, 512], strides = [1, 1]} : vector<16x512xbf16> to vector<2x512xbf16>
      %229 = arith.extf %228 : vector<2x512xbf16> to vector<2x512xf32>
      %230 = arith.addf %227, %229 : vector<2x512xf32>
      %231 = vector.extract_strided_slice %226 {offsets = [0, 512], sizes = [2, 512], strides = [1, 1]} : vector<2x1024xf32> to vector<2x512xf32>
      %c0_86 = arith.constant 0 : index
      %c0_87 = arith.constant 0 : index
      %232 = vector.load %arg12[%c0_86, %c0_87] : memref<1x512xf32, #tpu.memory_space<vmem>>, vector<1x512xf32>
      %233 = vector.broadcast %232 : vector<1x512xf32> to vector<2x512xf32>
      %234 = arith.addf %231, %233 : vector<2x512xf32>
      %235 = tpu.concatenate %230, %234 in 0 : vector<2x512xf32>, vector<2x512xf32> -> vector<4x512xf32>
      %236 = tpu.concatenate %220, %222 in 0 : vector<2x128xf32>, vector<2x128xf32> -> vector<4x128xf32>
      %237 = vector.extract_strided_slice %235 {offsets = [0, 0], sizes = [4, 128], strides = [1, 1]} : vector<4x512xf32> to vector<4x128xf32>
      %238 = arith.negf %237 : vector<4x128xf32>
      %239 = math.exp %238 : vector<4x128xf32>
      %cst_88 = arith.constant 1.000000e+00 : f32
      %240 = vector.broadcast %cst_88 : f32 to vector<4x128xf32>
      %241 = arith.addf %240, %239 : vector<4x128xf32>
      %242 = arith.divf %240, %241 : vector<4x128xf32>
      %243 = vector.extract_strided_slice %235 {offsets = [0, 128], sizes = [4, 128], strides = [1, 1]} : vector<4x512xf32> to vector<4x128xf32>
      %244 = arith.negf %243 : vector<4x128xf32>
      %245 = math.exp %244 : vector<4x128xf32>
      %cst_89 = arith.constant 1.000000e+00 : f32
      %246 = vector.broadcast %cst_89 : f32 to vector<4x128xf32>
      %247 = arith.addf %246, %245 : vector<4x128xf32>
      %248 = arith.divf %246, %247 : vector<4x128xf32>
      %249 = vector.extract_strided_slice %235 {offsets = [0, 256], sizes = [4, 128], strides = [1, 1]} : vector<4x512xf32> to vector<4x128xf32>
      %250 = math.tanh %249 : vector<4x128xf32>
      %251 = vector.extract_strided_slice %235 {offsets = [0, 384], sizes = [4, 128], strides = [1, 1]} : vector<4x512xf32> to vector<4x128xf32>
      %252 = arith.negf %251 : vector<4x128xf32>
      %253 = math.exp %252 : vector<4x128xf32>
      %cst_90 = arith.constant 1.000000e+00 : f32
      %254 = vector.broadcast %cst_90 : f32 to vector<4x128xf32>
      %255 = arith.addf %254, %253 : vector<4x128xf32>
      %256 = arith.divf %254, %255 : vector<4x128xf32>
      %257 = arith.mulf %248, %236 : vector<4x128xf32>
      %258 = arith.mulf %242, %250 : vector<4x128xf32>
      %259 = arith.addf %257, %258 : vector<4x128xf32>
      %260 = math.tanh %259 : vector<4x128xf32>
      %261 = arith.mulf %256, %260 : vector<4x128xf32>
      %262 = vector.extract_strided_slice %261 {offsets = [0, 0], sizes = [2, 128], strides = [1, 1]} : vector<4x128xf32> to vector<2x128xf32>
      %263 = vector.extract_strided_slice %259 {offsets = [0, 0], sizes = [2, 128], strides = [1, 1]} : vector<4x128xf32> to vector<2x128xf32>
      %264 = vector.extract_strided_slice %261 {offsets = [2, 0], sizes = [2, 128], strides = [1, 1]} : vector<4x128xf32> to vector<2x128xf32>
      %265 = vector.extract_strided_slice %259 {offsets = [2, 0], sizes = [2, 128], strides = [1, 1]} : vector<4x128xf32> to vector<2x128xf32>
      %266 = tpu.concatenate %262, %264 in 1 : vector<2x128xf32>, vector<2x128xf32> -> vector<2x256xf32>
      %267 = arith.truncf %266 : vector<2x256xf32> to vector<2x256xbf16>
      %c0_91 = arith.constant 0 : index
      %c0_92 = arith.constant 0 : index
      %268 = vector.load %arg10[%c0_91, %c0_92] : memref<256x1024xbf16, #tpu.memory_space<vmem>>, vector<256x1024xbf16>
      %cst_93 = arith.constant dense<0.000000e+00> : vector<2x1024xf32>
      %269 = tpu.matmul %267, %268, %cst_93 {dimension_numbers = #tpu.dot_dimension_numbers<[1], [0], [0], [1], [0, 0, 1, 1], [], []>} : vector<2x256xbf16>, vector<256x1024xbf16>, vector<2x1024xf32> -> vector<2x1024xf32>
      %270 = vector.extract_strided_slice %269 {offsets = [0, 0], sizes = [2, 512], strides = [1, 1]} : vector<2x1024xf32> to vector<2x512xf32>
      %271 = vector.extract_strided_slice %148 {offsets = [6, 0], sizes = [2, 512], strides = [1, 1]} : vector<16x512xbf16> to vector<2x512xbf16>
      %272 = arith.extf %271 : vector<2x512xbf16> to vector<2x512xf32>
      %273 = arith.addf %270, %272 : vector<2x512xf32>
      %274 = vector.extract_strided_slice %269 {offsets = [0, 512], sizes = [2, 512], strides = [1, 1]} : vector<2x1024xf32> to vector<2x512xf32>
      %c0_94 = arith.constant 0 : index
      %c0_95 = arith.constant 0 : index
      %275 = vector.load %arg12[%c0_94, %c0_95] : memref<1x512xf32, #tpu.memory_space<vmem>>, vector<1x512xf32>
      %276 = vector.broadcast %275 : vector<1x512xf32> to vector<2x512xf32>
      %277 = arith.addf %274, %276 : vector<2x512xf32>
      %278 = tpu.concatenate %273, %277 in 0 : vector<2x512xf32>, vector<2x512xf32> -> vector<4x512xf32>
      %279 = tpu.concatenate %263, %265 in 0 : vector<2x128xf32>, vector<2x128xf32> -> vector<4x128xf32>
      %280 = vector.extract_strided_slice %278 {offsets = [0, 0], sizes = [4, 128], strides = [1, 1]} : vector<4x512xf32> to vector<4x128xf32>
      %281 = arith.negf %280 : vector<4x128xf32>
      %282 = math.exp %281 : vector<4x128xf32>
      %cst_96 = arith.constant 1.000000e+00 : f32
      %283 = vector.broadcast %cst_96 : f32 to vector<4x128xf32>
      %284 = arith.addf %283, %282 : vector<4x128xf32>
      %285 = arith.divf %283, %284 : vector<4x128xf32>
      %286 = vector.extract_strided_slice %278 {offsets = [0, 128], sizes = [4, 128], strides = [1, 1]} : vector<4x512xf32> to vector<4x128xf32>
      %287 = arith.negf %286 : vector<4x128xf32>
      %288 = math.exp %287 : vector<4x128xf32>
      %cst_97 = arith.constant 1.000000e+00 : f32
      %289 = vector.broadcast %cst_97 : f32 to vector<4x128xf32>
      %290 = arith.addf %289, %288 : vector<4x128xf32>
      %291 = arith.divf %289, %290 : vector<4x128xf32>
      %292 = vector.extract_strided_slice %278 {offsets = [0, 256], sizes = [4, 128], strides = [1, 1]} : vector<4x512xf32> to vector<4x128xf32>
      %293 = math.tanh %292 : vector<4x128xf32>
      %294 = vector.extract_strided_slice %278 {offsets = [0, 384], sizes = [4, 128], strides = [1, 1]} : vector<4x512xf32> to vector<4x128xf32>
      %295 = arith.negf %294 : vector<4x128xf32>
      %296 = math.exp %295 : vector<4x128xf32>
      %cst_98 = arith.constant 1.000000e+00 : f32
      %297 = vector.broadcast %cst_98 : f32 to vector<4x128xf32>
      %298 = arith.addf %297, %296 : vector<4x128xf32>
      %299 = arith.divf %297, %298 : vector<4x128xf32>
      %300 = arith.mulf %291, %279 : vector<4x128xf32>
      %301 = arith.mulf %285, %293 : vector<4x128xf32>
      %302 = arith.addf %300, %301 : vector<4x128xf32>
      %303 = math.tanh %302 : vector<4x128xf32>
      %304 = arith.mulf %299, %303 : vector<4x128xf32>
      %305 = vector.extract_strided_slice %304 {offsets = [0, 0], sizes = [2, 128], strides = [1, 1]} : vector<4x128xf32> to vector<2x128xf32>
      %306 = vector.extract_strided_slice %302 {offsets = [0, 0], sizes = [2, 128], strides = [1, 1]} : vector<4x128xf32> to vector<2x128xf32>
      %307 = vector.extract_strided_slice %304 {offsets = [2, 0], sizes = [2, 128], strides = [1, 1]} : vector<4x128xf32> to vector<2x128xf32>
      %308 = vector.extract_strided_slice %302 {offsets = [2, 0], sizes = [2, 128], strides = [1, 1]} : vector<4x128xf32> to vector<2x128xf32>
      %309 = tpu.concatenate %305, %307 in 1 : vector<2x128xf32>, vector<2x128xf32> -> vector<2x256xf32>
      %310 = arith.truncf %309 : vector<2x256xf32> to vector<2x256xbf16>
      %c0_99 = arith.constant 0 : index
      %c0_100 = arith.constant 0 : index
      %311 = vector.load %arg10[%c0_99, %c0_100] : memref<256x1024xbf16, #tpu.memory_space<vmem>>, vector<256x1024xbf16>
      %cst_101 = arith.constant dense<0.000000e+00> : vector<2x1024xf32>
      %312 = tpu.matmul %310, %311, %cst_101 {dimension_numbers = #tpu.dot_dimension_numbers<[1], [0], [0], [1], [0, 0, 1, 1], [], []>} : vector<2x256xbf16>, vector<256x1024xbf16>, vector<2x1024xf32> -> vector<2x1024xf32>
      %313 = vector.extract_strided_slice %312 {offsets = [0, 0], sizes = [2, 512], strides = [1, 1]} : vector<2x1024xf32> to vector<2x512xf32>
      %314 = vector.extract_strided_slice %148 {offsets = [8, 0], sizes = [2, 512], strides = [1, 1]} : vector<16x512xbf16> to vector<2x512xbf16>
      %315 = arith.extf %314 : vector<2x512xbf16> to vector<2x512xf32>
      %316 = arith.addf %313, %315 : vector<2x512xf32>
      %317 = vector.extract_strided_slice %312 {offsets = [0, 512], sizes = [2, 512], strides = [1, 1]} : vector<2x1024xf32> to vector<2x512xf32>
      %c0_102 = arith.constant 0 : index
      %c0_103 = arith.constant 0 : index
      %318 = vector.load %arg12[%c0_102, %c0_103] : memref<1x512xf32, #tpu.memory_space<vmem>>, vector<1x512xf32>
      %319 = vector.broadcast %318 : vector<1x512xf32> to vector<2x512xf32>
      %320 = arith.addf %317, %319 : vector<2x512xf32>
      %321 = tpu.concatenate %316, %320 in 0 : vector<2x512xf32>, vector<2x512xf32> -> vector<4x512xf32>
      %322 = tpu.concatenate %306, %308 in 0 : vector<2x128xf32>, vector<2x128xf32> -> vector<4x128xf32>
      %323 = vector.extract_strided_slice %321 {offsets = [0, 0], sizes = [4, 128], strides = [1, 1]} : vector<4x512xf32> to vector<4x128xf32>
      %324 = arith.negf %323 : vector<4x128xf32>
      %325 = math.exp %324 : vector<4x128xf32>
      %cst_104 = arith.constant 1.000000e+00 : f32
      %326 = vector.broadcast %cst_104 : f32 to vector<4x128xf32>
      %327 = arith.addf %326, %325 : vector<4x128xf32>
      %328 = arith.divf %326, %327 : vector<4x128xf32>
      %329 = vector.extract_strided_slice %321 {offsets = [0, 128], sizes = [4, 128], strides = [1, 1]} : vector<4x512xf32> to vector<4x128xf32>
      %330 = arith.negf %329 : vector<4x128xf32>
      %331 = math.exp %330 : vector<4x128xf32>
      %cst_105 = arith.constant 1.000000e+00 : f32
      %332 = vector.broadcast %cst_105 : f32 to vector<4x128xf32>
      %333 = arith.addf %332, %331 : vector<4x128xf32>
      %334 = arith.divf %332, %333 : vector<4x128xf32>
      %335 = vector.extract_strided_slice %321 {offsets = [0, 256], sizes = [4, 128], strides = [1, 1]} : vector<4x512xf32> to vector<4x128xf32>
      %336 = math.tanh %335 : vector<4x128xf32>
      %337 = vector.extract_strided_slice %321 {offsets = [0, 384], sizes = [4, 128], strides = [1, 1]} : vector<4x512xf32> to vector<4x128xf32>
      %338 = arith.negf %337 : vector<4x128xf32>
      %339 = math.exp %338 : vector<4x128xf32>
      %cst_106 = arith.constant 1.000000e+00 : f32
      %340 = vector.broadcast %cst_106 : f32 to vector<4x128xf32>
      %341 = arith.addf %340, %339 : vector<4x128xf32>
      %342 = arith.divf %340, %341 : vector<4x128xf32>
      %343 = arith.mulf %334, %322 : vector<4x128xf32>
      %344 = arith.mulf %328, %336 : vector<4x128xf32>
      %345 = arith.addf %343, %344 : vector<4x128xf32>
      %346 = math.tanh %345 : vector<4x128xf32>
      %347 = arith.mulf %342, %346 : vector<4x128xf32>
      %348 = vector.extract_strided_slice %347 {offsets = [0, 0], sizes = [2, 128], strides = [1, 1]} : vector<4x128xf32> to vector<2x128xf32>
      %349 = vector.extract_strided_slice %345 {offsets = [0, 0], sizes = [2, 128], strides = [1, 1]} : vector<4x128xf32> to vector<2x128xf32>
      %350 = vector.extract_strided_slice %347 {offsets = [2, 0], sizes = [2, 128], strides = [1, 1]} : vector<4x128xf32> to vector<2x128xf32>
      %351 = vector.extract_strided_slice %345 {offsets = [2, 0], sizes = [2, 128], strides = [1, 1]} : vector<4x128xf32> to vector<2x128xf32>
      %352 = tpu.concatenate %348, %350 in 1 : vector<2x128xf32>, vector<2x128xf32> -> vector<2x256xf32>
      %353 = arith.truncf %352 : vector<2x256xf32> to vector<2x256xbf16>
      %c0_107 = arith.constant 0 : index
      %c0_108 = arith.constant 0 : index
      %354 = vector.load %arg10[%c0_107, %c0_108] : memref<256x1024xbf16, #tpu.memory_space<vmem>>, vector<256x1024xbf16>
      %cst_109 = arith.constant dense<0.000000e+00> : vector<2x1024xf32>
      %355 = tpu.matmul %353, %354, %cst_109 {dimension_numbers = #tpu.dot_dimension_numbers<[1], [0], [0], [1], [0, 0, 1, 1], [], []>} : vector<2x256xbf16>, vector<256x1024xbf16>, vector<2x1024xf32> -> vector<2x1024xf32>
      %356 = vector.extract_strided_slice %355 {offsets = [0, 0], sizes = [2, 512], strides = [1, 1]} : vector<2x1024xf32> to vector<2x512xf32>
      %357 = vector.extract_strided_slice %148 {offsets = [10, 0], sizes = [2, 512], strides = [1, 1]} : vector<16x512xbf16> to vector<2x512xbf16>
      %358 = arith.extf %357 : vector<2x512xbf16> to vector<2x512xf32>
      %359 = arith.addf %356, %358 : vector<2x512xf32>
      %360 = vector.extract_strided_slice %355 {offsets = [0, 512], sizes = [2, 512], strides = [1, 1]} : vector<2x1024xf32> to vector<2x512xf32>
      %c0_110 = arith.constant 0 : index
      %c0_111 = arith.constant 0 : index
      %361 = vector.load %arg12[%c0_110, %c0_111] : memref<1x512xf32, #tpu.memory_space<vmem>>, vector<1x512xf32>
      %362 = vector.broadcast %361 : vector<1x512xf32> to vector<2x512xf32>
      %363 = arith.addf %360, %362 : vector<2x512xf32>
      %364 = tpu.concatenate %359, %363 in 0 : vector<2x512xf32>, vector<2x512xf32> -> vector<4x512xf32>
      %365 = tpu.concatenate %349, %351 in 0 : vector<2x128xf32>, vector<2x128xf32> -> vector<4x128xf32>
      %366 = vector.extract_strided_slice %364 {offsets = [0, 0], sizes = [4, 128], strides = [1, 1]} : vector<4x512xf32> to vector<4x128xf32>
      %367 = arith.negf %366 : vector<4x128xf32>
      %368 = math.exp %367 : vector<4x128xf32>
      %cst_112 = arith.constant 1.000000e+00 : f32
      %369 = vector.broadcast %cst_112 : f32 to vector<4x128xf32>
      %370 = arith.addf %369, %368 : vector<4x128xf32>
      %371 = arith.divf %369, %370 : vector<4x128xf32>
      %372 = vector.extract_strided_slice %364 {offsets = [0, 128], sizes = [4, 128], strides = [1, 1]} : vector<4x512xf32> to vector<4x128xf32>
      %373 = arith.negf %372 : vector<4x128xf32>
      %374 = math.exp %373 : vector<4x128xf32>
      %cst_113 = arith.constant 1.000000e+00 : f32
      %375 = vector.broadcast %cst_113 : f32 to vector<4x128xf32>
      %376 = arith.addf %375, %374 : vector<4x128xf32>
      %377 = arith.divf %375, %376 : vector<4x128xf32>
      %378 = vector.extract_strided_slice %364 {offsets = [0, 256], sizes = [4, 128], strides = [1, 1]} : vector<4x512xf32> to vector<4x128xf32>
      %379 = math.tanh %378 : vector<4x128xf32>
      %380 = vector.extract_strided_slice %364 {offsets = [0, 384], sizes = [4, 128], strides = [1, 1]} : vector<4x512xf32> to vector<4x128xf32>
      %381 = arith.negf %380 : vector<4x128xf32>
      %382 = math.exp %381 : vector<4x128xf32>
      %cst_114 = arith.constant 1.000000e+00 : f32
      %383 = vector.broadcast %cst_114 : f32 to vector<4x128xf32>
      %384 = arith.addf %383, %382 : vector<4x128xf32>
      %385 = arith.divf %383, %384 : vector<4x128xf32>
      %386 = arith.mulf %377, %365 : vector<4x128xf32>
      %387 = arith.mulf %371, %379 : vector<4x128xf32>
      %388 = arith.addf %386, %387 : vector<4x128xf32>
      %389 = math.tanh %388 : vector<4x128xf32>
      %390 = arith.mulf %385, %389 : vector<4x128xf32>
      %391 = vector.extract_strided_slice %390 {offsets = [0, 0], sizes = [2, 128], strides = [1, 1]} : vector<4x128xf32> to vector<2x128xf32>
      %392 = vector.extract_strided_slice %388 {offsets = [0, 0], sizes = [2, 128], strides = [1, 1]} : vector<4x128xf32> to vector<2x128xf32>
      %393 = vector.extract_strided_slice %390 {offsets = [2, 0], sizes = [2, 128], strides = [1, 1]} : vector<4x128xf32> to vector<2x128xf32>
      %394 = vector.extract_strided_slice %388 {offsets = [2, 0], sizes = [2, 128], strides = [1, 1]} : vector<4x128xf32> to vector<2x128xf32>
      %395 = tpu.concatenate %391, %393 in 1 : vector<2x128xf32>, vector<2x128xf32> -> vector<2x256xf32>
      %396 = arith.truncf %395 : vector<2x256xf32> to vector<2x256xbf16>
      %c0_115 = arith.constant 0 : index
      %c0_116 = arith.constant 0 : index
      %397 = vector.load %arg10[%c0_115, %c0_116] : memref<256x1024xbf16, #tpu.memory_space<vmem>>, vector<256x1024xbf16>
      %cst_117 = arith.constant dense<0.000000e+00> : vector<2x1024xf32>
      %398 = tpu.matmul %396, %397, %cst_117 {dimension_numbers = #tpu.dot_dimension_numbers<[1], [0], [0], [1], [0, 0, 1, 1], [], []>} : vector<2x256xbf16>, vector<256x1024xbf16>, vector<2x1024xf32> -> vector<2x1024xf32>
      %399 = vector.extract_strided_slice %398 {offsets = [0, 0], sizes = [2, 512], strides = [1, 1]} : vector<2x1024xf32> to vector<2x512xf32>
      %400 = vector.extract_strided_slice %148 {offsets = [12, 0], sizes = [2, 512], strides = [1, 1]} : vector<16x512xbf16> to vector<2x512xbf16>
      %401 = arith.extf %400 : vector<2x512xbf16> to vector<2x512xf32>
      %402 = arith.addf %399, %401 : vector<2x512xf32>
      %403 = vector.extract_strided_slice %398 {offsets = [0, 512], sizes = [2, 512], strides = [1, 1]} : vector<2x1024xf32> to vector<2x512xf32>
      %c0_118 = arith.constant 0 : index
      %c0_119 = arith.constant 0 : index
      %404 = vector.load %arg12[%c0_118, %c0_119] : memref<1x512xf32, #tpu.memory_space<vmem>>, vector<1x512xf32>
      %405 = vector.broadcast %404 : vector<1x512xf32> to vector<2x512xf32>
      %406 = arith.addf %403, %405 : vector<2x512xf32>
      %407 = tpu.concatenate %402, %406 in 0 : vector<2x512xf32>, vector<2x512xf32> -> vector<4x512xf32>
      %408 = tpu.concatenate %392, %394 in 0 : vector<2x128xf32>, vector<2x128xf32> -> vector<4x128xf32>
      %409 = vector.extract_strided_slice %407 {offsets = [0, 0], sizes = [4, 128], strides = [1, 1]} : vector<4x512xf32> to vector<4x128xf32>
      %410 = arith.negf %409 : vector<4x128xf32>
      %411 = math.exp %410 : vector<4x128xf32>
      %cst_120 = arith.constant 1.000000e+00 : f32
      %412 = vector.broadcast %cst_120 : f32 to vector<4x128xf32>
      %413 = arith.addf %412, %411 : vector<4x128xf32>
      %414 = arith.divf %412, %413 : vector<4x128xf32>
      %415 = vector.extract_strided_slice %407 {offsets = [0, 128], sizes = [4, 128], strides = [1, 1]} : vector<4x512xf32> to vector<4x128xf32>
      %416 = arith.negf %415 : vector<4x128xf32>
      %417 = math.exp %416 : vector<4x128xf32>
      %cst_121 = arith.constant 1.000000e+00 : f32
      %418 = vector.broadcast %cst_121 : f32 to vector<4x128xf32>
      %419 = arith.addf %418, %417 : vector<4x128xf32>
      %420 = arith.divf %418, %419 : vector<4x128xf32>
      %421 = vector.extract_strided_slice %407 {offsets = [0, 256], sizes = [4, 128], strides = [1, 1]} : vector<4x512xf32> to vector<4x128xf32>
      %422 = math.tanh %421 : vector<4x128xf32>
      %423 = vector.extract_strided_slice %407 {offsets = [0, 384], sizes = [4, 128], strides = [1, 1]} : vector<4x512xf32> to vector<4x128xf32>
      %424 = arith.negf %423 : vector<4x128xf32>
      %425 = math.exp %424 : vector<4x128xf32>
      %cst_122 = arith.constant 1.000000e+00 : f32
      %426 = vector.broadcast %cst_122 : f32 to vector<4x128xf32>
      %427 = arith.addf %426, %425 : vector<4x128xf32>
      %428 = arith.divf %426, %427 : vector<4x128xf32>
      %429 = arith.mulf %420, %408 : vector<4x128xf32>
      %430 = arith.mulf %414, %422 : vector<4x128xf32>
      %431 = arith.addf %429, %430 : vector<4x128xf32>
      %432 = math.tanh %431 : vector<4x128xf32>
      %433 = arith.mulf %428, %432 : vector<4x128xf32>
      %434 = vector.extract_strided_slice %433 {offsets = [0, 0], sizes = [2, 128], strides = [1, 1]} : vector<4x128xf32> to vector<2x128xf32>
      %435 = vector.extract_strided_slice %431 {offsets = [0, 0], sizes = [2, 128], strides = [1, 1]} : vector<4x128xf32> to vector<2x128xf32>
      %436 = vector.extract_strided_slice %433 {offsets = [2, 0], sizes = [2, 128], strides = [1, 1]} : vector<4x128xf32> to vector<2x128xf32>
      %437 = vector.extract_strided_slice %431 {offsets = [2, 0], sizes = [2, 128], strides = [1, 1]} : vector<4x128xf32> to vector<2x128xf32>
      %438 = tpu.concatenate %434, %436 in 1 : vector<2x128xf32>, vector<2x128xf32> -> vector<2x256xf32>
      %439 = arith.truncf %438 : vector<2x256xf32> to vector<2x256xbf16>
      %c0_123 = arith.constant 0 : index
      %c0_124 = arith.constant 0 : index
      %440 = vector.load %arg10[%c0_123, %c0_124] : memref<256x1024xbf16, #tpu.memory_space<vmem>>, vector<256x1024xbf16>
      %cst_125 = arith.constant dense<0.000000e+00> : vector<2x1024xf32>
      %441 = tpu.matmul %439, %440, %cst_125 {dimension_numbers = #tpu.dot_dimension_numbers<[1], [0], [0], [1], [0, 0, 1, 1], [], []>} : vector<2x256xbf16>, vector<256x1024xbf16>, vector<2x1024xf32> -> vector<2x1024xf32>
      %442 = vector.extract_strided_slice %441 {offsets = [0, 0], sizes = [2, 512], strides = [1, 1]} : vector<2x1024xf32> to vector<2x512xf32>
      %443 = vector.extract_strided_slice %148 {offsets = [14, 0], sizes = [2, 512], strides = [1, 1]} : vector<16x512xbf16> to vector<2x512xbf16>
      %444 = arith.extf %443 : vector<2x512xbf16> to vector<2x512xf32>
      %445 = arith.addf %442, %444 : vector<2x512xf32>
      %446 = vector.extract_strided_slice %441 {offsets = [0, 512], sizes = [2, 512], strides = [1, 1]} : vector<2x1024xf32> to vector<2x512xf32>
      %c0_126 = arith.constant 0 : index
      %c0_127 = arith.constant 0 : index
      %447 = vector.load %arg12[%c0_126, %c0_127] : memref<1x512xf32, #tpu.memory_space<vmem>>, vector<1x512xf32>
      %448 = vector.broadcast %447 : vector<1x512xf32> to vector<2x512xf32>
      %449 = arith.addf %446, %448 : vector<2x512xf32>
      %450 = tpu.concatenate %445, %449 in 0 : vector<2x512xf32>, vector<2x512xf32> -> vector<4x512xf32>
      %451 = tpu.concatenate %435, %437 in 0 : vector<2x128xf32>, vector<2x128xf32> -> vector<4x128xf32>
      %452 = vector.extract_strided_slice %450 {offsets = [0, 0], sizes = [4, 128], strides = [1, 1]} : vector<4x512xf32> to vector<4x128xf32>
      %453 = arith.negf %452 : vector<4x128xf32>
      %454 = math.exp %453 : vector<4x128xf32>
      %cst_128 = arith.constant 1.000000e+00 : f32
      %455 = vector.broadcast %cst_128 : f32 to vector<4x128xf32>
      %456 = arith.addf %455, %454 : vector<4x128xf32>
      %457 = arith.divf %455, %456 : vector<4x128xf32>
      %458 = vector.extract_strided_slice %450 {offsets = [0, 128], sizes = [4, 128], strides = [1, 1]} : vector<4x512xf32> to vector<4x128xf32>
      %459 = arith.negf %458 : vector<4x128xf32>
      %460 = math.exp %459 : vector<4x128xf32>
      %cst_129 = arith.constant 1.000000e+00 : f32
      %461 = vector.broadcast %cst_129 : f32 to vector<4x128xf32>
      %462 = arith.addf %461, %460 : vector<4x128xf32>
      %463 = arith.divf %461, %462 : vector<4x128xf32>
      %464 = vector.extract_strided_slice %450 {offsets = [0, 256], sizes = [4, 128], strides = [1, 1]} : vector<4x512xf32> to vector<4x128xf32>
      %465 = math.tanh %464 : vector<4x128xf32>
      %466 = vector.extract_strided_slice %450 {offsets = [0, 384], sizes = [4, 128], strides = [1, 1]} : vector<4x512xf32> to vector<4x128xf32>
      %467 = arith.negf %466 : vector<4x128xf32>
      %468 = math.exp %467 : vector<4x128xf32>
      %cst_130 = arith.constant 1.000000e+00 : f32
      %469 = vector.broadcast %cst_130 : f32 to vector<4x128xf32>
      %470 = arith.addf %469, %468 : vector<4x128xf32>
      %471 = arith.divf %469, %470 : vector<4x128xf32>
      %472 = arith.mulf %463, %451 : vector<4x128xf32>
      %473 = arith.mulf %457, %465 : vector<4x128xf32>
      %474 = arith.addf %472, %473 : vector<4x128xf32>
      %475 = math.tanh %474 : vector<4x128xf32>
      %476 = arith.mulf %471, %475 : vector<4x128xf32>
      %477 = vector.extract_strided_slice %476 {offsets = [0, 0], sizes = [2, 128], strides = [1, 1]} : vector<4x128xf32> to vector<2x128xf32>
      %478 = vector.extract_strided_slice %474 {offsets = [0, 0], sizes = [2, 128], strides = [1, 1]} : vector<4x128xf32> to vector<2x128xf32>
      %479 = vector.extract_strided_slice %476 {offsets = [2, 0], sizes = [2, 128], strides = [1, 1]} : vector<4x128xf32> to vector<2x128xf32>
      %480 = vector.extract_strided_slice %474 {offsets = [2, 0], sizes = [2, 128], strides = [1, 1]} : vector<4x128xf32> to vector<2x128xf32>
      %481 = tpu.concatenate %477, %479 in 1 : vector<2x128xf32>, vector<2x128xf32> -> vector<2x256xf32>
      %482 = arith.truncf %481 : vector<2x256xf32> to vector<2x256xbf16>
      %c0_131 = arith.constant 0 : index
      %c0_132 = arith.constant 0 : index
      %483 = vector.load %arg11[%c0_131, %c0_132] : memref<256x512xbf16, #tpu.memory_space<vmem>>, vector<256x512xbf16>
      %cst_133 = arith.constant dense<0.000000e+00> : vector<2x512xf32>
      %484 = tpu.matmul %482, %483, %cst_133 {dimension_numbers = #tpu.dot_dimension_numbers<[1], [0], [0], [1], [0, 0, 1, 1], [], []>} : vector<2x256xbf16>, vector<256x512xbf16>, vector<2x512xf32> -> vector<2x512xf32>
      %c0_134 = arith.constant 0 : index
      %c0_135 = arith.constant 0 : index
      %485 = vector.load %arg12[%c0_134, %c0_135] : memref<1x512xf32, #tpu.memory_space<vmem>>, vector<1x512xf32>
      %486 = vector.broadcast %485 : vector<1x512xf32> to vector<2x512xf32>
      %487 = arith.addf %484, %486 : vector<2x512xf32>
      %488 = vector.extract_strided_slice %487 {offsets = [0, 0], sizes = [2, 128], strides = [1, 1]} : vector<2x512xf32> to vector<2x128xf32>
      %489 = arith.negf %488 : vector<2x128xf32>
      %490 = math.exp %489 : vector<2x128xf32>
      %cst_136 = arith.constant 1.000000e+00 : f32
      %491 = vector.broadcast %cst_136 : f32 to vector<2x128xf32>
      %492 = arith.addf %491, %490 : vector<2x128xf32>
      %493 = arith.divf %491, %492 : vector<2x128xf32>
      %494 = vector.extract_strided_slice %487 {offsets = [0, 128], sizes = [2, 128], strides = [1, 1]} : vector<2x512xf32> to vector<2x128xf32>
      %495 = arith.negf %494 : vector<2x128xf32>
      %496 = math.exp %495 : vector<2x128xf32>
      %cst_137 = arith.constant 1.000000e+00 : f32
      %497 = vector.broadcast %cst_137 : f32 to vector<2x128xf32>
      %498 = arith.addf %497, %496 : vector<2x128xf32>
      %499 = arith.divf %497, %498 : vector<2x128xf32>
      %500 = vector.extract_strided_slice %487 {offsets = [0, 256], sizes = [2, 128], strides = [1, 1]} : vector<2x512xf32> to vector<2x128xf32>
      %501 = math.tanh %500 : vector<2x128xf32>
      %502 = vector.extract_strided_slice %487 {offsets = [0, 384], sizes = [2, 128], strides = [1, 1]} : vector<2x512xf32> to vector<2x128xf32>
      %503 = arith.negf %502 : vector<2x128xf32>
      %504 = math.exp %503 : vector<2x128xf32>
      %cst_138 = arith.constant 1.000000e+00 : f32
      %505 = vector.broadcast %cst_138 : f32 to vector<2x128xf32>
      %506 = arith.addf %505, %504 : vector<2x128xf32>
      %507 = arith.divf %505, %506 : vector<2x128xf32>
      %508 = arith.mulf %499, %480 : vector<2x128xf32>
      %509 = arith.mulf %493, %501 : vector<2x128xf32>
      %510 = arith.addf %508, %509 : vector<2x128xf32>
      %511 = math.tanh %510 : vector<2x128xf32>
      %512 = arith.mulf %507, %511 : vector<2x128xf32>
      scf.yield %477, %478, %512, %510 : vector<2x128xf32>, vector<2x128xf32>, vector<2x128xf32>, vector<2x128xf32>
    }
    %c8_i32_60 = arith.constant 8 : i32
    %c0_61 = arith.constant 0 : index
    %c0_62 = arith.constant 0 : index
    %136 = vector.load %arg13[%c0_61, %c0_62] : memref<1x128xf32, #tpu.memory_space<vmem>>, vector<1x128xf32>
    %137 = vector.broadcast %136 : vector<1x128xf32> to vector<2x128xf32>
    %138 = arith.mulf %135#2, %137 : vector<2x128xf32>
    %cst_63 = arith.constant dense<0.000000e+00> : vector<2xf32>
    %139 = vector.multi_reduction <add>, %138, %cst_63 [1] : vector<2x128xf32> to vector<2xf32>
    %140 = vector.shape_cast %139 : vector<2xf32> to vector<2x1xf32>
    %c0_64 = arith.constant 0 : index
    %c0_65 = arith.constant 0 : index
    %141 = vector.load %arg14[%c0_64, %c0_65] : memref<1x1xf32, #tpu.memory_space<vmem>>, vector<1x1xf32>
    %142 = vector.broadcast %141 : vector<1x1xf32> to vector<2x1xf32>
    %143 = arith.addf %140, %142 : vector<2x1xf32>
    %c0_66 = arith.constant 0 : index
    %c0_67 = arith.constant 0 : index
    %144 = vector.load %arg15[%c0_66, %c0_67] : memref<2x1xf32, #tpu.memory_space<vmem>>, vector<2x1xf32>
    tpu.vector_store %arg15[%c0_66, %c0_67], %143 {strides = array<i32>} : memref<2x1xf32, #tpu.memory_space<vmem>>, vector<2x1xf32>,
    return
  }
}

</mosaic_0001>

<bundles_post_ra>
// kernel: lstemo2_forward.1
= control target key start
LH: loop header
LB: loop body
LE: loop exit
PB: predicated region body
PF: predicated region fallthrough
CT: control target
= control target key end

     0   :  { %s9855_s0 = inlined_call_operand.vmem [shape: f32[128,3], index: 0, kind: input, shape index: {}]   ;;  %s9856_s1 = inlined_call_operand.vmem [shape: f32[3,16], index: 1, kind: input, shape index: {}]   ;;  %s9857_s2 = inlined_call_operand.vmem [shape: f32[1,16], index: 2, kind: input, shape index: {}]   ;;  %s9858_s3 = inlined_call_operand.vmem [shape: bf16[3,48,16], index: 3, kind: input, shape index: {}]   ;;  %s9859_s4 = inlined_call_operand.vmem [shape: f32[3,1,16], index: 4, kind: input, shape index: {}]   ;;  %s9860_s5 = inlined_call_operand.hbm [shape: bf16[3,16,16], index: 5, kind: input, shape index: {}]   ;;  %s9861_s6 = inlined_call_operand.vmem [shape: f32[3,1,16], index: 6, kind: input, shape index: {}]   ;;  %s9862_s7 = inlined_call_operand.vmem [shape: bf16[16,512], index: 7, kind: input, shape index: {}]   ;;  %s9863_s8 = inlined_call_operand.vmem [shape: f32[1,512], index: 8, kind: input, shape index: {}]   ;;  %s9864_s9 = inlined_call_operand.vmem [shape: bf16[128,512], index: 9, kind: input, shape index: {}]   ;;  %s9865_s10 = inlined_call_operand.hbm [shape: bf16[256,1024], index: 10, kind: input, shape index: {}]   ;;  %s9866_s11 = inlined_call_operand.hbm [shape: bf16[256,512], index: 11, kind: input, shape index: {}]   ;;  %s9867_s12 = inlined_call_operand.vmem [shape: f32[1,512], index: 12, kind: input, shape index: {}]   ;;  %s9868_s13 = inlined_call_operand.vmem [shape: f32[1,128], index: 13, kind: input, shape index: {}]   ;;  %s9869_s14 = inlined_call_operand.<no memory space> [shape: f32[1,1], index: 14, kind: input, shape index: {}]   ;;  %s9870_s15 = inlined_call_operand.vmem [shape: f32[2,1], index: 15, kind: output, shape index: {}]  }
   0x1   :  { %v20_v0 = vstv %s9869_s14 }
   0x2   :  { %21 = vst [vmem:[#allocation3] sm:$0x1] %v20_v0 }
   0x3   :  { %22 = vsyncpa [#allocation5], 0 }
   0x4   :  { %23 = vsyncpa [#allocation7], 0  ;;  %s7145_s20 = smov [#allocation6]   ;;  %s7035_s24 = scalar_lea.hbm %s9865_s10, 16384 }
   0x5   :  { %s59_s21 = sshll.u32 %s7145_s20, 4  ;;  %p7036_p0 = scmp.ne.s32.totalorder %s9865_s10, %s7035_s24  ;;  %s60_s21 = int_to_ptr.vmem [resolvable:$true] %s59_s21 }
   0x6   :  { %p7039_p1 = scmp.lt.u32.totalorder %s7035_s24, %s9865_s10 }
   0x8   :  { %p7041_p2 = pnand %p7039_p1, %p7036_p0 }
   0xa   :  { %7044 = shalt.err (!%p7041_p2)
}
   0xb   :  { %s7045_s14 = scalar_lea.vmem %s60_s21, 16384  ;;  %p7050_p4 = scmp.lt.s32.totalorder %s60_s21, %s60_s21 }
   0xc   :  { %p7046_p3 = scmp.ne.s32.totalorder %s60_s21, %s7045_s14  ;;  %p7051_p5 = scmp.lt.s32.totalorder %s7045_s14, %s7045_s14 }
   0xe   :  { %p7052_p6 = por %p7051_p5, %p7050_p4 }
  0x10   :  { %p7053_p7 = pnand %p7052_p6, %p7046_p3 }
  0x12   :  { %7056 = shalt.err (!%p7053_p7)
}
  0x13   :  { %s7146_s29 = smov 512   ;;  %s7147_s30 = smov 32  }
  0x14   :  { %65 = dma.hbm_to_vmem [thread:$0]  %s9865_s10, 16384, %s60_s21, [#allocation7], %s7146_s29, %s7146_s29, %s7147_s30  }
  0x15   :  { %s7148_s18 = smov [#allocation4]   ;;  %s7057_s23 = scalar_lea.hbm %s9860_s5, 384 }
  0x16   :  { %s39_s19 = sshll.u32 %s7148_s18, 4  ;;  %p7058_p8 = scmp.ne.s32.totalorder %s9860_s5, %s7057_s23  ;;  %s40_s19 = int_to_ptr.vmem [resolvable:$true] %s39_s19 }
  0x17   :  { %p7061_p9 = scmp.lt.u32.totalorder %s7057_s23, %s9860_s5 }
  0x19   :  { %p7063_p10 = pnand %p7061_p9, %p7058_p8 }
  0x1b   :  { %7066 = shalt.err (!%p7063_p10)
}
  0x1c   :  { %s7067_s28 = scalar_lea.vmem %s40_s19, 384  ;;  %p7072_p12 = scmp.lt.s32.totalorder %s40_s19, %s40_s19 }
  0x1d   :  { %p7068_p11 = scmp.ne.s32.totalorder %s40_s19, %s7067_s28  ;;  %p7073_p13 = scmp.lt.s32.totalorder %s7067_s28, %s7067_s28 }
  0x1f   :  { %p7074_p0 = por %p7073_p13, %p7072_p12 }
  0x21   :  { %p7075_p1 = pnand %p7074_p0, %p7068_p11 }
  0x23   :  { %7078 = shalt.err (!%p7075_p1)
}
  0x24   :  { %s7149_s10 = smov 64   ;;  %s7150_s21 = smov 4  }
  0x25   :  { %45 = dma.hbm_to_vmem [thread:$0]  %s9860_s5, 384, %s40_s19, [#allocation5], %s7149_s10, %s7149_s10, %s7150_s21  }
  0x26   :  { %s7151_s16 = smov [#allocation8]   ;;  %s7079_s22 = scalar_lea.hbm %s9866_s11, 8192 }
  0x27   :  { %s71_s17 = sshll.u32 %s7151_s16, 4  ;;  %p7080_p2 = scmp.ne.s32.totalorder %s9866_s11, %s7079_s22  ;;  %s72_s17 = int_to_ptr.vmem [resolvable:$true] %s71_s17 }
  0x28   :  { %p7083_p3 = scmp.lt.u32.totalorder %s7079_s22, %s9866_s11 }
  0x2a   :  { %p7085_p4 = pnand %p7083_p3, %p7080_p2 }
  0x2c   :  { %7088 = shalt.err (!%p7085_p4)
}
  0x2d   :  { %s7089_s27 = scalar_lea.vmem %s72_s17, 8192  ;;  %p7094_p6 = scmp.lt.s32.totalorder %s72_s17, %s72_s17 }
  0x2e   :  { %p7090_p5 = scmp.ne.s32.totalorder %s72_s17, %s7089_s27  ;;  %p7095_p7 = scmp.lt.s32.totalorder %s7089_s27, %s7089_s27 }
  0x30   :  { %p7096_p8 = por %p7095_p7, %p7094_p6 }
  0x32   :  { %p7097_p9 = pnand %p7096_p8, %p7090_p5 }
  0x34   :  { %7100 = shalt.err (!%p7097_p9)
}
  0x35   :  { %s7152_s5 = smov 256   ;;  %s7153_s19 = smov 16  }
  0x36   :  { %77 = dma.hbm_to_vmem [thread:$0]  %s9866_s11, 8192, %s72_s17, [#allocation7], %s7152_s5, %s7152_s5, %s7153_s19  }
  0x37   :  { %7121 = dma.done.wait [#allocation5], 384  }
  0x38   :  { %7122 = vsyncadd [#allocation5], 4294966912 }
  0x39   :  { %7123 = dma.done.wait [#allocation7], 24576  }
  0x3a   :  { %7124 = vsyncadd [#allocation7], 4294942720  ;;  %v7154_v1 = vmov 0   ;;  %v96_v2 = vld [vmem:[%s9855_s0 + $0x10] sm:$0xff]  ;;  %v94_v3 = vld [vmem:[%s9855_s0] sm:$0xff]  ;;  %v7155_v5 = vmov 1  }
  0x3b   :  { %6460 = vset.pattern.permute.xlu1 %v7154_v1  ;;  %6459 = vset.pattern.permute.xlu0 %v7154_v1  ;;  %v95_v4 = vld [vmem:[%s9855_s0 + $0x8] sm:$0xff]  ;;  %v98_v6 = vld [vmem:[%s9855_s0 + $0x20] sm:$0xff]  ;;  %v97_v7 = vld [vmem:[%s9855_s0 + $0x18] sm:$0xff]  ;;  %v7156_v11 = vmov 2   ;;  %vm535_vm0 = vcmask 1045504   ;;  %vm486_vm1 = vcmask 1041408  }
  0x3c   :  { %123 = vperm.xlu1 %6460, %v96_v2   ;;  %113 = vperm.xlu0 %6459, %v94_v3   ;;  %v100_v8 = vld [vmem:[%s9855_s0 + $0x30] sm:$0xff]  ;;  %v101_v9 = vld [vmem:[%s9855_s0 + $0x38] sm:$0xff]  ;;  %v99_v12 = vld [vmem:[%s9855_s0 + $0x28] sm:$0xff]  ;;  %vm666_vm2 = vcmask 130048   ;;  %vm683_vm3 = vcmask 261120   ;;  %vm739_vm4 = vcmask 392192  }
  0x3d   :  { %v105_v10 = vld [vmem:[%s9855_s0 + $0x58] sm:$0xff]  ;;  %v102_v13 = vld [vmem:[%s9855_s0 + $0x40] sm:$0xff]  ;;  %v104_v14 = vld [vmem:[%s9855_s0 + $0x50] sm:$0xff]  ;;  %vm1119_vm5 = vcmask 1043456  }
  0x3e   :  { %v107_v15 = vld [vmem:[%s9855_s0 + $0x68] sm:$0xff]  ;;  %v108_v16 = vld [vmem:[%s9855_s0 + $0x70] sm:$0xff]  ;;  %v106_v18 = vld [vmem:[%s9855_s0 + $0x60] sm:$0xff] }
  0x3f   :  { %v103_v17 = vld [vmem:[%s9855_s0 + $0x48] sm:$0xff]  ;;  %v109_v19 = vld [vmem:[%s9855_s0 + $0x78] sm:$0xff]  ;;  %v7354_v31 = vld [vmem:[%s9856_s1] ss:$0 sm:$0xff] }
  0x40   :  { %6461 = vset.pattern.permute.xlu1 %v7155_v5  ;;  %118 = vperm.xlu0 %6459, %v95_v4   ;;  %v7359_v32 = vld [vmem:[%s9856_s1 + $0x1] ss:$0 sm:$0xff]  ;;  %v7368_v37 = vld [vmem:[%s9856_s1 + $0x2] ss:$0 sm:$0xff]  ;;  %v7378_v45 = vld [vmem:[%s9857_s2] ss:$0 sm:$0xff] }
  0x41   :  { %213 = vperm.xlu1 %6461, %v94_v3   ;;  %v6725_v47 = vld [vmem:[%s9858_s3] sm:$0xff]  }
  0x42   :  { %6286 = vmatprep.subr.bf16.mxu0 %v6725_v47 }
  0x43   :  { %6287 = vmatpush3.bf16.msra.mxu0 %v6725_v47 }
  0x44   :  { %133 = vperm.xlu0 %6459, %v98_v6  }
  0x45   :  { %221 = vperm.xlu1 %6461, %v96_v2  }
  0x48   :  { %6463 = vset.pattern.permute.xlu0 %v7155_v5 }
  0x49   :  { %6462 = vset.pattern.permute.xlu1 %v7154_v1  ;;  %217 = vperm.xlu0 %6463, %v95_v4  }
  0x4a   :  { %128 = vperm.xlu1 %6462, %v97_v7  }
  0x4d   :  { %237 = vperm.xlu0 %6463, %v100_v8  }
  0x4e   :  { %6464 = vset.pattern.permute.xlu1 %v7155_v5 }
  0x4f   :  { %225 = vperm.xlu1 %6464, %v97_v7  }
  0x51   :  { %241 = vperm.xlu0 %6463, %v101_v9  }
  0x53   :  { %229 = vperm.xlu1 %6464, %v98_v6  }
  0x55   :  { %257 = vperm.xlu0 %6463, %v105_v10  }
  0x57   :  { %6465 = vset.pattern.permute.xlu1 %v7156_v11 }
  0x58   :  { %318 = vperm.xlu1 %6465, %v95_v4  }
  0x59   :  { %6474 = vset.pattern.permute.xlu0 %v7156_v11 }
  0x5a   :  { %314 = vperm.xlu0 %6474, %v94_v3   ;;  %v6726_v3 = vld [vmem:[%s9858_s3 + $0x8] sm:$0xff]  }
  0x5b   :  { %6288 = vmatprep.subr.bf16.mxu0 %v6726_v3 }
  0x5c   :  { %322 = vperm.xlu1 %6465, %v96_v2   ;;  %6289 = vmatpush3.bf16.msra.mxu0 %v6726_v3 }
  0x5e   :  { %326 = vperm.xlu0 %6474, %v97_v7  }
  0x60   :  { %330 = vperm.xlu1 %6465, %v98_v6  }
  0x62   :  { %334 = vperm.xlu0 %6474, %v99_v12  }
  0x64   :  { %6466 = vset.pattern.permute.xlu1 %v7154_v1 }
  0x65   :  { %143 = vperm.xlu1 %6466, %v100_v8  }
  0x66   :  { %346 = vperm.xlu0 %6474, %v102_v13  }
  0x69   :  { %6467 = vset.pattern.permute.xlu1 %v7155_v5 }
  0x6a   :  { %233 = vperm.xlu1 %6467, %v99_v12   ;;  %354 = vperm.xlu0 %6474, %v104_v14  }
  0x6e   :  { %6468 = vset.pattern.permute.xlu1 %v7154_v1  ;;  %6477 = vset.pattern.permute.xlu0 %v7154_v1 }
  0x6f   :  { %148 = vperm.xlu1 %6468, %v101_v9   ;;  %138 = vperm.xlu0 %6477, %v99_v12  }
  0x73   :  { %153 = vperm.xlu1 %6468, %v102_v13   ;;  %163 = vperm.xlu0 %6477, %v104_v14  }
  0x77   :  { %6469 = vset.pattern.permute.xlu1 %v7155_v5  ;;  %168 = vperm.xlu0 %6477, %v105_v10  }
  0x78   :  { %245 = vperm.xlu1 %6469, %v102_v13  }
  0x7b   :  { %178 = vperm.xlu0 %6477, %v107_v15  }
  0x7c   :  { %6470 = vset.pattern.permute.xlu1 %v7156_v11 }
  0x7d   :  { %338 = vperm.xlu1 %6470, %v100_v8  }
  0x7f   :  { %6480 = vset.pattern.permute.xlu0 %v7155_v5 }
  0x80   :  { %269 = vperm.xlu0 %6480, %v108_v16  }
  0x81   :  { %342 = vperm.xlu1 %6470, %v101_v9  }
  0x84   :  { %6483 = vset.pattern.permute.xlu0 %v7156_v11 }
  0x85   :  { %6471 = vset.pattern.permute.xlu1 %v7154_v1  ;;  %366 = vperm.xlu0 %6483, %v107_v15  }
  0x86   :  { %158 = vperm.xlu1 %6471, %v103_v17  }
  0x8a   :  { %6472 = vset.pattern.permute.xlu1 %v7155_v5 }
  0x8b   :  { %249 = vperm.xlu1 %6472, %v103_v17  }
  0x8f   :  { %253 = vperm.xlu1 %6472, %v104_v14  }
  0x93   :  { %6473 = vset.pattern.permute.xlu1 %v7154_v1 }
  0x94   :  { %173 = vperm.xlu1 %6473, %v106_v18  }
  0x98   :  { %6475 = vset.pattern.permute.xlu1 %v7155_v5 }
  0x99   :  { %261 = vperm.xlu1 %6475, %v106_v18  }
  0x9d   :  { %6476 = vset.pattern.permute.xlu1 %v7156_v11 }
  0x9e   :  { %350 = vperm.xlu1 %6476, %v103_v17  }
  0xa2   :  { %358 = vperm.xlu1 %6476, %v105_v10  }
  0xa6   :  { %362 = vperm.xlu1 %6476, %v106_v18  }
  0xaa   :  { %6478 = vset.pattern.permute.xlu1 %v7154_v1 }
  0xab   :  { %183 = vperm.xlu1 %6478, %v108_v16  }
  0xaf   :  { %6479 = vset.pattern.permute.xlu1 %v7155_v5 }
  0xb0   :  { %265 = vperm.xlu1 %6479, %v107_v15   ;;  %v6727_v15 = vld [vmem:[%s9858_s3 + $0x10] sm:$0xff]  }
  0xb1   :  { %6290 = vmatprep.subr.bf16.mxu0 %v6727_v15 }
  0xb2   :  { %6291 = vmatpush3.bf16.msra.mxu0 %v6727_v15 }
  0xb4   :  { %6481 = vset.pattern.permute.xlu1 %v7154_v1 }
  0xb5   :  { %188 = vperm.xlu1 %6481, %v109_v19  }
  0xb9   :  { %6482 = vset.pattern.permute.xlu1 %v7155_v5 }
  0xba   :  { %273 = vperm.xlu1 %6482, %v109_v19  }
  0xbb   :  { %v124_v20 = vpop.permute.xlu1 %123  ;;  %v114_v21 = vpop.permute.xlu0 %113 }
  0xbc   :  { %v195_v38 = vmul.f32 %v7354_v31, %v114_v21  ;;  %v197_v48 = vmul.f32 %v7354_v31, %v124_v20 }
  0xbe   :  { %6484 = vset.pattern.permute.xlu1 %v7156_v11 }
  0xbf   :  { %370 = vperm.xlu1 %6484, %v108_v16   ;;  %v119_v22 = vpop.permute.xlu0 %118 }
  0xc0   :  { %v214_v23 = vpop.permute.xlu1 %213  ;;  %v196_v33 = vmul.f32 %v7354_v31, %v119_v22 }
  0xc1   :  { %v280_v39 = vmul.f32 %v7359_v32, %v214_v23 }
  0xc3   :  { %374 = vperm.xlu1 %6484, %v109_v19   ;;  %v134_v24 = vpop.permute.xlu0 %133  ;;  %v296_v49 = vadd.f32 %v280_v39, %v195_v38 }
  0xc4   :  { %v222_v25 = vpop.permute.xlu1 %221  ;;  %v199_v58 = vmul.f32 %v7354_v31, %v134_v24 }
  0xc5   :  { %v282_v42 = vmul.f32 %v7359_v32, %v222_v25 }
  0xc7   :  { %v298_v54 = vadd.f32 %v282_v42, %v197_v48 }
  0xc8   :  { %v218_v26 = vpop.permute.xlu0 %217 }
  0xc9   :  { %v129_v27 = vpop.permute.xlu1 %128  ;;  %v281_v34 = vmul.f32 %v7359_v32, %v218_v26 }
  0xca   :  { %v198_v52 = vmul.f32 %v7354_v31, %v129_v27 }
  0xcb   :  { %v297_v40 = vadd.f32 %v281_v34, %v196_v33 }
  0xcc   :  { %v7347_v28 = vpop.permute.xlu0 %237 }
  0xce   :  { %v226_v29 = vpop.permute.xlu1 %225 }
  0xcf   :  { %v283_v44 = vmul.f32 %v7359_v32, %v226_v29 }
  0xd0   :  { %v7349_v30 = vpop.permute.xlu0 %241 }
  0xd1   :  { %v299_v59 = vadd.f32 %v283_v44, %v198_v52 }
  0xd2   :  { %v230_v35 = vpop.permute.xlu1 %229 }
  0xd3   :  { %v284_v60 = vmul.f32 %v7359_v32, %v230_v35 }
  0xd4   :  { %v7363_v36 = vpop.permute.xlu0 %257 }
  0xd5   :  { %v300_v8 = vadd.f32 %v284_v60, %v199_v58 }
  0xd7   :  { %v319_v41 = vpop.permute.xlu1 %318 }
  0xd8   :  { %v382_v43 = vmul.f32 %v7368_v37, %v319_v41 }
  0xd9   :  { %v315_v46 = vpop.permute.xlu0 %314 }
  0xda   :  { %v398_v50 = vadd.f32 %v382_v43, %v297_v40  ;;  %v381_v51 = vmul.f32 %v7368_v37, %v315_v46 }
  0xdb   :  { %v323_v53 = vpop.permute.xlu1 %322 }
  0xdc   :  { %v421_v55 = vadd.f32 %v7378_v45, %v398_v50  ;;  %v397_v56 = vadd.f32 %v381_v51, %v296_v49  ;;  %v383_v57 = vmul.f32 %v7368_v37, %v323_v53 }
  0xdd   :  { %v327_v61 = vpop.permute.xlu0 %326 }
  0xde   :  { %v437_v62 = vmul.f32 0.2, %v421_v55  ;;  %v420_v63 = vadd.f32 %v7378_v45, %v397_v56  ;;  %v399_v0 = vadd.f32 %v383_v57, %v298_v54  ;;  %v384_v2 = vmul.f32 %v7368_v37, %v327_v61 }
  0xdf   :  { %v331_v4 = vpop.permute.xlu1 %330  ;;  %v286_v61 = vmul.f32 %v7359_v32, %v7347_v28 }
  0xe0   :  { %v436_v5 = vmul.f32 0.2, %v420_v63  ;;  %v422_v6 = vadd.f32 %v7378_v45, %v399_v0  ;;  %v400_v7 = vadd.f32 %v384_v2, %v299_v59  ;;  %v385_v9 = vmul.f32 %v7368_v37, %v331_v4 }
  0xe1   :  { %v335_v10 = vpop.permute.xlu0 %334  ;;  %v7397_v11 = vmax.f32 %v421_v55, %v437_v62 }
  0xe2   :  { %v7399_v12 = vmax.f32 %v420_v63, %v436_v5  ;;  %v438_v13 = vmul.f32 0.2, %v422_v6  ;;  %v423_v14 = vadd.f32 %v7378_v45, %v400_v7  ;;  %v401_v16 = vadd.f32 %v385_v9, %v300_v8 }
  0xe3   :  { %v536_v25 = vrot.slane %v7397_v11, 2  ;;  %v386_v49 = vmul.f32 %v7368_v37, %v335_v10  ;;  %v287_v5 = vmul.f32 %v7359_v32, %v7349_v30 }
  0xe4   :  { %v7405_v17 = vmax.f32 %v422_v6, %v438_v13  ;;  %v439_v18 = vmul.f32 0.2, %v423_v14  ;;  %v144_v19 = vpop.permute.xlu1 %143  ;;  %v6485_v20 = vpack.i.bf16 %v7397_v11, %v7399_v12  ;;  %v469_v21 = vrot.slane %v7399_v12, 2 }
  0xe5   :  { %v424_v22 = vadd.f32 %v7378_v45, %v401_v16  ;;  %v347_v23 = vpop.permute.xlu0 %346  ;;  %v201_v62 = vmul.f32 %v7354_v31, %v144_v19 }
  0xe6   :  { %v7411_v24 = vmax.f32 %v423_v14, %v439_v18  ;;  %6486 = vrot.lane.b32.xlu0 %v6485_v20, %s7153_s19  ;;  %v538_v26 = vrot.slane %v7405_v17, 2  ;;  %v537_v33 = vsel %vm535_vm0, %v469_v21, %v536_v25  ;;  %v389_v58 = vmul.f32 %v7368_v37, %v347_v23 }
  0xe7   :  { %v440_v27 = vmul.f32 0.2, %v424_v22  ;;  %v302_v6 = vadd.f32 %v286_v61, %v201_v62  ;;  %v291_v62 = vmul.f32 %v7359_v32, %v7363_v36 }
  0xe8   :  { %v6490_v29 = vpack.i.bf16 %v7411_v24, %v7405_v17  ;;  %v539_v34 = vsel %vm535_vm0, %v536_v25, %v538_v26  ;;  %v540_v41 = vrot.slane %v7411_v24, 2 }
  0xe9   :  { %v7422_v35 = vmax.f32 %v424_v22, %v440_v27  ;;  %v234_v38 = vpop.permute.xlu1 %233  ;;  %v7424_v39 = vpop.permute.xlu0 %354  ;;  %v6495_v40 = vpack.i.bf16 %v539_v34, %v537_v33 }
  0xea   :  { %6491 = vrot.lane.b32.xlu1 %v6490_v29, %s7153_s19  ;;  %v541_v43 = vsel %vm535_vm0, %v538_v26, %v540_v41  ;;  %v285_v50 = vmul.f32 %v7359_v32, %v234_v38 }
  0xeb   :  { %6496 = vrot.lane.b32.xlu0 %v6495_v40, %s7147_s30  ;;  %v542_v42 = vrot.slane %v7422_v35, 2 }
  0xed   :  { %v543_v44 = vsel %vm535_vm0, %v540_v41, %v542_v42 }
  0xee   :  { %v149_v46 = vpop.permute.xlu1 %148  ;;  %v139_v47 = vpop.permute.xlu0 %138  ;;  %v6505_v48 = vpack.i.bf16 %v543_v44, %v541_v43 }
  0xef   :  { %v200_v51 = vmul.f32 %v7354_v31, %v139_v47  ;;  %v202_v7 = vmul.f32 %v7354_v31, %v149_v46 }
  0xf0   :  { %6506 = vrot.lane.b32.xlu1 %v6505_v48, %s7147_s30 }
  0xf1   :  { %v301_v52 = vadd.f32 %v285_v50, %v200_v51  ;;  %v303_v13 = vadd.f32 %v287_v5, %v202_v7 }
  0xf2   :  { %v154_v53 = vpop.permute.xlu1 %153 }
  0xf3   :  { %v402_v54 = vadd.f32 %v386_v49, %v301_v52  ;;  %v203_v59 = vmul.f32 %v7354_v31, %v154_v53  ;;  %v391_v52 = vmul.f32 %v7368_v37, %v7424_v39 }
  0xf5   :  { %v425_v55 = vadd.f32 %v7378_v45, %v402_v54 }
  0xf7   :  { %v441_v56 = vmul.f32 0.2, %v425_v55  ;;  %v246_v57 = vpop.permute.xlu1 %245 }
  0xf8   :  { %v288_v60 = vmul.f32 %v7359_v32, %v246_v57 }
  0xf9   :  { %v7443_v63 = vmax.f32 %v425_v55, %v441_v56 }
  0xfa   :  { %v304_v0 = vadd.f32 %v288_v60, %v203_v59 }
  0xfb   :  { %v6500_v2 = vpack.i.bf16 %v7443_v63, %v7422_v35  ;;  %v544_v23 = vrot.slane %v7443_v63, 2 }
  0xfc   :  { %v405_v3 = vadd.f32 %v389_v58, %v304_v0  ;;  %v339_v4 = vpop.permute.xlu1 %338 }
  0xfd   :  { %v387_v8 = vmul.f32 %v7368_v37, %v339_v4  ;;  %6501 = vrot.lane.b32.xlu0 %v6500_v2, %s7153_s19  ;;  %v545_v33 = vsel %vm535_vm0, %v542_v42, %v544_v23  ;;  %v164_v42 = vpop.permute.xlu0 %163 }
  0xfe   :  { %v428_v28 = vadd.f32 %v7378_v45, %v405_v3  ;;  %v205_v50 = vmul.f32 %v7354_v31, %v164_v42 }
  0xff   :  { %v403_v9 = vadd.f32 %v387_v8, %v302_v6 }
 0x100   :  { %v343_v10 = vpop.permute.xlu1 %342  ;;  %v444_v16 = vmul.f32 0.2, %v428_v28 }
 0x101   :  { %v426_v14 = vadd.f32 %v7378_v45, %v403_v9  ;;  %v388_v15 = vmul.f32 %v7368_v37, %v343_v10  ;;  %v169_v58 = vpop.permute.xlu0 %168 }
 0x102   :  { %v7459_v25 = vmax.f32 %v428_v28, %v444_v16  ;;  %v206_v0 = vmul.f32 %v7354_v31, %v169_v58 }
 0x103   :  { %v442_v18 = vmul.f32 0.2, %v426_v14  ;;  %v404_v19 = vadd.f32 %v388_v15, %v303_v13 }
 0x104   :  { %v550_v44 = vrot.slane %v7459_v25, 2  ;;  %v307_v6 = vadd.f32 %v291_v62, %v206_v0 }
 0x105   :  { %v7455_v30 = vmax.f32 %v426_v14, %v442_v18  ;;  %v427_v20 = vadd.f32 %v7378_v45, %v404_v19  ;;  %v159_v22 = vpop.permute.xlu1 %158  ;;  %v179_v10 = vpop.permute.xlu0 %178 }
 0x106   :  { %v204_v60 = vmul.f32 %v7354_v31, %v159_v22 }
 0x107   :  { %v443_v26 = vmul.f32 0.2, %v427_v20  ;;  %v546_v27 = vrot.slane %v7455_v30, 2 }
 0x109   :  { %v7462_v29 = vmax.f32 %v427_v20, %v443_v26  ;;  %v547_v34 = vsel %vm535_vm0, %v544_v23, %v546_v27 }
 0x10a   :  { %v250_v38 = vpop.permute.xlu1 %249  ;;  %v6515_v40 = vpack.i.bf16 %v547_v34, %v545_v33  ;;  %v270_v34 = vpop.permute.xlu0 %269 }
 0x10b   :  { %v6510_v41 = vpack.i.bf16 %v7462_v29, %v7455_v30  ;;  %v548_v43 = vrot.slane %v7462_v29, 2  ;;  %v289_v57 = vmul.f32 %v7359_v32, %v250_v38 }
 0x10c   :  { %6516 = vrot.lane.b32.xlu0 %v6515_v40, %s7147_s30 }
 0x10d   :  { %6511 = vrot.lane.b32.xlu1 %v6510_v41, %s7153_s19  ;;  %v549_v46 = vsel %vm535_vm0, %v546_v27, %v548_v43  ;;  %v551_v47 = vsel %vm535_vm0, %v548_v43, %v550_v44  ;;  %v305_v2 = vadd.f32 %v289_v57, %v204_v60 }
 0x10e   :  { %v254_v48 = vpop.permute.xlu1 %253  ;;  %v6525_v49 = vpack.i.bf16 %v551_v47, %v549_v46 }
 0x10f   :  { %v290_v51 = vmul.f32 %v7359_v32, %v254_v48 }
 0x111   :  { %6526 = vrot.lane.b32.xlu1 %v6525_v49, %s7147_s30  ;;  %v306_v53 = vadd.f32 %v290_v51, %v205_v50  ;;  %v367_v49 = vpop.permute.xlu0 %366 }
 0x113   :  { %v174_v54 = vpop.permute.xlu1 %173  ;;  %v407_v55 = vadd.f32 %v391_v52, %v306_v53  ;;  %v208_v53 = vmul.f32 %v7354_v31, %v179_v10 }
 0x114   :  { %v207_v36 = vmul.f32 %v7354_v31, %v174_v54  ;;  %v394_v54 = vmul.f32 %v7368_v37, %v367_v49 }
 0x115   :  { %v430_v59 = vadd.f32 %v7378_v45, %v407_v55 }
 0x117   :  { %v446_v3 = vmul.f32 0.2, %v430_v59 }
 0x118   :  { %v262_v56 = vpop.permute.xlu1 %261 }
 0x119   :  { %v292_v7 = vmul.f32 %v7359_v32, %v262_v56  ;;  %v7489_v9 = vmax.f32 %v430_v59, %v446_v3 }
 0x11b   :  { %v308_v16 = vadd.f32 %v292_v7, %v207_v36  ;;  %v554_v22 = vrot.slane %v7489_v9, 2 }
 0x11d   :  { %v351_v61 = vpop.permute.xlu1 %350 }
 0x11e   :  { %v390_v39 = vmul.f32 %v7368_v37, %v351_v61 }
 0x120   :  { %v406_v4 = vadd.f32 %v390_v39, %v305_v2 }
 0x121   :  { %v359_v5 = vpop.permute.xlu1 %358 }
 0x122   :  { %v429_v8 = vadd.f32 %v7378_v45, %v406_v4  ;;  %v392_v28 = vmul.f32 %v7368_v37, %v359_v5  ;;  %v294_v4 = vmul.f32 %v7359_v32, %v270_v34 }
 0x124   :  { %v445_v13 = vmul.f32 0.2, %v429_v8  ;;  %v408_v14 = vadd.f32 %v392_v28, %v307_v6 }
 0x125   :  { %v363_v15 = vpop.permute.xlu1 %362 }
 0x126   :  { %v7492_v18 = vmax.f32 %v429_v8, %v445_v13  ;;  %v431_v19 = vadd.f32 %v7378_v45, %v408_v14  ;;  %v393_v20 = vmul.f32 %v7368_v37, %v363_v15 }
 0x128   :  { %v447_v23 = vmul.f32 0.2, %v431_v19  ;;  %v409_v26 = vadd.f32 %v393_v20, %v308_v16  ;;  %v6520_v27 = vpack.i.bf16 %v7492_v18, %v7459_v25  ;;  %v552_v33 = vrot.slane %v7492_v18, 2 }
 0x12a   :  { %v7500_v38 = vmax.f32 %v431_v19, %v447_v23  ;;  %v432_v40 = vadd.f32 %v7378_v45, %v409_v26  ;;  %v184_v41 = vpop.permute.xlu1 %183  ;;  %6521 = vrot.lane.b32.xlu0 %v6520_v27, %s7153_s19  ;;  %v553_v43 = vsel %vm535_vm0, %v550_v44, %v552_v33  ;;  %v555_v46 = vsel %vm535_vm0, %v552_v33, %v554_v22 }
 0x12b   :  { %v6535_v47 = vpack.i.bf16 %v555_v46, %v553_v43  ;;  %v209_v3 = vmul.f32 %v7354_v31, %v184_v41 }
 0x12c   :  { %v448_v42 = vmul.f32 0.2, %v432_v40  ;;  %v6530_v48 = vpack.i.bf16 %v7500_v38, %v7489_v9  ;;  %v556_v51 = vrot.slane %v7500_v38, 2 }
 0x12d   :  { %v310_v7 = vadd.f32 %v294_v4, %v209_v3 }
 0x12e   :  { %v7508_v50 = vmax.f32 %v432_v40, %v448_v42  ;;  %6536 = vrot.lane.b32.xlu0 %v6535_v47, %s7147_s30  ;;  %6531 = vrot.lane.b32.xlu1 %v6530_v48, %s7153_s19  ;;  %v557_v57 = vsel %vm535_vm0, %v554_v22, %v556_v51  ;;  %v487_v48 = vrot.slane %v7399_v12, 6 }
 0x12f   :  { %v266_v52 = vpop.permute.xlu1 %265 }
 0x130   :  { %v293_v44 = vmul.f32 %v7359_v32, %v266_v52  ;;  %v558_v55 = vrot.slane %v7508_v50, 2  ;;  %v488_v52 = vrot.slane %v7397_v11, 6 }
 0x132   :  { %v309_v56 = vadd.f32 %v293_v44, %v208_v53  ;;  %v559_v58 = vsel %vm535_vm0, %v556_v51, %v558_v55 }
 0x133   :  { %v6540_v59 = vpack.i.bf16 %v559_v58, %v557_v57  ;;  %v534_v57 = vsel %vm486_vm1, %v469_v21, %v487_v48  ;;  %v490_v58 = vrot.slane %v7405_v17, 6 }
 0x134   :  { %v410_v60 = vadd.f32 %v394_v54, %v309_v56  ;;  %v189_v61 = vpop.permute.xlu1 %188  ;;  %v489_v56 = vsel %vm486_vm1, %v487_v48, %v488_v52 }
 0x135   :  { %6541 = vrot.lane.b32.xlu1 %v6540_v59, %s7147_s30  ;;  %v210_v10 = vmul.f32 %v7354_v31, %v189_v61  ;;  %v492_v59 = vrot.slane %v7411_v24, 6 }
 0x136   :  { %v433_v62 = vadd.f32 %v7378_v45, %v410_v60 }
 0x137   :  { %v493_v21 = vsel %vm486_vm1, %v490_v58, %v492_v59 }
 0x138   :  { %v449_v0 = vmul.f32 0.2, %v433_v62 }
 0x139   :  { %v274_v2 = vpop.permute.xlu1 %273 }
 0x13a   :  { %v7521_v39 = vmax.f32 %v433_v62, %v449_v0  ;;  %v295_v8 = vmul.f32 %v7359_v32, %v274_v2 }
 0x13c   :  { %v6545_v5 = vpack.i.bf16 %v7521_v39, %v7508_v50  ;;  %v311_v14 = vadd.f32 %v295_v8, %v210_v10  ;;  %v560_v26 = vrot.slane %v7521_v39, 2 }
 0x13e   :  { %v371_v6 = vpop.permute.xlu1 %370  ;;  %6546 = vrot.lane.b32.xlu0 %v6545_v5, %s7153_s19  ;;  %v561_v31 = vsel %vm535_vm0, %v558_v55, %v560_v26 }
 0x13f   :  { %v395_v28 = vmul.f32 %v7368_v37, %v371_v6  ;;  %v491_v6 = vsel %vm486_vm1, %v488_v52, %v490_v58 }
 0x141   :  { %v411_v36 = vadd.f32 %v395_v28, %v310_v7 }
 0x142   :  { %v375_v13 = vpop.permute.xlu1 %374 }
 0x143   :  { %v434_v15 = vadd.f32 %v7378_v45, %v411_v36  ;;  %v396_v16 = vmul.f32 %v7368_v37, %v375_v13 }
 0x145   :  { %v450_v19 = vmul.f32 0.2, %v434_v15  ;;  %v412_v20 = vadd.f32 %v396_v16, %v311_v14  ;;  %v494_v16 = vrot.slane %v7422_v35, 6 }
 0x147   :  { %v7533_v22 = vmax.f32 %v434_v15, %v450_v19  ;;  %v435_v23 = vadd.f32 %v7378_v45, %v412_v20  ;;  %v496_v19 = vrot.slane %v7443_v63, 6 }
 0x149   :  { %v451_v32 = vmul.f32 0.2, %v435_v23  ;;  %v562_v27 = vrot.slane %v7533_v22, 2 }
 0x14b   :  { %v7538_v33 = vmax.f32 %v435_v23, %v451_v32  ;;  %v563_v34 = vsel %vm535_vm0, %v560_v26, %v562_v27  ;;  %v495_v32 = vsel %vm486_vm1, %v492_v59, %v494_v16 }
 0x14c   :  { %v6555_v40 = vpack.i.bf16 %v563_v34, %v561_v31 }
 0x14d   :  { %v6550_v37 = vpack.i.bf16 %v7538_v33, %v7533_v22  ;;  %v516_v41 = vrot.slane %v7538_v33, 6  ;;  %v564_v43 = vrot.slane %v7538_v33, 2 }
 0x14e   :  { %6556 = vrot.lane.b32.xlu0 %v6555_v40, %s7147_s30 }
 0x14f   :  { %6551 = vrot.lane.b32.xlu1 %v6550_v37, %s7153_s19  ;;  %v565_v45 = vsel %vm535_vm0, %v562_v27, %v564_v43  ;;  %v568_v46 = vsel %vm535_vm0, %v564_v43, %v516_v41  ;;  %v497_v27 = vsel %vm486_vm1, %v494_v16, %v496_v19 }
 0x150   :  { %v6560_v47 = vpack.i.bf16 %v568_v46, %v565_v45  ;;  %v498_v45 = vrot.slane %v7455_v30, 6  ;;  %v500_v46 = vrot.slane %v7462_v29, 6 }
 0x153   :  { %6561 = vrot.lane.b32.xlu1 %v6560_v47, %s7147_s30 }
 0x158   :  { %v6487_v42 = vpop.permute.xlu0 %6486 }
 0x159   :  { %v6489_v49 = vunpack.i.h.bf16 %v6487_v42  ;;  %v6488_v51 = vunpack.i.l.bf16 %v6487_v42 }
 0x15b   :  { %v667_v60 = vsel %vm666_vm2, %v534_v57, %v6488_v51  ;;  %v668_v61 = vsel %vm666_vm2, %v489_v56, %v6489_v49 }
 0x15c   :  { %v6492_v53 = vpop.permute.xlu1 %6491 }
 0x15d   :  { %v6497_v44 = vpop.permute.xlu0 %6496  ;;  %v6494_v62 = vunpack.i.h.bf16 %v6492_v53  ;;  %v6493_v0 = vunpack.i.l.bf16 %v6492_v53  ;;  %v501_v53 = vsel %vm486_vm1, %v498_v45, %v500_v46 }
 0x15e   :  { %v6499_v54 = vunpack.i.h.bf16 %v6497_v44  ;;  %v6498_v55 = vunpack.i.l.bf16 %v6497_v44  ;;  %v499_v44 = vsel %vm486_vm1, %v496_v19, %v498_v45 }
 0x15f   :  { %v669_v28 = vsel %vm666_vm2, %v491_v6, %v6493_v0  ;;  %v670_v10 = vsel %vm666_vm2, %v493_v21, %v6494_v62  ;;  %v504_v62 = vrot.slane %v7492_v18, 6 }
 0x160   :  { %v684_v2 = vsel %vm683_vm3, %v667_v60, %v6498_v55  ;;  %v685_v3 = vsel %vm683_vm3, %v668_v61, %v6499_v54 }
 0x161   :  { %v700_v4 = vpack.c.bf16 %v685_v3, %v684_v2  ;;  %v502_v3 = vrot.slane %v7459_v25, 6 }
 0x162   :  { %v6507_v5 = vpop.permute.xlu1 %6506 }
 0x163   :  { %v6509_v7 = vunpack.i.h.bf16 %v6507_v5  ;;  %v6508_v8 = vunpack.i.l.bf16 %v6507_v5  ;;  %6292 = vmatprep.mubr.msk.bf16.mxu0 %vm739_vm4, %v700_v4  ;;  %v503_v5 = vsel %vm486_vm1, %v500_v46, %v502_v3  ;;  %v505_v6 = vsel %vm486_vm1, %v502_v3, %v504_v62 }
 0x165   :  { %v686_v36 = vsel %vm683_vm3, %v669_v28, %v6508_v8  ;;  %v687_v13 = vsel %vm683_vm3, %v670_v10, %v6509_v7 }
 0x166   :  { %v701_v14 = vpack.c.bf16 %v687_v13, %v686_v36 }
 0x168   :  { %6293 = vmatmul.mubr.msk.bf16.vlgmr.msra.gmra.mrb[0].mxu0 %vm739_vm4, %v701_v14  ;;  %v508_v14 = vrot.slane %v7500_v38, 6 }
 0x16f   :  { %v6502_v15 = vpop.permute.xlu0 %6501 }
 0x170   :  { %v6504_v20 = vunpack.i.h.bf16 %v6502_v15  ;;  %v6503_v23 = vunpack.i.l.bf16 %v6502_v15 }
 0x172   :  { %v672_v37 = vsel %vm666_vm2, %v497_v27, %v6504_v20  ;;  %v671_v43 = vsel %vm666_vm2, %v495_v32, %v6503_v23  ;;  %v506_v20 = vrot.slane %v7489_v9, 6 }
 0x174   :  { %v509_v32 = vsel %vm486_vm1, %v506_v20, %v508_v14 }
 0x17e   :  { %v6517_v26 = vpop.permute.xlu0 %6516 }
 0x17f   :  { %v6519_v31 = vunpack.i.h.bf16 %v6517_v26  ;;  %v6518_v34 = vunpack.i.l.bf16 %v6517_v26  ;;  %v6512_v40 = vpop.permute.xlu1 %6511  ;;  %v507_v26 = vsel %vm486_vm1, %v504_v62, %v506_v20 }
 0x180   :  { %v6514_v48 = vunpack.i.h.bf16 %v6512_v40  ;;  %v6513_v49 = vunpack.i.l.bf16 %v6512_v40 }
 0x181   :  { %v688_v47 = vsel %vm683_vm3, %v671_v43, %v6518_v34  ;;  %v689_v42 = vsel %vm683_vm3, %v672_v37, %v6519_v31 }
 0x182   :  { %v702_v51 = vpack.c.bf16 %v689_v42, %v688_v47  ;;  %v674_v56 = vsel %vm666_vm2, %v501_v53, %v6514_v48  ;;  %v673_v57 = vsel %vm666_vm2, %v499_v44, %v6513_v49  ;;  %v510_v47 = vrot.slane %v7508_v50, 6 }
 0x183   :  { %v6527_v52 = vpop.permute.xlu1 %6526  ;;  %v512_v42 = vrot.slane %v7521_v39, 6 }
 0x184   :  { %v6529_v54 = vunpack.i.h.bf16 %v6527_v52  ;;  %v6528_v55 = vunpack.i.l.bf16 %v6527_v52  ;;  %6296 = vmatprep.mubr.msk.bf16.mxu0 %vm739_vm4, %v702_v51  ;;  %v511_v52 = vsel %vm486_vm1, %v508_v14, %v510_v47 }
 0x185   :  { %v513_v53 = vsel %vm486_vm1, %v510_v47, %v512_v42 }
 0x186   :  { %v691_v58 = vsel %vm683_vm3, %v674_v56, %v6529_v54  ;;  %v690_v59 = vsel %vm683_vm3, %v673_v57, %v6528_v55 }
 0x187   :  { %v703_v60 = vpack.c.bf16 %v691_v58, %v690_v59  ;;  %v514_v58 = vrot.slane %v7533_v22, 6 }
 0x189   :  { %6297 = vmatmul.mubr.msk.bf16.gmra.mrb[4].mxu0 %vm739_vm4, %v703_v60 }
 0x19c   :  { %v6522_v61 = vpop.permute.xlu0 %6521 }
 0x19d   :  { %v6524_v0 = vunpack.i.h.bf16 %v6522_v61  ;;  %v6523_v2 = vunpack.i.l.bf16 %v6522_v61 }
 0x19f   :  { %v676_v8 = vsel %vm666_vm2, %v505_v6, %v6524_v0  ;;  %v675_v28 = vsel %vm666_vm2, %v503_v5, %v6523_v2  ;;  %v6728_v2 = vld [vmem:[#allocation4] sm:$0xff]   ;;  %v517_v5 = vsel %vm486_vm1, %v514_v58, %v516_v41  ;;  %v7631_v41 = vld [vmem:[%s9859_s4] ss:$0 sm:$0xff] }
 0x1a0   :  { %v6537_v4 = vpop.permute.xlu0 %6536  ;;  %v6532_v10 = vpop.permute.xlu1 %6531  ;;  %6308 = vmatprep.subr.bf16.mxu1 %v6728_v2 }
 0x1a1   :  { %v6539_v21 = vunpack.i.h.bf16 %v6537_v4  ;;  %v6538_v7 = vunpack.i.l.bf16 %v6537_v4  ;;  %v6534_v16 = vunpack.i.h.bf16 %v6532_v10  ;;  %v6533_v19 = vunpack.i.l.bf16 %v6532_v10  ;;  %6309 = vmatpush3.bf16.msra.mxu1 %v6728_v2 }
 0x1a2   :  { %v515_v4 = vsel %vm486_vm1, %v512_v42, %v514_v58 }
 0x1a3   :  { %v692_v36 = vsel %vm683_vm3, %v675_v28, %v6538_v7  ;;  %v693_v13 = vsel %vm683_vm3, %v676_v8, %v6539_v21  ;;  %v677_v34 = vsel %vm666_vm2, %v507_v26, %v6533_v19  ;;  %v678_v40 = vsel %vm666_vm2, %v509_v32, %v6534_v16 }
 0x1a4   :  { %v704_v15 = vpack.c.bf16 %v693_v13, %v692_v36 }
 0x1a6   :  { %6300 = vmatprep.mubr.msk.bf16.mxu0 %vm739_vm4, %v704_v15 }
 0x1a7   :  { %v6542_v23 = vpop.permute.xlu1 %6541 }
 0x1a8   :  { %v6544_v27 = vunpack.i.h.bf16 %v6542_v23  ;;  %v6543_v31 = vunpack.i.l.bf16 %v6542_v23 }
 0x1aa   :  { %v694_v37 = vsel %vm683_vm3, %v677_v34, %v6543_v31  ;;  %v695_v43 = vsel %vm683_vm3, %v678_v40, %v6544_v27 }
 0x1ab   :  { %v705_v45 = vpack.c.bf16 %v695_v43, %v694_v37 }
 0x1ad   :  { %6301 = vmatmul.mubr.msk.bf16.gmra.mrb[8].mxu0 %vm739_vm4, %v705_v45 }
 0x1b0   :  { %v6547_v46 = vpop.permute.xlu0 %6546 }
 0x1b1   :  { %v6549_v48 = vunpack.i.h.bf16 %v6547_v46  ;;  %v6548_v49 = vunpack.i.l.bf16 %v6547_v46 }
 0x1b3   :  { %v680_v56 = vsel %vm666_vm2, %v513_v53, %v6549_v48  ;;  %v679_v57 = vsel %vm666_vm2, %v511_v52, %v6548_v49 }
 0x1c0   :  { %v6557_v51 = vpop.permute.xlu0 %6556 }
 0x1c1   :  { %v6559_v44 = vunpack.i.h.bf16 %v6557_v51  ;;  %v6558_v54 = vunpack.i.l.bf16 %v6557_v51  ;;  %v6552_v55 = vpop.permute.xlu1 %6551 }
 0x1c2   :  { %v6554_v61 = vunpack.i.h.bf16 %v6552_v55  ;;  %v6553_v62 = vunpack.i.l.bf16 %v6552_v55 }
 0x1c3   :  { %v696_v59 = vsel %vm683_vm3, %v679_v57, %v6558_v54  ;;  %v697_v60 = vsel %vm683_vm3, %v680_v56, %v6559_v44 }
 0x1c4   :  { %v706_v0 = vpack.c.bf16 %v697_v60, %v696_v59  ;;  %v681_v7 = vsel %vm666_vm2, %v515_v4, %v6553_v62  ;;  %v682_v8 = vsel %vm666_vm2, %v517_v5, %v6554_v61 }
 0x1c5   :  { %v6562_v3 = vpop.permute.xlu1 %6561 }
 0x1c6   :  { %v6564_v6 = vunpack.i.h.bf16 %v6562_v3  ;;  %v6563_v21 = vunpack.i.l.bf16 %v6562_v3  ;;  %6304 = vmatprep.mubr.msk.bf16.mxu0 %vm739_vm4, %v706_v0 }
 0x1c8   :  { %v698_v28 = vsel %vm683_vm3, %v681_v7, %v6563_v21  ;;  %v699_v10 = vsel %vm683_vm3, %v682_v8, %v6564_v6 }
 0x1c9   :  { %v707_v36 = vpack.c.bf16 %v699_v10, %v698_v28 }
 0x1cb   :  { %6305 = vmatmul.mubr.msk.bf16.gmra.mrb[12].mxu0 %vm739_vm4, %v707_v36 }
 0x23b   :  { %v6294_v13 = vpop.f32.mrb[0].mxu0 }
 0x23c   :  { %v807_v14 = vadd.f32 %v6294_v13, %v7631_v41  ;;  %v798_v15 = vpop.f32.mrb[1].mxu0 }
 0x23d   :  { %v799_v16 = vadd.f32 %v7631_v41, %v798_v15  ;;  %v6295_v19 = vpop.f32.mrb[2].mxu0 }
 0x23e   :  { %v863_v20 = vmul.f32 0.2, %v807_v14  ;;  %v810_v23 = vadd.f32 %v6295_v19, %v7631_v41  ;;  %v801_v26 = vpop.f32.mrb[3].mxu0 }
 0x23f   :  { %v861_v32 = vmul.f32 0.2, %v799_v16  ;;  %v802_v27 = vadd.f32 %v7631_v41, %v801_v26 }
 0x240   :  { %v864_v31 = vmul.f32 0.2, %v810_v23  ;;  %v879_v40 = vmax.f32 %v807_v14, %v863_v20 }
 0x241   :  { %v862_v34 = vmul.f32 0.2, %v802_v27  ;;  %v877_v43 = vmax.f32 %v799_v16, %v861_v32 }
 0x242   :  { %v880_v37 = vmax.f32 %v810_v23, %v864_v31 }
 0x243   :  { %v878_v45 = vmax.f32 %v802_v27, %v862_v34 }
 0x244   :  { %v894_v46 = vpack.c.bf16 %v880_v37, %v879_v40 }
 0x245   :  { %v893_v47 = vpack.c.bf16 %v878_v45, %v877_v43 }
 0x247   :  { %6310 = vmatprep.mubr.msk.bf16.mxu1 %vm666_vm2, %v893_v47 }
 0x248   :  { %6311 = vmatmul.mubr.msk.bf16.vlgmr.msra.gmra.mrb[0].mxu1 %vm666_vm2, %v894_v46 }
 0x25c   :  { %v6298_v42 = vpop.f32.mrb[4].mxu0 }
 0x25d   :  { %v823_v48 = vadd.f32 %v6298_v42, %v7631_v41  ;;  %v814_v49 = vpop.f32.mrb[5].mxu0 }
 0x25e   :  { %v815_v51 = vadd.f32 %v7631_v41, %v814_v49  ;;  %v6299_v52 = vpop.f32.mrb[6].mxu0 }
 0x25f   :  { %v867_v53 = vmul.f32 0.2, %v823_v48  ;;  %v826_v44 = vadd.f32 %v6299_v52, %v7631_v41  ;;  %v817_v54 = vpop.f32.mrb[7].mxu0 }
 0x260   :  { %v865_v55 = vmul.f32 0.2, %v815_v51  ;;  %v818_v56 = vadd.f32 %v7631_v41, %v817_v54 }
 0x261   :  { %v868_v57 = vmul.f32 0.2, %v826_v44  ;;  %v883_v59 = vmax.f32 %v823_v48, %v867_v53 }
 0x262   :  { %v866_v58 = vmul.f32 0.2, %v818_v56  ;;  %v881_v61 = vmax.f32 %v815_v51, %v865_v55  ;;  %v7660_v55 = vld [vmem:[%s9861_s6] ss:$0 sm:$0xff] }
 0x263   :  { %v884_v60 = vmax.f32 %v826_v44, %v868_v57 }
 0x264   :  { %v882_v62 = vmax.f32 %v818_v56, %v866_v58 }
 0x265   :  { %v896_v0 = vpack.c.bf16 %v884_v60, %v883_v59 }
 0x266   :  { %v895_v2 = vpack.c.bf16 %v882_v62, %v881_v61 }
 0x268   :  { %6314 = vmatprep.mubr.msk.bf16.mxu1 %vm666_vm2, %v895_v2 }
 0x269   :  { %6315 = vmatmul.mubr.msk.bf16.gmra.mrb[4].mxu1 %vm666_vm2, %v896_v0 }
 0x280   :  { %v6302_v3 = vpop.f32.mrb[8].mxu0 }
 0x281   :  { %v839_v4 = vadd.f32 %v6302_v3, %v7631_v41  ;;  %v830_v5 = vpop.f32.mrb[9].mxu0 }
 0x282   :  { %v831_v6 = vadd.f32 %v7631_v41, %v830_v5  ;;  %v6303_v21 = vpop.f32.mrb[10].mxu0  ;;  %v6729_v5 = vld [vmem:[%s9858_s3 + $0x18] sm:$0xff]  }
 0x283   :  { %v871_v7 = vmul.f32 0.2, %v839_v4  ;;  %v842_v8 = vadd.f32 %v6303_v21, %v7631_v41  ;;  %v833_v28 = vpop.f32.mrb[11].mxu0  ;;  %6326 = vmatprep.subr.bf16.mxu1 %v6729_v5 }
 0x284   :  { %v869_v10 = vmul.f32 0.2, %v831_v6  ;;  %v834_v36 = vadd.f32 %v7631_v41, %v833_v28  ;;  %6327 = vmatpush3.bf16.msra.mxu1 %v6729_v5 }
 0x285   :  { %v872_v13 = vmul.f32 0.2, %v842_v8  ;;  %v887_v15 = vmax.f32 %v839_v4, %v871_v7 }
 0x286   :  { %v870_v14 = vmul.f32 0.2, %v834_v36  ;;  %v885_v19 = vmax.f32 %v831_v6, %v869_v10 }
 0x287   :  { %v888_v16 = vmax.f32 %v842_v8, %v872_v13 }
 0x288   :  { %v886_v20 = vmax.f32 %v834_v36, %v870_v14  ;;  %v6731_v36 = vld [vmem:[%s9858_s3 + $0x28] sm:$0xff]  }
 0x289   :  { %v898_v23 = vpack.c.bf16 %v888_v16, %v887_v15 }
 0x28a   :  { %v897_v26 = vpack.c.bf16 %v886_v20, %v885_v19 }
 0x28c   :  { %6318 = vmatprep.mubr.msk.bf16.mxu1 %vm666_vm2, %v897_v26 }
 0x28d   :  { %6319 = vmatmul.mubr.msk.bf16.gmra.mrb[8].mxu1 %vm666_vm2, %v898_v23 }
 0x29e   :  { %v6306_v32 = vpop.f32.mrb[12].mxu0 }
 0x29f   :  { %v855_v27 = vadd.f32 %v6306_v32, %v7631_v41  ;;  %v846_v31 = vpop.f32.mrb[13].mxu0 }
 0x2a0   :  { %v847_v34 = vadd.f32 %v7631_v41, %v846_v31  ;;  %v6307_v40 = vpop.f32.mrb[14].mxu0 }
 0x2a1   :  { %v875_v37 = vmul.f32 0.2, %v855_v27  ;;  %v858_v43 = vadd.f32 %v6307_v40, %v7631_v41  ;;  %v849_v45 = vpop.f32.mrb[15].mxu0 }
 0x2a2   :  { %v873_v46 = vmul.f32 0.2, %v847_v34  ;;  %v850_v47 = vadd.f32 %v7631_v41, %v849_v45 }
 0x2a3   :  { %v876_v42 = vmul.f32 0.2, %v858_v43  ;;  %v891_v49 = vmax.f32 %v855_v27, %v875_v37 }
 0x2a4   :  { %v874_v48 = vmul.f32 0.2, %v850_v47  ;;  %v889_v52 = vmax.f32 %v847_v34, %v873_v46 }
 0x2a5   :  { %v892_v51 = vmax.f32 %v858_v43, %v876_v42 }
 0x2a6   :  { %v890_v53 = vmax.f32 %v850_v47, %v874_v48 }
 0x2a7   :  { %v900_v44 = vpack.c.bf16 %v892_v51, %v891_v49 }
 0x2a8   :  { %v899_v54 = vpack.c.bf16 %v890_v53, %v889_v52 }
 0x2aa   :  { %6322 = vmatprep.mubr.msk.bf16.mxu1 %vm666_vm2, %v899_v54 }
 0x2ab   :  { %6323 = vmatmul.mubr.msk.bf16.gmra.mrb[12].mxu1 %vm666_vm2, %v900_v44 }
 0x31b   :  { %v6312_v56 = vpop.f32.mrb[0].mxu1 }
 0x31c   :  { %v983_v41 = vadd.f32 %v6312_v56, %v7660_v55  ;;  %v974_v57 = vpop.f32.mrb[1].mxu1 }
 0x31d   :  { %v975_v58 = vadd.f32 %v7660_v55, %v974_v57  ;;  %v6313_v59 = vpop.f32.mrb[2].mxu1 }
 0x31e   :  { %v986_v60 = vadd.f32 %v6313_v59, %v7660_v55  ;;  %v977_v61 = vpop.f32.mrb[3].mxu1  ;;  %v7666_v62 = vadd.f32 %v983_v41, %v7405_v17 }
 0x31f   :  { %v7669_v0 = vadd.f32 %v975_v58, %v7399_v12  ;;  %v978_v2 = vadd.f32 %v7660_v55, %v977_v61  ;;  %v6730_v12 = vld [vmem:[%s9858_s3 + $0x20] sm:$0xff]  }
 0x320   :  { %v7673_v3 = vadd.f32 %v986_v60, %v7411_v24  ;;  %v1124_v21 = vrot.slane %v7666_v62, 6  ;;  %6328 = vmatprep.subr.bf16.mxu1 %v6730_v12 }
 0x321   :  { %v7676_v4 = vadd.f32 %v978_v2, %v7397_v11  ;;  %v7689_v24 = vrot.slane %v7669_v0, 6  ;;  %6329 = vmatpush3.bf16.msra.mxu1 %v6730_v12 }
 0x322   :  { %v6565_v6 = vpack.i.bf16 %v7673_v3, %v7666_v62  ;;  %6330 = vmatprep.subr.bf16.mxu1 %v6731_v36  ;;  %v1126_v20 = vrot.slane %v7673_v3, 6 }
 0x323   :  { %v6570_v17 = vpack.i.bf16 %v7676_v4, %v7669_v0  ;;  %v1122_v11 = vrot.slane %v7676_v4, 6 }
 0x324   :  { %6566 = vrot.lane.b32.xlu1 %v6565_v6, %s7153_s19  ;;  %v1127_v40 = vsel %vm486_vm1, %v1124_v21, %v1126_v20 }
 0x325   :  { %6571 = vrot.lane.b32.xlu0 %v6570_v17, %s7153_s19  ;;  %v1123_v7 = vsel %vm486_vm1, %v7689_v24, %v1122_v11  ;;  %v1125_v8 = vsel %vm486_vm1, %v1122_v11, %v1124_v21  ;;  %6331 = vmatpush3.bf16.msra.mxu1 %v6731_v36 }
 0x326   :  { %v6575_v28 = vpack.i.bf16 %v1125_v8, %v1123_v7 }
 0x329   :  { %6576 = vrot.lane.b32.xlu0 %v6575_v28, %s7147_s30 }
 0x33c   :  { %v6316_v10 = vpop.f32.mrb[4].mxu1 }
 0x33d   :  { %v999_v13 = vadd.f32 %v6316_v10, %v7660_v55  ;;  %v990_v14 = vpop.f32.mrb[5].mxu1 }
 0x33e   :  { %v991_v15 = vadd.f32 %v7660_v55, %v990_v14  ;;  %v6317_v16 = vpop.f32.mrb[6].mxu1 }
 0x33f   :  { %v993_v19 = vpop.f32.mrb[7].mxu1  ;;  %v7706_v23 = vadd.f32 %v999_v13, %v7455_v30  ;;  %v1002_v27 = vadd.f32 %v6317_v16, %v7660_v55 }
 0x340   :  { %v7709_v26 = vadd.f32 %v991_v15, %v7422_v35  ;;  %v994_v32 = vadd.f32 %v7660_v55, %v993_v19 }
 0x341   :  { %v1132_v35 = vrot.slane %v7706_v23, 6  ;;  %v7724_v45 = vadd.f32 %v1002_v27, %v7462_v29 }
 0x342   :  { %v7714_v31 = vadd.f32 %v994_v32, %v7443_v63  ;;  %v1128_v34 = vrot.slane %v7709_v26, 6 }
 0x343   :  { %v6590_v48 = vpack.i.bf16 %v7724_v45, %v7706_v23  ;;  %v1134_v54 = vrot.slane %v7724_v45, 6 }
 0x344   :  { %v6580_v37 = vpack.i.bf16 %v7714_v31, %v7709_v26  ;;  %v1129_v30 = vsel %vm486_vm1, %v1126_v20, %v1128_v34  ;;  %v1130_v43 = vrot.slane %v7714_v31, 6 }
 0x345   :  { %v6585_v46 = vpack.i.bf16 %v1129_v30, %v1127_v40  ;;  %v1135_v61 = vsel %vm486_vm1, %v1132_v35, %v1134_v54 }
 0x346   :  { %6581 = vrot.lane.b32.xlu0 %v6580_v37, %s7153_s19  ;;  %v1131_v63 = vsel %vm486_vm1, %v1128_v34, %v1130_v43  ;;  %v1133_v47 = vsel %vm486_vm1, %v1130_v43, %v1132_v35 }
 0x347   :  { %6586 = vrot.lane.b32.xlu1 %v6585_v46, %s7147_s30  ;;  %v6595_v42 = vpack.i.bf16 %v1133_v47, %v1131_v63 }
 0x34a   :  { %6596 = vrot.lane.b32.xlu0 %v6595_v42, %s7147_s30 }
 0x34b   :  { %6591 = vrot.lane.b32.xlu1 %v6590_v48, %s7153_s19 }
 0x360   :  { %v6320_v49 = vpop.f32.mrb[8].mxu1 }
 0x361   :  { %v1015_v29 = vadd.f32 %v6320_v49, %v7660_v55  ;;  %v1006_v51 = vpop.f32.mrb[9].mxu1 }
 0x362   :  { %v1007_v52 = vadd.f32 %v7660_v55, %v1006_v51  ;;  %v6321_v53 = vpop.f32.mrb[10].mxu1 }
 0x363   :  { %v1009_v44 = vpop.f32.mrb[11].mxu1  ;;  %v7738_v56 = vadd.f32 %v1015_v29, %v7489_v9  ;;  %v1018_v58 = vadd.f32 %v6321_v53, %v7660_v55  ;;  %v1056_v29 = vrot.slane %v7669_v0, 2  ;;  %v1073_v53 = vrot.slane %v7676_v4, 2 }
 0x364   :  { %v7741_v41 = vadd.f32 %v1007_v52, %v7459_v25  ;;  %v1010_v57 = vadd.f32 %v7660_v55, %v1009_v44 }
 0x365   :  { %v1140_v25 = vrot.slane %v7738_v56, 6  ;;  %v7756_v6 = vadd.f32 %v1018_v58, %v7500_v38  ;;  %v1118_v51 = vsel %vm486_vm1, %v7689_v24, %v1056_v29 }
 0x366   :  { %v7746_v59 = vadd.f32 %v1010_v57, %v7492_v18  ;;  %v1136_v60 = vrot.slane %v7741_v41, 6  ;;  %v1120_v57 = vsel %vm1119_vm5, %v1118_v51, %v7689_v24  ;;  %v1077_v24 = vrot.slane %v7673_v3, 2 }
 0x367   :  { %v6610_v21 = vpack.i.bf16 %v7756_v6, %v7738_v56  ;;  %v1142_v14 = vrot.slane %v7756_v6, 6 }
 0x368   :  { %v6605_v2 = vpack.i.bf16 %v7746_v59, %v7741_v41  ;;  %v1137_v9 = vsel %vm486_vm1, %v1134_v54, %v1136_v60  ;;  %v1138_v5 = vrot.slane %v7746_v59, 6 }
 0x369   :  { %v6600_v12 = vpack.i.bf16 %v1137_v9, %v1135_v61  ;;  %v1143_v34 = vsel %vm486_vm1, %v1140_v25, %v1142_v14  ;;  %v1121_v61 = vsel %vm535_vm0, %v1120_v57, %v1056_v29  ;;  %v1087_v57 = vrot.slane %v7741_v41, 2 }
 0x36a   :  { %6606 = vrot.lane.b32.xlu0 %v6605_v2, %s7153_s19  ;;  %v1139_v18 = vsel %vm486_vm1, %v1136_v60, %v1138_v5  ;;  %v1141_v17 = vsel %vm486_vm1, %v1138_v5, %v1140_v25  ;;  %v1074_v60 = vsel %vm535_vm0, %v1056_v29, %v1073_v53 }
 0x36b   :  { %6601 = vrot.lane.b32.xlu1 %v6600_v12, %s7147_s30  ;;  %v6615_v11 = vpack.i.bf16 %v1141_v17, %v1139_v18 }
 0x36e   :  { %6616 = vrot.lane.b32.xlu0 %v6615_v11, %s7147_s30 }
 0x36f   :  { %6611 = vrot.lane.b32.xlu1 %v6610_v21, %s7153_s19  ;;  %v1075_v21 = vrot.slane %v7666_v62, 2 }
 0x37e   :  { %v6324_v7 = vpop.f32.mrb[12].mxu1 }
 0x37f   :  { %v1031_v38 = vadd.f32 %v6324_v7, %v7660_v55  ;;  %v1022_v8 = vpop.f32.mrb[13].mxu1 }
 0x380   :  { %v1023_v28 = vadd.f32 %v7660_v55, %v1022_v8  ;;  %v6325_v10 = vpop.f32.mrb[14].mxu1  ;;  %v1079_v8 = vrot.slane %v7709_v26, 2 }
 0x381   :  { %v1034_v36 = vadd.f32 %v6325_v10, %v7660_v55  ;;  %v1025_v13 = vpop.f32.mrb[15].mxu1  ;;  %v7771_v15 = vadd.f32 %v1031_v38, %v7533_v22  ;;  %v1081_v10 = vrot.slane %v7714_v31, 2 }
 0x382   :  { %v7774_v16 = vadd.f32 %v1023_v28, %v7508_v50  ;;  %v1026_v19 = vadd.f32 %v7660_v55, %v1025_v13  ;;  %v1078_v13 = vsel %vm535_vm0, %v1075_v21, %v1077_v24 }
 0x383   :  { %v7778_v20 = vadd.f32 %v1034_v36, %v7538_v33  ;;  %v1148_v37 = vrot.slane %v7771_v15, 6  ;;  %v1076_v36 = vsel %vm535_vm0, %v1073_v53, %v1075_v21  ;;  %v1083_v53 = vrot.slane %v7706_v23, 2 }
 0x384   :  { %v7781_v32 = vadd.f32 %v1026_v19, %v7521_v39  ;;  %v1144_v27 = vrot.slane %v7774_v16, 6 }
 0x385   :  { %v7786_v40 = vrot.slane %v7778_v20, 2  ;;  %v1150_v22 = vrot.slane %v7778_v20, 6  ;;  %v6630_v47 = vpack.i.bf16 %v7778_v20, %v7771_v15 }
 0x386   :  { %v6625_v50 = vpack.i.bf16 %v7781_v32, %v7774_v16  ;;  %v1145_v55 = vsel %vm486_vm1, %v1142_v14, %v1144_v27  ;;  %v1146_v33 = vrot.slane %v7781_v32, 6 }
 0x387   :  { %v6620_v39 = vpack.i.bf16 %v1145_v55, %v1143_v34  ;;  %v1154_v30 = vsel %vm486_vm1, %v1150_v22, %v7786_v40  ;;  %v1151_v48 = vsel %vm486_vm1, %v1148_v37, %v1150_v22 }
 0x388   :  { %6626 = vrot.lane.b32.xlu0 %v6625_v50, %s7153_s19  ;;  %v1147_v43 = vsel %vm486_vm1, %v1144_v27, %v1146_v33  ;;  %v1149_v35 = vsel %vm486_vm1, %v1146_v33, %v1148_v37  ;;  %v1155_v63 = vsel %vm1119_vm5, %v1154_v30, %v1150_v22  ;;  %v1080_v33 = vsel %vm535_vm0, %v1077_v24, %v1079_v8 }
 0x389   :  { %6621 = vrot.lane.b32.xlu1 %v6620_v39, %s7147_s30  ;;  %v6635_v46 = vpack.i.bf16 %v1149_v35, %v1147_v43  ;;  %v1156_v42 = vsel %vm535_vm0, %v1155_v63, %v7786_v40  ;;  %v1082_v43 = vsel %vm535_vm0, %v1079_v8, %v1081_v10 }
 0x38a   :  { %v6640_v49 = vpack.i.bf16 %v1156_v42, %v1151_v48 }
 0x38c   :  { %6636 = vrot.lane.b32.xlu0 %v6635_v46, %s7147_s30 }
 0x38d   :  { %6631 = vrot.lane.b32.xlu1 %v6630_v47, %s7153_s19 }
 0x391   :  { %6641 = vrot.lane.b32.xlu1 %v6640_v49, %s7147_s30 }
 0x396   :  { %v6567_v11 = vpop.permute.xlu1 %6566 }
 0x397   :  { %v6572_v52 = vpop.permute.xlu0 %6571  ;;  %v6569_v7 = vunpack.i.h.bf16 %v6567_v11  ;;  %v6568_v38 = vunpack.i.l.bf16 %v6567_v11 }
 0x398   :  { %v6574_v44 = vunpack.i.h.bf16 %v6572_v52  ;;  %v6573_v54 = vunpack.i.l.bf16 %v6572_v52  ;;  %v1085_v52 = vrot.slane %v7724_v45, 2 }
 0x399   :  { %v1256_v50 = vsel %vm666_vm2, %v1076_v36, %v6568_v38  ;;  %v1257_v55 = vsel %vm666_vm2, %v1078_v13, %v6569_v7 }
 0x39a   :  { %v1254_v5 = vsel %vm666_vm2, %v1121_v61, %v6573_v54  ;;  %v1255_v25 = vsel %vm666_vm2, %v1074_v60, %v6574_v44  ;;  %v1089_v60 = vrot.slane %v7746_v59, 2  ;;  %v1084_v61 = vsel %vm535_vm0, %v1081_v10, %v1083_v53 }
 0x39b   :  { %v6577_v58 = vpop.permute.xlu0 %6576  ;;  %v1088_v24 = vsel %vm535_vm0, %v1085_v52, %v1087_v57 }
 0x39c   :  { %v6579_v2 = vunpack.i.h.bf16 %v6577_v58  ;;  %v6578_v9 = vunpack.i.l.bf16 %v6577_v58  ;;  %v1090_v8 = vsel %vm535_vm0, %v1087_v57, %v1089_v60 }
 0x39e   :  { %v1271_v12 = vsel %vm683_vm3, %v1255_v25, %v6579_v2  ;;  %v1270_v18 = vsel %vm683_vm3, %v1254_v5, %v6578_v9  ;;  %v1086_v2 = vsel %vm535_vm0, %v1083_v53, %v1085_v52 }
 0x39f   :  { %v1286_v17 = vpack.c.bf16 %v1271_v12, %v1270_v18 }
 0x3a1   :  { %6332 = vmatprep.mubr.msk.bf16.mxu1 %vm739_vm4, %v1286_v17 }
 0x3b8   :  { %v6582_v28 = vpop.permute.xlu0 %6581 }
 0x3b9   :  { %v6587_v14 = vpop.permute.xlu1 %6586  ;;  %v6584_v19 = vunpack.i.h.bf16 %v6582_v28  ;;  %v6583_v27 = vunpack.i.l.bf16 %v6582_v28 }
 0x3ba   :  { %v6589_v34 = vunpack.i.h.bf16 %v6587_v14  ;;  %v6588_v22 = vunpack.i.l.bf16 %v6587_v14 }
 0x3bb   :  { %v1259_v47 = vsel %vm666_vm2, %v1082_v43, %v6584_v19  ;;  %v1258_v42 = vsel %vm666_vm2, %v1080_v33, %v6583_v27  ;;  %v1097_v43 = vrot.slane %v7781_v32, 2 }
 0x3bc   :  { %v1273_v37 = vsel %vm683_vm3, %v1257_v55, %v6589_v34  ;;  %v1272_v39 = vsel %vm683_vm3, %v1256_v50, %v6588_v22  ;;  %v6597_v30 = vpop.permute.xlu0 %6596  ;;  %v1093_v50 = vrot.slane %v7756_v6, 2  ;;  %v1091_v55 = vrot.slane %v7738_v56, 2 }
 0x3bd   :  { %v1287_v35 = vpack.c.bf16 %v1273_v37, %v1272_v39  ;;  %v6599_v46 = vunpack.i.h.bf16 %v6597_v30  ;;  %v6598_v63 = vunpack.i.l.bf16 %v6597_v30  ;;  %v6592_v51 = vpop.permute.xlu1 %6591  ;;  %v1095_v39 = vrot.slane %v7774_v16, 2 }
 0x3be   :  { %v6594_v44 = vunpack.i.h.bf16 %v6592_v51  ;;  %v6593_v54 = vunpack.i.l.bf16 %v6592_v51 }
 0x3bf   :  { %v1274_v48 = vsel %vm683_vm3, %v1258_v42, %v6598_v63  ;;  %v1275_v49 = vsel %vm683_vm3, %v1259_v47, %v6599_v46  ;;  %6333 = vmatmul.mubr.msk.bf16.vlgmr.msra.gmra.mrb[16].mxu1 %vm739_vm4, %v1287_v35  ;;  %v1092_v35 = vsel %vm535_vm0, %v1089_v60, %v1091_v55  ;;  %v1094_v46 = vsel %vm535_vm0, %v1091_v55, %v1093_v50 }
 0x3c0   :  { %v1288_v29 = vpack.c.bf16 %v1275_v49, %v1274_v48  ;;  %v1261_v17 = vsel %vm666_vm2, %v1086_v2, %v6594_v44  ;;  %v1260_v11 = vsel %vm666_vm2, %v1084_v61, %v6593_v54  ;;  %v1096_v52 = vsel %vm535_vm0, %v1093_v50, %v1095_v39 }
 0x3c1   :  { %v1098_v57 = vsel %vm535_vm0, %v1095_v39, %v1097_v43 }
 0x3c2   :  { %6336 = vmatprep.mubr.msk.bf16.mxu1 %vm739_vm4, %v1288_v29 }
 0x3dc   :  { %v6607_v58 = vpop.permute.xlu0 %6606 }
 0x3dd   :  { %v6602_v9 = vpop.permute.xlu1 %6601  ;;  %v6609_v5 = vunpack.i.h.bf16 %v6607_v58  ;;  %v6608_v25 = vunpack.i.l.bf16 %v6607_v58 }
 0x3de   :  { %v6604_v12 = vunpack.i.h.bf16 %v6602_v9  ;;  %v6603_v18 = vunpack.i.l.bf16 %v6602_v9 }
 0x3df   :  { %v1263_v13 = vsel %vm666_vm2, %v1090_v8, %v6609_v5  ;;  %v1262_v14 = vsel %vm666_vm2, %v1088_v24, %v6608_v25 }
 0x3e0   :  { %v1276_v21 = vsel %vm683_vm3, %v1260_v11, %v6603_v18  ;;  %v1277_v7 = vsel %vm683_vm3, %v1261_v17, %v6604_v12  ;;  %v6617_v38 = vpop.permute.xlu0 %6616  ;;  %v1099_v11 = vrot.slane %v7771_v15, 2 }
 0x3e1   :  { %v1289_v28 = vpack.c.bf16 %v1277_v7, %v1276_v21  ;;  %v6619_v10 = vunpack.i.h.bf16 %v6617_v38  ;;  %v6618_v36 = vunpack.i.l.bf16 %v6617_v38  ;;  %v6612_v22 = vpop.permute.xlu1 %6611 }
 0x3e2   :  { %v6614_v33 = vunpack.i.h.bf16 %v6612_v22  ;;  %v6613_v37 = vunpack.i.l.bf16 %v6612_v22  ;;  %v1100_v7 = vsel %vm535_vm0, %v1097_v43, %v1099_v11  ;;  %v1102_v38 = vsel %vm535_vm0, %v1099_v11, %v7786_v40  ;;  %v7888_v40 = vld [vmem:[%s9859_s4 + $0x1] ss:$0 sm:$0xff] }
 0x3e3   :  { %v1278_v19 = vsel %vm683_vm3, %v1262_v14, %v6618_v36  ;;  %v1279_v27 = vsel %vm683_vm3, %v1263_v13, %v6619_v10  ;;  %6337 = vmatmul.mubr.msk.bf16.gmra.mrb[20].mxu1 %vm739_vm4, %v1289_v28 }
 0x3e4   :  { %v1290_v34 = vpack.c.bf16 %v1279_v27, %v1278_v19  ;;  %v1265_v29 = vsel %vm666_vm2, %v1094_v46, %v6614_v33  ;;  %v1264_v51 = vsel %vm666_vm2, %v1092_v35, %v6613_v37  ;;  %v6732_v27 = vld [vmem:[#allocation4 + $0x8] sm:$0xff]  }
 0x3e5   :  { %6348 = vmatprep.subr.bf16.mxu0 %v6732_v27 }
 0x3e6   :  { %6340 = vmatprep.mubr.msk.bf16.mxu1 %vm739_vm4, %v1290_v34  ;;  %6349 = vmatpush3.bf16.msra.mxu0 %v6732_v27 }
 0x3fa   :  { %v6627_v30 = vpop.permute.xlu0 %6626 }
 0x3fb   :  { %v6622_v63 = vpop.permute.xlu1 %6621  ;;  %v6629_v47 = vunpack.i.h.bf16 %v6627_v30  ;;  %v6628_v42 = vunpack.i.l.bf16 %v6627_v30 }
 0x3fc   :  { %v6624_v48 = vunpack.i.h.bf16 %v6622_v63  ;;  %v6623_v49 = vunpack.i.l.bf16 %v6622_v63 }
 0x3fd   :  { %v1267_v9 = vsel %vm666_vm2, %v1098_v57, %v6629_v47  ;;  %v1266_v5 = vsel %vm666_vm2, %v1096_v52, %v6628_v42 }
 0x3fe   :  { %v1280_v53 = vsel %vm683_vm3, %v1264_v51, %v6623_v49  ;;  %v1281_v44 = vsel %vm683_vm3, %v1265_v29, %v6624_v48  ;;  %v6637_v54 = vpop.permute.xlu0 %6636 }
 0x3ff   :  { %v1291_v58 = vpack.c.bf16 %v1281_v44, %v1280_v53  ;;  %v6639_v60 = vunpack.i.h.bf16 %v6637_v54  ;;  %v6638_v61 = vunpack.i.l.bf16 %v6637_v54  ;;  %v6632_v2 = vpop.permute.xlu1 %6631 }
 0x400   :  { %v6634_v18 = vunpack.i.h.bf16 %v6632_v2  ;;  %v6633_v17 = vunpack.i.l.bf16 %v6632_v2 }
 0x401   :  { %v1282_v25 = vsel %vm683_vm3, %v1266_v5, %v6638_v61  ;;  %v1283_v12 = vsel %vm683_vm3, %v1267_v9, %v6639_v60  ;;  %6341 = vmatmul.mubr.msk.bf16.gmra.mrb[24].mxu1 %vm739_vm4, %v1291_v58 }
 0x402   :  { %v1292_v24 = vpack.c.bf16 %v1283_v12, %v1282_v25  ;;  %v1269_v10 = vsel %vm666_vm2, %v1102_v38, %v6634_v18  ;;  %v1268_v36 = vsel %vm666_vm2, %v1100_v7, %v6633_v17 }
 0x403   :  { %v6642_v21 = vpop.permute.xlu1 %6641 }
 0x404   :  { %v6644_v8 = vunpack.i.h.bf16 %v6642_v21  ;;  %v6643_v28 = vunpack.i.l.bf16 %v6642_v21  ;;  %6344 = vmatprep.mubr.msk.bf16.mxu1 %vm739_vm4, %v1292_v24 }
 0x406   :  { %v1284_v13 = vsel %vm683_vm3, %v1268_v36, %v6643_v28  ;;  %v1285_v14 = vsel %vm683_vm3, %v1269_v10, %v6644_v8 }
 0x407   :  { %v1293_v19 = vpack.c.bf16 %v1285_v14, %v1284_v13 }
 0x409   :  { %6345 = vmatmul.mubr.msk.bf16.gmra.mrb[28].mxu1 %vm739_vm4, %v1293_v19 }
 0x492   :  { %v6334_v34 = vpop.f32.mrb[16].mxu1 }
 0x493   :  { %v1394_v22 = vadd.f32 %v6334_v34, %v7888_v40  ;;  %v1385_v50 = vpop.f32.mrb[17].mxu1 }
 0x494   :  { %v1386_v55 = vadd.f32 %v7888_v40, %v1385_v50  ;;  %v6335_v33 = vpop.f32.mrb[18].mxu1 }
 0x495   :  { %v1450_v37 = vmul.f32 0.2, %v1394_v22  ;;  %v1397_v39 = vadd.f32 %v6335_v33, %v7888_v40  ;;  %v1388_v30 = vpop.f32.mrb[19].mxu1 }
 0x496   :  { %v1448_v43 = vmul.f32 0.2, %v1386_v55  ;;  %v1389_v35 = vadd.f32 %v7888_v40, %v1388_v30 }
 0x497   :  { %v1451_v46 = vmul.f32 0.2, %v1397_v39  ;;  %v1466_v47 = vmax.f32 %v1394_v22, %v1450_v37 }
 0x498   :  { %v1449_v63 = vmul.f32 0.2, %v1389_v35  ;;  %v1464_v48 = vmax.f32 %v1386_v55, %v1448_v43 }
 0x499   :  { %v1467_v42 = vmax.f32 %v1397_v39, %v1451_v46 }
 0x49a   :  { %v1465_v49 = vmax.f32 %v1389_v35, %v1449_v63 }
 0x49b   :  { %v1481_v29 = vpack.c.bf16 %v1467_v42, %v1466_v47 }
 0x49c   :  { %v1480_v51 = vpack.c.bf16 %v1465_v49, %v1464_v48 }
 0x49e   :  { %6350 = vmatprep.mubr.msk.bf16.mxu0 %vm666_vm2, %v1480_v51 }
 0x49f   :  { %6351 = vmatmul.mubr.msk.bf16.vlgmr.msra.gmra.mrb[16].mxu0 %vm666_vm2, %v1481_v29 }
 0x4b6   :  { %v6338_v52 = vpop.f32.mrb[20].mxu1 }
 0x4b7   :  { %v1410_v53 = vadd.f32 %v6338_v52, %v7888_v40  ;;  %v1401_v44 = vpop.f32.mrb[21].mxu1 }
 0x4b8   :  { %v1402_v54 = vadd.f32 %v7888_v40, %v1401_v44  ;;  %v6339_v57 = vpop.f32.mrb[22].mxu1 }
 0x4b9   :  { %v1454_v58 = vmul.f32 0.2, %v1410_v53  ;;  %v1413_v60 = vadd.f32 %v6339_v57, %v7888_v40  ;;  %v1404_v61 = vpop.f32.mrb[23].mxu1 }
 0x4ba   :  { %v1452_v2 = vmul.f32 0.2, %v1402_v54  ;;  %v1405_v9 = vadd.f32 %v7888_v40, %v1404_v61 }
 0x4bb   :  { %v1455_v5 = vmul.f32 0.2, %v1413_v60  ;;  %v1470_v12 = vmax.f32 %v1410_v53, %v1454_v58 }
 0x4bc   :  { %v1453_v25 = vmul.f32 0.2, %v1405_v9  ;;  %v1468_v17 = vmax.f32 %v1402_v54, %v1452_v2  ;;  %v6733_v2 = vld [vmem:[%s9858_s3 + $0x30] sm:$0xff]  }
 0x4bd   :  { %v1471_v18 = vmax.f32 %v1413_v60, %v1455_v5  ;;  %6366 = vmatprep.subr.bf16.mxu1 %v6733_v2 }
 0x4be   :  { %v1469_v11 = vmax.f32 %v1405_v9, %v1453_v25  ;;  %v6734_v9 = vld [vmem:[%s9858_s3 + $0x38] sm:$0xff]   ;;  %6367 = vmatpush3.bf16.msra.mxu1 %v6733_v2 }
 0x4bf   :  { %v1483_v24 = vpack.c.bf16 %v1471_v18, %v1470_v12  ;;  %6368 = vmatprep.subr.bf16.mxu1 %v6734_v9 }
 0x4c0   :  { %v1482_v21 = vpack.c.bf16 %v1469_v11, %v1468_v17 }
 0x4c2   :  { %6354 = vmatprep.mubr.msk.bf16.mxu0 %vm666_vm2, %v1482_v21  ;;  %6369 = vmatpush3.bf16.msra.mxu1 %v6734_v9 }
 0x4c3   :  { %6355 = vmatmul.mubr.msk.bf16.gmra.mrb[20].mxu0 %vm666_vm2, %v1483_v24 }
 0x4d4   :  { %v6342_v7 = vpop.f32.mrb[24].mxu1 }
 0x4d5   :  { %v1426_v38 = vadd.f32 %v6342_v7, %v7888_v40  ;;  %v1417_v8 = vpop.f32.mrb[25].mxu1 }
 0x4d6   :  { %v1418_v28 = vadd.f32 %v7888_v40, %v1417_v8  ;;  %v6343_v10 = vpop.f32.mrb[26].mxu1 }
 0x4d7   :  { %v1458_v36 = vmul.f32 0.2, %v1426_v38  ;;  %v1429_v13 = vadd.f32 %v6343_v10, %v7888_v40  ;;  %v1420_v14 = vpop.f32.mrb[27].mxu1 }
 0x4d8   :  { %v1456_v19 = vmul.f32 0.2, %v1418_v28  ;;  %v1421_v27 = vadd.f32 %v7888_v40, %v1420_v14 }
 0x4d9   :  { %v1459_v34 = vmul.f32 0.2, %v1429_v13  ;;  %v1474_v50 = vmax.f32 %v1426_v38, %v1458_v36 }
 0x4da   :  { %v1457_v22 = vmul.f32 0.2, %v1421_v27  ;;  %v1472_v33 = vmax.f32 %v1418_v28, %v1456_v19 }
 0x4db   :  { %v1475_v55 = vmax.f32 %v1429_v13, %v1459_v34 }
 0x4dc   :  { %v1473_v37 = vmax.f32 %v1421_v27, %v1457_v22  ;;  %v6346_v39 = vpop.f32.mrb[28].mxu1 }
 0x4dd   :  { %v1485_v30 = vpack.c.bf16 %v1475_v55, %v1474_v50  ;;  %v1442_v43 = vadd.f32 %v6346_v39, %v7888_v40  ;;  %v1433_v35 = vpop.f32.mrb[29].mxu1 }
 0x4de   :  { %v1484_v46 = vpack.c.bf16 %v1473_v37, %v1472_v33  ;;  %v1434_v63 = vadd.f32 %v7888_v40, %v1433_v35  ;;  %v6347_v47 = vpop.f32.mrb[30].mxu1 }
 0x4df   :  { %v1462_v42 = vmul.f32 0.2, %v1442_v43  ;;  %v1445_v48 = vadd.f32 %v6347_v47, %v7888_v40  ;;  %v1436_v49 = vpop.f32.mrb[31].mxu1 }
 0x4e0   :  { %v1460_v29 = vmul.f32 0.2, %v1434_v63  ;;  %v1437_v51 = vadd.f32 %v7888_v40, %v1436_v49  ;;  %6358 = vmatprep.mubr.msk.bf16.mxu0 %vm666_vm2, %v1484_v46  ;;  %v7917_v40 = vld [vmem:[%s9861_s6 + $0x1] ss:$0 sm:$0xff] }
 0x4e1   :  { %v1463_v52 = vmul.f32 0.2, %v1445_v48  ;;  %6359 = vmatmul.mubr.msk.bf16.gmra.mrb[24].mxu0 %vm666_vm2, %v1485_v30  ;;  %v1478_v44 = vmax.f32 %v1442_v43, %v1462_v42 }
 0x4e2   :  { %v1461_v53 = vmul.f32 0.2, %v1437_v51  ;;  %v1476_v57 = vmax.f32 %v1434_v63, %v1460_v29 }
 0x4e3   :  { %v1479_v54 = vmax.f32 %v1445_v48, %v1463_v52 }
 0x4e4   :  { %v1477_v58 = vmax.f32 %v1437_v51, %v1461_v53 }
 0x4e5   :  { %v1487_v60 = vpack.c.bf16 %v1479_v54, %v1478_v44 }
 0x4e6   :  { %v1486_v61 = vpack.c.bf16 %v1477_v58, %v1476_v57 }
 0x4e8   :  { %6362 = vmatprep.mubr.msk.bf16.mxu0 %vm666_vm2, %v1486_v61 }
 0x4e9   :  { %6363 = vmatmul.mubr.msk.bf16.gmra.mrb[28].mxu0 %vm666_vm2, %v1487_v60 }
 0x572   :  { %v6352_v5 = vpop.f32.mrb[16].mxu0 }
 0x573   :  { %v1572_v25 = vadd.f32 %v6352_v5, %v7917_v40  ;;  %v1563_v12 = vpop.f32.mrb[17].mxu0 }
 0x574   :  { %v1564_v18 = vadd.f32 %v7917_v40, %v1563_v12  ;;  %v6353_v17 = vpop.f32.mrb[18].mxu0 }
 0x575   :  { %v1575_v11 = vadd.f32 %v6353_v17, %v7917_v40  ;;  %v1566_v24 = vpop.f32.mrb[19].mxu0  ;;  %v7930_v7 = vadd.f32 %v1572_v25, %v7666_v62 }
 0x576   :  { %v1567_v21 = vadd.f32 %v7917_v40, %v1566_v24  ;;  %v7936_v8 = vadd.f32 %v1564_v18, %v7669_v0 }
 0x577   :  { %v7933_v38 = vadd.f32 %v1575_v11, %v7673_v3  ;;  %v1643_v33 = vrot.slane %v7930_v7, 2 }
 0x578   :  { %v7939_v28 = vadd.f32 %v1567_v21, %v7676_v4  ;;  %v6735_v4 = vld [vmem:[%s9858_s3 + $0x40] sm:$0xff]  }
 0x579   :  { %v6645_v10 = vpack.i.bf16 %v7933_v38, %v7930_v7  ;;  %v1714_v50 = vrot.slane %v7933_v38, 2  ;;  %6370 = vmatprep.subr.bf16.mxu1 %v6735_v4 }
 0x57a   :  { %v6650_v36 = vpack.i.bf16 %v7939_v28, %v7936_v8  ;;  %6371 = vmatpush3.bf16.msra.mxu1 %v6735_v4 }
 0x57b   :  { %6646 = vrot.lane.b32.xlu1 %v6645_v10, %s7153_s19 }
 0x57c   :  { %6651 = vrot.lane.b32.xlu0 %v6650_v36, %s7153_s19 }
 0x596   :  { %v6356_v62 = vpop.f32.mrb[20].mxu0 }
 0x597   :  { %v1588_v3 = vadd.f32 %v6356_v62, %v7917_v40  ;;  %v1579_v13 = vpop.f32.mrb[21].mxu0 }
 0x598   :  { %v1580_v0 = vadd.f32 %v7917_v40, %v1579_v13  ;;  %v6357_v14 = vpop.f32.mrb[22].mxu0 }
 0x599   :  { %v1582_v19 = vpop.f32.mrb[23].mxu0  ;;  %v7953_v27 = vadd.f32 %v1588_v3, %v7706_v23  ;;  %v1591_v39 = vadd.f32 %v6357_v14, %v7917_v40  ;;  %v1715_v23 = vsel %vm535_vm0, %v1643_v33, %v1714_v50 }
 0x59a   :  { %v7956_v34 = vadd.f32 %v1580_v0, %v7709_v26  ;;  %v1583_v22 = vadd.f32 %v7917_v40, %v1582_v19 }
 0x59b   :  { %v1720_v43 = vrot.slane %v7953_v27, 2  ;;  %v7975_v63 = vadd.f32 %v1591_v39, %v7724_v45 }
 0x59c   :  { %v7961_v55 = vadd.f32 %v1583_v22, %v7714_v31  ;;  %v1716_v37 = vrot.slane %v7956_v34, 2 }
 0x59d   :  { %v6670_v48 = vpack.i.bf16 %v7975_v63, %v7953_v27  ;;  %v1722_v60 = vrot.slane %v7975_v63, 2 }
 0x59e   :  { %v1717_v26 = vsel %vm535_vm0, %v1714_v50, %v1716_v37  ;;  %v1718_v30 = vrot.slane %v7961_v55, 2  ;;  %v6665_v42 = vpack.i.bf16 %v7961_v55, %v7956_v34 }
 0x59f   :  { %v6655_v35 = vpack.i.bf16 %v1717_v26, %v1715_v23  ;;  %v1723_v25 = vsel %vm535_vm0, %v1720_v43, %v1722_v60 }
 0x5a0   :  { %v1719_v31 = vsel %vm535_vm0, %v1716_v37, %v1718_v30  ;;  %v1721_v46 = vsel %vm535_vm0, %v1718_v30, %v1720_v43 }
 0x5a1   :  { %6656 = vrot.lane.b32.xlu0 %v6655_v35, %s7147_s30  ;;  %v6660_v47 = vpack.i.bf16 %v1721_v46, %v1719_v31 }
 0x5a3   :  { %6661 = vrot.lane.b32.xlu1 %v6660_v47, %s7147_s30 }
 0x5a5   :  { %6666 = vrot.lane.b32.xlu0 %v6665_v42, %s7153_s19 }
 0x5a7   :  { %6671 = vrot.lane.b32.xlu1 %v6670_v48, %s7153_s19 }
 0x5b4   :  { %v6360_v49 = vpop.f32.mrb[24].mxu0 }
 0x5b5   :  { %v1604_v29 = vadd.f32 %v6360_v49, %v7917_v40  ;;  %v1595_v45 = vpop.f32.mrb[25].mxu0 }
 0x5b6   :  { %v1596_v51 = vadd.f32 %v7917_v40, %v1595_v45  ;;  %v6361_v52 = vpop.f32.mrb[26].mxu0 }
 0x5b7   :  { %v1607_v53 = vadd.f32 %v6361_v52, %v7917_v40  ;;  %v1598_v44 = vpop.f32.mrb[27].mxu0  ;;  %v7989_v54 = vadd.f32 %v1604_v29, %v7738_v56  ;;  %v6736_v29 = vld [vmem:[#allocation4 + $0x10] sm:$0xff]  }
 0x5b8   :  { %v7992_v57 = vadd.f32 %v1596_v51, %v7741_v41  ;;  %v1599_v58 = vadd.f32 %v7917_v40, %v1598_v44  ;;  %6388 = vmatprep.subr.bf16.mxu0 %v6736_v29 }
 0x5b9   :  { %v8001_v9 = vadd.f32 %v1607_v53, %v7756_v6  ;;  %v1728_v12 = vrot.slane %v7989_v54, 2  ;;  %6389 = vmatpush3.bf16.msra.mxu0 %v6736_v29  ;;  %v1672_v29 = vrot.slane %v7956_v34, 6 }
 0x5ba   :  { %v7997_v61 = vadd.f32 %v1599_v58, %v7746_v59  ;;  %v1724_v2 = vrot.slane %v7992_v57, 2 }
 0x5bb   :  { %v1730_v3 = vrot.slane %v8001_v9, 2 }
 0x5bc   :  { %v6364_v5 = vpop.f32.mrb[28].mxu0  ;;  %v1725_v56 = vsel %vm535_vm0, %v1722_v60, %v1724_v2  ;;  %v1726_v41 = vrot.slane %v7997_v61, 2  ;;  %v6685_v19 = vpack.i.bf16 %v7997_v61, %v7992_v57 }
 0x5bd   :  { %v1620_v18 = vadd.f32 %v6364_v5, %v7917_v40  ;;  %v1611_v17 = vpop.f32.mrb[29].mxu0  ;;  %v6675_v11 = vpack.i.bf16 %v1725_v56, %v1723_v25  ;;  %v1650_v5 = vrot.slane %v7939_v28, 6  ;;  %v1645_v25 = vrot.slane %v7930_v7, 6 }
 0x5be   :  { %v1612_v59 = vadd.f32 %v7917_v40, %v1611_v17  ;;  %v6365_v24 = vpop.f32.mrb[30].mxu0  ;;  %v1727_v21 = vsel %vm535_vm0, %v1724_v2, %v1726_v41  ;;  %v1729_v6 = vsel %vm535_vm0, %v1726_v41, %v1728_v12  ;;  %v1648_v2 = vrot.slane %v7939_v28, 2 }
 0x5bf   :  { %v1623_v10 = vadd.f32 %v6365_v24, %v7917_v40  ;;  %v1614_v36 = vpop.f32.mrb[31].mxu0  ;;  %6676 = vrot.lane.b32.xlu0 %v6675_v11, %s7147_s30  ;;  %v6680_v62 = vpack.i.bf16 %v1729_v6, %v1727_v21  ;;  %v8015_v13 = vadd.f32 %v1620_v18, %v7771_v15  ;;  %v6690_v15 = vpack.i.bf16 %v8001_v9, %v7989_v54 }
 0x5c0   :  { %v8018_v0 = vadd.f32 %v1612_v59, %v7774_v16  ;;  %v1615_v14 = vadd.f32 %v7917_v40, %v1614_v36  ;;  %v1731_v16 = vsel %vm535_vm0, %v1728_v12, %v1730_v3  ;;  %v1708_v56 = vsel %vm486_vm1, %v1648_v2, %v1650_v5 }
 0x5c1   :  { %v8022_v4 = vadd.f32 %v1623_v10, %v7778_v20  ;;  %6681 = vrot.lane.b32.xlu1 %v6680_v62, %s7147_s30  ;;  %v1736_v37 = vrot.slane %v8015_v13, 2  ;;  %v1744_v23 = vrot.slane %v8015_v13, 6  ;;  %v1653_v12 = vrot.slane %v7936_v8, 2 }
 0x5c2   :  { %v8028_v22 = vadd.f32 %v1615_v14, %v7781_v32  ;;  %v1732_v50 = vrot.slane %v8018_v0, 2  ;;  %v1655_v18 = vrot.slane %v7936_v8, 6  ;;  %v1705_v17 = vsel %vm486_vm1, %v1643_v33, %v1645_v25 }
 0x5c3   :  { %6686 = vrot.lane.b32.xlu0 %v6685_v19, %s7153_s19  ;;  %v1738_v20 = vrot.slane %v8022_v4, 2  ;;  %v1741_v40 = vrot.slane %v8022_v4, 6  ;;  %v1752_v47 = vsel %vm486_vm1, %v1736_v37, %v1744_v23  ;;  %v6710_v52 = vpack.i.bf16 %v8022_v4, %v8015_v13 }
 0x5c4   :  { %v1733_v39 = vsel %vm535_vm0, %v1730_v3, %v1732_v50  ;;  %v1734_v32 = vrot.slane %v8028_v22, 2  ;;  %v1690_v46 = vrot.slane %v8028_v22, 6  ;;  %v6705_v42 = vpack.i.bf16 %v8028_v22, %v8018_v0 }
 0x5c5   :  { %6691 = vrot.lane.b32.xlu1 %v6690_v15, %s7153_s19  ;;  %v6695_v26 = vpack.i.bf16 %v1733_v39, %v1731_v16  ;;  %v1749_v35 = vsel %vm486_vm1, %v1738_v20, %v1741_v40  ;;  %v1739_v45 = vsel %vm535_vm0, %v1736_v37, %v1738_v20  ;;  %v1748_v51 = vsel %vm535_vm0, %v1738_v20, %v1741_v40 }
 0x5c6   :  { %v1735_v30 = vsel %vm535_vm0, %v1732_v50, %v1734_v32  ;;  %v1737_v43 = vsel %vm535_vm0, %v1734_v32, %v1736_v37  ;;  %v1750_v48 = vsel %vm1119_vm5, %v1749_v35, %v1736_v37  ;;  %v1753_v49 = vsel %vm1119_vm5, %v1752_v47, %v1734_v32 }
 0x5c7   :  { %6696 = vrot.lane.b32.xlu0 %v6695_v26, %s7147_s30  ;;  %v6700_v31 = vpack.i.bf16 %v1737_v43, %v1735_v30  ;;  %v1751_v53 = vsel %vm535_vm0, %v1750_v48, %v1744_v23  ;;  %v1754_v44 = vsel %vm535_vm0, %v1753_v49, %v1690_v46  ;;  %v6715_v58 = vpack.i.bf16 %v1748_v51, %v1739_v45 }
 0x5c8   :  { %v6720_v60 = vpack.i.bf16 %v1754_v44, %v1751_v53  ;;  %v1706_v59 = vsel %vm1119_vm5, %v1705_v17, %v1648_v2  ;;  %v1709_v6 = vsel %vm1119_vm5, %v1708_v56, %v1653_v12  ;;  %v1668_v15 = vsel %vm486_vm1, %v1655_v18, %v1650_v5 }
 0x5c9   :  { %6701 = vrot.lane.b32.xlu1 %v6700_v31, %s7147_s30  ;;  %v1707_v3 = vsel %vm535_vm0, %v1706_v59, %v1650_v5  ;;  %v1710_v14 = vsel %vm535_vm0, %v1709_v6, %v1655_v18  ;;  %v1711_v33 = vsel %vm486_vm1, %v1653_v12, %v1655_v18  ;;  %v1670_v48 = vrot.slane %v7933_v38, 6 }
 0x5ca   :  { %v1674_v45 = vrot.slane %v7961_v55, 6 }
 0x5cb   :  { %6706 = vrot.lane.b32.xlu0 %v6705_v42, %s7153_s19  ;;  %v1671_v2 = vsel %vm486_vm1, %v1645_v25, %v1670_v48  ;;  %v1673_v17 = vsel %vm486_vm1, %v1670_v48, %v1672_v29 }
 0x5cd   :  { %6711 = vrot.lane.b32.xlu1 %v6710_v52, %s7153_s19 }
 0x5cf   :  { %6716 = vrot.lane.b32.xlu0 %v6715_v58, %s7147_s30 }
 0x5d1   :  { %6721 = vrot.lane.b32.xlu1 %v6720_v60, %s7147_s30  ;;  %v1669_v60 = vsel %vm486_vm1, %v1650_v5, %v1645_v25 }
 0x5ed   :  { %v6647_v11 = vpop.permute.xlu1 %6646 }
 0x5ee   :  { %v6652_v41 = vpop.permute.xlu0 %6651  ;;  %v6649_v10 = vunpack.i.h.bf16 %v6647_v11  ;;  %v6648_v36 = vunpack.i.l.bf16 %v6647_v11  ;;  %v1675_v11 = vsel %vm486_vm1, %v1672_v29, %v1674_v45 }
 0x5ef   :  { %v6654_v24 = vunpack.i.h.bf16 %v6652_v41  ;;  %v6653_v21 = vunpack.i.l.bf16 %v6652_v41 }
 0x5f0   :  { %v1856_v26 = vsel %vm666_vm2, %v1711_v33, %v6648_v36  ;;  %v1857_v30 = vsel %vm666_vm2, %v1668_v15, %v6649_v10  ;;  %v1682_v15 = vrot.slane %v7997_v61, 6 }
 0x5f1   :  { %v1854_v16 = vsel %vm666_vm2, %v1707_v3, %v6653_v21  ;;  %v1855_v20 = vsel %vm666_vm2, %v1710_v14, %v6654_v24  ;;  %v1678_v3 = vrot.slane %v7975_v63, 6  ;;  %v1680_v14 = vrot.slane %v7992_v57, 6 }
 0x5f3   :  { %v1683_v48 = vsel %vm486_vm1, %v1680_v14, %v1682_v15 }
 0x613   :  { %v6657_v62 = vpop.permute.xlu0 %6656 }
 0x614   :  { %v6659_v19 = vunpack.i.h.bf16 %v6657_v62  ;;  %v6658_v50 = vunpack.i.l.bf16 %v6657_v62 }
 0x615   :  { %v6662_v40 = vpop.permute.xlu1 %6661 }
 0x616   :  { %v1870_v37 = vsel %vm683_vm3, %v1854_v16, %v6658_v50  ;;  %v1871_v39 = vsel %vm683_vm3, %v1855_v20, %v6659_v19  ;;  %v6664_v32 = vunpack.i.h.bf16 %v6662_v40  ;;  %v6663_v23 = vunpack.i.l.bf16 %v6662_v40 }
 0x617   :  { %v1886_v43 = vpack.c.bf16 %v1871_v39, %v1870_v37  ;;  %v6667_v42 = vpop.permute.xlu0 %6666  ;;  %v1676_v37 = vrot.slane %v7953_v27, 6 }
 0x618   :  { %v1872_v35 = vsel %vm683_vm3, %v1856_v26, %v6663_v23  ;;  %v1873_v31 = vsel %vm683_vm3, %v1857_v30, %v6664_v32  ;;  %v6669_v51 = vunpack.i.h.bf16 %v6667_v42  ;;  %v6668_v52 = vunpack.i.l.bf16 %v6667_v42 }
 0x619   :  { %v1887_v47 = vpack.c.bf16 %v1873_v31, %v1872_v35  ;;  %6372 = vmatprep.mubr.msk.bf16.mxu1 %vm739_vm4, %v1886_v43  ;;  %v6672_v49 = vpop.permute.xlu1 %6671  ;;  %v1677_v26 = vsel %vm486_vm1, %v1674_v45, %v1676_v37  ;;  %v1679_v30 = vsel %vm486_vm1, %v1676_v37, %v1678_v3  ;;  %v1681_v42 = vsel %vm486_vm1, %v1678_v3, %v1680_v14 }
 0x61a   :  { %v6674_v53 = vunpack.i.h.bf16 %v6672_v49  ;;  %v6673_v44 = vunpack.i.l.bf16 %v6672_v49  ;;  %v1859_v12 = vsel %vm666_vm2, %v1671_v2, %v6669_v51  ;;  %v1858_v18 = vsel %vm666_vm2, %v1669_v60, %v6668_v52 }
 0x61b   :  { %6373 = vmatmul.mubr.msk.bf16.vlgmr.msra.gmra.mrb[32].mxu1 %vm739_vm4, %v1887_v47  ;;  %v1686_v2 = vrot.slane %v8001_v9, 6 }
 0x61c   :  { %v1860_v5 = vsel %vm666_vm2, %v1673_v17, %v6673_v44  ;;  %v1861_v25 = vsel %vm666_vm2, %v1675_v11, %v6674_v53 }
 0x631   :  { %v6677_v58 = vpop.permute.xlu0 %6676 }
 0x632   :  { %v6679_v56 = vunpack.i.h.bf16 %v6677_v58  ;;  %v6678_v41 = vunpack.i.l.bf16 %v6677_v58 }
 0x633   :  { %v6682_v59 = vpop.permute.xlu1 %6681 }
 0x634   :  { %v1874_v24 = vsel %vm683_vm3, %v1858_v18, %v6678_v41  ;;  %v1875_v21 = vsel %vm683_vm3, %v1859_v12, %v6679_v56  ;;  %v6684_v6 = vunpack.i.h.bf16 %v6682_v59  ;;  %v6683_v10 = vunpack.i.l.bf16 %v6682_v59 }
 0x635   :  { %v1888_v36 = vpack.c.bf16 %v1875_v21, %v1874_v24  ;;  %v6687_v62 = vpop.permute.xlu0 %6686  ;;  %v1688_v12 = vrot.slane %v8018_v0, 6  ;;  %v1684_v24 = vrot.slane %v7989_v54, 6 }
 0x636   :  { %v1876_v19 = vsel %vm683_vm3, %v1860_v5, %v6683_v10  ;;  %v1877_v50 = vsel %vm683_vm3, %v1861_v25, %v6684_v6  ;;  %v6689_v16 = vunpack.i.h.bf16 %v6687_v62  ;;  %v6688_v20 = vunpack.i.l.bf16 %v6687_v62 }
 0x637   :  { %v1889_v33 = vpack.c.bf16 %v1877_v50, %v1876_v19  ;;  %v6692_v40 = vpop.permute.xlu1 %6691  ;;  %6376 = vmatprep.mubr.msk.bf16.mxu1 %vm739_vm4, %v1888_v36  ;;  %v1685_v5 = vsel %vm486_vm1, %v1682_v15, %v1684_v24  ;;  %v1687_v25 = vsel %vm486_vm1, %v1684_v24, %v1686_v2  ;;  %v1689_v19 = vsel %vm486_vm1, %v1686_v2, %v1688_v12 }
 0x638   :  { %v6694_v39 = vunpack.i.h.bf16 %v6692_v40  ;;  %v6693_v32 = vunpack.i.l.bf16 %v6692_v40  ;;  %v1863_v31 = vsel %vm666_vm2, %v1679_v30, %v6689_v16  ;;  %v1862_v47 = vsel %vm666_vm2, %v1677_v26, %v6688_v20 }
 0x639   :  { %v6697_v23 = vpop.permute.xlu0 %6696  ;;  %6377 = vmatmul.mubr.msk.bf16.gmra.mrb[36].mxu1 %vm739_vm4, %v1889_v33  ;;  %v1691_v50 = vsel %vm486_vm1, %v1688_v12, %v1690_v46  ;;  %v6737_v46 = vld [vmem:[%s9862_s7] ss:$16 sps:$4 sm:$0xff]  }
 0x63a   :  { %v6699_v43 = vunpack.i.h.bf16 %v6697_v23  ;;  %v6698_v35 = vunpack.i.l.bf16 %v6697_v23  ;;  %v1865_v45 = vsel %vm666_vm2, %v1683_v48, %v6694_v39  ;;  %v1864_v44 = vsel %vm666_vm2, %v1681_v42, %v6693_v32 }
 0x63b   :  { %v6702_v49 = vpop.permute.xlu1 %6701 }
 0x63c   :  { %v1878_v29 = vsel %vm683_vm3, %v1862_v47, %v6698_v35  ;;  %v1879_v51 = vsel %vm683_vm3, %v1863_v31, %v6699_v43  ;;  %v6704_v52 = vunpack.i.h.bf16 %v6702_v49  ;;  %v6703_v53 = vunpack.i.l.bf16 %v6702_v49  ;;  %v6739_v43 = vld [vmem:[%s9862_s7 + $0x4] ss:$16 sps:$4 sm:$0xff]   ;;  %v6742_v35 = vld [vmem:[%s9862_s7 + $0xc] ss:$16 sps:$4 sm:$0xff]   ;;  %v8157_v31 = vld [vmem:[%s9859_s4 + $0x2] ss:$0 sm:$0xff] }
 0x63d   :  { %v1890_v58 = vpack.c.bf16 %v1879_v51, %v1878_v29  ;;  %v6707_v60 = vpop.permute.xlu0 %6706  ;;  %2320 = vmatprep.subr.bf16.mxu1 %v6739_v43  ;;  %2433 = vmatprep.subr.bf16.mxu0 %v6742_v35 }
 0x63e   :  { %v1880_v56 = vsel %vm683_vm3, %v1864_v44, %v6703_v53  ;;  %v1881_v41 = vsel %vm683_vm3, %v1865_v45, %v6704_v52  ;;  %v6709_v17 = vunpack.i.h.bf16 %v6707_v60  ;;  %v6708_v11 = vunpack.i.l.bf16 %v6707_v60  ;;  %2321 = vmatpush1.bf16.msra.mxu1 %v6737_v46 }
 0x63f   :  { %v1891_v18 = vpack.c.bf16 %v1881_v41, %v1880_v56  ;;  %v6712_v59 = vpop.permute.xlu1 %6711  ;;  %6380 = vmatprep.mubr.msk.bf16.mxu1 %vm739_vm4, %v1890_v58 }
 0x640   :  { %v6714_v21 = vunpack.i.h.bf16 %v6712_v59  ;;  %v6713_v6 = vunpack.i.l.bf16 %v6712_v59  ;;  %v1867_v3 = vsel %vm666_vm2, %v1687_v25, %v6709_v17  ;;  %v1866_v14 = vsel %vm666_vm2, %v1685_v5, %v6708_v11  ;;  %v6740_v11 = vld [vmem:[%s9862_s7 + $0x8] ss:$16 sps:$4 sm:$0xff]  }
 0x641   :  { %v6717_v10 = vpop.permute.xlu0 %6716  ;;  %6381 = vmatmul.mubr.msk.bf16.gmra.mrb[40].mxu1 %vm739_vm4, %v1891_v18 }
 0x642   :  { %v6719_v36 = vunpack.i.h.bf16 %v6717_v10  ;;  %v6718_v62 = vunpack.i.l.bf16 %v6717_v10  ;;  %v1869_v37 = vsel %vm666_vm2, %v1691_v50, %v6714_v21  ;;  %v1868_v39 = vsel %vm666_vm2, %v1689_v19, %v6713_v6 }
 0x643   :  { %v6722_v33 = vpop.permute.xlu1 %6721 }
 0x644   :  { %v1882_v16 = vsel %vm683_vm3, %v1866_v14, %v6718_v62  ;;  %v1883_v20 = vsel %vm683_vm3, %v1867_v3, %v6719_v36  ;;  %v6724_v15 = vunpack.i.h.bf16 %v6722_v33  ;;  %v6723_v40 = vunpack.i.l.bf16 %v6722_v33 }
 0x645   :  { %v1892_v32 = vpack.c.bf16 %v1883_v20, %v1882_v16 }
 0x646   :  { %v1884_v23 = vsel %vm683_vm3, %v1868_v39, %v6723_v40  ;;  %v1885_v26 = vsel %vm683_vm3, %v1869_v37, %v6724_v15 }
 0x647   :  { %v1893_v30 = vpack.c.bf16 %v1885_v26, %v1884_v23  ;;  %6384 = vmatprep.mubr.msk.bf16.mxu1 %vm739_vm4, %v1892_v32 }
 0x649   :  { %6385 = vmatmul.mubr.msk.bf16.gmra.mrb[44].mxu1 %vm739_vm4, %v1893_v30 }
 0x64a   :  { %2352 = vmatprep.mubr.bf16.mxu1 %v7154_v1 }
 0x6ee   :  { %v6374_v47 = vpop.f32.mrb[32].mxu1 }
 0x6ef   :  { %v1994_v42 = vadd.f32 %v6374_v47, %v8157_v31  ;;  %v1985_v48 = vpop.f32.mrb[33].mxu1 }
 0x6f0   :  { %v1986_v49 = vadd.f32 %v8157_v31, %v1985_v48  ;;  %v6375_v29 = vpop.f32.mrb[34].mxu1 }
 0x6f1   :  { %v2050_v51 = vmul.f32 0.2, %v1994_v42  ;;  %v1997_v52 = vadd.f32 %v6375_v29, %v8157_v31  ;;  %v1988_v53 = vpop.f32.mrb[35].mxu1 }
 0x6f2   :  { %v2048_v45 = vmul.f32 0.2, %v1986_v49  ;;  %v1989_v44 = vadd.f32 %v8157_v31, %v1988_v53 }
 0x6f3   :  { %v2051_v58 = vmul.f32 0.2, %v1997_v52  ;;  %v2066_v2 = vmax.f32 %v1994_v42, %v2050_v51 }
 0x6f4   :  { %v2049_v60 = vmul.f32 0.2, %v1989_v44  ;;  %v2064_v41 = vmax.f32 %v1986_v49, %v2048_v45 }
 0x6f5   :  { %v2067_v56 = vmax.f32 %v1997_v52, %v2051_v58 }
 0x6f6   :  { %v2065_v12 = vmax.f32 %v1989_v44, %v2049_v60 }
 0x6f7   :  { %v2081_v18 = vpack.c.bf16 %v2067_v56, %v2066_v2 }
 0x6f8   :  { %v2080_v17 = vpack.c.bf16 %v2065_v12, %v2064_v41 }
 0x6fa   :  { %6390 = vmatprep.mubr.msk.bf16.mxu0 %vm666_vm2, %v2080_v17 }
 0x6fb   :  { %6391 = vmatmul.mubr.msk.bf16.vlgmr.msra.gmra.mrb[32].mxu0 %vm666_vm2, %v2081_v18 }
 0x6fc   :  { %2434 = vmatpush1.bf16.msra.mxu0 %v6740_v11 }
 0x70c   :  { %v6378_v59 = vpop.f32.mrb[36].mxu1 }
 0x70d   :  { %v2010_v24 = vadd.f32 %v6378_v59, %v8157_v31  ;;  %v2001_v21 = vpop.f32.mrb[37].mxu1 }
 0x70e   :  { %v2002_v6 = vadd.f32 %v8157_v31, %v2001_v21  ;;  %v6379_v10 = vpop.f32.mrb[38].mxu1 }
 0x70f   :  { %v2054_v5 = vmul.f32 0.2, %v2010_v24  ;;  %v2013_v25 = vadd.f32 %v6379_v10, %v8157_v31  ;;  %v2004_v36 = vpop.f32.mrb[39].mxu1 }
 0x710   :  { %v2052_v62 = vmul.f32 0.2, %v2002_v6  ;;  %v2005_v3 = vadd.f32 %v8157_v31, %v2004_v36 }
 0x711   :  { %v2055_v14 = vmul.f32 0.2, %v2013_v25  ;;  %v2070_v50 = vmax.f32 %v2010_v24, %v2054_v5 }
 0x712   :  { %v2053_v19 = vmul.f32 0.2, %v2005_v3  ;;  %v2068_v16 = vmax.f32 %v2002_v6, %v2052_v62 }
 0x713   :  { %v2071_v33 = vmax.f32 %v2013_v25, %v2055_v14 }
 0x714   :  { %v2069_v20 = vmax.f32 %v2005_v3, %v2053_v19  ;;  %v6382_v15 = vpop.f32.mrb[40].mxu1 }
 0x715   :  { %v2083_v40 = vpack.c.bf16 %v2071_v33, %v2070_v50  ;;  %v2026_v37 = vadd.f32 %v6382_v15, %v8157_v31  ;;  %v2017_v39 = vpop.f32.mrb[41].mxu1 }
 0x716   :  { %v2082_v32 = vpack.c.bf16 %v2069_v20, %v2068_v16  ;;  %v2018_v23 = vadd.f32 %v8157_v31, %v2017_v39  ;;  %v6383_v26 = vpop.f32.mrb[42].mxu1 }
 0x717   :  { %v2058_v30 = vmul.f32 0.2, %v2026_v37  ;;  %v2029_v46 = vadd.f32 %v6383_v26, %v8157_v31  ;;  %v2020_v43 = vpop.f32.mrb[43].mxu1 }
 0x718   :  { %v2056_v35 = vmul.f32 0.2, %v2018_v23  ;;  %v2021_v47 = vadd.f32 %v8157_v31, %v2020_v43  ;;  %6394 = vmatprep.mubr.msk.bf16.mxu0 %vm666_vm2, %v2082_v32 }
 0x719   :  { %v2059_v42 = vmul.f32 0.2, %v2029_v46  ;;  %6395 = vmatmul.mubr.msk.bf16.gmra.mrb[36].mxu0 %vm666_vm2, %v2083_v40  ;;  %v2074_v49 = vmax.f32 %v2026_v37, %v2058_v30 }
 0x71a   :  { %v2057_v48 = vmul.f32 0.2, %v2021_v47  ;;  %v2072_v51 = vmax.f32 %v2018_v23, %v2056_v35 }
 0x71b   :  { %v2075_v29 = vmax.f32 %v2029_v46, %v2059_v42 }
 0x71c   :  { %v2073_v52 = vmax.f32 %v2021_v47, %v2057_v48  ;;  %v6386_v53 = vpop.f32.mrb[44].mxu1 }
 0x71d   :  { %v2085_v45 = vpack.c.bf16 %v2075_v29, %v2074_v49  ;;  %v2042_v44 = vadd.f32 %v6386_v53, %v8157_v31  ;;  %v2033_v58 = vpop.f32.mrb[45].mxu1 }
 0x71e   :  { %v2084_v60 = vpack.c.bf16 %v2073_v52, %v2072_v51  ;;  %v2034_v2 = vadd.f32 %v8157_v31, %v2033_v58  ;;  %v6387_v56 = vpop.f32.mrb[46].mxu1 }
 0x71f   :  { %v2062_v41 = vmul.f32 0.2, %v2042_v44  ;;  %v2045_v12 = vadd.f32 %v6387_v56, %v8157_v31  ;;  %v2036_v18 = vpop.f32.mrb[47].mxu1 }
 0x720   :  { %v2060_v17 = vmul.f32 0.2, %v2034_v2  ;;  %v2037_v11 = vadd.f32 %v8157_v31, %v2036_v18  ;;  %6398 = vmatprep.mubr.msk.bf16.mxu0 %vm666_vm2, %v2084_v60  ;;  %v8190_v31 = vld [vmem:[%s9861_s6 + $0x2] ss:$0 sm:$0xff] }
 0x721   :  { %v2063_v59 = vmul.f32 0.2, %v2045_v12  ;;  %6399 = vmatmul.mubr.msk.bf16.gmra.mrb[40].mxu0 %vm666_vm2, %v2085_v45  ;;  %v2078_v21 = vmax.f32 %v2042_v44, %v2062_v41 }
 0x722   :  { %v2061_v24 = vmul.f32 0.2, %v2037_v11  ;;  %v2076_v10 = vmax.f32 %v2034_v2, %v2060_v17 }
 0x723   :  { %v2079_v6 = vmax.f32 %v2045_v12, %v2063_v59 }
 0x724   :  { %v2077_v5 = vmax.f32 %v2037_v11, %v2061_v24 }
 0x725   :  { %v2087_v25 = vpack.c.bf16 %v2079_v6, %v2078_v21 }
 0x726   :  { %v2086_v36 = vpack.c.bf16 %v2077_v5, %v2076_v10 }
 0x728   :  { %6402 = vmatprep.mubr.msk.bf16.mxu0 %vm666_vm2, %v2086_v36 }
 0x729   :  { %6403 = vmatmul.mubr.msk.bf16.gmra.mrb[44].mxu0 %vm666_vm2, %v2087_v25  ;;  %v2254_v25 = vld [vmem:[%s9863_s8] sm:$0xf]  ;;  %s8351_s8 = smov 0  }
 0x72a   :  { %2465 = vmatprep.mubr.bf16.mxu0 %v7154_v1 }
 0x7ce   :  { %v6392_v62 = vpop.f32.mrb[32].mxu0 }
 0x7cf   :  { %v2172_v3 = vadd.f32 %v6392_v62, %v8190_v31  ;;  %v2163_v14 = vpop.f32.mrb[33].mxu0 }
 0x7d0   :  { %v2164_v19 = vadd.f32 %v8190_v31, %v2163_v14  ;;  %v6393_v50 = vpop.f32.mrb[34].mxu0 }
 0x7d1   :  { %v2175_v33 = vadd.f32 %v6393_v50, %v8190_v31  ;;  %v2166_v16 = vpop.f32.mrb[35].mxu0  ;;  %v2228_v15 = vadd.f32 %v2172_v3, %v7930_v7 }
 0x7d2   :  { %v2167_v20 = vadd.f32 %v8190_v31, %v2166_v16  ;;  %v2226_v37 = vadd.f32 %v2164_v19, %v7936_v8 }
 0x7d3   :  { %v2229_v40 = vadd.f32 %v2175_v33, %v7933_v38 }
 0x7d4   :  { %v2227_v39 = vadd.f32 %v2167_v20, %v7939_v28 }
 0x7d5   :  { %v2243_v32 = vpack.c.bf16 %v2229_v40, %v2228_v15 }
 0x7d6   :  { %v2242_v23 = vpack.c.bf16 %v2227_v39, %v2226_v37 }
 0x7d8   :  { %5953 = vmatmul.mubr.msk.bf16.vlgmr.msra.gmra.mrb[48].mxu1 %vm666_vm2, %v2242_v23  ;;  %5961 = vmatmul.mubr.msk.bf16.vlgmr.msra.gmra.mrb[48].mxu0 %vm666_vm2, %v2242_v23 }
 0x7d9   :  { %2362 = vmatprep.mubr.bf16.mxu1 %v7154_v1  ;;  %2475 = vmatprep.mubr.bf16.mxu0 %v7154_v1 }
 0x7e0   :  { %5954 = vmatmul.mubr.msk.bf16.gmra.mrb[52].mxu1 %vm666_vm2, %v2243_v32  ;;  %5962 = vmatmul.mubr.msk.bf16.gmra.mrb[52].mxu0 %vm666_vm2, %v2243_v32 }
 0x7e1   :  { %2372 = vmatprep.mubr.bf16.mxu1 %v7154_v1  ;;  %2485 = vmatprep.mubr.bf16.mxu0 %v7154_v1 }
 0x7ec   :  { %v6396_v7 = vpop.f32.mrb[36].mxu0 }
 0x7ed   :  { %v2188_v38 = vadd.f32 %v6396_v7, %v8190_v31  ;;  %v2179_v8 = vpop.f32.mrb[37].mxu0 }
 0x7ee   :  { %v2180_v28 = vadd.f32 %v8190_v31, %v2179_v8  ;;  %v6397_v26 = vpop.f32.mrb[38].mxu0 }
 0x7ef   :  { %v2191_v30 = vadd.f32 %v6397_v26, %v8190_v31  ;;  %v2182_v46 = vpop.f32.mrb[39].mxu0  ;;  %v2232_v35 = vadd.f32 %v2188_v38, %v7953_v27 }
 0x7f0   :  { %v2183_v43 = vadd.f32 %v8190_v31, %v2182_v46  ;;  %v2230_v42 = vadd.f32 %v2180_v28, %v7956_v34 }
 0x7f1   :  { %v2233_v47 = vadd.f32 %v2191_v30, %v7975_v63 }
 0x7f2   :  { %v2231_v48 = vadd.f32 %v2183_v43, %v7961_v55 }
 0x7f3   :  { %v2245_v49 = vpack.c.bf16 %v2233_v47, %v2232_v35 }
 0x7f4   :  { %v2244_v29 = vpack.c.bf16 %v2231_v48, %v2230_v42  ;;  %v6400_v51 = vpop.f32.mrb[40].mxu0 }
 0x7f5   :  { %v2204_v52 = vadd.f32 %v6400_v51, %v8190_v31  ;;  %v2195_v53 = vpop.f32.mrb[41].mxu0 }
 0x7f6   :  { %v2196_v45 = vadd.f32 %v8190_v31, %v2195_v53  ;;  %v6401_v44 = vpop.f32.mrb[42].mxu0  ;;  %5955 = vmatmul.mubr.msk.bf16.gmra.mrb[56].mxu1 %vm666_vm2, %v2244_v29  ;;  %5963 = vmatmul.mubr.msk.bf16.gmra.mrb[56].mxu0 %vm666_vm2, %v2244_v29 }
 0x7f7   :  { %v2207_v27 = vadd.f32 %v6401_v44, %v8190_v31  ;;  %v2198_v63 = vpop.f32.mrb[43].mxu0  ;;  %2382 = vmatprep.mubr.bf16.mxu1 %v7154_v1  ;;  %2495 = vmatprep.mubr.bf16.mxu0 %v7154_v1  ;;  %v2236_v55 = vadd.f32 %v2204_v52, %v7989_v54 }
 0x7f8   :  { %v2199_v34 = vadd.f32 %v8190_v31, %v2198_v63  ;;  %v2234_v60 = vadd.f32 %v2196_v45, %v7992_v57 }
 0x7f9   :  { %v2237_v58 = vadd.f32 %v2207_v27, %v8001_v9 }
 0x7fa   :  { %v2235_v2 = vadd.f32 %v2199_v34, %v7997_v61 }
 0x7fb   :  { %v2247_v56 = vpack.c.bf16 %v2237_v58, %v2236_v55 }
 0x7fc   :  { %v2246_v41 = vpack.c.bf16 %v2235_v2, %v2234_v60  ;;  %v6404_v12 = vpop.f32.mrb[44].mxu0 }
 0x7fd   :  { %v2220_v18 = vadd.f32 %v6404_v12, %v8190_v31  ;;  %v2211_v17 = vpop.f32.mrb[45].mxu0 }
 0x7fe   :  { %v2212_v11 = vadd.f32 %v8190_v31, %v2211_v17  ;;  %v6405_v59 = vpop.f32.mrb[46].mxu0  ;;  %5956 = vmatmul.mubr.msk.bf16.gmra.mrb[60].mxu1 %vm666_vm2, %v2245_v49  ;;  %5964 = vmatmul.mubr.msk.bf16.gmra.mrb[60].mxu0 %vm666_vm2, %v2245_v49 }
 0x7ff   :  { %v2223_v54 = vadd.f32 %v6405_v59, %v8190_v31  ;;  %v2214_v9 = vpop.f32.mrb[47].mxu0  ;;  %2392 = vmatprep.mubr.bf16.mxu1 %v7154_v1  ;;  %2505 = vmatprep.mubr.bf16.mxu0 %v7154_v1  ;;  %v2240_v61 = vadd.f32 %v2220_v18, %v8015_v13  ;;  %v2256_v13 = vlaneseq }
 0x800   :  { %v2215_v57 = vadd.f32 %v8190_v31, %v2214_v9  ;;  %v2238_v21 = vadd.f32 %v2212_v11, %v8018_v0 }
 0x801   :  { %v2241_v24 = vadd.f32 %v2223_v54, %v8022_v4  ;;  %v8254_v0 = vshrl.u32 %v2256_v13, 7 }
 0x802   :  { %v2239_v6 = vadd.f32 %v2215_v57, %v8028_v22 }
 0x803   :  { %v2249_v10 = vpack.c.bf16 %v2241_v24, %v2240_v61  ;;  %10167 = vst [vmem:[#allocation11_spill] sm:$0xff] %v8254_v0  ;;  %v9874_v4 = vsub.s32 0, %v8254_v0  ;;  %v9873_v22 = vsub.s32 2, %v8254_v0  ;;  %v9872_v36 = vsub.s32 1, %v8254_v0 }
 0x804   :  { %v2248_v5 = vpack.c.bf16 %v2239_v6, %v2238_v21  ;;  %v9871_v31 = vsub.s32 3, %v8254_v0 }
 0x805   :  { %v8269_v62 = vrot.slane %v2254_v25, %v9873_v22  ;;  %v8273_v19 = vrot.slane %v2254_v25, %v9872_v36 }
 0x806   :  { %5957 = vmatmul.mubr.msk.bf16.gmra.mrb[64].mxu1 %vm666_vm2, %v2246_v41  ;;  %5965 = vmatmul.mubr.msk.bf16.gmra.mrb[64].mxu0 %vm666_vm2, %v2246_v41  ;;  %v8277_v50 = vrot.slane %v2254_v25, %v9871_v31 }
 0x807   :  { %2402 = vmatprep.mubr.bf16.mxu1 %v7154_v1  ;;  %2515 = vmatprep.mubr.bf16.mxu0 %v7154_v1 }
 0x80e   :  { %5958 = vmatmul.mubr.msk.bf16.gmra.mrb[68].mxu1 %vm666_vm2, %v2247_v56  ;;  %5966 = vmatmul.mubr.msk.bf16.gmra.mrb[68].mxu0 %vm666_vm2, %v2247_v56 }
 0x80f   :  { %2412 = vmatprep.mubr.bf16.mxu1 %v7154_v1  ;;  %2525 = vmatprep.mubr.bf16.mxu0 %v7154_v1 }
 0x816   :  { %5959 = vmatmul.mubr.msk.bf16.gmra.mrb[72].mxu1 %vm666_vm2, %v2248_v5  ;;  %5967 = vmatmul.mubr.msk.bf16.gmra.mrb[72].mxu0 %vm666_vm2, %v2248_v5 }
 0x817   :  { %2422 = vmatprep.mubr.bf16.mxu1 %v7154_v1  ;;  %2535 = vmatprep.mubr.bf16.mxu0 %v7154_v1  ;;  %v8265_v1 = vrot.slane %v2254_v25, %v9874_v4 }
 0x81e   :  { %5960 = vmatmul.mubr.msk.bf16.gmra.mrb[76].mxu1 %vm666_vm2, %v2249_v10  ;;  %5968 = vmatmul.mubr.msk.bf16.gmra.mrb[76].mxu0 %vm666_vm2, %v2249_v10 }
 0x8ab   :  { %v2354_v3 = vpop.f32.mrb[48].mxu1  ;;  %v2467_v14 = vpop.f32.mrb[48].mxu0 }
 0x8ac   :  { %v2356_v33 = vpop.f32.mrb[49].mxu1  ;;  %v2469_v16 = vpop.f32.mrb[49].mxu0  ;;  %v2355_v40 = vadd.f32 %v2354_v3, %v8265_v1  ;;  %v2468_v37 = vadd.f32 %v2467_v14, %v8269_v62 }
 0x8ad   :  { %v2358_v20 = vpop.f32.mrb[50].mxu1  ;;  %v2471_v15 = vpop.f32.mrb[50].mxu0  ;;  %v2357_v38 = vadd.f32 %v2356_v33, %v8273_v19  ;;  %v2470_v8 = vadd.f32 %v2469_v16, %v8277_v50 }
 0x8ae   :  { %v2359_v39 = vadd.f32 %v2358_v20, %v8265_v1  ;;  %v2472_v32 = vadd.f32 %v2471_v15, %v8269_v62  ;;  %v2360_v23 = vpop.f32.mrb[51].mxu1  ;;  %v2473_v7 = vpop.f32.mrb[51].mxu0 }
 0x8af   :  { %v2361_v28 = vadd.f32 %v2360_v23, %v8273_v19  ;;  %v2474_v26 = vadd.f32 %v2473_v7, %v8277_v50 }
 0x8b0   :  { %v2546_v30 = vpack.c.bf16 %v2359_v39, %v2355_v40  ;;  %v2548_v46 = vpack.c.bf16 %v2472_v32, %v2468_v37 }
 0x8b1   :  { %v2547_v43 = vpack.c.bf16 %v2361_v28, %v2357_v38  ;;  %v2549_v35 = vpack.c.bf16 %v2474_v26, %v2470_v8 }
 0x8b2   :  { %2578 = vst [vmem:[#allocation2] sm:$0xff] %v2546_v30  ;;  %2580 = vst [vmem:[#allocation2 + $0x10] sm:$0xff] %v2548_v46 }
 0x8b3   :  { %2579 = vst [vmem:[#allocation2 + $0x8] sm:$0xff] %v2547_v43  ;;  %2581 = vst [vmem:[#allocation2 + $0x18] sm:$0xff] %v2549_v35  ;;  %v2364_v47 = vpop.f32.mrb[52].mxu1  ;;  %v2477_v42 = vpop.f32.mrb[52].mxu0 }
 0x8b4   :  { %v2366_v48 = vpop.f32.mrb[53].mxu1  ;;  %v2479_v49 = vpop.f32.mrb[53].mxu0  ;;  %v2365_v52 = vadd.f32 %v2364_v47, %v8265_v1  ;;  %v2478_v53 = vadd.f32 %v2477_v42, %v8269_v62 }
 0x8b5   :  { %v2368_v29 = vpop.f32.mrb[54].mxu1  ;;  %v2481_v51 = vpop.f32.mrb[54].mxu0  ;;  %v2367_v34 = vadd.f32 %v2366_v48, %v8273_v19  ;;  %v2480_v55 = vadd.f32 %v2479_v49, %v8277_v50 }
 0x8b6   :  { %v2369_v45 = vadd.f32 %v2368_v29, %v8265_v1  ;;  %v2482_v44 = vadd.f32 %v2481_v51, %v8269_v62  ;;  %v2370_v27 = vpop.f32.mrb[55].mxu1  ;;  %v2483_v63 = vpop.f32.mrb[55].mxu0 }
 0x8b7   :  { %v2371_v58 = vadd.f32 %v2370_v27, %v8273_v19  ;;  %v2484_v60 = vadd.f32 %v2483_v63, %v8277_v50 }
 0x8b8   :  { %v2550_v2 = vpack.c.bf16 %v2369_v45, %v2365_v52  ;;  %v2552_v56 = vpack.c.bf16 %v2482_v44, %v2478_v53 }
 0x8b9   :  { %v2551_v41 = vpack.c.bf16 %v2371_v58, %v2367_v34  ;;  %v2553_v12 = vpack.c.bf16 %v2484_v60, %v2480_v55 }
 0x8ba   :  { %2582 = vst [vmem:[#allocation2 + $0x20] sm:$0xff] %v2550_v2  ;;  %2584 = vst [vmem:[#allocation2 + $0x30] sm:$0xff] %v2552_v56 }
 0x8bb   :  { %2583 = vst [vmem:[#allocation2 + $0x28] sm:$0xff] %v2551_v41  ;;  %2585 = vst [vmem:[#allocation2 + $0x38] sm:$0xff] %v2553_v12 }
 0x8c9   :  { %v2374_v18 = vpop.f32.mrb[56].mxu1  ;;  %v2487_v17 = vpop.f32.mrb[56].mxu0 }
 0x8ca   :  { %v2376_v11 = vpop.f32.mrb[57].mxu1  ;;  %v2489_v59 = vpop.f32.mrb[57].mxu0  ;;  %v2375_v57 = vadd.f32 %v2374_v18, %v8265_v1  ;;  %v2488_v61 = vadd.f32 %v2487_v17, %v8269_v62 }
 0x8cb   :  { %v2378_v54 = vpop.f32.mrb[58].mxu1  ;;  %v2491_v9 = vpop.f32.mrb[58].mxu0  ;;  %v2377_v5 = vadd.f32 %v2376_v11, %v8273_v19  ;;  %v2490_v13 = vadd.f32 %v2489_v59, %v8277_v50 }
 0x8cc   :  { %v2379_v24 = vadd.f32 %v2378_v54, %v8265_v1  ;;  %v2492_v21 = vadd.f32 %v2491_v9, %v8269_v62  ;;  %v2380_v6 = vpop.f32.mrb[59].mxu1  ;;  %v2493_v10 = vpop.f32.mrb[59].mxu0 }
 0x8cd   :  { %v2381_v25 = vadd.f32 %v2380_v6, %v8273_v19  ;;  %v2494_v3 = vadd.f32 %v2493_v10, %v8277_v50 }
 0x8ce   :  { %v2554_v14 = vpack.c.bf16 %v2379_v24, %v2375_v57  ;;  %v2556_v33 = vpack.c.bf16 %v2492_v21, %v2488_v61 }
 0x8cf   :  { %v2555_v16 = vpack.c.bf16 %v2381_v25, %v2377_v5  ;;  %v2557_v20 = vpack.c.bf16 %v2494_v3, %v2490_v13 }
 0x8d0   :  { %2586 = vst [vmem:[#allocation2 + $0x40] sm:$0xff] %v2554_v14  ;;  %2588 = vst [vmem:[#allocation2 + $0x50] sm:$0xff] %v2556_v33 }
 0x8d1   :  { %2587 = vst [vmem:[#allocation2 + $0x48] sm:$0xff] %v2555_v16  ;;  %2589 = vst [vmem:[#allocation2 + $0x58] sm:$0xff] %v2557_v20  ;;  %v2384_v15 = vpop.f32.mrb[60].mxu1  ;;  %v2497_v40 = vpop.f32.mrb[60].mxu0 }
 0x8d2   :  { %v2386_v37 = vpop.f32.mrb[61].mxu1  ;;  %v2499_v39 = vpop.f32.mrb[61].mxu0  ;;  %v2385_v7 = vadd.f32 %v2384_v15, %v8265_v1  ;;  %v2498_v38 = vadd.f32 %v2497_v40, %v8269_v62 }
 0x8d3   :  { %v2388_v32 = vpop.f32.mrb[62].mxu1  ;;  %v2501_v23 = vpop.f32.mrb[62].mxu0  ;;  %v2387_v46 = vadd.f32 %v2386_v37, %v8273_v19  ;;  %v2500_v43 = vadd.f32 %v2499_v39, %v8277_v50 }
 0x8d4   :  { %v2389_v8 = vadd.f32 %v2388_v32, %v8265_v1  ;;  %v2502_v28 = vadd.f32 %v2501_v23, %v8269_v62  ;;  %v2390_v26 = vpop.f32.mrb[63].mxu1  ;;  %v2503_v30 = vpop.f32.mrb[63].mxu0 }
 0x8d5   :  { %v2391_v35 = vadd.f32 %v2390_v26, %v8273_v19  ;;  %v2504_v47 = vadd.f32 %v2503_v30, %v8277_v50 }
 0x8d6   :  { %v2558_v42 = vpack.c.bf16 %v2389_v8, %v2385_v7  ;;  %v2560_v48 = vpack.c.bf16 %v2502_v28, %v2498_v38 }
 0x8d7   :  { %v2559_v49 = vpack.c.bf16 %v2391_v35, %v2387_v46  ;;  %v2561_v29 = vpack.c.bf16 %v2504_v47, %v2500_v43 }
 0x8d8   :  { %2590 = vst [vmem:[#allocation2 + $0x60] sm:$0xff] %v2558_v42  ;;  %2592 = vst [vmem:[#allocation2 + $0x70] sm:$0xff] %v2560_v48 }
 0x8d9   :  { %2591 = vst [vmem:[#allocation2 + $0x68] sm:$0xff] %v2559_v49  ;;  %2593 = vst [vmem:[#allocation2 + $0x78] sm:$0xff] %v2561_v29  ;;  %v2394_v51 = vpop.f32.mrb[64].mxu1  ;;  %v2507_v52 = vpop.f32.mrb[64].mxu0 }
 0x8da   :  { %v2396_v53 = vpop.f32.mrb[65].mxu1  ;;  %v2509_v45 = vpop.f32.mrb[65].mxu0  ;;  %v2395_v63 = vadd.f32 %v2394_v51, %v8265_v1  ;;  %v2508_v34 = vadd.f32 %v2507_v52, %v8269_v62 }
 0x8db   :  { %v2398_v44 = vpop.f32.mrb[66].mxu1  ;;  %v2511_v27 = vpop.f32.mrb[66].mxu0  ;;  %v2397_v56 = vadd.f32 %v2396_v53, %v8273_v19  ;;  %v2510_v41 = vadd.f32 %v2509_v45, %v8277_v50 }
 0x8dc   :  { %v2399_v55 = vadd.f32 %v2398_v44, %v8265_v1  ;;  %v2512_v58 = vadd.f32 %v2511_v27, %v8269_v62  ;;  %v2400_v60 = vpop.f32.mrb[67].mxu1  ;;  %v2513_v2 = vpop.f32.mrb[67].mxu0 }
 0x8dd   :  { %v2401_v12 = vadd.f32 %v2400_v60, %v8273_v19  ;;  %v2514_v18 = vadd.f32 %v2513_v2, %v8277_v50 }
 0x8de   :  { %v2562_v17 = vpack.c.bf16 %v2399_v55, %v2395_v63  ;;  %v2564_v11 = vpack.c.bf16 %v2512_v58, %v2508_v34 }
 0x8df   :  { %v2563_v59 = vpack.c.bf16 %v2401_v12, %v2397_v56  ;;  %v2565_v54 = vpack.c.bf16 %v2514_v18, %v2510_v41 }
 0x8e0   :  { %2594 = vst [vmem:[#allocation2 + $0x80] sm:$0xff] %v2562_v17  ;;  %2596 = vst [vmem:[#allocation2 + $0x90] sm:$0xff] %v2564_v11 }
 0x8e1   :  { %2595 = vst [vmem:[#allocation2 + $0x88] sm:$0xff] %v2563_v59  ;;  %2597 = vst [vmem:[#allocation2 + $0x98] sm:$0xff] %v2565_v54  ;;  %v2404_v9 = vpop.f32.mrb[68].mxu1  ;;  %v2517_v57 = vpop.f32.mrb[68].mxu0 }
 0x8e2   :  { %v2406_v61 = vpop.f32.mrb[69].mxu1  ;;  %v2519_v24 = vpop.f32.mrb[69].mxu0  ;;  %v2405_v10 = vadd.f32 %v2404_v9, %v8265_v1  ;;  %v2518_v5 = vadd.f32 %v2517_v57, %v8269_v62 }
 0x8e3   :  { %v2408_v21 = vpop.f32.mrb[70].mxu1  ;;  %v2521_v6 = vpop.f32.mrb[70].mxu0  ;;  %v2407_v33 = vadd.f32 %v2406_v61, %v8273_v19  ;;  %v2520_v16 = vadd.f32 %v2519_v24, %v8277_v50 }
 0x8e4   :  { %v2409_v13 = vadd.f32 %v2408_v21, %v8265_v1  ;;  %v2522_v25 = vadd.f32 %v2521_v6, %v8269_v62  ;;  %v2410_v3 = vpop.f32.mrb[71].mxu1  ;;  %v2523_v14 = vpop.f32.mrb[71].mxu0  ;;  %v8347_v6 = vmov 0.0  }
 0x8e5   :  { %v2411_v20 = vadd.f32 %v2410_v3, %v8273_v19  ;;  %v2524_v15 = vadd.f32 %v2523_v14, %v8277_v50 }
 0x8e6   :  { %v2566_v40 = vpack.c.bf16 %v2409_v13, %v2405_v10  ;;  %v2568_v37 = vpack.c.bf16 %v2522_v25, %v2518_v5  ;;  %v8349_v10 = vmov 0.0  }
 0x8e7   :  { %v2567_v39 = vpack.c.bf16 %v2411_v20, %v2407_v33  ;;  %v2569_v32 = vpack.c.bf16 %v2524_v15, %v2520_v16 }
 0x8e8   :  { %2598 = vst [vmem:[#allocation2 + $0xa0] sm:$0xff] %v2566_v40  ;;  %2600 = vst [vmem:[#allocation2 + $0xb0] sm:$0xff] %v2568_v37 }
 0x8e9   :  { %2599 = vst [vmem:[#allocation2 + $0xa8] sm:$0xff] %v2567_v39  ;;  %2601 = vst [vmem:[#allocation2 + $0xb8] sm:$0xff] %v2569_v32  ;;  %v2414_v23 = vpop.f32.mrb[72].mxu1  ;;  %v2527_v7 = vpop.f32.mrb[72].mxu0 }
 0x8ea   :  { %v2416_v38 = vpop.f32.mrb[73].mxu1  ;;  %v2529_v8 = vpop.f32.mrb[73].mxu0  ;;  %v2415_v30 = vadd.f32 %v2414_v23, %v8265_v1  ;;  %v2528_v46 = vadd.f32 %v2527_v7, %v8269_v62 }
 0x8eb   :  { %v2418_v28 = vpop.f32.mrb[74].mxu1  ;;  %v2531_v26 = vpop.f32.mrb[74].mxu0  ;;  %v2417_v48 = vadd.f32 %v2416_v38, %v8273_v19  ;;  %v2530_v49 = vadd.f32 %v2529_v8, %v8277_v50 }
 0x8ec   :  { %v2419_v43 = vadd.f32 %v2418_v28, %v8265_v1  ;;  %v2532_v35 = vadd.f32 %v2531_v26, %v8269_v62  ;;  %v2420_v47 = vpop.f32.mrb[75].mxu1  ;;  %v2533_v42 = vpop.f32.mrb[75].mxu0 }
 0x8ed   :  { %v2421_v29 = vadd.f32 %v2420_v47, %v8273_v19  ;;  %v2534_v51 = vadd.f32 %v2533_v42, %v8277_v50 }
 0x8ee   :  { %v2570_v52 = vpack.c.bf16 %v2419_v43, %v2415_v30  ;;  %v2572_v53 = vpack.c.bf16 %v2532_v35, %v2528_v46 }
 0x8ef   :  { %v2571_v45 = vpack.c.bf16 %v2421_v29, %v2417_v48  ;;  %v2573_v44 = vpack.c.bf16 %v2534_v51, %v2530_v49 }
 0x8f0   :  { %2602 = vst [vmem:[#allocation2 + $0xc0] sm:$0xff] %v2570_v52  ;;  %2604 = vst [vmem:[#allocation2 + $0xd0] sm:$0xff] %v2572_v53 }
 0x8f1   :  { %2603 = vst [vmem:[#allocation2 + $0xc8] sm:$0xff] %v2571_v45  ;;  %2605 = vst [vmem:[#allocation2 + $0xd8] sm:$0xff] %v2573_v44  ;;  %v2424_v27 = vpop.f32.mrb[76].mxu1  ;;  %v2537_v63 = vpop.f32.mrb[76].mxu0 }
 0x8f2   :  { %v2426_v34 = vpop.f32.mrb[77].mxu1  ;;  %v2539_v55 = vpop.f32.mrb[77].mxu0  ;;  %v2425_v2 = vadd.f32 %v2424_v27, %v8265_v1  ;;  %v2538_v56 = vadd.f32 %v2537_v63, %v8269_v62 }
 0x8f3   :  { %v2428_v58 = vpop.f32.mrb[78].mxu1  ;;  %v2541_v60 = vpop.f32.mrb[78].mxu0  ;;  %v2427_v11 = vadd.f32 %v2426_v34, %v8273_v19  ;;  %v2540_v59 = vadd.f32 %v2539_v55, %v8277_v50 }
 0x8f4   :  { %v2429_v41 = vadd.f32 %v2428_v58, %v8265_v1  ;;  %v2542_v12 = vadd.f32 %v2541_v60, %v8269_v62  ;;  %v2430_v18 = vpop.f32.mrb[79].mxu1  ;;  %v2543_v17 = vpop.f32.mrb[79].mxu0  ;;  %v8343_v1 = vmov 0.0   ;;  %v8345_v62 = vmov 0.0  }
 0x8f5   :  { %v2431_v54 = vadd.f32 %v2430_v18, %v8273_v19  ;;  %v2544_v9 = vadd.f32 %v2543_v17, %v8277_v50 }
 0x8f6   :  { %v2574_v57 = vpack.c.bf16 %v2429_v41, %v2425_v2  ;;  %v2576_v61 = vpack.c.bf16 %v2542_v12, %v2538_v56 }
 0x8f7   :  { %v2575_v24 = vpack.c.bf16 %v2431_v54, %v2427_v11  ;;  %v2577_v21 = vpack.c.bf16 %v2544_v9, %v2540_v59 }
 0x8f8   :  { %2606 = vst [vmem:[#allocation2 + $0xe0] sm:$0xff] %v2574_v57  ;;  %2608 = vst [vmem:[#allocation2 + $0xf0] sm:$0xff] %v2576_v61 }
 0x8f9   :  { %2607 = vst [vmem:[#allocation2 + $0xe8] sm:$0xff] %v2575_v24  ;;  %2609 = vst [vmem:[#allocation2 + $0xf8] sm:$0xff] %v2577_v21 }
 0x8fa LB: > { %10168 = vst [vmem:[#allocation12_spill] sm:$0xff] %v7127_v1  ;;  %v6743_v19 = vld [vmem:[%s9864_s9 + $0x4] ss:$16 sps:$4 sm:$0xff]   ;;  %v6745_v50 = vld [vmem:[%s9864_s9] ss:$16 sps:$4 sm:$0xff]   ;;  %v7157_v5 = vmov 0   ;;  %v2634_v58 = vpack.c.bf16 %v7139_v10, %v7139_v10  ;;  %s7143_s8 = sphi %s8351_s8, %s2615_s8   ;;  %v7139_v10 = vphi %v8349_v10, %v5318_v10   ;;  %v7135_v6 = vphi %v8347_v6, %v5316_v6   ;;  %v7131_v62 = vphi %v8345_v62, %v10876_v62   ;;  %v7127_v1 = vphi %v8343_v1, %v5814_v1  }
 0x8fb   : > { %2859 = vmatprep.mubr.bf16.mxu0 %v7157_v5  ;;  %2900 = vmatprep.mubr.bf16.mxu1 %v7157_v5  ;;  %v6746_v13 = vld [vmem:[%s9864_s9 + $0x24] ss:$16 sps:$4 sm:$0xff]   ;;  %v6748_v25 = vld [vmem:[%s9864_s9 + $0x20] ss:$16 sps:$4 sm:$0xff]   ;;  %v6754_v14 = vld [vmem:[%s9864_s9 + $0xc] ss:$16 sps:$4 sm:$0xff]  }
 0x8fc   : > { %2827 = vmatprep.subr.bf16.mxu0 %v6743_v19  ;;  %v6749_v3 = vld [vmem:[%s9864_s9 + $0x44] ss:$16 sps:$4 sm:$0xff]   ;;  %v6757_v33 = vld [vmem:[%s9864_s9 + $0x8] ss:$16 sps:$4 sm:$0xff]   ;;  %v6751_v16 = vld [vmem:[%s9864_s9 + $0x40] ss:$16 sps:$4 sm:$0xff]   ;;  %2868 = vmatprep.subr.bf16.mxu1 %v6754_v14 }
 0x8fd   : > { %2828 = vmatpush1.bf16.msra.mxu0 %v6745_v50  ;;  %v6752_v20 = vld [vmem:[%s9864_s9 + $0x64] ss:$16 sps:$4 sm:$0xff]   ;;  %2869 = vmatpush1.bf16.msra.mxu1 %v6757_v33  ;;  %v6760_v15 = vld [vmem:[%s9864_s9 + $0x2c] ss:$16 sps:$4 sm:$0xff]   ;;  %v6763_v40 = vld [vmem:[%s9864_s9 + $0x28] ss:$16 sps:$4 sm:$0xff]  }
 0x8fe   : > { %2829 = vmatprep.subr.bf16.mxu0 %v6746_v13  ;;  %2870 = vmatprep.subr.bf16.mxu1 %v6760_v15  ;;  %v6756_v37 = vld [vmem:[%s9864_s9 + $0x60] ss:$16 sps:$4 sm:$0xff]   ;;  %v6758_v39 = vld [vmem:[%s9864_s9 + $0x84] ss:$16 sps:$4 sm:$0xff]   ;;  %v6766_v32 = vld [vmem:[%s9864_s9 + $0x4c] ss:$16 sps:$4 sm:$0xff]  }
 0x8ff   : > { %v6769_v23 = vld [vmem:[%s9864_s9 + $0x48] ss:$16 sps:$4 sm:$0xff]   ;;  %v6772_v7 = vld [vmem:[%s9864_s9 + $0x6c] ss:$16 sps:$4 sm:$0xff]   ;;  %v6762_v38 = vld [vmem:[%s9864_s9 + $0x80] ss:$16 sps:$4 sm:$0xff]  }
 0x900   : > { %v6764_v8 = vld [vmem:[%s9864_s9 + $0xa4] ss:$16 sps:$4 sm:$0xff]   ;;  %v6775_v28 = vld [vmem:[%s9864_s9 + $0x68] ss:$16 sps:$4 sm:$0xff]   ;;  %v6778_v26 = vld [vmem:[%s9864_s9 + $0x8c] ss:$16 sps:$4 sm:$0xff]  }
 0x901   : > { %2830 = vmatpush1.bf16.msra.mxu0 %v6748_v25  ;;  %2871 = vmatpush1.bf16.msra.mxu1 %v6763_v40  ;;  %v6768_v30 = vld [vmem:[%s9864_s9 + $0xa0] ss:$16 sps:$4 sm:$0xff]   ;;  %v6770_v46 = vld [vmem:[%s9864_s9 + $0xc4] ss:$16 sps:$4 sm:$0xff]   ;;  %v6781_v43 = vld [vmem:[%s9864_s9 + $0x88] ss:$16 sps:$4 sm:$0xff]  }
 0x902   : > { %2831 = vmatprep.subr.bf16.mxu0 %v6749_v3  ;;  %2872 = vmatprep.subr.bf16.mxu1 %v6766_v32  ;;  %v6782_v35 = vld [vmem:[%s9864_s9 + $0xac] ss:$16 sps:$4 sm:$0xff]   ;;  %v6774_v47 = vld [vmem:[%s9864_s9 + $0xc0] ss:$16 sps:$4 sm:$0xff]   ;;  %v6776_v42 = vld [vmem:[%s9864_s9 + $0xe4] ss:$16 sps:$4 sm:$0xff]  }
 0x903   : > { %v6784_v48 = vld [vmem:[%s9864_s9 + $0xa8] ss:$16 sps:$4 sm:$0xff]   ;;  %v6785_v49 = vld [vmem:[%s9864_s9 + $0xcc] ss:$16 sps:$4 sm:$0xff]   ;;  %v6780_v52 = vld [vmem:[%s9864_s9 + $0xe0] ss:$16 sps:$4 sm:$0xff]  }
 0x904   : > { %v2939_v29 = vld [vmem:[#allocation6] sm:$0xff]  ;;  %v2940_v34 = vld [vmem:[#allocation6 + $0x8] sm:$0xff]  ;;  %s5969_s3 = sshll.u32 %s7143_s8, 4  ;;  %s2615_s8 = sadd.s32 1, %s7143_s8  }
 0x905   : > { %2832 = vmatpush1.bf16.msra.mxu0 %v6751_v16  ;;  %2873 = vmatpush1.bf16.msra.mxu1 %v6769_v23  ;;  %v2943_v51 = vld [vmem:[#allocation6 + $0x20] sm:$0xff]  ;;  %v2944_v55 = vld [vmem:[#allocation6 + $0x28] sm:$0xff]  ;;  %s2621_s30 = sshra.s32 %s5969_s3, 4  ;;  %p2612_p10 = scmp.ge.s32.totalorder %s2615_s8, 8  }
 0x906   : > { %2833 = vmatprep.subr.bf16.mxu0 %v6752_v20  ;;  %2874 = vmatprep.subr.bf16.mxu1 %v6772_v7  ;;  %v6787_v53 = vld [vmem:[%s9864_s9 + $0xc8] ss:$16 sps:$4 sm:$0xff]   ;;  %v6788_v45 = vld [vmem:[%s9864_s9 + $0xec] ss:$16 sps:$4 sm:$0xff]   ;;  %v8461_v63 = vcombine.high %v2939_v29, %v2943_v51  ;;  %v8468_v2 = vcombine.low %v2939_v29, %v2943_v51  ;;  %v8473_v11 = vcombine.high %v2940_v34, %v2944_v55  ;;  %s6225_s19 = sshll.u32 %s2621_s30, 5  ;;  %vm5836_vm6 = vcmask (%p2612_p10), 1024  }
 0x907   : > { %v2947_v44 = vld [vmem:[#allocation6 + $0x40] sm:$0xff]  ;;  %v2948_v18 = vld [vmem:[#allocation6 + $0x48] sm:$0xff]  ;;  %v8478_v57 = vcombine.low %v2940_v34, %v2944_v55  ;;  %s8675_s23 = scalar_lea.vmem [#allocation2], %s6225_s19 }
 0x908   : > { %v2951_v27 = vld [vmem:[#allocation6 + $0x60] sm:$0xff]  ;;  %10169 = vst [vmem:[#allocation13_spill] sm:$0xff] %v8461_v63  ;;  %10170 = vst [vmem:[#allocation14_spill] sm:$0xff] %v8468_v2  ;;  %v2952_v17 = vld [vmem:[#allocation6 + $0x68] sm:$0xff] }
 0x909   : > { %2834 = vmatpush1.bf16.msra.mxu0 %v6756_v37  ;;  %2875 = vmatpush1.bf16.msra.mxu1 %v6775_v28  ;;  %v6790_v60 = vld [vmem:[%s9864_s9 + $0xe8] ss:$16 sps:$4 sm:$0xff]   ;;  %v8471_v12 = vcombine.high %v2947_v44, %v2951_v27  ;;  %10172 = vst [vmem:[#allocation16_spill] sm:$0xff] %v8473_v11  ;;  %v8476_v59 = vcombine.low %v2947_v44, %v2951_v27  ;;  %10174 = vst [vmem:[#allocation18_spill] sm:$0xff] %v8478_v57 }
 0x90a   : > { %2835 = vmatprep.subr.bf16.mxu0 %v6758_v39  ;;  %2876 = vmatprep.subr.bf16.mxu1 %v6778_v26  ;;  %v2955_v56 = vld [vmem:[#allocation6 + $0x80] sm:$0xff]  ;;  %v2956_v24 = vld [vmem:[#allocation6 + $0x88] sm:$0xff]  ;;  %v8484_v10 = vcombine.high %v2948_v18, %v2952_v17  ;;  %v8490_v50 = vcombine.low %v2948_v18, %v2952_v17 }
 0x90b   : > { %v2959_v41 = vld [vmem:[#allocation6 + $0xa0] sm:$0xff]  ;;  %10171 = vst [vmem:[#allocation15_spill] sm:$0xff] %v8471_v12  ;;  %10173 = vst [vmem:[#allocation17_spill] sm:$0xff] %v8476_v59  ;;  %v2960_v21 = vld [vmem:[#allocation6 + $0xa8] sm:$0xff] }
 0x90c   : > { %v2963_v54 = vld [vmem:[#allocation6 + $0xc0] sm:$0xff]  ;;  %v8481_v61 = vcombine.high %v2955_v56, %v2959_v41  ;;  %10176 = vst [vmem:[#allocation20_spill] sm:$0xff] %v8484_v10  ;;  %v8487_v19 = vcombine.low %v2955_v56, %v2959_v41  ;;  %10178 = vst [vmem:[#allocation22_spill] sm:$0xff] %v8490_v50  ;;  %v2964_v13 = vld [vmem:[#allocation6 + $0xc8] sm:$0xff]  ;;  %v8496_v3 = vcombine.high %v2956_v24, %v2960_v21 }
 0x90d   : > { %2836 = vmatpush1.bf16.msra.mxu0 %v6762_v38  ;;  %2877 = vmatpush1.bf16.msra.mxu1 %v6781_v43  ;;  %v2967_v9 = vld [vmem:[#allocation6 + $0xe0] sm:$0xff]  ;;  %v2968_v25 = vld [vmem:[#allocation6 + $0xe8] sm:$0xff]  ;;  %v8502_v33 = vcombine.low %v2956_v24, %v2960_v21 }
 0x90e   : > { %2837 = vmatprep.subr.bf16.mxu0 %v6764_v8  ;;  %2878 = vmatprep.subr.bf16.mxu1 %v6782_v35  ;;  %10175 = vst [vmem:[#allocation19_spill] sm:$0xff] %v8481_v61  ;;  %10177 = vst [vmem:[#allocation21_spill] sm:$0xff] %v8487_v19  ;;  %v8493_v5 = vcombine.high %v2963_v54, %v2967_v9  ;;  %v8499_v14 = vcombine.low %v2963_v54, %v2967_v9  ;;  %v2971_v15 = vld [vmem:[#allocation6 + $0x100] sm:$0xff]  ;;  %v2972_v37 = vld [vmem:[#allocation6 + $0x108] sm:$0xff] }
 0x90f   : > { %10180 = vst [vmem:[#allocation24_spill] sm:$0xff] %v8496_v3  ;;  %10182 = vst [vmem:[#allocation26_spill] sm:$0xff] %v8502_v33  ;;  %v8506_v16 = vcombine.high %v2964_v13, %v2968_v25  ;;  %v8510_v20 = vcombine.low %v2964_v13, %v2968_v25  ;;  %v2975_v40 = vld [vmem:[#allocation6 + $0x120] sm:$0xff]  ;;  %v2976_v32 = vld [vmem:[#allocation6 + $0x128] sm:$0xff] }
 0x910   : > { %10179 = vst [vmem:[#allocation23_spill] sm:$0xff] %v8493_v5  ;;  %10181 = vst [vmem:[#allocation25_spill] sm:$0xff] %v8499_v14  ;;  %v8514_v39 = vcombine.high %v2971_v15, %v2975_v40  ;;  %v8516_v23 = vcombine.high %v2972_v37, %v2976_v32  ;;  %v8518_v7 = vcombine.low %v2971_v15, %v2975_v40  ;;  %v2979_v8 = vld [vmem:[#allocation6 + $0x140] sm:$0xff]  ;;  %v2980_v26 = vld [vmem:[#allocation6 + $0x148] sm:$0xff] }
 0x911   : > { %2838 = vmatpush1.bf16.msra.mxu0 %v6768_v30  ;;  %2879 = vmatpush1.bf16.msra.mxu1 %v6784_v48  ;;  %10183 = vst [vmem:[#allocation27_spill] sm:$0xff] %v8506_v16  ;;  %10184 = vst [vmem:[#allocation28_spill] sm:$0xff] %v8510_v20  ;;  %v8520_v38 = vcombine.low %v2972_v37, %v2976_v32  ;;  %v2983_v28 = vld [vmem:[#allocation6 + $0x160] sm:$0xff]  ;;  %v2992_v51 = vld [vmem:[#allocation6 + $0x1a8] sm:$0xff] }
 0x912   : > { %2839 = vmatprep.subr.bf16.mxu0 %v6770_v46  ;;  %2880 = vmatprep.subr.bf16.mxu1 %v6785_v49  ;;  %10185 = vst [vmem:[#allocation29_spill] sm:$0xff] %v8514_v39  ;;  %10186 = vst [vmem:[#allocation30_spill] sm:$0xff] %v8516_v23  ;;  %v8526_v30 = vcombine.high %v2979_v8, %v2983_v28  ;;  %v2984_v46 = vld [vmem:[#allocation6 + $0x168] sm:$0xff]  ;;  %v8530_v35 = vcombine.low %v2979_v8, %v2983_v28  ;;  %v2991_v48 = vld [vmem:[#allocation6 + $0x1a0] sm:$0xff] }
 0x913   : > { %10187 = vst [vmem:[#allocation31_spill] sm:$0xff] %v8518_v7  ;;  %10188 = vst [vmem:[#allocation32_spill] sm:$0xff] %v8520_v38  ;;  %v8528_v43 = vcombine.high %v2980_v26, %v2984_v46  ;;  %v2988_v49 = vld [vmem:[#allocation6 + $0x188] sm:$0xff]  ;;  %v2995_v44 = vld [vmem:[#allocation6 + $0x1c0] sm:$0xff] }
 0x914   : > { %10189 = vst [vmem:[#allocation33_spill] sm:$0xff] %v8526_v30  ;;  %10191 = vst [vmem:[#allocation35_spill] sm:$0xff] %v8530_v35  ;;  %v2999_v27 = vld [vmem:[#allocation6 + $0x1e0] sm:$0xff]  ;;  %v2996_v34 = vld [vmem:[#allocation6 + $0x1c8] sm:$0xff] }
 0x915   : > { %2840 = vmatpush1.bf16.msra.mxu0 %v6774_v47  ;;  %2881 = vmatpush1.bf16.msra.mxu1 %v6787_v53  ;;  %10190 = vst [vmem:[#allocation34_spill] sm:$0xff] %v8528_v43  ;;  %v8532_v47 = vcombine.low %v2980_v26, %v2984_v46  ;;  %v8550_v55 = vcombine.high %v2995_v44, %v2999_v27  ;;  %v3003_v18 = vld [vmem:[#allocation6 + $0x200] sm:$0xff]  ;;  %v3004_v54 = vld [vmem:[#allocation6 + $0x208] sm:$0xff] }
 0x916   : > { %2841 = vmatprep.subr.bf16.mxu0 %v6776_v42  ;;  %2882 = vmatprep.subr.bf16.mxu1 %v6788_v45  ;;  %v2987_v42 = vld [vmem:[#allocation6 + $0x180] sm:$0xff]  ;;  %v8544_v45 = vcombine.low %v2988_v49, %v2992_v51  ;;  %v8554_v56 = vcombine.low %v2995_v44, %v2999_v27  ;;  %v3008_v9 = vld [vmem:[#allocation6 + $0x228] sm:$0xff] }
 0x917   : > { %10192 = vst [vmem:[#allocation36_spill] sm:$0xff] %v8532_v47  ;;  %v8538_v29 = vcombine.high %v2987_v42, %v2991_v48  ;;  %v8542_v53 = vcombine.low %v2987_v42, %v2991_v48  ;;  %10197 = vst [vmem:[#allocation41_spill] sm:$0xff] %v8550_v55  ;;  %v3007_v17 = vld [vmem:[#allocation6 + $0x220] sm:$0xff]  ;;  %v8564_v21 = vcombine.high %v3004_v54, %v3008_v9  ;;  %v3012_v37 = vld [vmem:[#allocation6 + $0x248] sm:$0xff] }
 0x918   : > { %10196 = vst [vmem:[#allocation40_spill] sm:$0xff] %v8544_v45  ;;  %10199 = vst [vmem:[#allocation43_spill] sm:$0xff] %v8554_v56  ;;  %v8562_v24 = vcombine.high %v3003_v18, %v3007_v17  ;;  %v8566_v13 = vcombine.low %v3003_v18, %v3007_v17  ;;  %v8568_v25 = vcombine.low %v3004_v54, %v3008_v9  ;;  %v3011_v15 = vld [vmem:[#allocation6 + $0x240] sm:$0xff]  ;;  %v3016_v8 = vld [vmem:[#allocation6 + $0x268] sm:$0xff] }
 0x919   : > { %2842 = vmatpush1.bf16.msra.mxu0 %v6780_v52  ;;  %2883 = vmatpush1.bf16.msra.mxu1 %v6790_v60  ;;  %10193 = vst [vmem:[#allocation37_spill] sm:$0xff] %v8538_v29  ;;  %v8540_v52 = vcombine.high %v2988_v49, %v2992_v51  ;;  %10195 = vst [vmem:[#allocation39_spill] sm:$0xff] %v8542_v53  ;;  %v3015_v40 = vld [vmem:[#allocation6 + $0x260] sm:$0xff]  ;;  %v8576_v28 = vcombine.high %v3012_v37, %v3016_v8  ;;  %v3020_v49 = vld [vmem:[#allocation6 + $0x288] sm:$0xff] }
 0x91a   : > { %3707 = vmatprep.subr.bf16.mxu0 %v8461_v63  ;;  %3748 = vmatprep.subr.bf16.mxu1 %v8473_v11  ;;  %10201 = vst [vmem:[#allocation45_spill] sm:$0xff] %v8562_v24  ;;  %10202 = vst [vmem:[#allocation46_spill] sm:$0xff] %v8564_v21  ;;  %v8574_v32 = vcombine.high %v3011_v15, %v3015_v40  ;;  %v8578_v26 = vcombine.low %v3011_v15, %v3015_v40  ;;  %v3019_v42 = vld [vmem:[#allocation6 + $0x280] sm:$0xff]  ;;  %v3024_v44 = vld [vmem:[#allocation6 + $0x2a8] sm:$0xff] }
 0x91b   : > { %10194 = vst [vmem:[#allocation38_spill] sm:$0xff] %v8540_v52  ;;  %10203 = vst [vmem:[#allocation47_spill] sm:$0xff] %v8566_v13  ;;  %v8580_v46 = vcombine.low %v3012_v37, %v3016_v8  ;;  %v3023_v48 = vld [vmem:[#allocation6 + $0x2a0] sm:$0xff]  ;;  %v8588_v27 = vcombine.high %v3020_v49, %v3024_v44  ;;  %v3028_v54 = vld [vmem:[#allocation6 + $0x2c8] sm:$0xff] }
 0x91c   : > { %2860 = vmatmul.mubr.bf16.vlgmr.msra.gmra.mrb[0].mxu0 %v2634_v58  ;;  %2901 = vmatmul.mubr.bf16.vlgmr.msra.gmra.mrb[0].mxu1 %v2634_v58  ;;  %v3000_v58 = vld [vmem:[#allocation6 + $0x1e8] sm:$0xff]  ;;  %10204 = vst [vmem:[#allocation48_spill] sm:$0xff] %v8568_v25  ;;  %10205 = vst [vmem:[#allocation49_spill] sm:$0xff] %v8574_v32  ;;  %v8586_v51 = vcombine.high %v3019_v42, %v3023_v48  ;;  %v3027_v18 = vld [vmem:[#allocation6 + $0x2c0] sm:$0xff] }
 0x91d   : > { %3708 = vmatpush1.bf16.msra.mxu0 %v8468_v2  ;;  %3749 = vmatpush1.bf16.msra.mxu1 %v8478_v57  ;;  %v8552_v60 = vcombine.high %v2996_v34, %v3000_v58  ;;  %v8556_v41 = vcombine.low %v2996_v34, %v3000_v58  ;;  %10206 = vst [vmem:[#allocation50_spill] sm:$0xff] %v8576_v28  ;;  %10207 = vst [vmem:[#allocation51_spill] sm:$0xff] %v8578_v26  ;;  %v3031_v17 = vld [vmem:[#allocation6 + $0x2e0] sm:$0xff]  ;;  %v3032_v15 = vld [vmem:[#allocation6 + $0x2e8] sm:$0xff] }
 0x91e   : > { %3709 = vmatprep.subr.bf16.mxu0 %v8471_v12  ;;  %3750 = vmatprep.subr.bf16.mxu1 %v8484_v10  ;;  %10208 = vst [vmem:[#allocation52_spill] sm:$0xff] %v8580_v46  ;;  %10209 = vst [vmem:[#allocation53_spill] sm:$0xff] %v8586_v51  ;;  %v8590_v34 = vcombine.low %v3019_v42, %v3023_v48  ;;  %v8592_v58 = vcombine.low %v3020_v49, %v3024_v44  ;;  %v3035_v42 = vld [vmem:[#allocation6 + $0x300] sm:$0xff]  ;;  %v3036_v49 = vld [vmem:[#allocation6 + $0x308] sm:$0xff] }
 0x91f   : > { %10198 = vst [vmem:[#allocation42_spill] sm:$0xff] %v8552_v60  ;;  %10200 = vst [vmem:[#allocation44_spill] sm:$0xff] %v8556_v41  ;;  %v8598_v9 = vcombine.high %v3027_v18, %v3031_v17  ;;  %v8600_v40 = vcombine.high %v3028_v54, %v3032_v15  ;;  %v8602_v37 = vcombine.low %v3027_v18, %v3031_v17  ;;  %v3039_v48 = vld [vmem:[#allocation6 + $0x320] sm:$0xff]  ;;  %v3040_v31 = vld [vmem:[#allocation6 + $0x328] sm:$0xff] }
 0x920   : > { %10210 = vst [vmem:[#allocation54_spill] sm:$0xff] %v8588_v27  ;;  %10211 = vst [vmem:[#allocation55_spill] sm:$0xff] %v8590_v34  ;;  %v8604_v8 = vcombine.low %v3028_v54, %v3032_v15  ;;  %v8610_v44 = vcombine.high %v3035_v42, %v3039_v48  ;;  %v8612_v36 = vcombine.high %v3036_v49, %v3040_v31  ;;  %v3043_v54 = vld [vmem:[#allocation6 + $0x340] sm:$0xff]  ;;  %v3044_v22 = vld [vmem:[#allocation6 + $0x348] sm:$0xff] }
 0x921   : > { %3710 = vmatpush1.bf16.msra.mxu0 %v8476_v59  ;;  %3751 = vmatpush1.bf16.msra.mxu1 %v8490_v50  ;;  %10212 = vst [vmem:[#allocation56_spill] sm:$0xff] %v8592_v58  ;;  %10213 = vst [vmem:[#allocation57_spill] sm:$0xff] %v8598_v9  ;;  %v8614_v18 = vcombine.low %v3035_v42, %v3039_v48  ;;  %v8616_v17 = vcombine.low %v3036_v49, %v3040_v31  ;;  %v3047_v15 = vld [vmem:[#allocation6 + $0x360] sm:$0xff]  ;;  %v3048_v1 = vld [vmem:[#allocation6 + $0x368] sm:$0xff] }
 0x922   : > { %3711 = vmatprep.subr.bf16.mxu0 %v8481_v61  ;;  %3752 = vmatprep.subr.bf16.mxu1 %v8496_v3  ;;  %10214 = vst [vmem:[#allocation58_spill] sm:$0xff] %v8600_v40  ;;  %10215 = vst [vmem:[#allocation59_spill] sm:$0xff] %v8602_v37  ;;  %v8622_v4 = vcombine.high %v3043_v54, %v3047_v15  ;;  %v8624_v0 = vcombine.low %v3043_v54, %v3047_v15  ;;  %v3051_v42 = vld [vmem:[#allocation6 + $0x380] sm:$0xff] }
 0x923   : > { %10216 = vst [vmem:[#allocation60_spill] sm:$0xff] %v8604_v8  ;;  %10217 = vst [vmem:[#allocation61_spill] sm:$0xff] %v8610_v44  ;;  %v3055_v48 = vld [vmem:[#allocation6 + $0x3a0] sm:$0xff]  ;;  %v8626_v31 = vcombine.high %v3044_v22, %v3048_v1  ;;  %v8628_v49 = vcombine.low %v3044_v22, %v3048_v1  ;;  %v8644_v54 = vpack.c.bf16 %v7131_v62, %v7131_v62 }
 0x924   : > { %10218 = vst [vmem:[#allocation62_spill] sm:$0xff] %v8612_v36  ;;  %10219 = vst [vmem:[#allocation63_spill] sm:$0xff] %v8614_v18  ;;  %v8638_v22 = vcombine.low %v3051_v42, %v3055_v48 }
 0x925   : > { %3712 = vmatpush1.bf16.msra.mxu0 %v8487_v19  ;;  %3753 = vmatpush1.bf16.msra.mxu1 %v8502_v33  ;;  %10220 = vst [vmem:[#allocation64_spill] sm:$0xff] %v8616_v17  ;;  %10221 = vst [vmem:[#allocation65_spill] sm:$0xff] %v8622_v4 }
 0x926   : > { %3713 = vmatprep.subr.bf16.mxu0 %v8493_v5  ;;  %3754 = vmatprep.subr.bf16.mxu1 %v8506_v16  ;;  %10222 = vst [vmem:[#allocation66_spill] sm:$0xff] %v8624_v0  ;;  %10223 = vst [vmem:[#allocation67_spill] sm:$0xff] %v8626_v31 }
 0x927   : > { %10224 = vst [vmem:[#allocation68_spill] sm:$0xff] %v8628_v49  ;;  %10227 = vst [vmem:[#allocation71_spill] sm:$0xff] %v8638_v22  ;;  %3739 = vmatprep.mubr.bf16.mxu0 %v8644_v54  ;;  %3780 = vmatprep.mubr.bf16.mxu1 %v8644_v54 }
 0x929   : > { %3714 = vmatpush1.bf16.msra.mxu0 %v8499_v14  ;;  %3755 = vmatpush1.bf16.msra.mxu1 %v8510_v20 }
 0x92a   : > { %3715 = vmatprep.subr.bf16.mxu0 %v8514_v39  ;;  %3756 = vmatprep.subr.bf16.mxu1 %v8516_v23 }
 0x92d   : > { %3716 = vmatpush1.bf16.msra.mxu0 %v8518_v7  ;;  %3757 = vmatpush1.bf16.msra.mxu1 %v8520_v38 }
 0x92e   : > { %3717 = vmatprep.subr.bf16.mxu0 %v8526_v30  ;;  %3758 = vmatprep.subr.bf16.mxu1 %v8528_v43 }
 0x931   : > { %3718 = vmatpush1.bf16.msra.mxu0 %v8530_v35  ;;  %3759 = vmatpush1.bf16.msra.mxu1 %v8532_v47 }
 0x932   : > { %3719 = vmatprep.subr.bf16.mxu0 %v8538_v29  ;;  %3760 = vmatprep.subr.bf16.mxu1 %v8540_v52 }
 0x935   : > { %3720 = vmatpush1.bf16.msra.mxu0 %v8542_v53  ;;  %3761 = vmatpush1.bf16.msra.mxu1 %v8544_v45 }
 0x936   : > { %3721 = vmatprep.subr.bf16.mxu0 %v8550_v55  ;;  %3762 = vmatprep.subr.bf16.mxu1 %v8552_v60 }
 0x939   : > { %3722 = vmatpush1.bf16.msra.mxu0 %v8554_v56  ;;  %3763 = vmatpush1.bf16.msra.mxu1 %v8556_v41 }
 0x93a   : > { %3723 = vmatprep.subr.bf16.mxu0 %v8562_v24  ;;  %3764 = vmatprep.subr.bf16.mxu1 %v8564_v21 }
 0x93d   : > { %3724 = vmatpush1.bf16.msra.mxu0 %v8566_v13  ;;  %3765 = vmatpush1.bf16.msra.mxu1 %v8568_v25 }
 0x93e   : > { %3725 = vmatprep.subr.bf16.mxu0 %v8574_v32  ;;  %3766 = vmatprep.subr.bf16.mxu1 %v8576_v28 }
 0x941   : > { %3726 = vmatpush1.bf16.msra.mxu0 %v8578_v26  ;;  %3767 = vmatpush1.bf16.msra.mxu1 %v8580_v46 }
 0x942   : > { %3727 = vmatprep.subr.bf16.mxu0 %v8586_v51  ;;  %3768 = vmatprep.subr.bf16.mxu1 %v8588_v27 }
 0x945   : > { %3728 = vmatpush1.bf16.msra.mxu0 %v8590_v34  ;;  %3769 = vmatpush1.bf16.msra.mxu1 %v8592_v58 }
 0x946   : > { %3729 = vmatprep.subr.bf16.mxu0 %v8598_v9  ;;  %3770 = vmatprep.subr.bf16.mxu1 %v8600_v40  ;;  %v3060_v40 = vld [vmem:[#allocation6 + $0x3c8] sm:$0xff] }
 0x947   : > { %v3064_v9 = vld [vmem:[#allocation6 + $0x3e8] sm:$0xff] }
 0x949   : > { %3730 = vmatpush1.bf16.msra.mxu0 %v8602_v37  ;;  %3771 = vmatpush1.bf16.msra.mxu1 %v8604_v8  ;;  %v3056_v8 = vld [vmem:[#allocation6 + $0x3a8] sm:$0xff]  ;;  %v3059_v37 = vld [vmem:[#allocation6 + $0x3c0] sm:$0xff] }
 0x94a   : > { %3731 = vmatprep.subr.bf16.mxu0 %v8610_v44  ;;  %3772 = vmatprep.subr.bf16.mxu1 %v8612_v36  ;;  %v8630_v44 = vcombine.high %v3051_v42, %v3055_v48  ;;  %v3052_v36 = vld [vmem:[#allocation6 + $0x388] sm:$0xff]  ;;  %v2945_v42 = vld [vmem:[#allocation6 + $0x30] sm:$0xff]  ;;  %v8658_v48 = vcombine.low %v3060_v40, %v3064_v9 }
 0x94b   : > { %v8640_v1 = vcombine.low %v3052_v36, %v3056_v8 }
 0x94c   : > { %10225 = vst [vmem:[#allocation69_spill] sm:$0xff] %v8630_v44  ;;  %10232 = vst [vmem:[#allocation76_spill] sm:$0xff] %v8658_v48 }
 0x94d   : > { %3732 = vmatpush1.bf16.msra.mxu0 %v8614_v18  ;;  %3773 = vmatpush1.bf16.msra.mxu1 %v8616_v17  ;;  %v8633_v18 = vcombine.high %v3052_v36, %v3056_v8  ;;  %v3063_v17 = vld [vmem:[#allocation6 + $0x3e0] sm:$0xff]  ;;  %10228 = vst [vmem:[#allocation72_spill] sm:$0xff] %v8640_v1  ;;  %v2942_v36 = vld [vmem:[#allocation6 + $0x18] sm:$0xff] }
 0x94e   : > { %3733 = vmatprep.subr.bf16.mxu0 %v8622_v4  ;;  %3774 = vmatprep.subr.bf16.mxu1 %v8626_v31  ;;  %v8648_v15 = vcombine.high %v3059_v37, %v3063_v17  ;;  %v8650_v4 = vcombine.high %v3060_v40, %v3064_v9  ;;  %v2941_v31 = vld [vmem:[#allocation6 + $0x10] sm:$0xff]  ;;  %v2946_v8 = vld [vmem:[#allocation6 + $0x38] sm:$0xff]  ;;  %v8656_v62 = vcombine.low %v3059_v37, %v3063_v17  ;;  %v2626_v40 = vld [vmem:[%s8675_s23] sm:$0xff] }
 0x94f   : > { %10226 = vst [vmem:[#allocation70_spill] sm:$0xff] %v8633_v18  ;;  %v8670_v37 = vcombine.low %v2941_v31, %v2945_v42  ;;  %v8672_v9 = vcombine.low %v2942_v36, %v2946_v8  ;;  %v2627_v17 = vld [vmem:[%s8675_s23 + $0x8] sm:$0xff] }
 0x950   : > { %10229 = vst [vmem:[#allocation73_spill] sm:$0xff] %v8648_v15  ;;  %10230 = vst [vmem:[#allocation74_spill] sm:$0xff] %v8650_v4 }
 0x951   : > { %3734 = vmatpush1.bf16.msra.mxu0 %v8624_v0  ;;  %3775 = vmatpush1.bf16.msra.mxu1 %v8628_v49  ;;  %10231 = vst [vmem:[#allocation75_spill] sm:$0xff] %v8656_v62  ;;  %10235 = vst [vmem:[#allocation79_spill] sm:$0xff] %v8672_v9  ;;  %v2628_v49 = vld [vmem:[%s8675_s23 + $0x10] sm:$0xff] }
 0x952   : > { %3735 = vmatprep.subr.bf16.mxu0 %v8630_v44  ;;  %3776 = vmatprep.subr.bf16.mxu1 %v8633_v18  ;;  %v8662_v18 = vcombine.high %v2941_v31, %v2945_v42  ;;  %v8664_v44 = vcombine.high %v2942_v36, %v2946_v8  ;;  %v2629_v31 = vld [vmem:[%s8675_s23 + $0x18] sm:$0xff]  ;;  %v8690_v34 = vunpack.c.l.bf16 %v2628_v49 }
 0x954   : > { %10233 = vst [vmem:[#allocation77_spill] sm:$0xff] %v8662_v18  ;;  %10234 = vst [vmem:[#allocation78_spill] sm:$0xff] %v8664_v44 }
 0x955   : > { %3736 = vmatpush1.bf16.msra.mxu0 %v8638_v22  ;;  %3777 = vmatpush1.bf16.msra.mxu1 %v8640_v1  ;;  %v8686_v1 = vunpack.c.l.bf16 %v2629_v31  ;;  %10239 = vst [vmem:[#allocation83_spill] sm:$0xff] %v8690_v34 }
 0x956   : > { %3737 = vmatprep.subr.bf16.mxu0 %v8648_v15  ;;  %3778 = vmatprep.subr.bf16.mxu1 %v8650_v4 }
 0x957   : > { %10238 = vst [vmem:[#allocation82_spill] sm:$0xff] %v8686_v1 }
 0x959   : > { %3738 = vmatpush1.bf16.msra.mxu0 %v8656_v62  ;;  %3779 = vmatpush1.bf16.msra.mxu1 %v8658_v48  ;;  %v8679_v48 = vunpack.c.l.bf16 %v2626_v40 }
 0x95a   : > { %3789 = vmatprep.subr.bf16.mxu0 %v8662_v18  ;;  %3830 = vmatprep.subr.bf16.mxu1 %v8664_v44  ;;  %v8681_v18 = vunpack.c.l.bf16 %v2627_v17 }
 0x95b   : > { %10236 = vst [vmem:[#allocation80_spill] sm:$0xff] %v8679_v48 }
 0x95c   : > { %10237 = vst [vmem:[#allocation81_spill] sm:$0xff] %v8681_v18 }
 0x9ef   : > { %v2861_v44 = vpop.f32.mrb[0].mxu0  ;;  %v2902_v0 = vpop.f32.mrb[0].mxu1 }
 0x9f0   : > { %v2909_v42 = vadd.f32 %v2861_v44, %v8679_v48  ;;  %v2863_v36 = vpop.f32.mrb[1].mxu0  ;;  %v2904_v40 = vpop.f32.mrb[1].mxu1 }
 0x9f1   : > { %v2910_v8 = vadd.f32 %v2863_v36, %v8681_v18  ;;  %v2865_v62 = vpop.f32.mrb[2].mxu0  ;;  %v2912_v17 = vadd.f32 %v2904_v40, %v8686_v1  ;;  %v2906_v58 = vpop.f32.mrb[2].mxu1  ;;  %v2911_v36 = vadd.f32 %v2902_v0, %v8690_v34  ;;  %v2970_v34 = vld [vmem:[#allocation6 + $0xf8] sm:$0xff] }
 0x9f2   : > { %v6004_v4 = vmul.f32 -1.442695, %v2909_v42  ;;  %v2866_v15 = vpop.f32.mrb[3].mxu0  ;;  %v2907_v44 = vpop.f32.mrb[3].mxu1 }
 0x9f3   : > { %v6005_v22 = vmul.f32 -1.442695, %v2910_v8  ;;  %v6006_v48 = vmul.f32 -1.442695, %v2912_v17 }
 0x9f4   : > { %6887 = vpow2.f32 %v6004_v4 }
 0x9f5   : > { %6889 = vpow2.f32 %v6005_v22 }
 0x9f6   : > { %6891 = vpow2.f32 %v6006_v48  ;;  %v2949_v48 = vld [vmem:[#allocation6 + $0x50] sm:$0xff] }
 0x9f7   : > { %6893 = vtanh.f32 %v2911_v36  ;;  %v2953_v36 = vld [vmem:[#allocation6 + $0x70] sm:$0xff] }
 0x9f8   : > { %v8699_v1 = vcombine.high %v2949_v48, %v2953_v36 }
 0x9fa   : > { %10241 = vst [vmem:[#allocation85_spill] sm:$0xff] %v8699_v1 }
 0x9fe   : > { %v6888_v62 = vpop.eup %6887 }
 0x9ff   : > { %v6890_v15 = vpop.eup %6889  ;;  %v2916_v31 = vadd.f32 1.0, %v6888_v62  ;;  %v2950_v62 = vld [vmem:[#allocation6 + $0x58] sm:$0xff] }
 0xa00   : > { %v2922_v42 = vadd.f32 1.0, %v6890_v15  ;;  %v6892_v4 = vpop.eup %6891  ;;  %v2954_v15 = vld [vmem:[#allocation6 + $0x78] sm:$0xff] }
 0xa01   : > { %6895 = vrcp.f32 %v2916_v31  ;;  %v6894_v22 = vpop.eup %6893  ;;  %v2929_v18 = vadd.f32 1.0, %v6892_v4  ;;  %v8701_v4 = vcombine.high %v2950_v62, %v2954_v15 }
 0xa02   : > { %6897 = vrcp.f32 %v2922_v42 }
 0xa03   : > { %6899 = vrcp.f32 %v2929_v18  ;;  %10242 = vst [vmem:[#allocation86_spill] sm:$0xff] %v8701_v4  ;;  %v8707_v18 = vcombine.low %v2949_v48, %v2953_v36 }
 0xa05   : > { %10243 = vst [vmem:[#allocation87_spill] sm:$0xff] %v8707_v18 }
 0xa0b   : > { %v6896_v8 = vpop.eup %6895 }
 0xa0c   : > { %v6898_v40 = vpop.eup %6897  ;;  %v2933_v58 = vmul.f32 %v6896_v8, %v6894_v22  ;;  %v2957_v22 = vld [vmem:[#allocation6 + $0x90] sm:$0xff]  ;;  %v2958_v8 = vld [vmem:[#allocation6 + $0x98] sm:$0xff] }
 0xa0d   : > { %v2932_v49 = vmul.f32 %v7135_v6, %v6898_v40  ;;  %v6900_v0 = vpop.eup %6899  ;;  %v2961_v6 = vld [vmem:[#allocation6 + $0xb0] sm:$0xff]  ;;  %v2962_v40 = vld [vmem:[#allocation6 + $0xb8] sm:$0xff] }
 0xa0e   : > { %v8721_v48 = vcombine.low %v2957_v22, %v2961_v6  ;;  %v8723_v36 = vcombine.low %v2958_v8, %v2962_v40 }
 0xa0f   : > { %v8694_v44 = vadd.f32 %v2933_v58, %v2932_v49  ;;  %v8709_v58 = vcombine.low %v2950_v62, %v2954_v15  ;;  %v8713_v49 = vcombine.high %v2957_v22, %v2961_v6 }
 0xa10   : > { %10247 = vst [vmem:[#allocation91_spill] sm:$0xff] %v8721_v48  ;;  %10248 = vst [vmem:[#allocation92_spill] sm:$0xff] %v8723_v36 }
 0xa11   : > { %10240 = vst [vmem:[#allocation84_spill] sm:$0xff] %v8694_v44  ;;  %6901 = vtanh.f32 %v8694_v44  ;;  %10244 = vst [vmem:[#allocation88_spill] sm:$0xff] %v8709_v58  ;;  %v2966_v44 = vld [vmem:[#allocation6 + $0xd8] sm:$0xff] }
 0xa12   : > { %10245 = vst [vmem:[#allocation89_spill] sm:$0xff] %v8713_v49  ;;  %v8729_v15 = vcombine.high %v2966_v44, %v2970_v34  ;;  %v8735_v6 = vcombine.low %v2966_v44, %v2970_v34 }
 0xa14   : > { %10250 = vst [vmem:[#allocation94_spill] sm:$0xff] %v8729_v15  ;;  %10252 = vst [vmem:[#allocation96_spill] sm:$0xff] %v8735_v6 }
 0xa1b   : > { %v6902_v17 = vpop.eup %6901 }
 0xa1c   : > { %v2936_v31 = vmul.f32 %v6902_v17, %v6900_v0  ;;  %v8715_v0 = vcombine.high %v2958_v8, %v2962_v40  ;;  %v2965_v17 = vld [vmem:[#allocation6 + $0xd0] sm:$0xff] }
 0xa1e   : > { %v8697_v42 = vpack.c.bf16 %v2936_v31, %v2936_v31  ;;  %10246 = vst [vmem:[#allocation90_spill] sm:$0xff] %v8715_v0  ;;  %v2969_v31 = vld [vmem:[#allocation6 + $0xf0] sm:$0xff] }
 0xa1f   : > { %v8727_v62 = vcombine.high %v2965_v17, %v2969_v31  ;;  %v8733_v22 = vcombine.low %v2965_v17, %v2969_v31 }
 0xa20   : > { %3740 = vmatmul.mubr.bf16.vlgmr.msra.gmra.mrb[4].mxu0 %v8697_v42  ;;  %3781 = vmatmul.mubr.bf16.vlgmr.msra.gmra.mrb[4].mxu1 %v8697_v42 }
 0xa21   : > { %3790 = vmatpush1.bf16.msra.mxu0 %v8670_v37  ;;  %3831 = vmatpush1.bf16.msra.mxu1 %v8672_v9  ;;  %10249 = vst [vmem:[#allocation93_spill] sm:$0xff] %v8727_v62  ;;  %v2974_v9 = vld [vmem:[#allocation6 + $0x118] sm:$0xff]  ;;  %10251 = vst [vmem:[#allocation95_spill] sm:$0xff] %v8733_v22 }
 0xa22   : > { %3791 = vmatprep.subr.bf16.mxu0 %v8699_v1  ;;  %3832 = vmatprep.subr.bf16.mxu1 %v8701_v4  ;;  %v2973_v4 = vld [vmem:[#allocation6 + $0x110] sm:$0xff] }
 0xa23   : > { %3821 = vmatprep.mubr.bf16.mxu0 %v8644_v54  ;;  %3862 = vmatprep.mubr.bf16.mxu1 %v8644_v54  ;;  %v2977_v1 = vld [vmem:[#allocation6 + $0x130] sm:$0xff]  ;;  %v2978_v54 = vld [vmem:[#allocation6 + $0x138] sm:$0xff] }
 0xa24   : > { %v8739_v8 = vcombine.high %v2973_v4, %v2977_v1  ;;  %v8741_v40 = vcombine.high %v2974_v9, %v2978_v54  ;;  %v8745_v17 = vcombine.low %v2973_v4, %v2977_v1  ;;  %v8747_v34 = vcombine.low %v2974_v9, %v2978_v54 }
 0xa25   : > { %3792 = vmatpush1.bf16.msra.mxu0 %v8707_v18  ;;  %3833 = vmatpush1.bf16.msra.mxu1 %v8709_v58  ;;  %v2982_v58 = vld [vmem:[#allocation6 + $0x158] sm:$0xff] }
 0xa26   : > { %3793 = vmatprep.subr.bf16.mxu0 %v8713_v49  ;;  %3834 = vmatprep.subr.bf16.mxu1 %v8715_v0  ;;  %10253 = vst [vmem:[#allocation97_spill] sm:$0xff] %v8739_v8  ;;  %10254 = vst [vmem:[#allocation98_spill] sm:$0xff] %v8741_v40  ;;  %v2981_v0 = vld [vmem:[#allocation6 + $0x150] sm:$0xff]  ;;  %v2986_v18 = vld [vmem:[#allocation6 + $0x178] sm:$0xff] }
 0xa27   : > { %v2985_v49 = vld [vmem:[#allocation6 + $0x170] sm:$0xff]  ;;  %10255 = vst [vmem:[#allocation99_spill] sm:$0xff] %v8745_v17  ;;  %10256 = vst [vmem:[#allocation100_spill] sm:$0xff] %v8747_v34  ;;  %v8753_v31 = vcombine.high %v2982_v58, %v2986_v18  ;;  %v8759_v9 = vcombine.low %v2982_v58, %v2986_v18 }
 0xa28   : > { %v8751_v44 = vcombine.high %v2981_v0, %v2985_v49  ;;  %v8757_v1 = vcombine.low %v2981_v0, %v2985_v49 }
 0xa29   : > { %3794 = vmatpush1.bf16.msra.mxu0 %v8721_v48  ;;  %3835 = vmatpush1.bf16.msra.mxu1 %v8723_v36  ;;  %10258 = vst [vmem:[#allocation102_spill] sm:$0xff] %v8753_v31  ;;  %v2990_v36 = vld [vmem:[#allocation6 + $0x198] sm:$0xff]  ;;  %10260 = vst [vmem:[#allocation104_spill] sm:$0xff] %v8759_v9 }
 0xa2a   : > { %3795 = vmatprep.subr.bf16.mxu0 %v8727_v62  ;;  %3836 = vmatprep.subr.bf16.mxu1 %v8729_v15  ;;  %10257 = vst [vmem:[#allocation101_spill] sm:$0xff] %v8751_v44  ;;  %v2989_v15 = vld [vmem:[#allocation6 + $0x190] sm:$0xff]  ;;  %v2994_v48 = vld [vmem:[#allocation6 + $0x1b8] sm:$0xff]  ;;  %10259 = vst [vmem:[#allocation103_spill] sm:$0xff] %v8757_v1 }
 0xa2b   : > { %v2993_v62 = vld [vmem:[#allocation6 + $0x1b0] sm:$0xff]  ;;  %v8765_v54 = vcombine.high %v2990_v36, %v2994_v48  ;;  %v8771_v18 = vcombine.low %v2990_v36, %v2994_v48 }
 0xa2c   : > { %v8763_v4 = vcombine.high %v2989_v15, %v2993_v62  ;;  %v8769_v49 = vcombine.low %v2989_v15, %v2993_v62 }
 0xa2d   : > { %3796 = vmatpush1.bf16.msra.mxu0 %v8733_v22  ;;  %3837 = vmatpush1.bf16.msra.mxu1 %v8735_v6  ;;  %10262 = vst [vmem:[#allocation106_spill] sm:$0xff] %v8765_v54  ;;  %v2998_v6 = vld [vmem:[#allocation6 + $0x1d8] sm:$0xff]  ;;  %10264 = vst [vmem:[#allocation108_spill] sm:$0xff] %v8771_v18 }
 0xa2e   : > { %3797 = vmatprep.subr.bf16.mxu0 %v8739_v8  ;;  %3838 = vmatprep.subr.bf16.mxu1 %v8741_v40  ;;  %10261 = vst [vmem:[#allocation105_spill] sm:$0xff] %v8763_v4  ;;  %v2997_v40 = vld [vmem:[#allocation6 + $0x1d0] sm:$0xff]  ;;  %v3002_v22 = vld [vmem:[#allocation6 + $0x1f8] sm:$0xff]  ;;  %10263 = vst [vmem:[#allocation107_spill] sm:$0xff] %v8769_v49 }
 0xa2f   : > { %v3001_v8 = vld [vmem:[#allocation6 + $0x1f0] sm:$0xff]  ;;  %v8777_v0 = vcombine.high %v2998_v6, %v3002_v22  ;;  %v8783_v48 = vcombine.low %v2998_v6, %v3002_v22 }
 0xa30   : > { %v8775_v58 = vcombine.high %v2997_v40, %v3001_v8  ;;  %v8781_v62 = vcombine.low %v2997_v40, %v3001_v8 }
 0xa31   : > { %3798 = vmatpush1.bf16.msra.mxu0 %v8745_v17  ;;  %3839 = vmatpush1.bf16.msra.mxu1 %v8747_v34  ;;  %10266 = vst [vmem:[#allocation110_spill] sm:$0xff] %v8777_v0  ;;  %v3006_v34 = vld [vmem:[#allocation6 + $0x218] sm:$0xff]  ;;  %10268 = vst [vmem:[#allocation112_spill] sm:$0xff] %v8783_v48 }
 0xa32   : > { %3799 = vmatprep.subr.bf16.mxu0 %v8751_v44  ;;  %3840 = vmatprep.subr.bf16.mxu1 %v8753_v31  ;;  %10265 = vst [vmem:[#allocation109_spill] sm:$0xff] %v8775_v58  ;;  %v3005_v31 = vld [vmem:[#allocation6 + $0x210] sm:$0xff]  ;;  %v3010_v17 = vld [vmem:[#allocation6 + $0x238] sm:$0xff]  ;;  %10267 = vst [vmem:[#allocation111_spill] sm:$0xff] %v8781_v62 }
 0xa33   : > { %v3009_v44 = vld [vmem:[#allocation6 + $0x230] sm:$0xff]  ;;  %v8789_v15 = vcombine.high %v3006_v34, %v3010_v17  ;;  %v8795_v22 = vcombine.low %v3006_v34, %v3010_v17 }
 0xa34   : > { %v8787_v36 = vcombine.high %v3005_v31, %v3009_v44  ;;  %v8793_v8 = vcombine.low %v3005_v31, %v3009_v44 }
 0xa35   : > { %3800 = vmatpush1.bf16.msra.mxu0 %v8757_v1  ;;  %3841 = vmatpush1.bf16.msra.mxu1 %v8759_v9  ;;  %10270 = vst [vmem:[#allocation114_spill] sm:$0xff] %v8789_v15  ;;  %v3014_v9 = vld [vmem:[#allocation6 + $0x258] sm:$0xff]  ;;  %10272 = vst [vmem:[#allocation116_spill] sm:$0xff] %v8795_v22 }
 0xa36   : > { %3801 = vmatprep.subr.bf16.mxu0 %v8763_v4  ;;  %3842 = vmatprep.subr.bf16.mxu1 %v8765_v54  ;;  %10269 = vst [vmem:[#allocation113_spill] sm:$0xff] %v8787_v36  ;;  %v3013_v54 = vld [vmem:[#allocation6 + $0x250] sm:$0xff]  ;;  %v3018_v1 = vld [vmem:[#allocation6 + $0x278] sm:$0xff]  ;;  %10271 = vst [vmem:[#allocation115_spill] sm:$0xff] %v8793_v8 }
 0xa37   : > { %v3017_v4 = vld [vmem:[#allocation6 + $0x270] sm:$0xff]  ;;  %v8801_v40 = vcombine.high %v3014_v9, %v3018_v1  ;;  %v8807_v17 = vcombine.low %v3014_v9, %v3018_v1 }
 0xa38   : > { %v8799_v6 = vcombine.high %v3013_v54, %v3017_v4  ;;  %v8805_v44 = vcombine.low %v3013_v54, %v3017_v4 }
 0xa39   : > { %3802 = vmatpush1.bf16.msra.mxu0 %v8769_v49  ;;  %3843 = vmatpush1.bf16.msra.mxu1 %v8771_v18  ;;  %10274 = vst [vmem:[#allocation118_spill] sm:$0xff] %v8801_v40  ;;  %v3022_v18 = vld [vmem:[#allocation6 + $0x298] sm:$0xff]  ;;  %10276 = vst [vmem:[#allocation120_spill] sm:$0xff] %v8807_v17 }
 0xa3a   : > { %3803 = vmatprep.subr.bf16.mxu0 %v8775_v58  ;;  %3844 = vmatprep.subr.bf16.mxu1 %v8777_v0  ;;  %10273 = vst [vmem:[#allocation117_spill] sm:$0xff] %v8799_v6  ;;  %v3021_v0 = vld [vmem:[#allocation6 + $0x290] sm:$0xff]  ;;  %v3026_v49 = vld [vmem:[#allocation6 + $0x2b8] sm:$0xff]  ;;  %10275 = vst [vmem:[#allocation119_spill] sm:$0xff] %v8805_v44 }
 0xa3b   : > { %v3025_v58 = vld [vmem:[#allocation6 + $0x2b0] sm:$0xff]  ;;  %v8813_v31 = vcombine.high %v3022_v18, %v3026_v49  ;;  %v8819_v1 = vcombine.low %v3022_v18, %v3026_v49 }
 0xa3c   : > { %v8811_v34 = vcombine.high %v3021_v0, %v3025_v58  ;;  %v8817_v4 = vcombine.low %v3021_v0, %v3025_v58 }
 0xa3d   : > { %3804 = vmatpush1.bf16.msra.mxu0 %v8781_v62  ;;  %3845 = vmatpush1.bf16.msra.mxu1 %v8783_v48  ;;  %10278 = vst [vmem:[#allocation122_spill] sm:$0xff] %v8813_v31  ;;  %v3030_v48 = vld [vmem:[#allocation6 + $0x2d8] sm:$0xff]  ;;  %10280 = vst [vmem:[#allocation124_spill] sm:$0xff] %v8819_v1 }
 0xa3e   : > { %3805 = vmatprep.subr.bf16.mxu0 %v8787_v36  ;;  %3846 = vmatprep.subr.bf16.mxu1 %v8789_v15  ;;  %10277 = vst [vmem:[#allocation121_spill] sm:$0xff] %v8811_v34  ;;  %v3029_v15 = vld [vmem:[#allocation6 + $0x2d0] sm:$0xff]  ;;  %v3034_v62 = vld [vmem:[#allocation6 + $0x2f8] sm:$0xff]  ;;  %10279 = vst [vmem:[#allocation123_spill] sm:$0xff] %v8817_v4 }
 0xa3f   : > { %v3033_v36 = vld [vmem:[#allocation6 + $0x2f0] sm:$0xff]  ;;  %v8825_v54 = vcombine.high %v3030_v48, %v3034_v62  ;;  %v8831_v49 = vcombine.low %v3030_v48, %v3034_v62 }
 0xa40   : > { %v8823_v9 = vcombine.high %v3029_v15, %v3033_v36  ;;  %v8829_v58 = vcombine.low %v3029_v15, %v3033_v36 }
 0xa41   : > { %3806 = vmatpush1.bf16.msra.mxu0 %v8793_v8  ;;  %3847 = vmatpush1.bf16.msra.mxu1 %v8795_v22  ;;  %10282 = vst [vmem:[#allocation126_spill] sm:$0xff] %v8825_v54  ;;  %v3038_v22 = vld [vmem:[#allocation6 + $0x318] sm:$0xff]  ;;  %10284 = vst [vmem:[#allocation128_spill] sm:$0xff] %v8831_v49 }
 0xa42   : > { %3807 = vmatprep.subr.bf16.mxu0 %v8799_v6  ;;  %3848 = vmatprep.subr.bf16.mxu1 %v8801_v40  ;;  %10281 = vst [vmem:[#allocation125_spill] sm:$0xff] %v8823_v9  ;;  %v3037_v40 = vld [vmem:[#allocation6 + $0x310] sm:$0xff]  ;;  %v3042_v8 = vld [vmem:[#allocation6 + $0x338] sm:$0xff]  ;;  %10283 = vst [vmem:[#allocation127_spill] sm:$0xff] %v8829_v58 }
 0xa43   : > { %v3041_v6 = vld [vmem:[#allocation6 + $0x330] sm:$0xff]  ;;  %v8837_v0 = vcombine.high %v3038_v22, %v3042_v8  ;;  %v8843_v62 = vcombine.low %v3038_v22, %v3042_v8 }
 0xa44   : > { %v8835_v18 = vcombine.high %v3037_v40, %v3041_v6  ;;  %v8841_v36 = vcombine.low %v3037_v40, %v3041_v6 }
 0xa45   : > { %3808 = vmatpush1.bf16.msra.mxu0 %v8805_v44  ;;  %3849 = vmatpush1.bf16.msra.mxu1 %v8807_v17  ;;  %10286 = vst [vmem:[#allocation130_spill] sm:$0xff] %v8837_v0  ;;  %v3046_v17 = vld [vmem:[#allocation6 + $0x358] sm:$0xff]  ;;  %10288 = vst [vmem:[#allocation132_spill] sm:$0xff] %v8843_v62 }
 0xa46   : > { %3809 = vmatprep.subr.bf16.mxu0 %v8811_v34  ;;  %3850 = vmatprep.subr.bf16.mxu1 %v8813_v31  ;;  %10285 = vst [vmem:[#allocation129_spill] sm:$0xff] %v8835_v18  ;;  %v3045_v31 = vld [vmem:[#allocation6 + $0x350] sm:$0xff]  ;;  %v3050_v44 = vld [vmem:[#allocation6 + $0x378] sm:$0xff]  ;;  %10287 = vst [vmem:[#allocation131_spill] sm:$0xff] %v8841_v36 }
 0xa47   : > { %v3049_v34 = vld [vmem:[#allocation6 + $0x370] sm:$0xff]  ;;  %v8849_v15 = vcombine.high %v3046_v17, %v3050_v44  ;;  %v8855_v8 = vcombine.low %v3046_v17, %v3050_v44 }
 0xa48   : > { %v8847_v48 = vcombine.high %v3045_v31, %v3049_v34  ;;  %v8853_v6 = vcombine.low %v3045_v31, %v3049_v34 }
 0xa49   : > { %3810 = vmatpush1.bf16.msra.mxu0 %v8817_v4  ;;  %3851 = vmatpush1.bf16.msra.mxu1 %v8819_v1  ;;  %10290 = vst [vmem:[#allocation134_spill] sm:$0xff] %v8849_v15  ;;  %v3054_v1 = vld [vmem:[#allocation6 + $0x398] sm:$0xff]  ;;  %10292 = vst [vmem:[#allocation136_spill] sm:$0xff] %v8855_v8 }
 0xa4a   : > { %3811 = vmatprep.subr.bf16.mxu0 %v8823_v9  ;;  %3852 = vmatprep.subr.bf16.mxu1 %v8825_v54  ;;  %10289 = vst [vmem:[#allocation133_spill] sm:$0xff] %v8847_v48  ;;  %v3053_v54 = vld [vmem:[#allocation6 + $0x390] sm:$0xff]  ;;  %v3058_v4 = vld [vmem:[#allocation6 + $0x3b8] sm:$0xff]  ;;  %10291 = vst [vmem:[#allocation135_spill] sm:$0xff] %v8853_v6 }
 0xa4b   : > { %v3057_v9 = vld [vmem:[#allocation6 + $0x3b0] sm:$0xff]  ;;  %v8861_v40 = vcombine.high %v3054_v1, %v3058_v4  ;;  %v8867_v44 = vcombine.low %v3054_v1, %v3058_v4  ;;  %v10302_v4 = vld [vmem:[#allocation56_spill] sm:$0xff] }
 0xa4c   : > { %v8859_v22 = vcombine.high %v3053_v54, %v3057_v9  ;;  %v8865_v34 = vcombine.low %v3053_v54, %v3057_v9  ;;  %v10303_v1 = vld [vmem:[#allocation57_spill] sm:$0xff]  ;;  %v10304_v9 = vld [vmem:[#allocation58_spill] sm:$0xff]  ;;  %v10305_v54 = vld [vmem:[#allocation59_spill] sm:$0xff] }
 0xa4d   : > { %3812 = vmatpush1.bf16.msra.mxu0 %v8829_v58  ;;  %3853 = vmatpush1.bf16.msra.mxu1 %v8831_v49  ;;  %10294 = vst [vmem:[#allocation138_spill] sm:$0xff] %v8861_v40  ;;  %v3062_v49 = vld [vmem:[#allocation6 + $0x3d8] sm:$0xff]  ;;  %10296 = vst [vmem:[#allocation140_spill] sm:$0xff] %v8867_v44 }
 0xa4e   : > { %3813 = vmatprep.subr.bf16.mxu0 %v8835_v18  ;;  %3854 = vmatprep.subr.bf16.mxu1 %v8837_v0  ;;  %10293 = vst [vmem:[#allocation137_spill] sm:$0xff] %v8859_v22  ;;  %v3061_v0 = vld [vmem:[#allocation6 + $0x3d0] sm:$0xff]  ;;  %v3066_v58 = vld [vmem:[#allocation6 + $0x3f8] sm:$0xff]  ;;  %10295 = vst [vmem:[#allocation139_spill] sm:$0xff] %v8865_v34 }
 0xa4f   : > { %v3065_v18 = vld [vmem:[#allocation6 + $0x3f0] sm:$0xff]  ;;  %v8873_v31 = vcombine.high %v3062_v49, %v3066_v58 }
 0xa50   : > { %v8871_v17 = vcombine.high %v3061_v0, %v3065_v18 }
 0xa51   : > { %3814 = vmatpush1.bf16.msra.mxu0 %v8841_v36  ;;  %3855 = vmatpush1.bf16.msra.mxu1 %v8843_v62  ;;  %10298 = vst [vmem:[#allocation142_spill] sm:$0xff] %v8873_v31 }
 0xa52   : > { %3815 = vmatprep.subr.bf16.mxu0 %v8847_v48  ;;  %3856 = vmatprep.subr.bf16.mxu1 %v8849_v15  ;;  %10297 = vst [vmem:[#allocation141_spill] sm:$0xff] %v8871_v17  ;;  %v8877_v15 = vcombine.low %v3061_v0, %v3065_v18  ;;  %v10308_v18 = vld [vmem:[#allocation62_spill] sm:$0xff]  ;;  %v10309_v0 = vld [vmem:[#allocation63_spill] sm:$0xff] }
 0xa54   : > { %10299 = vst [vmem:[#allocation143_spill] sm:$0xff] %v8877_v15 }
 0xa55   : > { %3816 = vmatpush1.bf16.msra.mxu0 %v8853_v6  ;;  %3857 = vmatpush1.bf16.msra.mxu1 %v8855_v8  ;;  %v8879_v6 = vcombine.low %v3062_v49, %v3066_v58  ;;  %v10306_v58 = vld [vmem:[#allocation60_spill] sm:$0xff]  ;;  %v10307_v49 = vld [vmem:[#allocation61_spill] sm:$0xff] }
 0xa56   : > { %3817 = vmatprep.subr.bf16.mxu0 %v8859_v22  ;;  %3858 = vmatprep.subr.bf16.mxu1 %v8861_v40 }
 0xa57   : > { %10300 = vst [vmem:[#allocation144_spill] sm:$0xff] %v8879_v6 }
 0xa59   : > { %3818 = vmatpush1.bf16.msra.mxu0 %v8865_v34  ;;  %3859 = vmatpush1.bf16.msra.mxu1 %v8867_v44 }
 0xa5a   : > { %3819 = vmatprep.subr.bf16.mxu0 %v8871_v17  ;;  %3860 = vmatprep.subr.bf16.mxu1 %v8873_v31 }
 0xa5d   : > { %3820 = vmatpush1.bf16.msra.mxu0 %v8877_v15  ;;  %3861 = vmatpush1.bf16.msra.mxu1 %v8879_v6 }
 0xa5e   : > { %3962 = vmatprep.subr.bf16.mxu0 %v8461_v63  ;;  %4003 = vmatprep.subr.bf16.mxu1 %v8473_v11 }
 0xa60   : > { %3822 = vmatmul.mubr.bf16.vlgmr.msra.gmra.mrb[8].mxu0 %v8697_v42  ;;  %3863 = vmatmul.mubr.bf16.vlgmr.msra.gmra.mrb[8].mxu1 %v8697_v42  ;;  %v10301_v42 = vld [vmem:[#allocation55_spill] sm:$0xff] }
 0xa61   : > { %3963 = vmatpush1.bf16.msra.mxu0 %v8468_v2  ;;  %4004 = vmatpush1.bf16.msra.mxu1 %v8478_v57 }
 0xa62   : > { %3964 = vmatprep.subr.bf16.mxu0 %v8471_v12  ;;  %4005 = vmatprep.subr.bf16.mxu1 %v8484_v10 }
 0xa65   : > { %3965 = vmatpush1.bf16.msra.mxu0 %v8476_v59  ;;  %4006 = vmatpush1.bf16.msra.mxu1 %v8490_v50 }
 0xa66   : > { %3966 = vmatprep.subr.bf16.mxu0 %v8481_v61  ;;  %4007 = vmatprep.subr.bf16.mxu1 %v8496_v3 }
 0xa69   : > { %3967 = vmatpush1.bf16.msra.mxu0 %v8487_v19  ;;  %4008 = vmatpush1.bf16.msra.mxu1 %v8502_v33 }
 0xa6a   : > { %3968 = vmatprep.subr.bf16.mxu0 %v8493_v5  ;;  %4009 = vmatprep.subr.bf16.mxu1 %v8506_v16 }
 0xa6d   : > { %3969 = vmatpush1.bf16.msra.mxu0 %v8499_v14  ;;  %4010 = vmatpush1.bf16.msra.mxu1 %v8510_v20 }
 0xa6e   : > { %3970 = vmatprep.subr.bf16.mxu0 %v8514_v39  ;;  %4011 = vmatprep.subr.bf16.mxu1 %v8516_v23 }
 0xa71   : > { %3971 = vmatpush1.bf16.msra.mxu0 %v8518_v7  ;;  %4012 = vmatpush1.bf16.msra.mxu1 %v8520_v38 }
 0xa72   : > { %3972 = vmatprep.subr.bf16.mxu0 %v8526_v30  ;;  %4013 = vmatprep.subr.bf16.mxu1 %v8528_v43 }
 0xa75   : > { %3973 = vmatpush1.bf16.msra.mxu0 %v8530_v35  ;;  %4014 = vmatpush1.bf16.msra.mxu1 %v8532_v47 }
 0xa76   : > { %3974 = vmatprep.subr.bf16.mxu0 %v8538_v29  ;;  %4015 = vmatprep.subr.bf16.mxu1 %v8540_v52 }
 0xa79   : > { %3975 = vmatpush1.bf16.msra.mxu0 %v8542_v53  ;;  %4016 = vmatpush1.bf16.msra.mxu1 %v8544_v45 }
 0xa7a   : > { %3976 = vmatprep.subr.bf16.mxu0 %v8550_v55  ;;  %4017 = vmatprep.subr.bf16.mxu1 %v8552_v60 }
 0xa7d   : > { %3977 = vmatpush1.bf16.msra.mxu0 %v8554_v56  ;;  %4018 = vmatpush1.bf16.msra.mxu1 %v8556_v41 }
 0xa7e   : > { %3978 = vmatprep.subr.bf16.mxu0 %v8562_v24  ;;  %4019 = vmatprep.subr.bf16.mxu1 %v8564_v21  ;;  %v10334_v24 = vld [vmem:[#allocation81_spill] sm:$0xff] }
 0xa7f   : > { %v3876_v41 = vrot.slane %v10334_v24, 2 }
 0xa81   : > { %3979 = vmatpush1.bf16.msra.mxu0 %v8566_v13  ;;  %4020 = vmatpush1.bf16.msra.mxu1 %v8568_v25  ;;  %v10333_v13 = vld [vmem:[#allocation83_spill] sm:$0xff] }
 0xa82   : > { %3980 = vmatprep.subr.bf16.mxu0 %v8574_v32  ;;  %4021 = vmatprep.subr.bf16.mxu1 %v8576_v28  ;;  %v3877_v21 = vrot.slane %v10333_v13, 2 }
 0xa85   : > { %3981 = vmatpush1.bf16.msra.mxu0 %v8578_v26  ;;  %4022 = vmatpush1.bf16.msra.mxu1 %v8580_v46 }
 0xa86   : > { %3982 = vmatprep.subr.bf16.mxu0 %v8586_v51  ;;  %4023 = vmatprep.subr.bf16.mxu1 %v8588_v27  ;;  %v10310_v51 = vld [vmem:[#allocation64_spill] sm:$0xff]  ;;  %v10311_v27 = vld [vmem:[#allocation65_spill] sm:$0xff] }
 0xa89   : > { %3983 = vmatpush1.bf16.msra.mxu0 %v10301_v42  ;;  %4024 = vmatpush1.bf16.msra.mxu1 %v10302_v4  ;;  %v10312_v42 = vld [vmem:[#allocation67_spill] sm:$0xff]  ;;  %v10313_v4 = vld [vmem:[#allocation66_spill] sm:$0xff] }
 0xa8a   : > { %3984 = vmatprep.subr.bf16.mxu0 %v10303_v1  ;;  %4025 = vmatprep.subr.bf16.mxu1 %v10304_v9  ;;  %v10314_v1 = vld [vmem:[#allocation68_spill] sm:$0xff]  ;;  %v10315_v9 = vld [vmem:[#allocation69_spill] sm:$0xff] }
 0xa8d   : > { %3985 = vmatpush1.bf16.msra.mxu0 %v10305_v54  ;;  %4026 = vmatpush1.bf16.msra.mxu1 %v10306_v58  ;;  %v10316_v54 = vld [vmem:[#allocation70_spill] sm:$0xff]  ;;  %v10317_v58 = vld [vmem:[#allocation71_spill] sm:$0xff] }
 0xa8e   : > { %3986 = vmatprep.subr.bf16.mxu0 %v10307_v49  ;;  %4027 = vmatprep.subr.bf16.mxu1 %v10308_v18  ;;  %v10318_v49 = vld [vmem:[#allocation72_spill] sm:$0xff]  ;;  %v10319_v18 = vld [vmem:[#allocation73_spill] sm:$0xff] }
 0xa91   : > { %3987 = vmatpush1.bf16.msra.mxu0 %v10309_v0  ;;  %4028 = vmatpush1.bf16.msra.mxu1 %v10310_v51  ;;  %v10320_v0 = vld [vmem:[#allocation74_spill] sm:$0xff]  ;;  %v10321_v51 = vld [vmem:[#allocation75_spill] sm:$0xff] }
 0xa92   : > { %3988 = vmatprep.subr.bf16.mxu0 %v10311_v27  ;;  %4029 = vmatprep.subr.bf16.mxu1 %v10312_v42  ;;  %v10322_v27 = vld [vmem:[#allocation76_spill] sm:$0xff]  ;;  %v10323_v42 = vld [vmem:[#allocation77_spill] sm:$0xff] }
 0xa95   : > { %3989 = vmatpush1.bf16.msra.mxu0 %v10313_v4  ;;  %4030 = vmatpush1.bf16.msra.mxu1 %v10314_v1  ;;  %v10324_v4 = vld [vmem:[#allocation78_spill] sm:$0xff] }
 0xa96   : > { %3990 = vmatprep.subr.bf16.mxu0 %v10315_v9  ;;  %4031 = vmatprep.subr.bf16.mxu1 %v10316_v54 }
 0xa99   : > { %3991 = vmatpush1.bf16.msra.mxu0 %v10317_v58  ;;  %4032 = vmatpush1.bf16.msra.mxu1 %v10318_v49 }
 0xa9a   : > { %3992 = vmatprep.subr.bf16.mxu0 %v10319_v18  ;;  %4033 = vmatprep.subr.bf16.mxu1 %v10320_v0  ;;  %v3887_v0 = vld [vmem:[%s9867_s12] sm:$0xf] }
 0xa9b   : > { %v10325_v18 = vld [vmem:[#allocation11_spill] sm:$0xff] }
 0xa9d   : > { %3993 = vmatpush1.bf16.msra.mxu0 %v10321_v51  ;;  %4034 = vmatpush1.bf16.msra.mxu1 %v10322_v27  ;;  %v10326_v51 = vsub.s32 0, %v10325_v18 }
 0xa9e   : > { %4044 = vmatprep.subr.bf16.mxu0 %v10323_v42  ;;  %4085 = vmatprep.subr.bf16.mxu1 %v10324_v4  ;;  %v10328_v42 = vsub.s32 2, %v10325_v18  ;;  %v10330_v4 = vsub.s32 1, %v10325_v18 }
 0xa9f   : > { %v8958_v32 = vrot.slane %v3887_v0, %v10326_v51  ;;  %v10335_v51 = vld [vmem:[#allocation82_spill] sm:$0xff] }
 0xaa0   : > { %v8962_v27 = vrot.slane %v3887_v0, %v10328_v42  ;;  %v8966_v25 = vrot.slane %v3887_v0, %v10330_v4  ;;  %v3878_v56 = vrot.slane %v10335_v51, 2 }
 0xaa1   : > { %10327 = vst [vmem:[#allocation145_spill] sm:$0xff] %v8958_v32 }
 0xaa2   : > { %10329 = vst [vmem:[#allocation146_spill] sm:$0xff] %v8962_v27 }
 0xaf3   : > { %v3741_v1 = vpop.f32.mrb[4].mxu0  ;;  %v3782_v9 = vpop.f32.mrb[4].mxu1 }
 0xaf4   : > { %v3743_v46 = vpop.f32.mrb[5].mxu0  ;;  %v3784_v54 = vpop.f32.mrb[5].mxu1  ;;  %v3885_v13 = vadd.f32 %v3877_v21, %v3782_v9 }
 0xaf5   : > { %v3745_v26 = vpop.f32.mrb[6].mxu0  ;;  %v3786_v58 = vpop.f32.mrb[6].mxu1  ;;  %v3884_v35 = vadd.f32 %v3876_v41, %v3743_v46  ;;  %v3886_v43 = vadd.f32 %v3878_v56, %v3784_v54 }
 0xaf6   : > { %v3746_v28 = vpop.f32.mrb[7].mxu0  ;;  %v3787_v49 = vpop.f32.mrb[7].mxu1  ;;  %v10331_v26 = vsub.s32 3, %v10325_v18  ;;  %v10332_v58 = vld [vmem:[#allocation80_spill] sm:$0xff] }
 0xaf7   : > { %v3875_v49 = vrot.slane %v10332_v58, 2 }
 0xaf8   : > { %v8970_v28 = vrot.slane %v3887_v0, %v10331_v26 }
 0xaf9   : > { %v3883_v52 = vadd.f32 %v3875_v49, %v3741_v1 }
 0xb33   : > { %v3823_v60 = vpop.f32.mrb[8].mxu0  ;;  %v3864_v55 = vpop.f32.mrb[8].mxu1 }
 0xb34   : > { %v3909_v42 = vadd.f32 %v8958_v32, %v3823_v60  ;;  %v3911_v45 = vadd.f32 %v8962_v27, %v3864_v55  ;;  %v3825_v4 = vpop.f32.mrb[9].mxu0  ;;  %v3866_v53 = vpop.f32.mrb[9].mxu1 }
 0xb35   : > { %v3910_v18 = vadd.f32 %v8966_v25, %v3825_v4  ;;  %v3912_v0 = vadd.f32 %v8970_v28, %v3866_v53  ;;  %v3827_v26 = vpop.f32.mrb[10].mxu0  ;;  %v3868_v58 = vpop.f32.mrb[10].mxu1 }
 0xb36   : > { %v3917_v29 = vrot.slane %v3909_v42, 6  ;;  %v3919_v24 = vrot.slane %v3911_v45, 6  ;;  %v3828_v47 = vpop.f32.mrb[11].mxu0  ;;  %v3869_v51 = vpop.f32.mrb[11].mxu1  ;;  %v10338_v26 = vld [vmem:[#allocation79_spill] sm:$0xff] }
 0xb37   : > { %v3918_v30 = vrot.slane %v3910_v18, 6  ;;  %v3920_v60 = vrot.slane %v3912_v0, 6 }
 0xb38   : > { %v3925_v55 = vsel %vm486_vm1, %v3883_v52, %v3917_v29  ;;  %v3927_v27 = vsel %vm486_vm1, %v3885_v13, %v3919_v24  ;;  %v10336_v29 = vld [vmem:[#allocation12_spill] sm:$0xff] }
 0xb39   : > { %v6135_v32 = vmul.f32 -1.442695, %v3925_v55  ;;  %v3926_v4 = vsel %vm486_vm1, %v3884_v35, %v3918_v30  ;;  %v3928_v53 = vsel %vm486_vm1, %v3886_v43, %v3920_v60  ;;  %v3930_v52 = vrot.slane %v10336_v29, 6  ;;  %v10337_v35 = vld [vmem:[#allocation84_spill] sm:$0xff]  ;;  %v10339_v60 = vld [vmem:[#allocation85_spill] sm:$0xff]  ;;  %v10340_v55 = vld [vmem:[#allocation86_spill] sm:$0xff] }
 0xb3a   : > { %v6136_v58 = vmul.f32 -1.442695, %v3926_v4  ;;  %v6137_v21 = vmul.f32 -1.442695, %v3928_v53  ;;  %v10341_v4 = vld [vmem:[#allocation87_spill] sm:$0xff]  ;;  %v10342_v53 = vld [vmem:[#allocation88_spill] sm:$0xff] }
 0xb3b   : > { %6903 = vpow2.f32 %v6135_v32  ;;  %v3932_v43 = vsel %vm486_vm1, %v10337_v35, %v3930_v52  ;;  %v10349_v29 = vld [vmem:[#allocation95_spill] sm:$0xff]  ;;  %v10350_v52 = vld [vmem:[#allocation96_spill] sm:$0xff]  ;;  %v10355_v35 = vld [vmem:[#allocation101_spill] sm:$0xff] }
 0xb3c   : > { %6905 = vpow2.f32 %v6136_v58  ;;  %v10343_v58 = vld [vmem:[#allocation89_spill] sm:$0xff] }
 0xb3d   : > { %6907 = vpow2.f32 %v6137_v21  ;;  %v10344_v21 = vld [vmem:[#allocation90_spill] sm:$0xff] }
 0xb3e   : > { %6909 = vtanh.f32 %v3927_v27 }
 0xb45   : > { %v6904_v45 = vpop.eup %6903 }
 0xb46   : > { %v6906_v47 = vpop.eup %6905  ;;  %v3936_v1 = vadd.f32 1.0, %v6904_v45  ;;  %v10345_v45 = vld [vmem:[#allocation91_spill] sm:$0xff] }
 0xb47   : > { %v3942_v56 = vadd.f32 1.0, %v6906_v47  ;;  %v6908_v41 = vpop.eup %6907  ;;  %v10346_v47 = vld [vmem:[#allocation92_spill] sm:$0xff] }
 0xb48   : > { %6911 = vrcp.f32 %v3936_v1  ;;  %v6910_v24 = vpop.eup %6909  ;;  %v3949_v46 = vadd.f32 1.0, %v6908_v41  ;;  %v10347_v1 = vld [vmem:[#allocation93_spill] sm:$0xff] }
 0xb49   : > { %6913 = vrcp.f32 %v3942_v56  ;;  %v10348_v56 = vld [vmem:[#allocation94_spill] sm:$0xff]  ;;  %v10351_v41 = vld [vmem:[#allocation97_spill] sm:$0xff] }
 0xb4a   : > { %6915 = vrcp.f32 %v3949_v46  ;;  %v10358_v46 = vld [vmem:[#allocation104_spill] sm:$0xff] }
 0xb52   : > { %v6912_v13 = vpop.eup %6911 }
 0xb53   : > { %v6914_v30 = vpop.eup %6913  ;;  %v3953_v32 = vmul.f32 %v6912_v13, %v6910_v24  ;;  %v10352_v24 = vld [vmem:[#allocation98_spill] sm:$0xff]  ;;  %v10353_v13 = vld [vmem:[#allocation99_spill] sm:$0xff] }
 0xb54   : > { %v3952_v9 = vmul.f32 %v6914_v30, %v3932_v43  ;;  %v6916_v27 = vpop.eup %6915  ;;  %v10354_v30 = vld [vmem:[#allocation100_spill] sm:$0xff]  ;;  %v10356_v43 = vld [vmem:[#allocation102_spill] sm:$0xff] }
 0xb56   : > { %v8987_v54 = vadd.f32 %v3953_v32, %v3952_v9  ;;  %v10357_v32 = vld [vmem:[#allocation103_spill] sm:$0xff]  ;;  %v10359_v9 = vld [vmem:[#allocation105_spill] sm:$0xff] }
 0xb58   : > { %6917 = vtanh.f32 %v8987_v54 }
 0xb62   : > { %v6918_v18 = vpop.eup %6917 }
 0xb63   : > { %v3956_v49 = vmul.f32 %v6918_v18, %v6916_v27  ;;  %v10360_v27 = vld [vmem:[#allocation106_spill] sm:$0xff]  ;;  %v10361_v18 = vld [vmem:[#allocation107_spill] sm:$0xff] }
 0xb65   : > { %v3958_v51 = vrot.slane %v3956_v49, 2  ;;  %v8990_v0 = vpack.c.bf16 %v3956_v49, %v3956_v49  ;;  %v10362_v49 = vld [vmem:[#allocation108_spill] sm:$0xff] }
 0xb67   : > { %v3961_v42 = vpack.c.bf16 %v3958_v51, %v3958_v51  ;;  %v10363_v51 = vld [vmem:[#allocation109_spill] sm:$0xff] }
 0xb69   : > { %3994 = vmatprep.mubr.bf16.mxu0 %v3961_v42  ;;  %4035 = vmatprep.mubr.bf16.mxu1 %v3961_v42 }
 0xb6a   : > { %3995 = vmatmul.mubr.bf16.vlgmr.msra.gmra.mrb[12].mxu0 %v8990_v0  ;;  %4036 = vmatmul.mubr.bf16.vlgmr.msra.gmra.mrb[12].mxu1 %v8990_v0 }
 0xb6b   : > { %4045 = vmatpush1.bf16.msra.mxu0 %v8670_v37  ;;  %4086 = vmatpush1.bf16.msra.mxu1 %v10338_v26 }
 0xb6c   : > { %4076 = vmatprep.mubr.bf16.mxu0 %v3961_v42  ;;  %4117 = vmatprep.mubr.bf16.mxu1 %v3961_v42  ;;  %v10364_v42 = vld [vmem:[#allocation110_spill] sm:$0xff] }
 0xb6d   : > { %4046 = vmatprep.subr.bf16.mxu0 %v10339_v60  ;;  %4087 = vmatprep.subr.bf16.mxu1 %v10340_v55 }
 0xb6f   : > { %4047 = vmatpush1.bf16.msra.mxu0 %v10341_v4  ;;  %4088 = vmatpush1.bf16.msra.mxu1 %v10342_v53 }
 0xb70   : > { %4048 = vmatprep.subr.bf16.mxu0 %v10343_v58  ;;  %4089 = vmatprep.subr.bf16.mxu1 %v10344_v21 }
 0xb73   : > { %4049 = vmatpush1.bf16.msra.mxu0 %v10345_v45  ;;  %4090 = vmatpush1.bf16.msra.mxu1 %v10346_v47 }
 0xb74   : > { %4050 = vmatprep.subr.bf16.mxu0 %v10347_v1  ;;  %4091 = vmatprep.subr.bf16.mxu1 %v10348_v56 }
 0xb77   : > { %4051 = vmatpush1.bf16.msra.mxu0 %v10349_v29  ;;  %4092 = vmatpush1.bf16.msra.mxu1 %v10350_v52 }
 0xb78   : > { %4052 = vmatprep.subr.bf16.mxu0 %v10351_v41  ;;  %4093 = vmatprep.subr.bf16.mxu1 %v10352_v24 }
 0xb7b   : > { %4053 = vmatpush1.bf16.msra.mxu0 %v10353_v13  ;;  %4094 = vmatpush1.bf16.msra.mxu1 %v10354_v30  ;;  %v10365_v30 = vld [vmem:[#allocation111_spill] sm:$0xff] }
 0xb7c   : > { %4054 = vmatprep.subr.bf16.mxu0 %v10355_v35  ;;  %4095 = vmatprep.subr.bf16.mxu1 %v10356_v43  ;;  %v10366_v35 = vld [vmem:[#allocation112_spill] sm:$0xff]  ;;  %v10367_v43 = vld [vmem:[#allocation113_spill] sm:$0xff] }
 0xb7f   : > { %4055 = vmatpush1.bf16.msra.mxu0 %v10357_v32  ;;  %4096 = vmatpush1.bf16.msra.mxu1 %v10358_v46  ;;  %v10368_v32 = vld [vmem:[#allocation114_spill] sm:$0xff]  ;;  %v10369_v46 = vld [vmem:[#allocation115_spill] sm:$0xff] }
 0xb80   : > { %4056 = vmatprep.subr.bf16.mxu0 %v10359_v9  ;;  %4097 = vmatprep.subr.bf16.mxu1 %v10360_v27  ;;  %v10370_v9 = vld [vmem:[#allocation116_spill] sm:$0xff]  ;;  %v10371_v27 = vld [vmem:[#allocation117_spill] sm:$0xff] }
 0xb83   : > { %4057 = vmatpush1.bf16.msra.mxu0 %v10361_v18  ;;  %4098 = vmatpush1.bf16.msra.mxu1 %v10362_v49  ;;  %v10372_v18 = vld [vmem:[#allocation118_spill] sm:$0xff]  ;;  %v10373_v49 = vld [vmem:[#allocation119_spill] sm:$0xff] }
 0xb84   : > { %4058 = vmatprep.subr.bf16.mxu0 %v10363_v51  ;;  %4099 = vmatprep.subr.bf16.mxu1 %v10364_v42  ;;  %v10374_v51 = vld [vmem:[#allocation120_spill] sm:$0xff]  ;;  %v10375_v42 = vld [vmem:[#allocation121_spill] sm:$0xff] }
 0xb87   : > { %4059 = vmatpush1.bf16.msra.mxu0 %v10365_v30  ;;  %4100 = vmatpush1.bf16.msra.mxu1 %v10366_v35  ;;  %v10376_v30 = vld [vmem:[#allocation122_spill] sm:$0xff]  ;;  %v10377_v35 = vld [vmem:[#allocation123_spill] sm:$0xff] }
 0xb88   : > { %4060 = vmatprep.subr.bf16.mxu0 %v10367_v43  ;;  %4101 = vmatprep.subr.bf16.mxu1 %v10368_v32  ;;  %v10378_v43 = vld [vmem:[#allocation124_spill] sm:$0xff]  ;;  %v10379_v32 = vld [vmem:[#allocation125_spill] sm:$0xff] }
 0xb8b   : > { %4061 = vmatpush1.bf16.msra.mxu0 %v10369_v46  ;;  %4102 = vmatpush1.bf16.msra.mxu1 %v10370_v9  ;;  %v10380_v46 = vld [vmem:[#allocation126_spill] sm:$0xff]  ;;  %v10381_v9 = vld [vmem:[#allocation127_spill] sm:$0xff] }
 0xb8c   : > { %4062 = vmatprep.subr.bf16.mxu0 %v10371_v27  ;;  %4103 = vmatprep.subr.bf16.mxu1 %v10372_v18  ;;  %v10382_v27 = vld [vmem:[#allocation128_spill] sm:$0xff]  ;;  %v10383_v18 = vld [vmem:[#allocation129_spill] sm:$0xff] }
 0xb8f   : > { %4063 = vmatpush1.bf16.msra.mxu0 %v10373_v49  ;;  %4104 = vmatpush1.bf16.msra.mxu1 %v10374_v51  ;;  %v10384_v49 = vld [vmem:[#allocation130_spill] sm:$0xff] }
 0xb90   : > { %4064 = vmatprep.subr.bf16.mxu0 %v10375_v42  ;;  %4105 = vmatprep.subr.bf16.mxu1 %v10376_v30 }
 0xb93   : > { %4065 = vmatpush1.bf16.msra.mxu0 %v10377_v35  ;;  %4106 = vmatpush1.bf16.msra.mxu1 %v10378_v43  ;;  %v10385_v35 = vld [vmem:[#allocation134_spill] sm:$0xff]  ;;  %v10386_v43 = vld [vmem:[#allocation135_spill] sm:$0xff] }
 0xb94   : > { %4066 = vmatprep.subr.bf16.mxu0 %v10379_v32  ;;  %4107 = vmatprep.subr.bf16.mxu1 %v10380_v46 }
 0xb97   : > { %4067 = vmatpush1.bf16.msra.mxu0 %v10381_v9  ;;  %4108 = vmatpush1.bf16.msra.mxu1 %v10382_v27 }
 0xb98   : > { %4068 = vmatprep.subr.bf16.mxu0 %v10383_v18  ;;  %4109 = vmatprep.subr.bf16.mxu1 %v10384_v49 }
 0xb9b   : > { %4069 = vmatpush1.bf16.msra.mxu0 %v8841_v36  ;;  %4110 = vmatpush1.bf16.msra.mxu1 %v8843_v62 }
 0xb9c   : > { %4070 = vmatprep.subr.bf16.mxu0 %v8847_v48  ;;  %4111 = vmatprep.subr.bf16.mxu1 %v10385_v35 }
 0xb9f   : > { %4071 = vmatpush1.bf16.msra.mxu0 %v10386_v43  ;;  %4112 = vmatpush1.bf16.msra.mxu1 %v8855_v8 }
 0xba0   : > { %4072 = vmatprep.subr.bf16.mxu0 %v8859_v22  ;;  %4113 = vmatprep.subr.bf16.mxu1 %v8861_v40 }
 0xba3   : > { %4073 = vmatpush1.bf16.msra.mxu0 %v8865_v34  ;;  %4114 = vmatpush1.bf16.msra.mxu1 %v8867_v44 }
 0xba4   : > { %4074 = vmatprep.subr.bf16.mxu0 %v8871_v17  ;;  %4115 = vmatprep.subr.bf16.mxu1 %v8873_v31 }
 0xba7   : > { %4075 = vmatpush1.bf16.msra.mxu0 %v8877_v15  ;;  %4116 = vmatpush1.bf16.msra.mxu1 %v8879_v6 }
 0xba8   : > { %4187 = vmatprep.subr.bf16.mxu0 %v8461_v63  ;;  %4228 = vmatprep.subr.bf16.mxu1 %v8473_v11  ;;  %v10437_v11 = vld [vmem:[#allocation145_spill] sm:$0xff]  ;;  %v10438_v63 = vld [vmem:[#allocation146_spill] sm:$0xff] }
 0xbaa   : > { %4077 = vmatmul.mubr.bf16.vlgmr.msra.gmra.mrb[16].mxu0 %v8990_v0  ;;  %4118 = vmatmul.mubr.bf16.vlgmr.msra.gmra.mrb[16].mxu1 %v8990_v0  ;;  %v10387_v0 = vld [vmem:[#allocation33_spill] sm:$0xff] }
 0xbab   : > { %4188 = vmatpush1.bf16.msra.mxu0 %v8468_v2  ;;  %4229 = vmatpush1.bf16.msra.mxu1 %v8478_v57  ;;  %v10436_v57 = vld [vmem:[#allocation82_spill] sm:$0xff] }
 0xbac   : > { %4189 = vmatprep.subr.bf16.mxu0 %v8471_v12  ;;  %4230 = vmatprep.subr.bf16.mxu1 %v8484_v10  ;;  %v10434_v10 = vld [vmem:[#allocation83_spill] sm:$0xff]  ;;  %v10435_v12 = vld [vmem:[#allocation81_spill] sm:$0xff] }
 0xbaf   : > { %4190 = vmatpush1.bf16.msra.mxu0 %v8476_v59  ;;  %4231 = vmatpush1.bf16.msra.mxu1 %v8490_v50  ;;  %v10433_v59 = vld [vmem:[#allocation80_spill] sm:$0xff] }
 0xbb0   : > { %4191 = vmatprep.subr.bf16.mxu0 %v8481_v61  ;;  %4232 = vmatprep.subr.bf16.mxu1 %v8496_v3 }
 0xbb3   : > { %4192 = vmatpush1.bf16.msra.mxu0 %v8487_v19  ;;  %4233 = vmatpush1.bf16.msra.mxu1 %v8502_v33  ;;  %v10388_v19 = vld [vmem:[#allocation34_spill] sm:$0xff]  ;;  %v10389_v33 = vld [vmem:[#allocation35_spill] sm:$0xff] }
 0xbb4   : > { %4193 = vmatprep.subr.bf16.mxu0 %v8493_v5  ;;  %4234 = vmatprep.subr.bf16.mxu1 %v8506_v16  ;;  %v10390_v5 = vld [vmem:[#allocation36_spill] sm:$0xff]  ;;  %v10391_v16 = vld [vmem:[#allocation37_spill] sm:$0xff] }
 0xbb7   : > { %4194 = vmatpush1.bf16.msra.mxu0 %v8499_v14  ;;  %4235 = vmatpush1.bf16.msra.mxu1 %v8510_v20  ;;  %v10392_v14 = vld [vmem:[#allocation38_spill] sm:$0xff]  ;;  %v10393_v20 = vld [vmem:[#allocation39_spill] sm:$0xff] }
 0xbb8   : > { %4195 = vmatprep.subr.bf16.mxu0 %v8514_v39  ;;  %4236 = vmatprep.subr.bf16.mxu1 %v8516_v23  ;;  %v10394_v39 = vld [vmem:[#allocation40_spill] sm:$0xff]  ;;  %v10395_v23 = vld [vmem:[#allocation41_spill] sm:$0xff] }
 0xbbb   : > { %4196 = vmatpush1.bf16.msra.mxu0 %v8518_v7  ;;  %4237 = vmatpush1.bf16.msra.mxu1 %v8520_v38  ;;  %v10396_v7 = vld [vmem:[#allocation42_spill] sm:$0xff]  ;;  %v10397_v38 = vld [vmem:[#allocation43_spill] sm:$0xff] }
 0xbbc   : > { %4197 = vmatprep.subr.bf16.mxu0 %v10387_v0  ;;  %4238 = vmatprep.subr.bf16.mxu1 %v10388_v19  ;;  %v10398_v0 = vld [vmem:[#allocation44_spill] sm:$0xff]  ;;  %v10399_v19 = vld [vmem:[#allocation45_spill] sm:$0xff] }
 0xbbf   : > { %4198 = vmatpush1.bf16.msra.mxu0 %v10389_v33  ;;  %4239 = vmatpush1.bf16.msra.mxu1 %v10390_v5  ;;  %v10400_v33 = vld [vmem:[#allocation46_spill] sm:$0xff]  ;;  %v10401_v5 = vld [vmem:[#allocation47_spill] sm:$0xff] }
 0xbc0   : > { %4199 = vmatprep.subr.bf16.mxu0 %v10391_v16  ;;  %4240 = vmatprep.subr.bf16.mxu1 %v10392_v14  ;;  %v10402_v16 = vld [vmem:[#allocation48_spill] sm:$0xff]  ;;  %v10403_v14 = vld [vmem:[#allocation49_spill] sm:$0xff] }
 0xbc3   : > { %4200 = vmatpush1.bf16.msra.mxu0 %v10393_v20  ;;  %4241 = vmatpush1.bf16.msra.mxu1 %v10394_v39  ;;  %v10404_v20 = vld [vmem:[#allocation50_spill] sm:$0xff]  ;;  %v10405_v39 = vld [vmem:[#allocation51_spill] sm:$0xff] }
 0xbc4   : > { %4201 = vmatprep.subr.bf16.mxu0 %v10395_v23  ;;  %4242 = vmatprep.subr.bf16.mxu1 %v10396_v7  ;;  %v10406_v23 = vld [vmem:[#allocation52_spill] sm:$0xff]  ;;  %v10407_v7 = vld [vmem:[#allocation53_spill] sm:$0xff] }
 0xbc7   : > { %4202 = vmatpush1.bf16.msra.mxu0 %v10397_v38  ;;  %4243 = vmatpush1.bf16.msra.mxu1 %v10398_v0  ;;  %v10408_v38 = vld [vmem:[#allocation54_spill] sm:$0xff]  ;;  %v10409_v0 = vld [vmem:[#allocation55_spill] sm:$0xff] }
 0xbc8   : > { %4203 = vmatprep.subr.bf16.mxu0 %v10399_v19  ;;  %4244 = vmatprep.subr.bf16.mxu1 %v10400_v33  ;;  %v10410_v19 = vld [vmem:[#allocation56_spill] sm:$0xff]  ;;  %v10411_v33 = vld [vmem:[#allocation57_spill] sm:$0xff] }
 0xbcb   : > { %4204 = vmatpush1.bf16.msra.mxu0 %v10401_v5  ;;  %4245 = vmatpush1.bf16.msra.mxu1 %v10402_v16  ;;  %v10412_v5 = vld [vmem:[#allocation58_spill] sm:$0xff]  ;;  %v10413_v16 = vld [vmem:[#allocation59_spill] sm:$0xff] }
 0xbcc   : > { %4205 = vmatprep.subr.bf16.mxu0 %v10403_v14  ;;  %4246 = vmatprep.subr.bf16.mxu1 %v10404_v20  ;;  %v10414_v14 = vld [vmem:[#allocation60_spill] sm:$0xff]  ;;  %v10415_v20 = vld [vmem:[#allocation61_spill] sm:$0xff] }
 0xbcf   : > { %4206 = vmatpush1.bf16.msra.mxu0 %v10405_v39  ;;  %4247 = vmatpush1.bf16.msra.mxu1 %v10406_v23  ;;  %v10416_v39 = vld [vmem:[#allocation62_spill] sm:$0xff]  ;;  %v10417_v23 = vld [vmem:[#allocation63_spill] sm:$0xff] }
 0xbd0   : > { %4207 = vmatprep.subr.bf16.mxu0 %v10407_v7  ;;  %4248 = vmatprep.subr.bf16.mxu1 %v10408_v38  ;;  %v10418_v7 = vld [vmem:[#allocation64_spill] sm:$0xff]  ;;  %v10419_v38 = vld [vmem:[#allocation65_spill] sm:$0xff] }
 0xbd3   : > { %4208 = vmatpush1.bf16.msra.mxu0 %v10409_v0  ;;  %4249 = vmatpush1.bf16.msra.mxu1 %v10410_v19  ;;  %v10420_v0 = vld [vmem:[#allocation67_spill] sm:$0xff]  ;;  %v10421_v19 = vld [vmem:[#allocation66_spill] sm:$0xff] }
 0xbd4   : > { %4209 = vmatprep.subr.bf16.mxu0 %v10411_v33  ;;  %4250 = vmatprep.subr.bf16.mxu1 %v10412_v5  ;;  %v10422_v33 = vld [vmem:[#allocation68_spill] sm:$0xff]  ;;  %v10423_v5 = vld [vmem:[#allocation69_spill] sm:$0xff] }
 0xbd7   : > { %4210 = vmatpush1.bf16.msra.mxu0 %v10413_v16  ;;  %4251 = vmatpush1.bf16.msra.mxu1 %v10414_v14  ;;  %v10424_v16 = vld [vmem:[#allocation70_spill] sm:$0xff]  ;;  %v10425_v14 = vld [vmem:[#allocation71_spill] sm:$0xff] }
 0xbd8   : > { %4211 = vmatprep.subr.bf16.mxu0 %v10415_v20  ;;  %4252 = vmatprep.subr.bf16.mxu1 %v10416_v39  ;;  %v10426_v20 = vld [vmem:[#allocation72_spill] sm:$0xff]  ;;  %v10427_v39 = vld [vmem:[#allocation73_spill] sm:$0xff] }
 0xbdb   : > { %4212 = vmatpush1.bf16.msra.mxu0 %v10417_v23  ;;  %4253 = vmatpush1.bf16.msra.mxu1 %v10418_v7  ;;  %v10428_v23 = vld [vmem:[#allocation74_spill] sm:$0xff]  ;;  %v10429_v7 = vld [vmem:[#allocation75_spill] sm:$0xff] }
 0xbdc   : > { %4213 = vmatprep.subr.bf16.mxu0 %v10419_v38  ;;  %4254 = vmatprep.subr.bf16.mxu1 %v10420_v0  ;;  %v10430_v38 = vld [vmem:[#allocation76_spill] sm:$0xff]  ;;  %v10431_v0 = vld [vmem:[#allocation77_spill] sm:$0xff] }
 0xbdf   : > { %4214 = vmatpush1.bf16.msra.mxu0 %v10421_v19  ;;  %4255 = vmatpush1.bf16.msra.mxu1 %v10422_v33  ;;  %v10432_v19 = vld [vmem:[#allocation78_spill] sm:$0xff] }
 0xbe0   : > { %4215 = vmatprep.subr.bf16.mxu0 %v10423_v5  ;;  %4256 = vmatprep.subr.bf16.mxu1 %v10424_v16 }
 0xbe3   : > { %4216 = vmatpush1.bf16.msra.mxu0 %v10425_v14  ;;  %4257 = vmatpush1.bf16.msra.mxu1 %v10426_v20 }
 0xbe4   : > { %4217 = vmatprep.subr.bf16.mxu0 %v10427_v39  ;;  %4258 = vmatprep.subr.bf16.mxu1 %v10428_v23  ;;  %v4126_v39 = vrot.slane %v10433_v59, 4  ;;  %v4128_v23 = vrot.slane %v10434_v10, 4 }
 0xbe7   : > { %4218 = vmatpush1.bf16.msra.mxu0 %v10429_v7  ;;  %4259 = vmatpush1.bf16.msra.mxu1 %v10430_v38  ;;  %v4127_v7 = vrot.slane %v10435_v12, 4  ;;  %v4129_v38 = vrot.slane %v10436_v57, 4 }
 0xbe8   : > { %4269 = vmatprep.subr.bf16.mxu0 %v10431_v0  ;;  %4310 = vmatprep.subr.bf16.mxu1 %v10432_v19 }
 0xc3d   : > { %v3996_v33 = vpop.f32.mrb[12].mxu0  ;;  %v4037_v5 = vpop.f32.mrb[12].mxu1 }
 0xc3e   : > { %v3998_v3 = vpop.f32.mrb[13].mxu0  ;;  %v4039_v16 = vpop.f32.mrb[13].mxu1  ;;  %v4134_v59 = vadd.f32 %v4126_v39, %v3996_v33  ;;  %v4136_v10 = vadd.f32 %v4128_v23, %v4037_v5 }
 0xc3f   : > { %v4000_v61 = vpop.f32.mrb[14].mxu0  ;;  %v4041_v14 = vpop.f32.mrb[14].mxu1  ;;  %v4135_v34 = vadd.f32 %v4127_v7, %v3998_v3  ;;  %v4137_v40 = vadd.f32 %v4129_v38, %v4039_v16 }
 0xc40   : > { %v4001_v50 = vpop.f32.mrb[15].mxu0  ;;  %v4042_v20 = vpop.f32.mrb[15].mxu1 }
 0xc7d   : > { %v4078_v2 = vpop.f32.mrb[16].mxu0  ;;  %v4119_v0 = vpop.f32.mrb[16].mxu1 }
 0xc7e   : > { %v4138_v19 = vadd.f32 %v4078_v2, %v10437_v11  ;;  %v4140_v6 = vadd.f32 %v4119_v0, %v10438_v63  ;;  %v4080_v15 = vpop.f32.mrb[17].mxu0  ;;  %v4121_v31 = vpop.f32.mrb[17].mxu1 }
 0xc7f   : > { %v4139_v61 = vadd.f32 %v4080_v15, %v8966_v25  ;;  %v4141_v50 = vadd.f32 %v4121_v31, %v8970_v28  ;;  %v4082_v14 = vpop.f32.mrb[18].mxu0  ;;  %v4123_v20 = vpop.f32.mrb[18].mxu1 }
 0xc80   : > { %v4146_v17 = vrot.slane %v4138_v19, 6  ;;  %v4148_v12 = vrot.slane %v4140_v6, 6  ;;  %v4083_v44 = vpop.f32.mrb[19].mxu0  ;;  %v4124_v57 = vpop.f32.mrb[19].mxu1  ;;  %v10444_v20 = vld [vmem:[#allocation105_spill] sm:$0xff] }
 0xc81   : > { %v4147_v22 = vrot.slane %v4139_v61, 6  ;;  %v4149_v2 = vrot.slane %v4141_v50, 6  ;;  %v10439_v44 = vld [vmem:[#allocation100_spill] sm:$0xff]  ;;  %v10442_v61 = vld [vmem:[#allocation103_spill] sm:$0xff] }
 0xc82   : > { %v4154_v0 = vsel %vm486_vm1, %v4134_v59, %v4146_v17  ;;  %v4156_v63 = vsel %vm486_vm1, %v4136_v10, %v4148_v12  ;;  %v10440_v17 = vld [vmem:[#allocation101_spill] sm:$0xff]  ;;  %v10443_v50 = vld [vmem:[#allocation104_spill] sm:$0xff] }
 0xc83   : > { %v6138_v11 = vmul.f32 -1.442695, %v4154_v0  ;;  %v4155_v15 = vsel %vm486_vm1, %v4135_v34, %v4147_v22  ;;  %v4157_v31 = vsel %vm486_vm1, %v4137_v40, %v4149_v2  ;;  %v10445_v2 = vld [vmem:[#allocation106_spill] sm:$0xff]  ;;  %v10446_v0 = vld [vmem:[#allocation107_spill] sm:$0xff] }
 0xc84   : > { %v6139_v14 = vmul.f32 -1.442695, %v4155_v15  ;;  %v6140_v19 = vmul.f32 -1.442695, %v4157_v31  ;;  %v10447_v15 = vld [vmem:[#allocation108_spill] sm:$0xff]  ;;  %v10448_v31 = vld [vmem:[#allocation109_spill] sm:$0xff] }
 0xc85   : > { %6919 = vpow2.f32 %v6138_v11 }
 0xc86   : > { %6921 = vpow2.f32 %v6139_v14  ;;  %v10449_v14 = vld [vmem:[#allocation110_spill] sm:$0xff] }
 0xc87   : > { %6923 = vpow2.f32 %v6140_v19  ;;  %v10450_v19 = vld [vmem:[#allocation111_spill] sm:$0xff] }
 0xc88   : > { %6925 = vtanh.f32 %v4156_v63 }
 0xc8f   : > { %v6920_v5 = vpop.eup %6919 }
 0xc90   : > { %v6922_v33 = vpop.eup %6921  ;;  %v4161_v57 = vadd.f32 1.0, %v6920_v5  ;;  %v10451_v5 = vld [vmem:[#allocation112_spill] sm:$0xff] }
 0xc91   : > { %v4167_v3 = vadd.f32 1.0, %v6922_v33  ;;  %v6924_v59 = vpop.eup %6923  ;;  %v10452_v33 = vld [vmem:[#allocation113_spill] sm:$0xff] }
 0xc92   : > { %6927 = vrcp.f32 %v4161_v57  ;;  %v6926_v16 = vpop.eup %6925  ;;  %v4174_v23 = vadd.f32 1.0, %v6924_v59  ;;  %v10453_v57 = vld [vmem:[#allocation114_spill] sm:$0xff]  ;;  %v10455_v59 = vld [vmem:[#allocation116_spill] sm:$0xff] }
 0xc93   : > { %6929 = vrcp.f32 %v4167_v3  ;;  %v10454_v3 = vld [vmem:[#allocation115_spill] sm:$0xff] }
 0xc94   : > { %6931 = vrcp.f32 %v4174_v23  ;;  %v10460_v23 = vld [vmem:[#allocation124_spill] sm:$0xff] }
 0xc9c   : > { %v6928_v12 = vpop.eup %6927 }
 0xc9d   : > { %v6930_v10 = vpop.eup %6929  ;;  %v4178_v39 = vmul.f32 %v6928_v12, %v6926_v16  ;;  %v10456_v16 = vld [vmem:[#allocation117_spill] sm:$0xff]  ;;  %v10457_v12 = vld [vmem:[#allocation118_spill] sm:$0xff] }
 0xc9e   : > { %v4177_v7 = vmul.f32 %v6930_v10, %v8987_v54  ;;  %v6932_v11 = vpop.eup %6931  ;;  %v10441_v54 = vld [vmem:[#allocation102_spill] sm:$0xff]  ;;  %v10458_v10 = vld [vmem:[#allocation119_spill] sm:$0xff] }
 0xca0   : > { %v9137_v38 = vadd.f32 %v4178_v39, %v4177_v7  ;;  %v10459_v39 = vld [vmem:[#allocation123_spill] sm:$0xff]  ;;  %v10461_v7 = vld [vmem:[#allocation137_spill] sm:$0xff] }
 0xca2   : > { %6933 = vtanh.f32 %v9137_v38 }
 0xcac   : > { %v6934_v6 = vpop.eup %6933 }
 0xcad   : > { %v4181_v22 = vmul.f32 %v6934_v6, %v6932_v11  ;;  %v10462_v11 = vld [vmem:[#allocation138_spill] sm:$0xff]  ;;  %v10463_v6 = vld [vmem:[#allocation139_spill] sm:$0xff] }
 0xcaf   : > { %v4183_v63 = vrot.slane %v4181_v22, 2  ;;  %v9140_v34 = vpack.c.bf16 %v4181_v22, %v4181_v22  ;;  %v10464_v22 = vld [vmem:[#allocation140_spill] sm:$0xff] }
 0xcb1   : > { %v4186_v40 = vpack.c.bf16 %v4183_v63, %v4183_v63  ;;  %v10465_v63 = vld [vmem:[#allocation141_spill] sm:$0xff] }
 0xcb3   : > { %4219 = vmatprep.mubr.bf16.mxu0 %v4186_v40  ;;  %4260 = vmatprep.mubr.bf16.mxu1 %v4186_v40 }
 0xcb4   : > { %4220 = vmatmul.mubr.bf16.vlgmr.msra.gmra.mrb[20].mxu0 %v9140_v34  ;;  %4261 = vmatmul.mubr.bf16.vlgmr.msra.gmra.mrb[20].mxu1 %v9140_v34 }
 0xcb5   : > { %4270 = vmatpush1.bf16.msra.mxu0 %v8670_v37  ;;  %4311 = vmatpush1.bf16.msra.mxu1 %v10338_v26 }
 0xcb6   : > { %4301 = vmatprep.mubr.bf16.mxu0 %v4186_v40  ;;  %4342 = vmatprep.mubr.bf16.mxu1 %v4186_v40  ;;  %v10466_v40 = vld [vmem:[#allocation142_spill] sm:$0xff] }
 0xcb7   : > { %4271 = vmatprep.subr.bf16.mxu0 %v10339_v60  ;;  %4312 = vmatprep.subr.bf16.mxu1 %v10340_v55 }
 0xcb9   : > { %4272 = vmatpush1.bf16.msra.mxu0 %v10341_v4  ;;  %4313 = vmatpush1.bf16.msra.mxu1 %v10342_v53 }
 0xcba   : > { %4273 = vmatprep.subr.bf16.mxu0 %v10343_v58  ;;  %4314 = vmatprep.subr.bf16.mxu1 %v10344_v21 }
 0xcbd   : > { %4274 = vmatpush1.bf16.msra.mxu0 %v10345_v45  ;;  %4315 = vmatpush1.bf16.msra.mxu1 %v10346_v47 }
 0xcbe   : > { %4275 = vmatprep.subr.bf16.mxu0 %v10347_v1  ;;  %4316 = vmatprep.subr.bf16.mxu1 %v10348_v56 }
 0xcc1   : > { %4276 = vmatpush1.bf16.msra.mxu0 %v10349_v29  ;;  %4317 = vmatpush1.bf16.msra.mxu1 %v10350_v52 }
 0xcc2   : > { %4277 = vmatprep.subr.bf16.mxu0 %v10351_v41  ;;  %4318 = vmatprep.subr.bf16.mxu1 %v10352_v24 }
 0xcc5   : > { %4278 = vmatpush1.bf16.msra.mxu0 %v10353_v13  ;;  %4319 = vmatpush1.bf16.msra.mxu1 %v10439_v44 }
 0xcc6   : > { %4279 = vmatprep.subr.bf16.mxu0 %v10440_v17  ;;  %4320 = vmatprep.subr.bf16.mxu1 %v10441_v54 }
 0xcc9   : > { %4280 = vmatpush1.bf16.msra.mxu0 %v10442_v61  ;;  %4321 = vmatpush1.bf16.msra.mxu1 %v10443_v50 }
 0xcca   : > { %4281 = vmatprep.subr.bf16.mxu0 %v10444_v20  ;;  %4322 = vmatprep.subr.bf16.mxu1 %v10445_v2 }
 0xccd   : > { %4282 = vmatpush1.bf16.msra.mxu0 %v10446_v0  ;;  %4323 = vmatpush1.bf16.msra.mxu1 %v10447_v15 }
 0xcce   : > { %4283 = vmatprep.subr.bf16.mxu0 %v10448_v31  ;;  %4324 = vmatprep.subr.bf16.mxu1 %v10449_v14 }
 0xcd1   : > { %4284 = vmatpush1.bf16.msra.mxu0 %v10450_v19  ;;  %4325 = vmatpush1.bf16.msra.mxu1 %v10451_v5 }
 0xcd2   : > { %4285 = vmatprep.subr.bf16.mxu0 %v10452_v33  ;;  %4326 = vmatprep.subr.bf16.mxu1 %v10453_v57 }
 0xcd5   : > { %4286 = vmatpush1.bf16.msra.mxu0 %v10454_v3  ;;  %4327 = vmatpush1.bf16.msra.mxu1 %v10455_v59 }
 0xcd6   : > { %4287 = vmatprep.subr.bf16.mxu0 %v10456_v16  ;;  %4328 = vmatprep.subr.bf16.mxu1 %v10457_v12 }
 0xcd9   : > { %4288 = vmatpush1.bf16.msra.mxu0 %v10458_v10  ;;  %4329 = vmatpush1.bf16.msra.mxu1 %v10374_v51 }
 0xcda   : > { %4289 = vmatprep.subr.bf16.mxu0 %v10375_v42  ;;  %4330 = vmatprep.subr.bf16.mxu1 %v10376_v30 }
 0xcdd   : > { %4290 = vmatpush1.bf16.msra.mxu0 %v10459_v39  ;;  %4331 = vmatpush1.bf16.msra.mxu1 %v10460_v23  ;;  %v10539_v23 = vld [vmem:[#allocation145_spill] sm:$0xff]  ;;  %v10540_v39 = vld [vmem:[#allocation146_spill] sm:$0xff] }
 0xcde   : > { %4291 = vmatprep.subr.bf16.mxu0 %v10379_v32  ;;  %4332 = vmatprep.subr.bf16.mxu1 %v10380_v46  ;;  %v10538_v46 = vld [vmem:[#allocation82_spill] sm:$0xff] }
 0xce1   : > { %4292 = vmatpush1.bf16.msra.mxu0 %v10381_v9  ;;  %4333 = vmatpush1.bf16.msra.mxu1 %v10382_v27  ;;  %v10536_v27 = vld [vmem:[#allocation83_spill] sm:$0xff]  ;;  %v10537_v9 = vld [vmem:[#allocation81_spill] sm:$0xff] }
 0xce2   : > { %4293 = vmatprep.subr.bf16.mxu0 %v10383_v18  ;;  %4334 = vmatprep.subr.bf16.mxu1 %v10384_v49  ;;  %v10535_v18 = vld [vmem:[#allocation80_spill] sm:$0xff] }
 0xce5   : > { %4294 = vmatpush1.bf16.msra.mxu0 %v8841_v36  ;;  %4335 = vmatpush1.bf16.msra.mxu1 %v8843_v62  ;;  %v10467_v62 = vld [vmem:[#allocation143_spill] sm:$0xff] }
 0xce6   : > { %4295 = vmatprep.subr.bf16.mxu0 %v8847_v48  ;;  %4336 = vmatprep.subr.bf16.mxu1 %v10385_v35  ;;  %v10468_v48 = vld [vmem:[#allocation144_spill] sm:$0xff]  ;;  %v10469_v35 = vld [vmem:[#allocation13_spill] sm:$0xff] }
 0xce9   : > { %4296 = vmatpush1.bf16.msra.mxu0 %v10386_v43  ;;  %4337 = vmatpush1.bf16.msra.mxu1 %v8855_v8  ;;  %v10470_v43 = vld [vmem:[#allocation16_spill] sm:$0xff] }
 0xcea   : > { %4297 = vmatprep.subr.bf16.mxu0 %v10461_v7  ;;  %4338 = vmatprep.subr.bf16.mxu1 %v10462_v11  ;;  %v10471_v11 = vld [vmem:[#allocation14_spill] sm:$0xff] }
 0xceb   : > { %v10480_v7 = vld [vmem:[#allocation26_spill] sm:$0xff] }
 0xced   : > { %4298 = vmatpush1.bf16.msra.mxu0 %v10463_v6  ;;  %4339 = vmatpush1.bf16.msra.mxu1 %v10464_v22  ;;  %v10472_v6 = vld [vmem:[#allocation18_spill] sm:$0xff]  ;;  %v10473_v22 = vld [vmem:[#allocation15_spill] sm:$0xff] }
 0xcee   : > { %4299 = vmatprep.subr.bf16.mxu0 %v10465_v63  ;;  %4340 = vmatprep.subr.bf16.mxu1 %v10466_v40  ;;  %v10474_v63 = vld [vmem:[#allocation20_spill] sm:$0xff]  ;;  %v10475_v40 = vld [vmem:[#allocation17_spill] sm:$0xff] }
 0xcf1   : > { %4300 = vmatpush1.bf16.msra.mxu0 %v10467_v62  ;;  %4341 = vmatpush1.bf16.msra.mxu1 %v10468_v48  ;;  %v10476_v62 = vld [vmem:[#allocation22_spill] sm:$0xff]  ;;  %v10477_v48 = vld [vmem:[#allocation19_spill] sm:$0xff] }
 0xcf2   : > { %4412 = vmatprep.subr.bf16.mxu0 %v10469_v35  ;;  %4453 = vmatprep.subr.bf16.mxu1 %v10470_v43  ;;  %v10478_v35 = vld [vmem:[#allocation24_spill] sm:$0xff]  ;;  %v10479_v43 = vld [vmem:[#allocation21_spill] sm:$0xff] }
 0xcf4   : > { %4302 = vmatmul.mubr.bf16.vlgmr.msra.gmra.mrb[24].mxu0 %v9140_v34  ;;  %4343 = vmatmul.mubr.bf16.vlgmr.msra.gmra.mrb[24].mxu1 %v9140_v34  ;;  %v10481_v34 = vld [vmem:[#allocation23_spill] sm:$0xff] }
 0xcf5   : > { %4413 = vmatpush1.bf16.msra.mxu0 %v10471_v11  ;;  %4454 = vmatpush1.bf16.msra.mxu1 %v10472_v6  ;;  %v10482_v11 = vld [vmem:[#allocation27_spill] sm:$0xff]  ;;  %v10483_v6 = vld [vmem:[#allocation25_spill] sm:$0xff] }
 0xcf6   : > { %4414 = vmatprep.subr.bf16.mxu0 %v10473_v22  ;;  %4455 = vmatprep.subr.bf16.mxu1 %v10474_v63  ;;  %v10484_v22 = vld [vmem:[#allocation28_spill] sm:$0xff]  ;;  %v10485_v63 = vld [vmem:[#allocation29_spill] sm:$0xff] }
 0xcf9   : > { %4415 = vmatpush1.bf16.msra.mxu0 %v10475_v40  ;;  %4456 = vmatpush1.bf16.msra.mxu1 %v10476_v62  ;;  %v10486_v40 = vld [vmem:[#allocation30_spill] sm:$0xff]  ;;  %v10487_v62 = vld [vmem:[#allocation31_spill] sm:$0xff] }
 0xcfa   : > { %4416 = vmatprep.subr.bf16.mxu0 %v10477_v48  ;;  %4457 = vmatprep.subr.bf16.mxu1 %v10478_v35  ;;  %v10488_v48 = vld [vmem:[#allocation32_spill] sm:$0xff]  ;;  %v10489_v35 = vld [vmem:[#allocation33_spill] sm:$0xff] }
 0xcfd   : > { %4417 = vmatpush1.bf16.msra.mxu0 %v10479_v43  ;;  %4458 = vmatpush1.bf16.msra.mxu1 %v10480_v7  ;;  %v10490_v43 = vld [vmem:[#allocation34_spill] sm:$0xff]  ;;  %v10491_v7 = vld [vmem:[#allocation35_spill] sm:$0xff] }
 0xcfe   : > { %4418 = vmatprep.subr.bf16.mxu0 %v10481_v34  ;;  %4459 = vmatprep.subr.bf16.mxu1 %v10482_v11  ;;  %v10492_v34 = vld [vmem:[#allocation36_spill] sm:$0xff]  ;;  %v10493_v11 = vld [vmem:[#allocation37_spill] sm:$0xff] }
 0xd01   : > { %4419 = vmatpush1.bf16.msra.mxu0 %v10483_v6  ;;  %4460 = vmatpush1.bf16.msra.mxu1 %v10484_v22  ;;  %v10494_v6 = vld [vmem:[#allocation38_spill] sm:$0xff]  ;;  %v10495_v22 = vld [vmem:[#allocation39_spill] sm:$0xff] }
 0xd02   : > { %4420 = vmatprep.subr.bf16.mxu0 %v10485_v63  ;;  %4461 = vmatprep.subr.bf16.mxu1 %v10486_v40  ;;  %v10496_v63 = vld [vmem:[#allocation40_spill] sm:$0xff]  ;;  %v10497_v40 = vld [vmem:[#allocation41_spill] sm:$0xff] }
 0xd05   : > { %4421 = vmatpush1.bf16.msra.mxu0 %v10487_v62  ;;  %4462 = vmatpush1.bf16.msra.mxu1 %v10488_v48  ;;  %v10498_v62 = vld [vmem:[#allocation42_spill] sm:$0xff]  ;;  %v10499_v48 = vld [vmem:[#allocation43_spill] sm:$0xff] }
 0xd06   : > { %4422 = vmatprep.subr.bf16.mxu0 %v10489_v35  ;;  %4463 = vmatprep.subr.bf16.mxu1 %v10490_v43  ;;  %v10500_v35 = vld [vmem:[#allocation44_spill] sm:$0xff]  ;;  %v10501_v43 = vld [vmem:[#allocation45_spill] sm:$0xff] }
 0xd09   : > { %4423 = vmatpush1.bf16.msra.mxu0 %v10491_v7  ;;  %4464 = vmatpush1.bf16.msra.mxu1 %v10492_v34  ;;  %v10502_v7 = vld [vmem:[#allocation46_spill] sm:$0xff]  ;;  %v10503_v34 = vld [vmem:[#allocation47_spill] sm:$0xff] }
 0xd0a   : > { %4424 = vmatprep.subr.bf16.mxu0 %v10493_v11  ;;  %4465 = vmatprep.subr.bf16.mxu1 %v10494_v6  ;;  %v10504_v11 = vld [vmem:[#allocation48_spill] sm:$0xff]  ;;  %v10505_v6 = vld [vmem:[#allocation49_spill] sm:$0xff] }
 0xd0d   : > { %4425 = vmatpush1.bf16.msra.mxu0 %v10495_v22  ;;  %4466 = vmatpush1.bf16.msra.mxu1 %v10496_v63  ;;  %v10506_v22 = vld [vmem:[#allocation50_spill] sm:$0xff]  ;;  %v10507_v63 = vld [vmem:[#allocation51_spill] sm:$0xff] }
 0xd0e   : > { %4426 = vmatprep.subr.bf16.mxu0 %v10497_v40  ;;  %4467 = vmatprep.subr.bf16.mxu1 %v10498_v62  ;;  %v10508_v40 = vld [vmem:[#allocation52_spill] sm:$0xff]  ;;  %v10509_v62 = vld [vmem:[#allocation53_spill] sm:$0xff] }
 0xd11   : > { %4427 = vmatpush1.bf16.msra.mxu0 %v10499_v48  ;;  %4468 = vmatpush1.bf16.msra.mxu1 %v10500_v35  ;;  %v10510_v48 = vld [vmem:[#allocation54_spill] sm:$0xff]  ;;  %v10511_v35 = vld [vmem:[#allocation55_spill] sm:$0xff] }
 0xd12   : > { %4428 = vmatprep.subr.bf16.mxu0 %v10501_v43  ;;  %4469 = vmatprep.subr.bf16.mxu1 %v10502_v7  ;;  %v10512_v43 = vld [vmem:[#allocation56_spill] sm:$0xff]  ;;  %v10513_v7 = vld [vmem:[#allocation57_spill] sm:$0xff] }
 0xd15   : > { %4429 = vmatpush1.bf16.msra.mxu0 %v10503_v34  ;;  %4470 = vmatpush1.bf16.msra.mxu1 %v10504_v11  ;;  %v10514_v34 = vld [vmem:[#allocation58_spill] sm:$0xff]  ;;  %v10515_v11 = vld [vmem:[#allocation59_spill] sm:$0xff] }
 0xd16   : > { %4430 = vmatprep.subr.bf16.mxu0 %v10505_v6  ;;  %4471 = vmatprep.subr.bf16.mxu1 %v10506_v22  ;;  %v10516_v6 = vld [vmem:[#allocation60_spill] sm:$0xff]  ;;  %v10517_v22 = vld [vmem:[#allocation61_spill] sm:$0xff] }
 0xd19   : > { %4431 = vmatpush1.bf16.msra.mxu0 %v10507_v63  ;;  %4472 = vmatpush1.bf16.msra.mxu1 %v10508_v40  ;;  %v10518_v63 = vld [vmem:[#allocation62_spill] sm:$0xff]  ;;  %v10519_v40 = vld [vmem:[#allocation63_spill] sm:$0xff] }
 0xd1a   : > { %4432 = vmatprep.subr.bf16.mxu0 %v10509_v62  ;;  %4473 = vmatprep.subr.bf16.mxu1 %v10510_v48  ;;  %v10520_v62 = vld [vmem:[#allocation64_spill] sm:$0xff]  ;;  %v10521_v48 = vld [vmem:[#allocation65_spill] sm:$0xff] }
 0xd1d   : > { %4433 = vmatpush1.bf16.msra.mxu0 %v10511_v35  ;;  %4474 = vmatpush1.bf16.msra.mxu1 %v10512_v43  ;;  %v10522_v35 = vld [vmem:[#allocation67_spill] sm:$0xff]  ;;  %v10523_v43 = vld [vmem:[#allocation66_spill] sm:$0xff] }
 0xd1e   : > { %4434 = vmatprep.subr.bf16.mxu0 %v10513_v7  ;;  %4475 = vmatprep.subr.bf16.mxu1 %v10514_v34  ;;  %v10524_v7 = vld [vmem:[#allocation68_spill] sm:$0xff]  ;;  %v10525_v34 = vld [vmem:[#allocation69_spill] sm:$0xff] }
 0xd21   : > { %4435 = vmatpush1.bf16.msra.mxu0 %v10515_v11  ;;  %4476 = vmatpush1.bf16.msra.mxu1 %v10516_v6  ;;  %v10526_v11 = vld [vmem:[#allocation70_spill] sm:$0xff]  ;;  %v10527_v6 = vld [vmem:[#allocation71_spill] sm:$0xff] }
 0xd22   : > { %4436 = vmatprep.subr.bf16.mxu0 %v10517_v22  ;;  %4477 = vmatprep.subr.bf16.mxu1 %v10518_v63  ;;  %v10528_v22 = vld [vmem:[#allocation72_spill] sm:$0xff]  ;;  %v10529_v63 = vld [vmem:[#allocation73_spill] sm:$0xff] }
 0xd25   : > { %4437 = vmatpush1.bf16.msra.mxu0 %v10519_v40  ;;  %4478 = vmatpush1.bf16.msra.mxu1 %v10520_v62  ;;  %v10530_v40 = vld [vmem:[#allocation74_spill] sm:$0xff]  ;;  %v10531_v62 = vld [vmem:[#allocation75_spill] sm:$0xff] }
 0xd26   : > { %4438 = vmatprep.subr.bf16.mxu0 %v10521_v48  ;;  %4479 = vmatprep.subr.bf16.mxu1 %v10522_v35  ;;  %v10532_v48 = vld [vmem:[#allocation76_spill] sm:$0xff]  ;;  %v10533_v35 = vld [vmem:[#allocation77_spill] sm:$0xff] }
 0xd29   : > { %4439 = vmatpush1.bf16.msra.mxu0 %v10523_v43  ;;  %4480 = vmatpush1.bf16.msra.mxu1 %v10524_v7  ;;  %v10534_v43 = vld [vmem:[#allocation78_spill] sm:$0xff] }
 0xd2a   : > { %4440 = vmatprep.subr.bf16.mxu0 %v10525_v34  ;;  %4481 = vmatprep.subr.bf16.mxu1 %v10526_v11 }
 0xd2d   : > { %4441 = vmatpush1.bf16.msra.mxu0 %v10527_v6  ;;  %4482 = vmatpush1.bf16.msra.mxu1 %v10528_v22 }
 0xd2e   : > { %4442 = vmatprep.subr.bf16.mxu0 %v10529_v63  ;;  %4483 = vmatprep.subr.bf16.mxu1 %v10530_v40  ;;  %v4351_v63 = vrot.slane %v10535_v18, 6  ;;  %v4353_v40 = vrot.slane %v10536_v27, 6 }
 0xd31   : > { %4443 = vmatpush1.bf16.msra.mxu0 %v10531_v62  ;;  %4484 = vmatpush1.bf16.msra.mxu1 %v10532_v48  ;;  %v4352_v62 = vrot.slane %v10537_v9, 6  ;;  %v4354_v48 = vrot.slane %v10538_v46, 6 }
 0xd32   : > { %4494 = vmatprep.subr.bf16.mxu0 %v10533_v35  ;;  %4535 = vmatprep.subr.bf16.mxu1 %v10534_v43 }
 0xd87   : > { %v4221_v7 = vpop.f32.mrb[20].mxu0  ;;  %v4262_v34 = vpop.f32.mrb[20].mxu1 }
 0xd88   : > { %v4223_v8 = vpop.f32.mrb[21].mxu0  ;;  %v4264_v11 = vpop.f32.mrb[21].mxu1  ;;  %v4361_v27 = vadd.f32 %v4353_v40, %v4262_v34 }
 0xd89   : > { %v4225_v36 = vpop.f32.mrb[22].mxu0  ;;  %v4266_v6 = vpop.f32.mrb[22].mxu1  ;;  %v4360_v16 = vadd.f32 %v4352_v62, %v4223_v8  ;;  %v4362_v59 = vadd.f32 %v4354_v48, %v4264_v11 }
 0xd8a   : > { %v4226_v49 = vpop.f32.mrb[23].mxu0  ;;  %v4267_v22 = vpop.f32.mrb[23].mxu1 }
 0xd8b   : > { %v4359_v22 = vadd.f32 %v4351_v63, %v4221_v7 }
 0xdc7   : > { %v4303_v32 = vpop.f32.mrb[24].mxu0  ;;  %v4344_v35 = vpop.f32.mrb[24].mxu1 }
 0xdc8   : > { %v4363_v43 = vadd.f32 %v4303_v32, %v10539_v23  ;;  %v4365_v30 = vadd.f32 %v4344_v35, %v10540_v39  ;;  %v4305_v42 = vpop.f32.mrb[25].mxu0  ;;  %v4346_v51 = vpop.f32.mrb[25].mxu1 }
 0xdc9   : > { %v4364_v36 = vadd.f32 %v4305_v42, %v8966_v25  ;;  %v4366_v49 = vadd.f32 %v4346_v51, %v8970_v28  ;;  %v4307_v6 = vpop.f32.mrb[26].mxu0  ;;  %v4348_v18 = vpop.f32.mrb[26].mxu1 }
 0xdca   : > { %v4371_v10 = vrot.slane %v4363_v43, 6  ;;  %v4373_v9 = vrot.slane %v4365_v30, 6  ;;  %v4308_v12 = vpop.f32.mrb[27].mxu0  ;;  %v4349_v46 = vpop.f32.mrb[27].mxu1  ;;  %v10542_v18 = vld [vmem:[#allocation116_spill] sm:$0xff] }
 0xdcb   : > { %v4372_v3 = vrot.slane %v4364_v36, 6  ;;  %v4374_v32 = vrot.slane %v4366_v49, 6  ;;  %v10546_v46 = vld [vmem:[#allocation120_spill] sm:$0xff] }
 0xdcc   : > { %v4379_v35 = vsel %vm486_vm1, %v4359_v22, %v4371_v10  ;;  %v4381_v39 = vsel %vm486_vm1, %v4361_v27, %v4373_v9  ;;  %v10543_v22 = vld [vmem:[#allocation117_spill] sm:$0xff]  ;;  %v10544_v27 = vld [vmem:[#allocation118_spill] sm:$0xff]  ;;  %v10545_v9 = vld [vmem:[#allocation119_spill] sm:$0xff] }
 0xdcd   : > { %v6141_v23 = vmul.f32 -1.442695, %v4379_v35  ;;  %v4380_v42 = vsel %vm486_vm1, %v4360_v16, %v4372_v3  ;;  %v4382_v51 = vsel %vm486_vm1, %v4362_v59, %v4374_v32  ;;  %v10547_v32 = vld [vmem:[#allocation121_spill] sm:$0xff]  ;;  %v10548_v35 = vld [vmem:[#allocation122_spill] sm:$0xff] }
 0xdce   : > { %v6142_v6 = vmul.f32 -1.442695, %v4380_v42  ;;  %v6143_v43 = vmul.f32 -1.442695, %v4382_v51  ;;  %v10549_v42 = vld [vmem:[#allocation123_spill] sm:$0xff]  ;;  %v10550_v51 = vld [vmem:[#allocation124_spill] sm:$0xff] }
 0xdcf   : > { %6935 = vpow2.f32 %v6141_v23 }
 0xdd0   : > { %6937 = vpow2.f32 %v6142_v6  ;;  %v10551_v6 = vld [vmem:[#allocation125_spill] sm:$0xff] }
 0xdd1   : > { %6939 = vpow2.f32 %v6143_v43  ;;  %v10552_v43 = vld [vmem:[#allocation126_spill] sm:$0xff] }
 0xdd2   : > { %6941 = vtanh.f32 %v4381_v39 }
 0xdd9   : > { %v6936_v30 = vpop.eup %6935 }
 0xdda   : > { %v6938_v12 = vpop.eup %6937  ;;  %v4386_v7 = vadd.f32 1.0, %v6936_v30  ;;  %v10553_v30 = vld [vmem:[#allocation127_spill] sm:$0xff] }
 0xddb   : > { %v4392_v62 = vadd.f32 1.0, %v6938_v12  ;;  %v6940_v48 = vpop.eup %6939  ;;  %v10554_v12 = vld [vmem:[#allocation128_spill] sm:$0xff] }
 0xddc   : > { %6943 = vrcp.f32 %v4386_v7  ;;  %v6942_v8 = vpop.eup %6941  ;;  %v4399_v3 = vadd.f32 1.0, %v6940_v48  ;;  %v10555_v7 = vld [vmem:[#allocation129_spill] sm:$0xff]  ;;  %v10557_v48 = vld [vmem:[#allocation131_spill] sm:$0xff] }
 0xddd   : > { %6945 = vrcp.f32 %v4392_v62  ;;  %v10556_v62 = vld [vmem:[#allocation130_spill] sm:$0xff] }
 0xdde   : > { %6947 = vrcp.f32 %v4399_v3  ;;  %v10562_v3 = vld [vmem:[#allocation136_spill] sm:$0xff] }
 0xde6   : > { %v6944_v10 = vpop.eup %6943 }
 0xde7   : > { %v6946_v11 = vpop.eup %6945  ;;  %v4403_v63 = vmul.f32 %v6944_v10, %v6942_v8  ;;  %v10558_v8 = vld [vmem:[#allocation132_spill] sm:$0xff]  ;;  %v10559_v10 = vld [vmem:[#allocation133_spill] sm:$0xff] }
 0xde8   : > { %v4402_v59 = vmul.f32 %v6946_v11, %v9137_v38  ;;  %v6948_v23 = vpop.eup %6947  ;;  %v10541_v38 = vld [vmem:[#allocation115_spill] sm:$0xff]  ;;  %v10560_v11 = vld [vmem:[#allocation134_spill] sm:$0xff] }
 0xdea   : > { %v9287_v16 = vadd.f32 %v4403_v63, %v4402_v59  ;;  %v10561_v63 = vld [vmem:[#allocation135_spill] sm:$0xff]  ;;  %v10563_v59 = vld [vmem:[#allocation137_spill] sm:$0xff] }
 0xdec   : > { %6949 = vtanh.f32 %v9287_v16 }
 0xdf6   : > { %v6950_v40 = vpop.eup %6949 }
 0xdf7   : > { %v4406_v34 = vmul.f32 %v6950_v40, %v6948_v23  ;;  %v10564_v23 = vld [vmem:[#allocation138_spill] sm:$0xff]  ;;  %v10565_v40 = vld [vmem:[#allocation139_spill] sm:$0xff] }
 0xdf9   : > { %v4408_v39 = vrot.slane %v4406_v34, 2  ;;  %v9290_v49 = vpack.c.bf16 %v4406_v34, %v4406_v34  ;;  %v10566_v34 = vld [vmem:[#allocation140_spill] sm:$0xff] }
 0xdfb   : > { %v4411_v36 = vpack.c.bf16 %v4408_v39, %v4408_v39  ;;  %v10567_v39 = vld [vmem:[#allocation141_spill] sm:$0xff] }
 0xdfd   : > { %4444 = vmatprep.mubr.bf16.mxu0 %v4411_v36  ;;  %4485 = vmatprep.mubr.bf16.mxu1 %v4411_v36 }
 0xdfe   : > { %4445 = vmatmul.mubr.bf16.vlgmr.msra.gmra.mrb[28].mxu0 %v9290_v49  ;;  %4486 = vmatmul.mubr.bf16.vlgmr.msra.gmra.mrb[28].mxu1 %v9290_v49 }
 0xdff   : > { %4495 = vmatpush1.bf16.msra.mxu0 %v8670_v37  ;;  %4536 = vmatpush1.bf16.msra.mxu1 %v10338_v26 }
 0xe00   : > { %4526 = vmatprep.mubr.bf16.mxu0 %v4411_v36  ;;  %4567 = vmatprep.mubr.bf16.mxu1 %v4411_v36  ;;  %v10568_v36 = vld [vmem:[#allocation142_spill] sm:$0xff] }
 0xe01   : > { %4496 = vmatprep.subr.bf16.mxu0 %v10339_v60  ;;  %4537 = vmatprep.subr.bf16.mxu1 %v10340_v55 }
 0xe03   : > { %4497 = vmatpush1.bf16.msra.mxu0 %v10341_v4  ;;  %4538 = vmatpush1.bf16.msra.mxu1 %v10342_v53 }
 0xe04   : > { %4498 = vmatprep.subr.bf16.mxu0 %v10343_v58  ;;  %4539 = vmatprep.subr.bf16.mxu1 %v10344_v21 }
 0xe07   : > { %4499 = vmatpush1.bf16.msra.mxu0 %v10345_v45  ;;  %4540 = vmatpush1.bf16.msra.mxu1 %v10346_v47 }
 0xe08   : > { %4500 = vmatprep.subr.bf16.mxu0 %v10347_v1  ;;  %4541 = vmatprep.subr.bf16.mxu1 %v10348_v56 }
 0xe0b   : > { %4501 = vmatpush1.bf16.msra.mxu0 %v10349_v29  ;;  %4542 = vmatpush1.bf16.msra.mxu1 %v10350_v52 }
 0xe0c   : > { %4502 = vmatprep.subr.bf16.mxu0 %v10351_v41  ;;  %4543 = vmatprep.subr.bf16.mxu1 %v10352_v24 }
 0xe0f   : > { %4503 = vmatpush1.bf16.msra.mxu0 %v10353_v13  ;;  %4544 = vmatpush1.bf16.msra.mxu1 %v10439_v44 }
 0xe10   : > { %4504 = vmatprep.subr.bf16.mxu0 %v10440_v17  ;;  %4545 = vmatprep.subr.bf16.mxu1 %v10441_v54 }
 0xe13   : > { %4505 = vmatpush1.bf16.msra.mxu0 %v10442_v61  ;;  %4546 = vmatpush1.bf16.msra.mxu1 %v10443_v50 }
 0xe14   : > { %4506 = vmatprep.subr.bf16.mxu0 %v10444_v20  ;;  %4547 = vmatprep.subr.bf16.mxu1 %v10445_v2 }
 0xe17   : > { %4507 = vmatpush1.bf16.msra.mxu0 %v10446_v0  ;;  %4548 = vmatpush1.bf16.msra.mxu1 %v10447_v15 }
 0xe18   : > { %4508 = vmatprep.subr.bf16.mxu0 %v10448_v31  ;;  %4549 = vmatprep.subr.bf16.mxu1 %v10449_v14 }
 0xe1b   : > { %4509 = vmatpush1.bf16.msra.mxu0 %v10450_v19  ;;  %4550 = vmatpush1.bf16.msra.mxu1 %v10451_v5 }
 0xe1c   : > { %4510 = vmatprep.subr.bf16.mxu0 %v10452_v33  ;;  %4551 = vmatprep.subr.bf16.mxu1 %v10453_v57 }
 0xe1f   : > { %4511 = vmatpush1.bf16.msra.mxu0 %v10541_v38  ;;  %4552 = vmatpush1.bf16.msra.mxu1 %v10542_v18 }
 0xe20   : > { %4512 = vmatprep.subr.bf16.mxu0 %v10543_v22  ;;  %4553 = vmatprep.subr.bf16.mxu1 %v10544_v27 }
 0xe23   : > { %4513 = vmatpush1.bf16.msra.mxu0 %v10545_v9  ;;  %4554 = vmatpush1.bf16.msra.mxu1 %v10546_v46 }
 0xe24   : > { %4514 = vmatprep.subr.bf16.mxu0 %v10547_v32  ;;  %4555 = vmatprep.subr.bf16.mxu1 %v10548_v35 }
 0xe27   : > { %4515 = vmatpush1.bf16.msra.mxu0 %v10549_v42  ;;  %4556 = vmatpush1.bf16.msra.mxu1 %v10550_v51  ;;  %v10642_v42 = vld [vmem:[#allocation146_spill] sm:$0xff] }
 0xe28   : > { %4516 = vmatprep.subr.bf16.mxu0 %v10551_v6  ;;  %4557 = vmatprep.subr.bf16.mxu1 %v10552_v43 }
 0xe2b   : > { %4517 = vmatpush1.bf16.msra.mxu0 %v10553_v30  ;;  %4558 = vmatpush1.bf16.msra.mxu1 %v10554_v12  ;;  %v7033_v12 = vld [vmem:[%s8675_s23 + $0x8] sm:$0xff] }
 0xe2c   : > { %4518 = vmatprep.subr.bf16.mxu0 %v10555_v7  ;;  %4559 = vmatprep.subr.bf16.mxu1 %v10556_v62  ;;  %v7031_v62 = vld [vmem:[%s8675_s23] sm:$0xff]  ;;  %v7032_v7 = vld [vmem:[%s8675_s23 + $0x10] sm:$0xff]  ;;  %v4581_v30 = vrot.slane %v7033_v12, 4 }
 0xe2f   : > { %4519 = vmatpush1.bf16.msra.mxu0 %v10557_v48  ;;  %4560 = vmatpush1.bf16.msra.mxu1 %v10558_v8  ;;  %v10569_v8 = vld [vmem:[#allocation143_spill] sm:$0xff] }
 0xe30   : > { %4520 = vmatprep.subr.bf16.mxu0 %v10559_v10  ;;  %4561 = vmatprep.subr.bf16.mxu1 %v10560_v11  ;;  %v10570_v10 = vld [vmem:[#allocation144_spill] sm:$0xff]  ;;  %v10571_v11 = vld [vmem:[#allocation13_spill] sm:$0xff] }
 0xe33   : > { %4521 = vmatpush1.bf16.msra.mxu0 %v10561_v63  ;;  %4562 = vmatpush1.bf16.msra.mxu1 %v10562_v3  ;;  %v10572_v63 = vld [vmem:[#allocation16_spill] sm:$0xff] }
 0xe34   : > { %4522 = vmatprep.subr.bf16.mxu0 %v10563_v59  ;;  %4563 = vmatprep.subr.bf16.mxu1 %v10564_v23  ;;  %v10573_v23 = vld [vmem:[#allocation14_spill] sm:$0xff] }
 0xe35   : > { %v10582_v59 = vld [vmem:[#allocation26_spill] sm:$0xff] }
 0xe37   : > { %4523 = vmatpush1.bf16.msra.mxu0 %v10565_v40  ;;  %4564 = vmatpush1.bf16.msra.mxu1 %v10566_v34  ;;  %v10574_v40 = vld [vmem:[#allocation18_spill] sm:$0xff]  ;;  %v10575_v34 = vld [vmem:[#allocation15_spill] sm:$0xff] }
 0xe38   : > { %4524 = vmatprep.subr.bf16.mxu0 %v10567_v39  ;;  %4565 = vmatprep.subr.bf16.mxu1 %v10568_v36  ;;  %v10576_v39 = vld [vmem:[#allocation20_spill] sm:$0xff]  ;;  %v10577_v36 = vld [vmem:[#allocation17_spill] sm:$0xff] }
 0xe3b   : > { %4525 = vmatpush1.bf16.msra.mxu0 %v10569_v8  ;;  %4566 = vmatpush1.bf16.msra.mxu1 %v10570_v10  ;;  %v10578_v8 = vld [vmem:[#allocation22_spill] sm:$0xff]  ;;  %v10579_v10 = vld [vmem:[#allocation19_spill] sm:$0xff] }
 0xe3c   : > { %4645 = vmatprep.subr.bf16.mxu0 %v10571_v11  ;;  %4686 = vmatprep.subr.bf16.mxu1 %v10572_v63  ;;  %v10580_v11 = vld [vmem:[#allocation24_spill] sm:$0xff]  ;;  %v10581_v63 = vld [vmem:[#allocation21_spill] sm:$0xff] }
 0xe3e   : > { %4527 = vmatmul.mubr.bf16.vlgmr.msra.gmra.mrb[32].mxu0 %v9290_v49  ;;  %4568 = vmatmul.mubr.bf16.vlgmr.msra.gmra.mrb[32].mxu1 %v9290_v49  ;;  %v10583_v49 = vld [vmem:[#allocation23_spill] sm:$0xff] }
 0xe3f   : > { %4646 = vmatpush1.bf16.msra.mxu0 %v10573_v23  ;;  %4687 = vmatpush1.bf16.msra.mxu1 %v10574_v40  ;;  %v10584_v23 = vld [vmem:[#allocation27_spill] sm:$0xff]  ;;  %v10585_v40 = vld [vmem:[#allocation25_spill] sm:$0xff] }
 0xe40   : > { %4647 = vmatprep.subr.bf16.mxu0 %v10575_v34  ;;  %4688 = vmatprep.subr.bf16.mxu1 %v10576_v39  ;;  %v10586_v34 = vld [vmem:[#allocation28_spill] sm:$0xff]  ;;  %v10587_v39 = vld [vmem:[#allocation29_spill] sm:$0xff] }
 0xe43   : > { %4648 = vmatpush1.bf16.msra.mxu0 %v10577_v36  ;;  %4689 = vmatpush1.bf16.msra.mxu1 %v10578_v8  ;;  %v10588_v36 = vld [vmem:[#allocation30_spill] sm:$0xff]  ;;  %v10589_v8 = vld [vmem:[#allocation31_spill] sm:$0xff] }
 0xe44   : > { %4649 = vmatprep.subr.bf16.mxu0 %v10579_v10  ;;  %4690 = vmatprep.subr.bf16.mxu1 %v10580_v11  ;;  %v10590_v10 = vld [vmem:[#allocation32_spill] sm:$0xff]  ;;  %v10591_v11 = vld [vmem:[#allocation33_spill] sm:$0xff] }
 0xe47   : > { %4650 = vmatpush1.bf16.msra.mxu0 %v10581_v63  ;;  %4691 = vmatpush1.bf16.msra.mxu1 %v10582_v59  ;;  %v10592_v63 = vld [vmem:[#allocation34_spill] sm:$0xff]  ;;  %v10593_v59 = vld [vmem:[#allocation35_spill] sm:$0xff] }
 0xe48   : > { %4651 = vmatprep.subr.bf16.mxu0 %v10583_v49  ;;  %4692 = vmatprep.subr.bf16.mxu1 %v10584_v23  ;;  %v10594_v49 = vld [vmem:[#allocation36_spill] sm:$0xff]  ;;  %v10595_v23 = vld [vmem:[#allocation37_spill] sm:$0xff] }
 0xe4b   : > { %4652 = vmatpush1.bf16.msra.mxu0 %v10585_v40  ;;  %4693 = vmatpush1.bf16.msra.mxu1 %v10586_v34  ;;  %v10596_v40 = vld [vmem:[#allocation38_spill] sm:$0xff]  ;;  %v10597_v34 = vld [vmem:[#allocation39_spill] sm:$0xff] }
 0xe4c   : > { %4653 = vmatprep.subr.bf16.mxu0 %v10587_v39  ;;  %4694 = vmatprep.subr.bf16.mxu1 %v10588_v36  ;;  %v10598_v39 = vld [vmem:[#allocation40_spill] sm:$0xff]  ;;  %v10599_v36 = vld [vmem:[#allocation41_spill] sm:$0xff] }
 0xe4f   : > { %4654 = vmatpush1.bf16.msra.mxu0 %v10589_v8  ;;  %4695 = vmatpush1.bf16.msra.mxu1 %v10590_v10  ;;  %v10600_v8 = vld [vmem:[#allocation42_spill] sm:$0xff]  ;;  %v10601_v10 = vld [vmem:[#allocation43_spill] sm:$0xff] }
 0xe50   : > { %4655 = vmatprep.subr.bf16.mxu0 %v10591_v11  ;;  %4696 = vmatprep.subr.bf16.mxu1 %v10592_v63  ;;  %v10602_v11 = vld [vmem:[#allocation44_spill] sm:$0xff]  ;;  %v10603_v63 = vld [vmem:[#allocation45_spill] sm:$0xff] }
 0xe53   : > { %4656 = vmatpush1.bf16.msra.mxu0 %v10593_v59  ;;  %4697 = vmatpush1.bf16.msra.mxu1 %v10594_v49  ;;  %v10604_v59 = vld [vmem:[#allocation46_spill] sm:$0xff]  ;;  %v10605_v49 = vld [vmem:[#allocation47_spill] sm:$0xff] }
 0xe54   : > { %4657 = vmatprep.subr.bf16.mxu0 %v10595_v23  ;;  %4698 = vmatprep.subr.bf16.mxu1 %v10596_v40  ;;  %v10606_v23 = vld [vmem:[#allocation48_spill] sm:$0xff]  ;;  %v10607_v40 = vld [vmem:[#allocation49_spill] sm:$0xff] }
 0xe57   : > { %4658 = vmatpush1.bf16.msra.mxu0 %v10597_v34  ;;  %4699 = vmatpush1.bf16.msra.mxu1 %v10598_v39  ;;  %v10608_v34 = vld [vmem:[#allocation50_spill] sm:$0xff]  ;;  %v10609_v39 = vld [vmem:[#allocation51_spill] sm:$0xff] }
 0xe58   : > { %4659 = vmatprep.subr.bf16.mxu0 %v10599_v36  ;;  %4700 = vmatprep.subr.bf16.mxu1 %v10600_v8  ;;  %v10610_v36 = vld [vmem:[#allocation52_spill] sm:$0xff]  ;;  %v10611_v8 = vld [vmem:[#allocation53_spill] sm:$0xff] }
 0xe5b   : > { %4660 = vmatpush1.bf16.msra.mxu0 %v10601_v10  ;;  %4701 = vmatpush1.bf16.msra.mxu1 %v10602_v11  ;;  %v10612_v10 = vld [vmem:[#allocation54_spill] sm:$0xff]  ;;  %v10613_v11 = vld [vmem:[#allocation55_spill] sm:$0xff] }
 0xe5c   : > { %4661 = vmatprep.subr.bf16.mxu0 %v10603_v63  ;;  %4702 = vmatprep.subr.bf16.mxu1 %v10604_v59  ;;  %v10614_v63 = vld [vmem:[#allocation56_spill] sm:$0xff]  ;;  %v10615_v59 = vld [vmem:[#allocation57_spill] sm:$0xff] }
 0xe5f   : > { %4662 = vmatpush1.bf16.msra.mxu0 %v10605_v49  ;;  %4703 = vmatpush1.bf16.msra.mxu1 %v10606_v23  ;;  %v10616_v49 = vld [vmem:[#allocation58_spill] sm:$0xff]  ;;  %v10617_v23 = vld [vmem:[#allocation59_spill] sm:$0xff] }
 0xe60   : > { %4663 = vmatprep.subr.bf16.mxu0 %v10607_v40  ;;  %4704 = vmatprep.subr.bf16.mxu1 %v10608_v34  ;;  %v10618_v40 = vld [vmem:[#allocation60_spill] sm:$0xff]  ;;  %v10619_v34 = vld [vmem:[#allocation61_spill] sm:$0xff] }
 0xe63   : > { %4664 = vmatpush1.bf16.msra.mxu0 %v10609_v39  ;;  %4705 = vmatpush1.bf16.msra.mxu1 %v10610_v36  ;;  %v10620_v39 = vld [vmem:[#allocation62_spill] sm:$0xff]  ;;  %v10621_v36 = vld [vmem:[#allocation63_spill] sm:$0xff] }
 0xe64   : > { %4665 = vmatprep.subr.bf16.mxu0 %v10611_v8  ;;  %4706 = vmatprep.subr.bf16.mxu1 %v10612_v10  ;;  %v10622_v8 = vld [vmem:[#allocation64_spill] sm:$0xff]  ;;  %v10623_v10 = vld [vmem:[#allocation65_spill] sm:$0xff] }
 0xe67   : > { %4666 = vmatpush1.bf16.msra.mxu0 %v10613_v11  ;;  %4707 = vmatpush1.bf16.msra.mxu1 %v10614_v63  ;;  %v10624_v11 = vld [vmem:[#allocation67_spill] sm:$0xff]  ;;  %v10625_v63 = vld [vmem:[#allocation66_spill] sm:$0xff] }
 0xe68   : > { %4667 = vmatprep.subr.bf16.mxu0 %v10615_v59  ;;  %4708 = vmatprep.subr.bf16.mxu1 %v10616_v49  ;;  %v10626_v59 = vld [vmem:[#allocation68_spill] sm:$0xff]  ;;  %v10627_v49 = vld [vmem:[#allocation69_spill] sm:$0xff] }
 0xe6b   : > { %4668 = vmatpush1.bf16.msra.mxu0 %v10617_v23  ;;  %4709 = vmatpush1.bf16.msra.mxu1 %v10618_v40  ;;  %v10628_v23 = vld [vmem:[#allocation70_spill] sm:$0xff]  ;;  %v10629_v40 = vld [vmem:[#allocation71_spill] sm:$0xff] }
 0xe6c   : > { %4669 = vmatprep.subr.bf16.mxu0 %v10619_v34  ;;  %4710 = vmatprep.subr.bf16.mxu1 %v10620_v39  ;;  %v10630_v34 = vld [vmem:[#allocation72_spill] sm:$0xff] }
 0xe6f   : > { %4670 = vmatpush1.bf16.msra.mxu0 %v10621_v36  ;;  %4711 = vmatpush1.bf16.msra.mxu1 %v10622_v8  ;;  %v10631_v36 = vld [vmem:[#allocation73_spill] sm:$0xff]  ;;  %v10632_v8 = vld [vmem:[#allocation74_spill] sm:$0xff] }
 0xe70   : > { %4671 = vmatprep.subr.bf16.mxu0 %v10623_v10  ;;  %4712 = vmatprep.subr.bf16.mxu1 %v10624_v11  ;;  %v10633_v10 = vld [vmem:[#allocation75_spill] sm:$0xff]  ;;  %v10634_v11 = vld [vmem:[#allocation76_spill] sm:$0xff] }
 0xe73   : > { %4672 = vmatpush1.bf16.msra.mxu0 %v10625_v63  ;;  %4713 = vmatpush1.bf16.msra.mxu1 %v10626_v59  ;;  %v10635_v59 = vld [vmem:[#allocation77_spill] sm:$0xff] }
 0xe74   : > { %4673 = vmatprep.subr.bf16.mxu0 %v10627_v49  ;;  %4714 = vmatprep.subr.bf16.mxu1 %v10628_v23  ;;  %v10636_v49 = vld [vmem:[#allocation78_spill] sm:$0xff] }
 0xe77   : > { %4674 = vmatpush1.bf16.msra.mxu0 %v10629_v40  ;;  %4715 = vmatpush1.bf16.msra.mxu1 %v10630_v34 }
 0xe78   : > { %4675 = vmatprep.subr.bf16.mxu0 %v10631_v36  ;;  %4716 = vmatprep.subr.bf16.mxu1 %v10632_v8  ;;  %v4580_v8 = vrot.slane %v7031_v62, 4 }
 0xe7b   : > { %4676 = vmatpush1.bf16.msra.mxu0 %v10633_v10  ;;  %4717 = vmatpush1.bf16.msra.mxu1 %v10634_v11  ;;  %v4582_v10 = vrot.slane %v7032_v7, 4  ;;  %v7034_v11 = vld [vmem:[%s8675_s23 + $0x18] sm:$0xff] }
 0xe7c   : > { %4727 = vmatprep.subr.bf16.mxu0 %v10635_v59  ;;  %4768 = vmatprep.subr.bf16.mxu1 %v10636_v49  ;;  %v4583_v43 = vrot.slane %v7034_v11, 4  ;;  %v9428_v59 = vunpack.c.l.bf16 %v4580_v8  ;;  %v9432_v49 = vunpack.c.l.bf16 %v4581_v30 }
 0xe7d   : > { %v9430_v6 = vunpack.c.l.bf16 %v4582_v10 }
 0xe7e   : > { %10637 = vst [vmem:[#allocation12_spill] sm:$0xff] %v9428_v59  ;;  %10639 = vst [vmem:[#allocation79_spill] sm:$0xff] %v9432_v49  ;;  %v9434_v51 = vunpack.c.l.bf16 %v4583_v43 }
 0xe7f   : > { %10638 = vst [vmem:[#allocation84_spill] sm:$0xff] %v9430_v6 }
 0xe80   : > { %10640 = vst [vmem:[#allocation85_spill] sm:$0xff] %v9434_v51 }
 0xed1   : > { %v4446_v23 = vpop.f32.mrb[28].mxu0  ;;  %v4487_v40 = vpop.f32.mrb[28].mxu1 }
 0xed2   : > { %v4448_v63 = vpop.f32.mrb[29].mxu0  ;;  %v4489_v39 = vpop.f32.mrb[29].mxu1  ;;  %v4592_v10 = vadd.f32 %v9428_v59, %v4446_v23  ;;  %v4594_v30 = vadd.f32 %v9430_v6, %v4487_v40 }
 0xed3   : > { %v4450_v34 = vpop.f32.mrb[30].mxu0  ;;  %v4491_v3 = vpop.f32.mrb[30].mxu1 }
 0xed4   : > { %v4451_v36 = vpop.f32.mrb[31].mxu0  ;;  %v4492_v48 = vpop.f32.mrb[31].mxu1 }
 0xed5   : > { %v10641_v36 = vld [vmem:[#allocation145_spill] sm:$0xff] }
 0xf11   : > { %v4528_v34 = vpop.f32.mrb[32].mxu0  ;;  %v4569_v3 = vpop.f32.mrb[32].mxu1 }
 0xf12   : > { %v4596_v48 = vadd.f32 %v4528_v34, %v10641_v36  ;;  %v4598_v62 = vadd.f32 %v4569_v3, %v10642_v42  ;;  %v4530_v35 = vpop.f32.mrb[33].mxu0  ;;  %v4571_v7 = vpop.f32.mrb[33].mxu1  ;;  %v4593_v34 = vadd.f32 %v9432_v49, %v4448_v63  ;;  %v4595_v3 = vadd.f32 %v9434_v51, %v4489_v39 }
 0xf13   : > { %v4597_v12 = vadd.f32 %v4530_v35, %v8966_v25  ;;  %v4599_v11 = vadd.f32 %v4571_v7, %v8970_v28  ;;  %v4532_v8 = vpop.f32.mrb[34].mxu0  ;;  %v4573_v32 = vpop.f32.mrb[34].mxu1 }
 0xf14   : > { %v4604_v43 = vrot.slane %v4596_v48, 6  ;;  %v4606_v46 = vrot.slane %v4598_v62, 6  ;;  %v4533_v9 = vpop.f32.mrb[35].mxu0  ;;  %v4574_v27 = vpop.f32.mrb[35].mxu1 }
 0xf15   : > { %v4605_v42 = vrot.slane %v4597_v12, 6  ;;  %v4607_v36 = vrot.slane %v4599_v11, 6 }
 0xf16   : > { %v4612_v35 = vsel %vm486_vm1, %v4592_v10, %v4604_v43  ;;  %v4614_v7 = vsel %vm486_vm1, %v4594_v30, %v4606_v46 }
 0xf17   : > { %v6144_v8 = vmul.f32 -1.442695, %v4612_v35  ;;  %v4613_v32 = vsel %vm486_vm1, %v4593_v34, %v4605_v42  ;;  %v4615_v23 = vsel %vm486_vm1, %v4595_v3, %v4607_v36 }
 0xf18   : > { %v6145_v40 = vmul.f32 -1.442695, %v4613_v32  ;;  %v6146_v9 = vmul.f32 -1.442695, %v4615_v23  ;;  %v10644_v32 = vld [vmem:[#allocation119_spill] sm:$0xff]  ;;  %v10645_v23 = vld [vmem:[#allocation120_spill] sm:$0xff] }
 0xf19   : > { %6951 = vpow2.f32 %v6144_v8 }
 0xf1a   : > { %6953 = vpow2.f32 %v6145_v40  ;;  %v10646_v40 = vld [vmem:[#allocation121_spill] sm:$0xff] }
 0xf1b   : > { %6955 = vpow2.f32 %v6146_v9  ;;  %v10647_v9 = vld [vmem:[#allocation122_spill] sm:$0xff] }
 0xf1c   : > { %6957 = vtanh.f32 %v4614_v7 }
 0xf23   : > { %v6952_v27 = vpop.eup %6951 }
 0xf24   : > { %v6954_v48 = vpop.eup %6953  ;;  %v4619_v63 = vadd.f32 1.0, %v6952_v27  ;;  %v10648_v27 = vld [vmem:[#allocation123_spill] sm:$0xff] }
 0xf25   : > { %v4625_v39 = vadd.f32 1.0, %v6954_v48  ;;  %v6956_v62 = vpop.eup %6955  ;;  %v10649_v48 = vld [vmem:[#allocation124_spill] sm:$0xff] }
 0xf26   : > { %6959 = vrcp.f32 %v4619_v63  ;;  %v6958_v12 = vpop.eup %6957  ;;  %v4632_v42 = vadd.f32 1.0, %v6956_v62  ;;  %v10650_v63 = vld [vmem:[#allocation125_spill] sm:$0xff]  ;;  %v10652_v62 = vld [vmem:[#allocation127_spill] sm:$0xff] }
 0xf27   : > { %6961 = vrcp.f32 %v4625_v39  ;;  %v10651_v39 = vld [vmem:[#allocation126_spill] sm:$0xff] }
 0xf28   : > { %6963 = vrcp.f32 %v4632_v42  ;;  %v10657_v42 = vld [vmem:[#allocation132_spill] sm:$0xff] }
 0xf30   : > { %v6960_v46 = vpop.eup %6959 }
 0xf31   : > { %v6962_v11 = vpop.eup %6961  ;;  %v4636_v10 = vmul.f32 %v6960_v46, %v6958_v12  ;;  %v10653_v12 = vld [vmem:[#allocation128_spill] sm:$0xff]  ;;  %v10654_v46 = vld [vmem:[#allocation129_spill] sm:$0xff] }
 0xf32   : > { %v4635_v36 = vmul.f32 %v6962_v11, %v9287_v16  ;;  %v6964_v43 = vpop.eup %6963  ;;  %v10643_v16 = vld [vmem:[#allocation118_spill] sm:$0xff] }
 0xf33   : > { %v10655_v11 = vld [vmem:[#allocation130_spill] sm:$0xff] }
 0xf34   : > { %v9449_v30 = vadd.f32 %v4636_v10, %v4635_v36  ;;  %v10656_v10 = vld [vmem:[#allocation131_spill] sm:$0xff]  ;;  %v10658_v36 = vld [vmem:[#allocation133_spill] sm:$0xff] }
 0xf36   : > { %6965 = vtanh.f32 %v9449_v30 }
 0xf40   : > { %v6966_v34 = vpop.eup %6965 }
 0xf41   : > { %v4639_v3 = vmul.f32 %v6966_v34, %v6964_v43  ;;  %v10659_v43 = vld [vmem:[#allocation134_spill] sm:$0xff]  ;;  %v10660_v34 = vld [vmem:[#allocation135_spill] sm:$0xff] }
 0xf43   : > { %v4641_v35 = vrot.slane %v4639_v3, 2  ;;  %v9452_v8 = vpack.c.bf16 %v4639_v3, %v4639_v3  ;;  %v10661_v3 = vld [vmem:[#allocation136_spill] sm:$0xff] }
 0xf45   : > { %v4644_v7 = vpack.c.bf16 %v4641_v35, %v4641_v35  ;;  %v10662_v35 = vld [vmem:[#allocation137_spill] sm:$0xff] }
 0xf47   : > { %4677 = vmatprep.mubr.bf16.mxu0 %v4644_v7  ;;  %4718 = vmatprep.mubr.bf16.mxu1 %v4644_v7 }
 0xf48   : > { %4678 = vmatmul.mubr.bf16.vlgmr.msra.gmra.mrb[36].mxu0 %v9452_v8  ;;  %4719 = vmatmul.mubr.bf16.vlgmr.msra.gmra.mrb[36].mxu1 %v9452_v8 }
 0xf49   : > { %4728 = vmatpush1.bf16.msra.mxu0 %v8670_v37  ;;  %4769 = vmatpush1.bf16.msra.mxu1 %v10338_v26 }
 0xf4a   : > { %4759 = vmatprep.mubr.bf16.mxu0 %v4644_v7  ;;  %4800 = vmatprep.mubr.bf16.mxu1 %v4644_v7  ;;  %v10663_v7 = vld [vmem:[#allocation138_spill] sm:$0xff] }
 0xf4b   : > { %4729 = vmatprep.subr.bf16.mxu0 %v10339_v60  ;;  %4770 = vmatprep.subr.bf16.mxu1 %v10340_v55 }
 0xf4d   : > { %4730 = vmatpush1.bf16.msra.mxu0 %v10341_v4  ;;  %4771 = vmatpush1.bf16.msra.mxu1 %v10342_v53 }
 0xf4e   : > { %4731 = vmatprep.subr.bf16.mxu0 %v10343_v58  ;;  %4772 = vmatprep.subr.bf16.mxu1 %v10344_v21 }
 0xf51   : > { %4732 = vmatpush1.bf16.msra.mxu0 %v10345_v45  ;;  %4773 = vmatpush1.bf16.msra.mxu1 %v10346_v47 }
 0xf52   : > { %4733 = vmatprep.subr.bf16.mxu0 %v10347_v1  ;;  %4774 = vmatprep.subr.bf16.mxu1 %v10348_v56 }
 0xf55   : > { %4734 = vmatpush1.bf16.msra.mxu0 %v10349_v29  ;;  %4775 = vmatpush1.bf16.msra.mxu1 %v10350_v52 }
 0xf56   : > { %4735 = vmatprep.subr.bf16.mxu0 %v10351_v41  ;;  %4776 = vmatprep.subr.bf16.mxu1 %v10352_v24 }
 0xf59   : > { %4736 = vmatpush1.bf16.msra.mxu0 %v10353_v13  ;;  %4777 = vmatpush1.bf16.msra.mxu1 %v10439_v44 }
 0xf5a   : > { %4737 = vmatprep.subr.bf16.mxu0 %v10440_v17  ;;  %4778 = vmatprep.subr.bf16.mxu1 %v10441_v54 }
 0xf5d   : > { %4738 = vmatpush1.bf16.msra.mxu0 %v10442_v61  ;;  %4779 = vmatpush1.bf16.msra.mxu1 %v10443_v50 }
 0xf5e   : > { %4739 = vmatprep.subr.bf16.mxu0 %v10444_v20  ;;  %4780 = vmatprep.subr.bf16.mxu1 %v10445_v2 }
 0xf61   : > { %4740 = vmatpush1.bf16.msra.mxu0 %v10446_v0  ;;  %4781 = vmatpush1.bf16.msra.mxu1 %v10447_v15 }
 0xf62   : > { %4741 = vmatprep.subr.bf16.mxu0 %v10448_v31  ;;  %4782 = vmatprep.subr.bf16.mxu1 %v10449_v14 }
 0xf65   : > { %4742 = vmatpush1.bf16.msra.mxu0 %v10450_v19  ;;  %4783 = vmatpush1.bf16.msra.mxu1 %v10451_v5 }
 0xf66   : > { %4743 = vmatprep.subr.bf16.mxu0 %v10452_v33  ;;  %4784 = vmatprep.subr.bf16.mxu1 %v10453_v57 }
 0xf69   : > { %4744 = vmatpush1.bf16.msra.mxu0 %v10541_v38  ;;  %4785 = vmatpush1.bf16.msra.mxu1 %v10542_v18 }
 0xf6a   : > { %4745 = vmatprep.subr.bf16.mxu0 %v10543_v22  ;;  %4786 = vmatprep.subr.bf16.mxu1 %v10643_v16 }
 0xf6d   : > { %4746 = vmatpush1.bf16.msra.mxu0 %v10644_v32  ;;  %4787 = vmatpush1.bf16.msra.mxu1 %v10645_v23 }
 0xf6e   : > { %4747 = vmatprep.subr.bf16.mxu0 %v10646_v40  ;;  %4788 = vmatprep.subr.bf16.mxu1 %v10647_v9 }
 0xf71   : > { %4748 = vmatpush1.bf16.msra.mxu0 %v10648_v27  ;;  %4789 = vmatpush1.bf16.msra.mxu1 %v10649_v48  ;;  %v10736_v48 = vld [vmem:[#allocation145_spill] sm:$0xff]  ;;  %v10737_v27 = vld [vmem:[#allocation146_spill] sm:$0xff] }
 0xf72   : > { %4749 = vmatprep.subr.bf16.mxu0 %v10650_v63  ;;  %4790 = vmatprep.subr.bf16.mxu1 %v10651_v39 }
 0xf75   : > { %4750 = vmatpush1.bf16.msra.mxu0 %v10652_v62  ;;  %4791 = vmatpush1.bf16.msra.mxu1 %v10653_v12  ;;  %v10664_v12 = vld [vmem:[#allocation139_spill] sm:$0xff] }
 0xf76   : > { %4751 = vmatprep.subr.bf16.mxu0 %v10654_v46  ;;  %4792 = vmatprep.subr.bf16.mxu1 %v10655_v11  ;;  %v10665_v46 = vld [vmem:[#allocation140_spill] sm:$0xff]  ;;  %v10666_v11 = vld [vmem:[#allocation141_spill] sm:$0xff] }
 0xf79   : > { %4752 = vmatpush1.bf16.msra.mxu0 %v10656_v10  ;;  %4793 = vmatpush1.bf16.msra.mxu1 %v10657_v42  ;;  %v10667_v10 = vld [vmem:[#allocation142_spill] sm:$0xff]  ;;  %v10668_v42 = vld [vmem:[#allocation143_spill] sm:$0xff] }
 0xf7a   : > { %4753 = vmatprep.subr.bf16.mxu0 %v10658_v36  ;;  %4794 = vmatprep.subr.bf16.mxu1 %v10659_v43  ;;  %v10669_v36 = vld [vmem:[#allocation144_spill] sm:$0xff]  ;;  %v10670_v43 = vld [vmem:[#allocation13_spill] sm:$0xff] }
 0xf7d   : > { %4754 = vmatpush1.bf16.msra.mxu0 %v10660_v34  ;;  %4795 = vmatpush1.bf16.msra.mxu1 %v10661_v3  ;;  %v10671_v34 = vld [vmem:[#allocation16_spill] sm:$0xff] }
 0xf7e   : > { %4755 = vmatprep.subr.bf16.mxu0 %v10662_v35  ;;  %4796 = vmatprep.subr.bf16.mxu1 %v10663_v7  ;;  %v10672_v7 = vld [vmem:[#allocation14_spill] sm:$0xff] }
 0xf7f   : > { %v10681_v35 = vld [vmem:[#allocation26_spill] sm:$0xff] }
 0xf81   : > { %4756 = vmatpush1.bf16.msra.mxu0 %v10664_v12  ;;  %4797 = vmatpush1.bf16.msra.mxu1 %v10665_v46  ;;  %v10673_v12 = vld [vmem:[#allocation18_spill] sm:$0xff]  ;;  %v10674_v46 = vld [vmem:[#allocation15_spill] sm:$0xff] }
 0xf82   : > { %4757 = vmatprep.subr.bf16.mxu0 %v10666_v11  ;;  %4798 = vmatprep.subr.bf16.mxu1 %v10667_v10  ;;  %v10675_v11 = vld [vmem:[#allocation20_spill] sm:$0xff]  ;;  %v10676_v10 = vld [vmem:[#allocation17_spill] sm:$0xff] }
 0xf85   : > { %4758 = vmatpush1.bf16.msra.mxu0 %v10668_v42  ;;  %4799 = vmatpush1.bf16.msra.mxu1 %v10669_v36  ;;  %v10677_v42 = vld [vmem:[#allocation22_spill] sm:$0xff]  ;;  %v10678_v36 = vld [vmem:[#allocation19_spill] sm:$0xff] }
 0xf86   : > { %4874 = vmatprep.subr.bf16.mxu0 %v10670_v43  ;;  %4915 = vmatprep.subr.bf16.mxu1 %v10671_v34  ;;  %v10679_v43 = vld [vmem:[#allocation24_spill] sm:$0xff]  ;;  %v10680_v34 = vld [vmem:[#allocation21_spill] sm:$0xff] }
 0xf88   : > { %4760 = vmatmul.mubr.bf16.vlgmr.msra.gmra.mrb[40].mxu0 %v9452_v8  ;;  %4801 = vmatmul.mubr.bf16.vlgmr.msra.gmra.mrb[40].mxu1 %v9452_v8  ;;  %v10682_v8 = vld [vmem:[#allocation23_spill] sm:$0xff] }
 0xf89   : > { %4875 = vmatpush1.bf16.msra.mxu0 %v10672_v7  ;;  %4916 = vmatpush1.bf16.msra.mxu1 %v10673_v12  ;;  %v10683_v7 = vld [vmem:[#allocation27_spill] sm:$0xff]  ;;  %v10684_v12 = vld [vmem:[#allocation25_spill] sm:$0xff] }
 0xf8a   : > { %4876 = vmatprep.subr.bf16.mxu0 %v10674_v46  ;;  %4917 = vmatprep.subr.bf16.mxu1 %v10675_v11  ;;  %v10685_v46 = vld [vmem:[#allocation28_spill] sm:$0xff]  ;;  %v10686_v11 = vld [vmem:[#allocation29_spill] sm:$0xff] }
 0xf8d   : > { %4877 = vmatpush1.bf16.msra.mxu0 %v10676_v10  ;;  %4918 = vmatpush1.bf16.msra.mxu1 %v10677_v42  ;;  %v10687_v10 = vld [vmem:[#allocation30_spill] sm:$0xff]  ;;  %v10688_v42 = vld [vmem:[#allocation31_spill] sm:$0xff] }
 0xf8e   : > { %4878 = vmatprep.subr.bf16.mxu0 %v10678_v36  ;;  %4919 = vmatprep.subr.bf16.mxu1 %v10679_v43  ;;  %v10689_v36 = vld [vmem:[#allocation32_spill] sm:$0xff]  ;;  %v10690_v43 = vld [vmem:[#allocation33_spill] sm:$0xff] }
 0xf91   : > { %4879 = vmatpush1.bf16.msra.mxu0 %v10680_v34  ;;  %4920 = vmatpush1.bf16.msra.mxu1 %v10681_v35  ;;  %v10691_v34 = vld [vmem:[#allocation34_spill] sm:$0xff]  ;;  %v10692_v35 = vld [vmem:[#allocation35_spill] sm:$0xff] }
 0xf92   : > { %4880 = vmatprep.subr.bf16.mxu0 %v10682_v8  ;;  %4921 = vmatprep.subr.bf16.mxu1 %v10683_v7  ;;  %v10693_v8 = vld [vmem:[#allocation36_spill] sm:$0xff]  ;;  %v10694_v7 = vld [vmem:[#allocation37_spill] sm:$0xff] }
 0xf95   : > { %4881 = vmatpush1.bf16.msra.mxu0 %v10684_v12  ;;  %4922 = vmatpush1.bf16.msra.mxu1 %v10685_v46  ;;  %v10695_v12 = vld [vmem:[#allocation38_spill] sm:$0xff]  ;;  %v10696_v46 = vld [vmem:[#allocation39_spill] sm:$0xff] }
 0xf96   : > { %4882 = vmatprep.subr.bf16.mxu0 %v10686_v11  ;;  %4923 = vmatprep.subr.bf16.mxu1 %v10687_v10  ;;  %v10697_v11 = vld [vmem:[#allocation40_spill] sm:$0xff]  ;;  %v10698_v10 = vld [vmem:[#allocation41_spill] sm:$0xff] }
 0xf99   : > { %4883 = vmatpush1.bf16.msra.mxu0 %v10688_v42  ;;  %4924 = vmatpush1.bf16.msra.mxu1 %v10689_v36  ;;  %v10699_v42 = vld [vmem:[#allocation42_spill] sm:$0xff]  ;;  %v10700_v36 = vld [vmem:[#allocation43_spill] sm:$0xff] }
 0xf9a   : > { %4884 = vmatprep.subr.bf16.mxu0 %v10690_v43  ;;  %4925 = vmatprep.subr.bf16.mxu1 %v10691_v34  ;;  %v10701_v43 = vld [vmem:[#allocation44_spill] sm:$0xff]  ;;  %v10702_v34 = vld [vmem:[#allocation45_spill] sm:$0xff] }
 0xf9d   : > { %4885 = vmatpush1.bf16.msra.mxu0 %v10692_v35  ;;  %4926 = vmatpush1.bf16.msra.mxu1 %v10693_v8  ;;  %v10703_v35 = vld [vmem:[#allocation46_spill] sm:$0xff]  ;;  %v10704_v8 = vld [vmem:[#allocation47_spill] sm:$0xff] }
 0xf9e   : > { %4886 = vmatprep.subr.bf16.mxu0 %v10694_v7  ;;  %4927 = vmatprep.subr.bf16.mxu1 %v10695_v12  ;;  %v10705_v7 = vld [vmem:[#allocation48_spill] sm:$0xff]  ;;  %v10706_v12 = vld [vmem:[#allocation49_spill] sm:$0xff] }
 0xfa1   : > { %4887 = vmatpush1.bf16.msra.mxu0 %v10696_v46  ;;  %4928 = vmatpush1.bf16.msra.mxu1 %v10697_v11  ;;  %v10707_v46 = vld [vmem:[#allocation50_spill] sm:$0xff]  ;;  %v10708_v11 = vld [vmem:[#allocation51_spill] sm:$0xff] }
 0xfa2   : > { %4888 = vmatprep.subr.bf16.mxu0 %v10698_v10  ;;  %4929 = vmatprep.subr.bf16.mxu1 %v10699_v42  ;;  %v10709_v10 = vld [vmem:[#allocation52_spill] sm:$0xff]  ;;  %v10710_v42 = vld [vmem:[#allocation53_spill] sm:$0xff] }
 0xfa5   : > { %4889 = vmatpush1.bf16.msra.mxu0 %v10700_v36  ;;  %4930 = vmatpush1.bf16.msra.mxu1 %v10701_v43  ;;  %v10711_v36 = vld [vmem:[#allocation54_spill] sm:$0xff]  ;;  %v10712_v43 = vld [vmem:[#allocation55_spill] sm:$0xff] }
 0xfa6   : > { %4890 = vmatprep.subr.bf16.mxu0 %v10702_v34  ;;  %4931 = vmatprep.subr.bf16.mxu1 %v10703_v35  ;;  %v10713_v34 = vld [vmem:[#allocation56_spill] sm:$0xff]  ;;  %v10714_v35 = vld [vmem:[#allocation57_spill] sm:$0xff] }
 0xfa9   : > { %4891 = vmatpush1.bf16.msra.mxu0 %v10704_v8  ;;  %4932 = vmatpush1.bf16.msra.mxu1 %v10705_v7  ;;  %v10715_v8 = vld [vmem:[#allocation58_spill] sm:$0xff]  ;;  %v10716_v7 = vld [vmem:[#allocation59_spill] sm:$0xff] }
 0xfaa   : > { %4892 = vmatprep.subr.bf16.mxu0 %v10706_v12  ;;  %4933 = vmatprep.subr.bf16.mxu1 %v10707_v46  ;;  %v10717_v12 = vld [vmem:[#allocation60_spill] sm:$0xff]  ;;  %v10718_v46 = vld [vmem:[#allocation61_spill] sm:$0xff] }
 0xfad   : > { %4893 = vmatpush1.bf16.msra.mxu0 %v10708_v11  ;;  %4934 = vmatpush1.bf16.msra.mxu1 %v10709_v10  ;;  %v10719_v11 = vld [vmem:[#allocation62_spill] sm:$0xff]  ;;  %v10720_v10 = vld [vmem:[#allocation63_spill] sm:$0xff] }
 0xfae   : > { %4894 = vmatprep.subr.bf16.mxu0 %v10710_v42  ;;  %4935 = vmatprep.subr.bf16.mxu1 %v10711_v36  ;;  %v10721_v42 = vld [vmem:[#allocation64_spill] sm:$0xff]  ;;  %v10722_v36 = vld [vmem:[#allocation65_spill] sm:$0xff] }
 0xfb1   : > { %4895 = vmatpush1.bf16.msra.mxu0 %v10712_v43  ;;  %4936 = vmatpush1.bf16.msra.mxu1 %v10713_v34  ;;  %v10723_v43 = vld [vmem:[#allocation67_spill] sm:$0xff]  ;;  %v10724_v34 = vld [vmem:[#allocation66_spill] sm:$0xff] }
 0xfb2   : > { %4896 = vmatprep.subr.bf16.mxu0 %v10714_v35  ;;  %4937 = vmatprep.subr.bf16.mxu1 %v10715_v8  ;;  %v10725_v35 = vld [vmem:[#allocation68_spill] sm:$0xff]  ;;  %v10726_v8 = vld [vmem:[#allocation69_spill] sm:$0xff] }
 0xfb5   : > { %4897 = vmatpush1.bf16.msra.mxu0 %v10716_v7  ;;  %4938 = vmatpush1.bf16.msra.mxu1 %v10717_v12  ;;  %v10727_v7 = vld [vmem:[#allocation70_spill] sm:$0xff]  ;;  %v10728_v12 = vld [vmem:[#allocation71_spill] sm:$0xff] }
 0xfb6   : > { %4898 = vmatprep.subr.bf16.mxu0 %v10718_v46  ;;  %4939 = vmatprep.subr.bf16.mxu1 %v10719_v11  ;;  %v10729_v46 = vld [vmem:[#allocation72_spill] sm:$0xff]  ;;  %v10730_v11 = vld [vmem:[#allocation73_spill] sm:$0xff] }
 0xfb9   : > { %4899 = vmatpush1.bf16.msra.mxu0 %v10720_v10  ;;  %4940 = vmatpush1.bf16.msra.mxu1 %v10721_v42  ;;  %v10731_v10 = vld [vmem:[#allocation74_spill] sm:$0xff]  ;;  %v10732_v42 = vld [vmem:[#allocation75_spill] sm:$0xff] }
 0xfba   : > { %4900 = vmatprep.subr.bf16.mxu0 %v10722_v36  ;;  %4941 = vmatprep.subr.bf16.mxu1 %v10723_v43  ;;  %v10733_v36 = vld [vmem:[#allocation76_spill] sm:$0xff]  ;;  %v10734_v43 = vld [vmem:[#allocation77_spill] sm:$0xff] }
 0xfbd   : > { %4901 = vmatpush1.bf16.msra.mxu0 %v10724_v34  ;;  %4942 = vmatpush1.bf16.msra.mxu1 %v10725_v35  ;;  %v10735_v34 = vld [vmem:[#allocation78_spill] sm:$0xff] }
 0xfbe   : > { %4902 = vmatprep.subr.bf16.mxu0 %v10726_v8  ;;  %4943 = vmatprep.subr.bf16.mxu1 %v10727_v7 }
 0xfc1   : > { %4903 = vmatpush1.bf16.msra.mxu0 %v10728_v12  ;;  %4944 = vmatpush1.bf16.msra.mxu1 %v10729_v46 }
 0xfc2   : > { %4904 = vmatprep.subr.bf16.mxu0 %v10730_v11  ;;  %4945 = vmatprep.subr.bf16.mxu1 %v10731_v10  ;;  %v4813_v11 = vrot.slane %v9428_v59, 2  ;;  %v4815_v10 = vrot.slane %v9430_v6, 2 }
 0xfc5   : > { %4905 = vmatpush1.bf16.msra.mxu0 %v10732_v42  ;;  %4946 = vmatpush1.bf16.msra.mxu1 %v10733_v36  ;;  %v4814_v42 = vrot.slane %v9432_v49, 2  ;;  %v4816_v36 = vrot.slane %v9434_v51, 2 }
 0xfc6   : > { %4956 = vmatprep.subr.bf16.mxu0 %v10734_v43  ;;  %4997 = vmatprep.subr.bf16.mxu1 %v10735_v34 }
0x101b   : > { %v4679_v35 = vpop.f32.mrb[36].mxu0  ;;  %v4720_v8 = vpop.f32.mrb[36].mxu1 }
0x101c   : > { %v4681_v3 = vpop.f32.mrb[37].mxu0  ;;  %v4722_v7 = vpop.f32.mrb[37].mxu1  ;;  %v4821_v59 = vadd.f32 %v4813_v11, %v4679_v35  ;;  %v4823_v6 = vadd.f32 %v4815_v10, %v4720_v8  ;;  %v10740_v8 = vld [vmem:[#allocation117_spill] sm:$0xff] }
0x101d   : > { %v4683_v62 = vpop.f32.mrb[38].mxu0  ;;  %v4724_v12 = vpop.f32.mrb[38].mxu1  ;;  %v4822_v22 = vadd.f32 %v4814_v42, %v4681_v3  ;;  %v4824_v18 = vadd.f32 %v4816_v36, %v4722_v7  ;;  %v10739_v7 = vld [vmem:[#allocation116_spill] sm:$0xff] }
0x101e   : > { %v4684_v39 = vpop.f32.mrb[39].mxu0  ;;  %v4725_v46 = vpop.f32.mrb[39].mxu1 }
0x105b   : > { %v4761_v63 = vpop.f32.mrb[40].mxu0  ;;  %v4802_v43 = vpop.f32.mrb[40].mxu1 }
0x105c   : > { %v4825_v34 = vadd.f32 %v4761_v63, %v10736_v48  ;;  %v4827_v9 = vadd.f32 %v4802_v43, %v10737_v27  ;;  %v4763_v40 = vpop.f32.mrb[41].mxu0  ;;  %v4804_v23 = vpop.f32.mrb[41].mxu1 }
0x105d   : > { %v4826_v62 = vadd.f32 %v4763_v40, %v8966_v25  ;;  %v4828_v39 = vadd.f32 %v4804_v23, %v8970_v28  ;;  %v4765_v12 = vpop.f32.mrb[42].mxu0  ;;  %v4806_v46 = vpop.f32.mrb[42].mxu1 }
0x105e   : > { %v4833_v32 = vrot.slane %v4825_v34, 6  ;;  %v4835_v49 = vrot.slane %v4827_v9, 6  ;;  %v4766_v16 = vpop.f32.mrb[43].mxu0  ;;  %v4807_v51 = vpop.f32.mrb[43].mxu1  ;;  %v10743_v46 = vld [vmem:[#allocation120_spill] sm:$0xff] }
0x105f   : > { %v4834_v38 = vrot.slane %v4826_v62, 6  ;;  %v4836_v63 = vrot.slane %v4828_v39, 6  ;;  %v10741_v62 = vld [vmem:[#allocation118_spill] sm:$0xff]  ;;  %v10742_v39 = vld [vmem:[#allocation119_spill] sm:$0xff] }
0x1060   : > { %v4841_v43 = vsel %vm486_vm1, %v4821_v59, %v4833_v32  ;;  %v4843_v27 = vsel %vm486_vm1, %v4823_v6, %v4835_v49 }
0x1061   : > { %v6147_v48 = vmul.f32 -1.442695, %v4841_v43  ;;  %v4842_v40 = vsel %vm486_vm1, %v4822_v22, %v4834_v38  ;;  %v4844_v23 = vsel %vm486_vm1, %v4824_v18, %v4836_v63  ;;  %v10744_v63 = vld [vmem:[#allocation121_spill] sm:$0xff]  ;;  %v10745_v43 = vld [vmem:[#allocation122_spill] sm:$0xff] }
0x1062   : > { %v6148_v12 = vmul.f32 -1.442695, %v4842_v40  ;;  %v6149_v11 = vmul.f32 -1.442695, %v4844_v23  ;;  %v10746_v40 = vld [vmem:[#allocation123_spill] sm:$0xff]  ;;  %v10747_v23 = vld [vmem:[#allocation124_spill] sm:$0xff] }
0x1063   : > { %6967 = vpow2.f32 %v6147_v48 }
0x1064   : > { %6969 = vpow2.f32 %v6148_v12  ;;  %v10748_v12 = vld [vmem:[#allocation125_spill] sm:$0xff] }
0x1065   : > { %6971 = vpow2.f32 %v6149_v11  ;;  %v10749_v11 = vld [vmem:[#allocation126_spill] sm:$0xff] }
0x1066   : > { %6973 = vtanh.f32 %v4843_v27 }
0x106d   : > { %v6968_v9 = vpop.eup %6967 }
0x106e   : > { %v6970_v16 = vpop.eup %6969  ;;  %v4848_v51 = vadd.f32 1.0, %v6968_v9  ;;  %v10750_v9 = vld [vmem:[#allocation127_spill] sm:$0xff] }
0x106f   : > { %v4854_v10 = vadd.f32 1.0, %v6970_v16  ;;  %v6972_v59 = vpop.eup %6971  ;;  %v10751_v16 = vld [vmem:[#allocation128_spill] sm:$0xff] }
0x1070   : > { %6975 = vrcp.f32 %v4848_v51  ;;  %v6974_v32 = vpop.eup %6973  ;;  %v4861_v38 = vadd.f32 1.0, %v6972_v59  ;;  %v10752_v51 = vld [vmem:[#allocation129_spill] sm:$0xff]  ;;  %v10754_v59 = vld [vmem:[#allocation131_spill] sm:$0xff] }
0x1071   : > { %6977 = vrcp.f32 %v4854_v10  ;;  %v10753_v10 = vld [vmem:[#allocation130_spill] sm:$0xff] }
0x1072   : > { %6979 = vrcp.f32 %v4861_v38  ;;  %v10759_v38 = vld [vmem:[#allocation136_spill] sm:$0xff] }
0x107a   : > { %v6976_v6 = vpop.eup %6975 }
0x107b   : > { %v6978_v49 = vpop.eup %6977  ;;  %v4865_v42 = vmul.f32 %v6976_v6, %v6974_v32  ;;  %v10755_v32 = vld [vmem:[#allocation132_spill] sm:$0xff]  ;;  %v10756_v6 = vld [vmem:[#allocation133_spill] sm:$0xff] }
0x107c   : > { %v4864_v18 = vmul.f32 %v6978_v49, %v9449_v30  ;;  %v6980_v48 = vpop.eup %6979  ;;  %v10738_v30 = vld [vmem:[#allocation115_spill] sm:$0xff]  ;;  %v10757_v49 = vld [vmem:[#allocation134_spill] sm:$0xff] }
0x107e   : > { %v9599_v22 = vadd.f32 %v4865_v42, %v4864_v18  ;;  %v10758_v42 = vld [vmem:[#allocation135_spill] sm:$0xff]  ;;  %v10760_v18 = vld [vmem:[#allocation137_spill] sm:$0xff] }
0x1080   : > { %6981 = vtanh.f32 %v9599_v22 }
0x108a   : > { %v6982_v36 = vpop.eup %6981 }
0x108b   : > { %v4868_v34 = vmul.f32 %v6982_v36, %v6980_v48  ;;  %v10761_v48 = vld [vmem:[#allocation138_spill] sm:$0xff]  ;;  %v10762_v36 = vld [vmem:[#allocation139_spill] sm:$0xff] }
0x108d   : > { %v4870_v27 = vrot.slane %v4868_v34, 2  ;;  %v9602_v35 = vpack.c.bf16 %v4868_v34, %v4868_v34  ;;  %v10763_v34 = vld [vmem:[#allocation140_spill] sm:$0xff] }
0x108f   : > { %v4873_v3 = vpack.c.bf16 %v4870_v27, %v4870_v27  ;;  %v10764_v27 = vld [vmem:[#allocation141_spill] sm:$0xff] }
0x1091   : > { %4906 = vmatprep.mubr.bf16.mxu0 %v4873_v3  ;;  %4947 = vmatprep.mubr.bf16.mxu1 %v4873_v3 }
0x1092   : > { %4907 = vmatmul.mubr.bf16.vlgmr.msra.gmra.mrb[44].mxu0 %v9602_v35  ;;  %4948 = vmatmul.mubr.bf16.vlgmr.msra.gmra.mrb[44].mxu1 %v9602_v35 }
0x1093   : > { %4957 = vmatpush1.bf16.msra.mxu0 %v8670_v37  ;;  %4998 = vmatpush1.bf16.msra.mxu1 %v10338_v26 }
0x1094   : > { %4988 = vmatprep.mubr.bf16.mxu0 %v4873_v3  ;;  %5029 = vmatprep.mubr.bf16.mxu1 %v4873_v3  ;;  %v10765_v3 = vld [vmem:[#allocation142_spill] sm:$0xff] }
0x1095   : > { %4958 = vmatprep.subr.bf16.mxu0 %v10339_v60  ;;  %4999 = vmatprep.subr.bf16.mxu1 %v10340_v55 }
0x1097   : > { %4959 = vmatpush1.bf16.msra.mxu0 %v10341_v4  ;;  %5000 = vmatpush1.bf16.msra.mxu1 %v10342_v53 }
0x1098   : > { %4960 = vmatprep.subr.bf16.mxu0 %v10343_v58  ;;  %5001 = vmatprep.subr.bf16.mxu1 %v10344_v21 }
0x109b   : > { %4961 = vmatpush1.bf16.msra.mxu0 %v10345_v45  ;;  %5002 = vmatpush1.bf16.msra.mxu1 %v10346_v47 }
0x109c   : > { %4962 = vmatprep.subr.bf16.mxu0 %v10347_v1  ;;  %5003 = vmatprep.subr.bf16.mxu1 %v10348_v56 }
0x109f   : > { %4963 = vmatpush1.bf16.msra.mxu0 %v10349_v29  ;;  %5004 = vmatpush1.bf16.msra.mxu1 %v10350_v52 }
0x10a0   : > { %4964 = vmatprep.subr.bf16.mxu0 %v10351_v41  ;;  %5005 = vmatprep.subr.bf16.mxu1 %v10352_v24 }
0x10a3   : > { %4965 = vmatpush1.bf16.msra.mxu0 %v10353_v13  ;;  %5006 = vmatpush1.bf16.msra.mxu1 %v10439_v44 }
0x10a4   : > { %4966 = vmatprep.subr.bf16.mxu0 %v10440_v17  ;;  %5007 = vmatprep.subr.bf16.mxu1 %v10441_v54 }
0x10a7   : > { %4967 = vmatpush1.bf16.msra.mxu0 %v10442_v61  ;;  %5008 = vmatpush1.bf16.msra.mxu1 %v10443_v50 }
0x10a8   : > { %4968 = vmatprep.subr.bf16.mxu0 %v10444_v20  ;;  %5009 = vmatprep.subr.bf16.mxu1 %v10445_v2 }
0x10ab   : > { %4969 = vmatpush1.bf16.msra.mxu0 %v10446_v0  ;;  %5010 = vmatpush1.bf16.msra.mxu1 %v10447_v15 }
0x10ac   : > { %4970 = vmatprep.subr.bf16.mxu0 %v10448_v31  ;;  %5011 = vmatprep.subr.bf16.mxu1 %v10449_v14 }
0x10af   : > { %4971 = vmatpush1.bf16.msra.mxu0 %v10450_v19  ;;  %5012 = vmatpush1.bf16.msra.mxu1 %v10451_v5 }
0x10b0   : > { %4972 = vmatprep.subr.bf16.mxu0 %v10452_v33  ;;  %5013 = vmatprep.subr.bf16.mxu1 %v10453_v57 }
0x10b3   : > { %4973 = vmatpush1.bf16.msra.mxu0 %v10738_v30  ;;  %5014 = vmatpush1.bf16.msra.mxu1 %v10739_v7 }
0x10b4   : > { %4974 = vmatprep.subr.bf16.mxu0 %v10740_v8  ;;  %5015 = vmatprep.subr.bf16.mxu1 %v10741_v62 }
0x10b7   : > { %4975 = vmatpush1.bf16.msra.mxu0 %v10742_v39  ;;  %5016 = vmatpush1.bf16.msra.mxu1 %v10743_v46 }
0x10b8   : > { %4976 = vmatprep.subr.bf16.mxu0 %v10744_v63  ;;  %5017 = vmatprep.subr.bf16.mxu1 %v10745_v43 }
0x10bb   : > { %4977 = vmatpush1.bf16.msra.mxu0 %v10746_v40  ;;  %5018 = vmatpush1.bf16.msra.mxu1 %v10747_v23  ;;  %v10838_v23 = vld [vmem:[#allocation145_spill] sm:$0xff]  ;;  %v10839_v40 = vld [vmem:[#allocation146_spill] sm:$0xff] }
0x10bc   : > { %4978 = vmatprep.subr.bf16.mxu0 %v10748_v12  ;;  %5019 = vmatprep.subr.bf16.mxu1 %v10749_v11  ;;  %v10837_v11 = vld [vmem:[#allocation85_spill] sm:$0xff] }
0x10bf   : > { %4979 = vmatpush1.bf16.msra.mxu0 %v10750_v9  ;;  %5020 = vmatpush1.bf16.msra.mxu1 %v10751_v16  ;;  %v10835_v16 = vld [vmem:[#allocation84_spill] sm:$0xff]  ;;  %v10836_v9 = vld [vmem:[#allocation79_spill] sm:$0xff] }
0x10c0   : > { %4980 = vmatprep.subr.bf16.mxu0 %v10752_v51  ;;  %5021 = vmatprep.subr.bf16.mxu1 %v10753_v10  ;;  %v10834_v51 = vld [vmem:[#allocation12_spill] sm:$0xff] }
0x10c3   : > { %4981 = vmatpush1.bf16.msra.mxu0 %v10754_v59  ;;  %5022 = vmatpush1.bf16.msra.mxu1 %v10755_v32  ;;  %v10766_v32 = vld [vmem:[#allocation143_spill] sm:$0xff] }
0x10c4   : > { %4982 = vmatprep.subr.bf16.mxu0 %v10756_v6  ;;  %5023 = vmatprep.subr.bf16.mxu1 %v10757_v49  ;;  %v10767_v6 = vld [vmem:[#allocation144_spill] sm:$0xff]  ;;  %v10768_v49 = vld [vmem:[#allocation13_spill] sm:$0xff] }
0x10c7   : > { %4983 = vmatpush1.bf16.msra.mxu0 %v10758_v42  ;;  %5024 = vmatpush1.bf16.msra.mxu1 %v10759_v38  ;;  %v10769_v42 = vld [vmem:[#allocation16_spill] sm:$0xff] }
0x10c8   : > { %4984 = vmatprep.subr.bf16.mxu0 %v10760_v18  ;;  %5025 = vmatprep.subr.bf16.mxu1 %v10761_v48  ;;  %v10770_v48 = vld [vmem:[#allocation14_spill] sm:$0xff] }
0x10c9   : > { %v10779_v18 = vld [vmem:[#allocation26_spill] sm:$0xff] }
0x10cb   : > { %4985 = vmatpush1.bf16.msra.mxu0 %v10762_v36  ;;  %5026 = vmatpush1.bf16.msra.mxu1 %v10763_v34  ;;  %v10771_v36 = vld [vmem:[#allocation18_spill] sm:$0xff]  ;;  %v10772_v34 = vld [vmem:[#allocation15_spill] sm:$0xff] }
0x10cc   : > { %4986 = vmatprep.subr.bf16.mxu0 %v10764_v27  ;;  %5027 = vmatprep.subr.bf16.mxu1 %v10765_v3  ;;  %v10773_v27 = vld [vmem:[#allocation20_spill] sm:$0xff]  ;;  %v10774_v3 = vld [vmem:[#allocation17_spill] sm:$0xff] }
0x10cf   : > { %4987 = vmatpush1.bf16.msra.mxu0 %v10766_v32  ;;  %5028 = vmatpush1.bf16.msra.mxu1 %v10767_v6  ;;  %v10775_v32 = vld [vmem:[#allocation22_spill] sm:$0xff]  ;;  %v10776_v6 = vld [vmem:[#allocation19_spill] sm:$0xff] }
0x10d0   : > { %5099 = vmatprep.subr.bf16.mxu0 %v10768_v49  ;;  %5140 = vmatprep.subr.bf16.mxu1 %v10769_v42  ;;  %v10777_v49 = vld [vmem:[#allocation24_spill] sm:$0xff]  ;;  %v10778_v42 = vld [vmem:[#allocation21_spill] sm:$0xff] }
0x10d2   : > { %4989 = vmatmul.mubr.bf16.vlgmr.msra.gmra.mrb[48].mxu0 %v9602_v35  ;;  %5030 = vmatmul.mubr.bf16.vlgmr.msra.gmra.mrb[48].mxu1 %v9602_v35  ;;  %v10780_v35 = vld [vmem:[#allocation23_spill] sm:$0xff] }
0x10d3   : > { %5100 = vmatpush1.bf16.msra.mxu0 %v10770_v48  ;;  %5141 = vmatpush1.bf16.msra.mxu1 %v10771_v36  ;;  %v10781_v48 = vld [vmem:[#allocation27_spill] sm:$0xff]  ;;  %v10782_v36 = vld [vmem:[#allocation25_spill] sm:$0xff] }
0x10d4   : > { %5101 = vmatprep.subr.bf16.mxu0 %v10772_v34  ;;  %5142 = vmatprep.subr.bf16.mxu1 %v10773_v27  ;;  %v10783_v34 = vld [vmem:[#allocation28_spill] sm:$0xff]  ;;  %v10784_v27 = vld [vmem:[#allocation29_spill] sm:$0xff] }
0x10d7   : > { %5102 = vmatpush1.bf16.msra.mxu0 %v10774_v3  ;;  %5143 = vmatpush1.bf16.msra.mxu1 %v10775_v32  ;;  %v10785_v3 = vld [vmem:[#allocation30_spill] sm:$0xff]  ;;  %v10786_v32 = vld [vmem:[#allocation31_spill] sm:$0xff] }
0x10d8   : > { %5103 = vmatprep.subr.bf16.mxu0 %v10776_v6  ;;  %5144 = vmatprep.subr.bf16.mxu1 %v10777_v49  ;;  %v10787_v6 = vld [vmem:[#allocation32_spill] sm:$0xff]  ;;  %v10788_v49 = vld [vmem:[#allocation33_spill] sm:$0xff] }
0x10db   : > { %5104 = vmatpush1.bf16.msra.mxu0 %v10778_v42  ;;  %5145 = vmatpush1.bf16.msra.mxu1 %v10779_v18  ;;  %v10789_v42 = vld [vmem:[#allocation34_spill] sm:$0xff]  ;;  %v10790_v18 = vld [vmem:[#allocation35_spill] sm:$0xff] }
0x10dc   : > { %5105 = vmatprep.subr.bf16.mxu0 %v10780_v35  ;;  %5146 = vmatprep.subr.bf16.mxu1 %v10781_v48  ;;  %v10791_v35 = vld [vmem:[#allocation36_spill] sm:$0xff]  ;;  %v10792_v48 = vld [vmem:[#allocation37_spill] sm:$0xff] }
0x10df   : > { %5106 = vmatpush1.bf16.msra.mxu0 %v10782_v36  ;;  %5147 = vmatpush1.bf16.msra.mxu1 %v10783_v34  ;;  %v10793_v36 = vld [vmem:[#allocation38_spill] sm:$0xff]  ;;  %v10794_v34 = vld [vmem:[#allocation39_spill] sm:$0xff] }
0x10e0   : > { %5107 = vmatprep.subr.bf16.mxu0 %v10784_v27  ;;  %5148 = vmatprep.subr.bf16.mxu1 %v10785_v3  ;;  %v10795_v27 = vld [vmem:[#allocation40_spill] sm:$0xff]  ;;  %v10796_v3 = vld [vmem:[#allocation41_spill] sm:$0xff] }
0x10e3   : > { %5108 = vmatpush1.bf16.msra.mxu0 %v10786_v32  ;;  %5149 = vmatpush1.bf16.msra.mxu1 %v10787_v6  ;;  %v10797_v32 = vld [vmem:[#allocation42_spill] sm:$0xff]  ;;  %v10798_v6 = vld [vmem:[#allocation43_spill] sm:$0xff] }
0x10e4   : > { %5109 = vmatprep.subr.bf16.mxu0 %v10788_v49  ;;  %5150 = vmatprep.subr.bf16.mxu1 %v10789_v42  ;;  %v10799_v49 = vld [vmem:[#allocation44_spill] sm:$0xff]  ;;  %v10800_v42 = vld [vmem:[#allocation45_spill] sm:$0xff] }
0x10e7   : > { %5110 = vmatpush1.bf16.msra.mxu0 %v10790_v18  ;;  %5151 = vmatpush1.bf16.msra.mxu1 %v10791_v35  ;;  %v10801_v18 = vld [vmem:[#allocation46_spill] sm:$0xff]  ;;  %v10802_v35 = vld [vmem:[#allocation47_spill] sm:$0xff] }
0x10e8   : > { %5111 = vmatprep.subr.bf16.mxu0 %v10792_v48  ;;  %5152 = vmatprep.subr.bf16.mxu1 %v10793_v36  ;;  %v10803_v48 = vld [vmem:[#allocation48_spill] sm:$0xff]  ;;  %v10804_v36 = vld [vmem:[#allocation49_spill] sm:$0xff] }
0x10eb   : > { %5112 = vmatpush1.bf16.msra.mxu0 %v10794_v34  ;;  %5153 = vmatpush1.bf16.msra.mxu1 %v10795_v27  ;;  %v10805_v34 = vld [vmem:[#allocation50_spill] sm:$0xff]  ;;  %v10806_v27 = vld [vmem:[#allocation51_spill] sm:$0xff] }
0x10ec   : > { %5113 = vmatprep.subr.bf16.mxu0 %v10796_v3  ;;  %5154 = vmatprep.subr.bf16.mxu1 %v10797_v32  ;;  %v10807_v3 = vld [vmem:[#allocation52_spill] sm:$0xff]  ;;  %v10808_v32 = vld [vmem:[#allocation53_spill] sm:$0xff] }
0x10ef   : > { %5114 = vmatpush1.bf16.msra.mxu0 %v10798_v6  ;;  %5155 = vmatpush1.bf16.msra.mxu1 %v10799_v49  ;;  %v10809_v6 = vld [vmem:[#allocation54_spill] sm:$0xff]  ;;  %v10810_v49 = vld [vmem:[#allocation55_spill] sm:$0xff] }
0x10f0   : > { %5115 = vmatprep.subr.bf16.mxu0 %v10800_v42  ;;  %5156 = vmatprep.subr.bf16.mxu1 %v10801_v18  ;;  %v10811_v42 = vld [vmem:[#allocation56_spill] sm:$0xff]  ;;  %v10812_v18 = vld [vmem:[#allocation57_spill] sm:$0xff] }
0x10f3   : > { %5116 = vmatpush1.bf16.msra.mxu0 %v10802_v35  ;;  %5157 = vmatpush1.bf16.msra.mxu1 %v10803_v48  ;;  %v10813_v35 = vld [vmem:[#allocation58_spill] sm:$0xff]  ;;  %v10814_v48 = vld [vmem:[#allocation59_spill] sm:$0xff] }
0x10f4   : > { %5117 = vmatprep.subr.bf16.mxu0 %v10804_v36  ;;  %5158 = vmatprep.subr.bf16.mxu1 %v10805_v34  ;;  %v10815_v36 = vld [vmem:[#allocation60_spill] sm:$0xff]  ;;  %v10816_v34 = vld [vmem:[#allocation61_spill] sm:$0xff] }
0x10f7   : > { %5118 = vmatpush1.bf16.msra.mxu0 %v10806_v27  ;;  %5159 = vmatpush1.bf16.msra.mxu1 %v10807_v3  ;;  %v10817_v27 = vld [vmem:[#allocation62_spill] sm:$0xff]  ;;  %v10818_v3 = vld [vmem:[#allocation63_spill] sm:$0xff] }
0x10f8   : > { %5119 = vmatprep.subr.bf16.mxu0 %v10808_v32  ;;  %5160 = vmatprep.subr.bf16.mxu1 %v10809_v6  ;;  %v10819_v32 = vld [vmem:[#allocation64_spill] sm:$0xff]  ;;  %v10820_v6 = vld [vmem:[#allocation65_spill] sm:$0xff] }
0x10fb   : > { %5120 = vmatpush1.bf16.msra.mxu0 %v10810_v49  ;;  %5161 = vmatpush1.bf16.msra.mxu1 %v10811_v42  ;;  %v10821_v49 = vld [vmem:[#allocation67_spill] sm:$0xff]  ;;  %v10822_v42 = vld [vmem:[#allocation66_spill] sm:$0xff] }
0x10fc   : > { %5121 = vmatprep.subr.bf16.mxu0 %v10812_v18  ;;  %5162 = vmatprep.subr.bf16.mxu1 %v10813_v35  ;;  %v10823_v18 = vld [vmem:[#allocation68_spill] sm:$0xff]  ;;  %v10824_v35 = vld [vmem:[#allocation69_spill] sm:$0xff] }
0x10ff   : > { %5122 = vmatpush1.bf16.msra.mxu0 %v10814_v48  ;;  %5163 = vmatpush1.bf16.msra.mxu1 %v10815_v36  ;;  %v10825_v48 = vld [vmem:[#allocation70_spill] sm:$0xff]  ;;  %v10826_v36 = vld [vmem:[#allocation71_spill] sm:$0xff] }
0x1100   : > { %5123 = vmatprep.subr.bf16.mxu0 %v10816_v34  ;;  %5164 = vmatprep.subr.bf16.mxu1 %v10817_v27  ;;  %v10827_v34 = vld [vmem:[#allocation72_spill] sm:$0xff]  ;;  %v10828_v27 = vld [vmem:[#allocation73_spill] sm:$0xff] }
0x1103   : > { %5124 = vmatpush1.bf16.msra.mxu0 %v10818_v3  ;;  %5165 = vmatpush1.bf16.msra.mxu1 %v10819_v32  ;;  %v10829_v3 = vld [vmem:[#allocation74_spill] sm:$0xff]  ;;  %v10830_v32 = vld [vmem:[#allocation75_spill] sm:$0xff] }
0x1104   : > { %5125 = vmatprep.subr.bf16.mxu0 %v10820_v6  ;;  %5166 = vmatprep.subr.bf16.mxu1 %v10821_v49  ;;  %v10831_v6 = vld [vmem:[#allocation76_spill] sm:$0xff]  ;;  %v10832_v49 = vld [vmem:[#allocation77_spill] sm:$0xff] }
0x1107   : > { %5126 = vmatpush1.bf16.msra.mxu0 %v10822_v42  ;;  %5167 = vmatpush1.bf16.msra.mxu1 %v10823_v18  ;;  %v10833_v42 = vld [vmem:[#allocation78_spill] sm:$0xff] }
0x1108   : > { %5127 = vmatprep.subr.bf16.mxu0 %v10824_v35  ;;  %5168 = vmatprep.subr.bf16.mxu1 %v10825_v48 }
0x110b   : > { %5128 = vmatpush1.bf16.msra.mxu0 %v10826_v36  ;;  %5169 = vmatpush1.bf16.msra.mxu1 %v10827_v34 }
0x110c   : > { %5129 = vmatprep.subr.bf16.mxu0 %v10828_v27  ;;  %5170 = vmatprep.subr.bf16.mxu1 %v10829_v3  ;;  %v5038_v27 = vrot.slane %v10834_v51, 4  ;;  %v5040_v3 = vrot.slane %v10835_v16, 4 }
0x110f   : > { %5130 = vmatpush1.bf16.msra.mxu0 %v10830_v32  ;;  %5171 = vmatpush1.bf16.msra.mxu1 %v10831_v6  ;;  %v5039_v32 = vrot.slane %v10836_v9, 4  ;;  %v5041_v6 = vrot.slane %v10837_v11, 4 }
0x1110   : > { %5181 = vmatprep.subr.bf16.mxu0 %v10832_v49  ;;  %5222 = vmatprep.subr.bf16.mxu1 %v10833_v42 }
0x1165   : > { %v4908_v18 = vpop.f32.mrb[44].mxu0  ;;  %v4949_v35 = vpop.f32.mrb[44].mxu1 }
0x1166   : > { %v4910_v38 = vpop.f32.mrb[45].mxu0  ;;  %v4951_v48 = vpop.f32.mrb[45].mxu1  ;;  %v5046_v51 = vadd.f32 %v5038_v27, %v4908_v18  ;;  %v5048_v16 = vadd.f32 %v5040_v3, %v4949_v35 }
0x1167   : > { %v4912_v59 = vpop.f32.mrb[46].mxu0  ;;  %v4953_v36 = vpop.f32.mrb[46].mxu1  ;;  %v5047_v8 = vadd.f32 %v5039_v32, %v4910_v38  ;;  %v5049_v7 = vadd.f32 %v5041_v6, %v4951_v48  ;;  %v6796_v6 = vld [vmem:[#allocation8 + $0xc] ss:$16 sps:$4 sm:$0xff]  }
0x1168   : > { %v4913_v10 = vpop.f32.mrb[47].mxu0  ;;  %v4954_v34 = vpop.f32.mrb[47].mxu1 }
0x11a5   : > { %v4990_v12 = vpop.f32.mrb[48].mxu0  ;;  %v5031_v49 = vpop.f32.mrb[48].mxu1 }
0x11a6   : > { %v5050_v42 = vadd.f32 %v4990_v12, %v10838_v23  ;;  %v5052_v43 = vadd.f32 %v5031_v49, %v10839_v40  ;;  %v4992_v63 = vpop.f32.mrb[49].mxu0  ;;  %v5033_v46 = vpop.f32.mrb[49].mxu1 }
0x11a7   : > { %v5051_v59 = vadd.f32 %v4992_v63, %v8966_v25  ;;  %v5053_v10 = vadd.f32 %v5033_v46, %v8970_v28  ;;  %v4994_v36 = vpop.f32.mrb[50].mxu0  ;;  %v5035_v34 = vpop.f32.mrb[50].mxu1 }
0x11a8   : > { %v5058_v39 = vrot.slane %v5050_v42, 6  ;;  %v5060_v9 = vrot.slane %v5052_v43, 6  ;;  %v4995_v62 = vpop.f32.mrb[51].mxu0  ;;  %v5036_v11 = vpop.f32.mrb[51].mxu1  ;;  %v6799_v42 = vld [vmem:[#allocation8 + $0x24] ss:$16 sps:$4 sm:$0xff]  }
0x11a9   : > { %v5059_v30 = vrot.slane %v5051_v59, 6  ;;  %v5061_v12 = vrot.slane %v5053_v10, 6  ;;  %v6802_v59 = vld [vmem:[#allocation8 + $0x2c] ss:$16 sps:$4 sm:$0xff]   ;;  %v6797_v10 = vld [vmem:[#allocation8 + $0x20] ss:$16 sps:$4 sm:$0xff]  }
0x11aa   : > { %v5066_v49 = vsel %vm486_vm1, %v5046_v51, %v5058_v39  ;;  %v5068_v40 = vsel %vm486_vm1, %v5048_v16, %v5060_v9  ;;  %v6800_v34 = vld [vmem:[#allocation8 + $0x28] ss:$16 sps:$4 sm:$0xff]  }
0x11ab   : > { %v6150_v23 = vmul.f32 -1.442695, %v5066_v49  ;;  %v5067_v63 = vsel %vm486_vm1, %v5047_v8, %v5059_v30  ;;  %v5069_v46 = vsel %vm486_vm1, %v5049_v7, %v5061_v12  ;;  %v6805_v12 = vld [vmem:[#allocation8 + $0x44] ss:$16 sps:$4 sm:$0xff]   ;;  %v6808_v49 = vld [vmem:[#allocation8 + $0x4c] ss:$16 sps:$4 sm:$0xff]  }
0x11ac   : > { %v6151_v36 = vmul.f32 -1.442695, %v5067_v63  ;;  %v6152_v18 = vmul.f32 -1.442695, %v5069_v46  ;;  %v6803_v63 = vld [vmem:[#allocation8 + $0x40] ss:$16 sps:$4 sm:$0xff]  }
0x11ad   : > { %6983 = vpow2.f32 %v6150_v23  ;;  %v6806_v46 = vld [vmem:[#allocation8 + $0x48] ss:$16 sps:$4 sm:$0xff]  }
0x11ae   : > { %6985 = vpow2.f32 %v6151_v36  ;;  %v6811_v36 = vld [vmem:[#allocation8 + $0x64] ss:$16 sps:$4 sm:$0xff]  }
0x11af   : > { %6987 = vpow2.f32 %v6152_v18  ;;  %v6814_v18 = vld [vmem:[#allocation8 + $0x6c] ss:$16 sps:$4 sm:$0xff]  }
0x11b0   : > { %6989 = vtanh.f32 %v5068_v40 }
0x11b7   : > { %v6984_v43 = vpop.eup %6983 }
0x11b8   : > { %v6986_v62 = vpop.eup %6985  ;;  %v5073_v11 = vadd.f32 1.0, %v6984_v43  ;;  %v6809_v43 = vld [vmem:[#allocation8 + $0x60] ss:$16 sps:$4 sm:$0xff]  }
0x11b9   : > { %v5079_v38 = vadd.f32 1.0, %v6986_v62  ;;  %v6988_v39 = vpop.eup %6987  ;;  %v6812_v62 = vld [vmem:[#allocation8 + $0x68] ss:$16 sps:$4 sm:$0xff]  }
0x11ba   : > { %6991 = vrcp.f32 %v5073_v11  ;;  %v6990_v51 = vpop.eup %6989  ;;  %v5086_v30 = vadd.f32 1.0, %v6988_v39  ;;  %v6817_v11 = vld [vmem:[#allocation8 + $0x84] ss:$16 sps:$4 sm:$0xff]   ;;  %v6815_v39 = vld [vmem:[#allocation8 + $0x80] ss:$16 sps:$4 sm:$0xff]  }
0x11bb   : > { %6993 = vrcp.f32 %v5079_v38  ;;  %v6820_v38 = vld [vmem:[#allocation8 + $0x8c] ss:$16 sps:$4 sm:$0xff]  }
0x11bc   : > { %6995 = vrcp.f32 %v5086_v30  ;;  %v6824_v30 = vld [vmem:[#allocation8 + $0xa8] ss:$16 sps:$4 sm:$0xff]  }
0x11c4   : > { %v6992_v9 = vpop.eup %6991 }
0x11c5   : > { %v6994_v16 = vpop.eup %6993  ;;  %v5090_v35 = vmul.f32 %v6992_v9, %v6990_v51  ;;  %v6818_v51 = vld [vmem:[#allocation8 + $0x88] ss:$16 sps:$4 sm:$0xff]   ;;  %v6823_v9 = vld [vmem:[#allocation8 + $0xa4] ss:$16 sps:$4 sm:$0xff]  }
0x11c6   : > { %v5089_v7 = vmul.f32 %v6994_v16, %v9599_v22  ;;  %v6996_v23 = vpop.eup %6995  ;;  %v6794_v22 = vld [vmem:[#allocation8 + $0x8] ss:$16 sps:$4 sm:$0xff]   ;;  %v6826_v16 = vld [vmem:[#allocation8 + $0xac] ss:$16 sps:$4 sm:$0xff]  }
0x11c8   : > { %v9749_v8 = vadd.f32 %v5090_v35, %v5089_v7  ;;  %v6821_v35 = vld [vmem:[#allocation8 + $0xa0] ss:$16 sps:$4 sm:$0xff]   ;;  %v6829_v7 = vld [vmem:[#allocation8 + $0xc4] ss:$16 sps:$4 sm:$0xff]  }
0x11ca   : > { %6997 = vtanh.f32 %v9749_v8 }
0x11d4   : > { %v6998_v48 = vpop.eup %6997 }
0x11d5   : > { %v5093_v27 = vmul.f32 %v6998_v48, %v6996_v23  ;;  %v6832_v23 = vld [vmem:[#allocation8 + $0xcc] ss:$16 sps:$4 sm:$0xff]   ;;  %v6827_v48 = vld [vmem:[#allocation8 + $0xc0] ss:$16 sps:$4 sm:$0xff]  }
0x11d7   : > { %v5095_v40 = vrot.slane %v5093_v27, 2  ;;  %v9752_v32 = vpack.c.bf16 %v5093_v27, %v5093_v27  ;;  %v6830_v27 = vld [vmem:[#allocation8 + $0xc8] ss:$16 sps:$4 sm:$0xff]  }
0x11d9   : > { %v5098_v3 = vpack.c.bf16 %v5095_v40, %v5095_v40  ;;  %v6835_v40 = vld [vmem:[#allocation8 + $0xe4] ss:$16 sps:$4 sm:$0xff]  }
0x11db   : > { %5131 = vmatprep.mubr.bf16.mxu0 %v5098_v3  ;;  %5172 = vmatprep.mubr.bf16.mxu1 %v5098_v3 }
0x11dc   : > { %5132 = vmatmul.mubr.bf16.vlgmr.msra.gmra.mrb[52].mxu0 %v9752_v32  ;;  %5173 = vmatmul.mubr.bf16.vlgmr.msra.gmra.mrb[52].mxu1 %v9752_v32 }
0x11dd   : > { %5182 = vmatpush1.bf16.msra.mxu0 %v8670_v37  ;;  %5223 = vmatpush1.bf16.msra.mxu1 %v10338_v26  ;;  %v10840_v37 = vld [vmem:[#allocation115_spill] sm:$0xff]  ;;  %v10841_v26 = vld [vmem:[#allocation116_spill] sm:$0xff] }
0x11de   : > { %5213 = vmatprep.mubr.bf16.mxu0 %v5098_v3  ;;  %5254 = vmatprep.mubr.bf16.mxu1 %v5098_v3  ;;  %v6838_v3 = vld [vmem:[#allocation8 + $0xec] ss:$16 sps:$4 sm:$0xff]  }
0x11df   : > { %5183 = vmatprep.subr.bf16.mxu0 %v10339_v60  ;;  %5224 = vmatprep.subr.bf16.mxu1 %v10340_v55  ;;  %v10842_v60 = vld [vmem:[#allocation117_spill] sm:$0xff]  ;;  %v10843_v55 = vld [vmem:[#allocation118_spill] sm:$0xff] }
0x11e1   : > { %5184 = vmatpush1.bf16.msra.mxu0 %v10341_v4  ;;  %5225 = vmatpush1.bf16.msra.mxu1 %v10342_v53  ;;  %v10844_v4 = vld [vmem:[#allocation119_spill] sm:$0xff]  ;;  %v10845_v53 = vld [vmem:[#allocation120_spill] sm:$0xff] }
0x11e2   : > { %5185 = vmatprep.subr.bf16.mxu0 %v10343_v58  ;;  %5226 = vmatprep.subr.bf16.mxu1 %v10344_v21  ;;  %v10846_v58 = vld [vmem:[#allocation121_spill] sm:$0xff]  ;;  %v10847_v21 = vld [vmem:[#allocation122_spill] sm:$0xff] }
0x11e5   : > { %5186 = vmatpush1.bf16.msra.mxu0 %v10345_v45  ;;  %5227 = vmatpush1.bf16.msra.mxu1 %v10346_v47  ;;  %v10848_v45 = vld [vmem:[#allocation123_spill] sm:$0xff]  ;;  %v10849_v47 = vld [vmem:[#allocation124_spill] sm:$0xff] }
0x11e6   : > { %5187 = vmatprep.subr.bf16.mxu0 %v10347_v1  ;;  %5228 = vmatprep.subr.bf16.mxu1 %v10348_v56  ;;  %v10850_v1 = vld [vmem:[#allocation125_spill] sm:$0xff]  ;;  %v10851_v56 = vld [vmem:[#allocation126_spill] sm:$0xff] }
0x11e9   : > { %5188 = vmatpush1.bf16.msra.mxu0 %v10349_v29  ;;  %5229 = vmatpush1.bf16.msra.mxu1 %v10350_v52  ;;  %v10852_v29 = vld [vmem:[#allocation127_spill] sm:$0xff]  ;;  %v10853_v52 = vld [vmem:[#allocation128_spill] sm:$0xff] }
0x11ea   : > { %5189 = vmatprep.subr.bf16.mxu0 %v10351_v41  ;;  %5230 = vmatprep.subr.bf16.mxu1 %v10352_v24  ;;  %v10854_v41 = vld [vmem:[#allocation129_spill] sm:$0xff]  ;;  %v10855_v24 = vld [vmem:[#allocation130_spill] sm:$0xff] }
0x11ed   : > { %5190 = vmatpush1.bf16.msra.mxu0 %v10353_v13  ;;  %5231 = vmatpush1.bf16.msra.mxu1 %v10439_v44  ;;  %v10856_v13 = vld [vmem:[#allocation131_spill] sm:$0xff]  ;;  %v10857_v44 = vld [vmem:[#allocation132_spill] sm:$0xff] }
0x11ee   : > { %5191 = vmatprep.subr.bf16.mxu0 %v10440_v17  ;;  %5232 = vmatprep.subr.bf16.mxu1 %v10441_v54  ;;  %v10858_v17 = vld [vmem:[#allocation133_spill] sm:$0xff]  ;;  %v10859_v54 = vld [vmem:[#allocation134_spill] sm:$0xff] }
0x11f1   : > { %5192 = vmatpush1.bf16.msra.mxu0 %v10442_v61  ;;  %5233 = vmatpush1.bf16.msra.mxu1 %v10443_v50  ;;  %v10860_v61 = vld [vmem:[#allocation135_spill] sm:$0xff]  ;;  %v10861_v50 = vld [vmem:[#allocation136_spill] sm:$0xff] }
0x11f2   : > { %5193 = vmatprep.subr.bf16.mxu0 %v10444_v20  ;;  %5234 = vmatprep.subr.bf16.mxu1 %v10445_v2  ;;  %v10862_v20 = vld [vmem:[#allocation137_spill] sm:$0xff]  ;;  %v10863_v2 = vld [vmem:[#allocation138_spill] sm:$0xff] }
0x11f5   : > { %5194 = vmatpush1.bf16.msra.mxu0 %v10446_v0  ;;  %5235 = vmatpush1.bf16.msra.mxu1 %v10447_v15  ;;  %v10864_v0 = vld [vmem:[#allocation139_spill] sm:$0xff]  ;;  %v10865_v15 = vld [vmem:[#allocation140_spill] sm:$0xff] }
0x11f6   : > { %5195 = vmatprep.subr.bf16.mxu0 %v10448_v31  ;;  %5236 = vmatprep.subr.bf16.mxu1 %v10449_v14  ;;  %v10866_v31 = vld [vmem:[#allocation141_spill] sm:$0xff]  ;;  %v10867_v14 = vld [vmem:[#allocation142_spill] sm:$0xff] }
0x11f9   : > { %5196 = vmatpush1.bf16.msra.mxu0 %v10450_v19  ;;  %5237 = vmatpush1.bf16.msra.mxu1 %v10451_v5  ;;  %v10868_v19 = vld [vmem:[#allocation143_spill] sm:$0xff]  ;;  %v10869_v5 = vld [vmem:[#allocation144_spill] sm:$0xff] }
0x11fa   : > { %5197 = vmatprep.subr.bf16.mxu0 %v10452_v33  ;;  %5238 = vmatprep.subr.bf16.mxu1 %v10453_v57  ;;  %v6791_v33 = vld [vmem:[#allocation8] ss:$16 sps:$4 sm:$0xff]   ;;  %v6793_v57 = vld [vmem:[#allocation8 + $0x4] ss:$16 sps:$4 sm:$0xff]  }
0x11fd   : > { %5198 = vmatpush1.bf16.msra.mxu0 %v10840_v37  ;;  %5239 = vmatpush1.bf16.msra.mxu1 %v10841_v26  ;;  %v6836_v37 = vld [vmem:[#allocation8 + $0xe8] ss:$16 sps:$4 sm:$0xff]   ;;  %v6841_v26 = vld [vmem:[#allocation8 + $0x104] ss:$16 sps:$4 sm:$0xff]  }
0x11fe   : > { %5199 = vmatprep.subr.bf16.mxu0 %v10842_v60  ;;  %5240 = vmatprep.subr.bf16.mxu1 %v10843_v55  ;;  %v6844_v60 = vld [vmem:[#allocation8 + $0x10c] ss:$16 sps:$4 sm:$0xff]   ;;  %v6839_v55 = vld [vmem:[#allocation8 + $0x100] ss:$16 sps:$4 sm:$0xff]  }
0x1201   : > { %5200 = vmatpush1.bf16.msra.mxu0 %v10844_v4  ;;  %5241 = vmatpush1.bf16.msra.mxu1 %v10845_v53  ;;  %v6842_v4 = vld [vmem:[#allocation8 + $0x108] ss:$16 sps:$4 sm:$0xff]   ;;  %v6847_v53 = vld [vmem:[#allocation8 + $0x124] ss:$16 sps:$4 sm:$0xff]  }
0x1202   : > { %5201 = vmatprep.subr.bf16.mxu0 %v10846_v58  ;;  %5242 = vmatprep.subr.bf16.mxu1 %v10847_v21  ;;  %v6850_v58 = vld [vmem:[#allocation8 + $0x12c] ss:$16 sps:$4 sm:$0xff]   ;;  %v6845_v21 = vld [vmem:[#allocation8 + $0x120] ss:$16 sps:$4 sm:$0xff]  }
0x1205   : > { %5202 = vmatpush1.bf16.msra.mxu0 %v10848_v45  ;;  %5243 = vmatpush1.bf16.msra.mxu1 %v10849_v47  ;;  %v6848_v45 = vld [vmem:[#allocation8 + $0x128] ss:$16 sps:$4 sm:$0xff]   ;;  %v6853_v47 = vld [vmem:[#allocation8 + $0x144] ss:$16 sps:$4 sm:$0xff]  }
0x1206   : > { %5203 = vmatprep.subr.bf16.mxu0 %v10850_v1  ;;  %5244 = vmatprep.subr.bf16.mxu1 %v10851_v56  ;;  %v6856_v1 = vld [vmem:[#allocation8 + $0x14c] ss:$16 sps:$4 sm:$0xff]   ;;  %v6851_v56 = vld [vmem:[#allocation8 + $0x140] ss:$16 sps:$4 sm:$0xff]  }
0x1209   : > { %5204 = vmatpush1.bf16.msra.mxu0 %v10852_v29  ;;  %5245 = vmatpush1.bf16.msra.mxu1 %v10853_v52  ;;  %v6854_v29 = vld [vmem:[#allocation8 + $0x148] ss:$16 sps:$4 sm:$0xff]   ;;  %v6857_v52 = vld [vmem:[#allocation8 + $0x160] ss:$16 sps:$4 sm:$0xff]  }
0x120a   : > { %5205 = vmatprep.subr.bf16.mxu0 %v10854_v41  ;;  %5246 = vmatprep.subr.bf16.mxu1 %v10855_v24  ;;  %v6859_v41 = vld [vmem:[#allocation8 + $0x164] ss:$16 sps:$4 sm:$0xff]   ;;  %v6860_v24 = vld [vmem:[#allocation8 + $0x168] ss:$16 sps:$4 sm:$0xff]  }
0x120d   : > { %5206 = vmatpush1.bf16.msra.mxu0 %v10856_v13  ;;  %5247 = vmatpush1.bf16.msra.mxu1 %v10857_v44  ;;  %v6862_v13 = vld [vmem:[#allocation8 + $0x16c] ss:$16 sps:$4 sm:$0xff]   ;;  %v6865_v44 = vld [vmem:[#allocation8 + $0x184] ss:$16 sps:$4 sm:$0xff]  }
0x120e   : > { %5207 = vmatprep.subr.bf16.mxu0 %v10858_v17  ;;  %5248 = vmatprep.subr.bf16.mxu1 %v10859_v54  ;;  %v6868_v17 = vld [vmem:[#allocation8 + $0x18c] ss:$16 sps:$4 sm:$0xff]   ;;  %v6863_v54 = vld [vmem:[#allocation8 + $0x180] ss:$16 sps:$4 sm:$0xff]  }
0x1211   : > { %5208 = vmatpush1.bf16.msra.mxu0 %v10860_v61  ;;  %5249 = vmatpush1.bf16.msra.mxu1 %v10861_v50  ;;  %v6866_v61 = vld [vmem:[#allocation8 + $0x188] ss:$16 sps:$4 sm:$0xff]   ;;  %v6871_v50 = vld [vmem:[#allocation8 + $0x1a4] ss:$16 sps:$4 sm:$0xff]  }
0x1212   : > { %5209 = vmatprep.subr.bf16.mxu0 %v10862_v20  ;;  %5250 = vmatprep.subr.bf16.mxu1 %v10863_v2  ;;  %v6874_v20 = vld [vmem:[#allocation8 + $0x1ac] ss:$16 sps:$4 sm:$0xff]   ;;  %v6869_v2 = vld [vmem:[#allocation8 + $0x1a0] ss:$16 sps:$4 sm:$0xff]  }
0x1215   : > { %5210 = vmatpush1.bf16.msra.mxu0 %v10864_v0  ;;  %5251 = vmatpush1.bf16.msra.mxu1 %v10865_v15  ;;  %v6872_v0 = vld [vmem:[#allocation8 + $0x1a8] ss:$16 sps:$4 sm:$0xff]   ;;  %v6877_v15 = vld [vmem:[#allocation8 + $0x1c4] ss:$16 sps:$4 sm:$0xff]  }
0x1216   : > { %5211 = vmatprep.subr.bf16.mxu0 %v10866_v31  ;;  %5252 = vmatprep.subr.bf16.mxu1 %v10867_v14  ;;  %v6880_v31 = vld [vmem:[#allocation8 + $0x1cc] ss:$16 sps:$4 sm:$0xff]   ;;  %v6875_v14 = vld [vmem:[#allocation8 + $0x1c0] ss:$16 sps:$4 sm:$0xff]  }
0x1219   : > { %5212 = vmatpush1.bf16.msra.mxu0 %v10868_v19  ;;  %5253 = vmatpush1.bf16.msra.mxu1 %v10869_v5  ;;  %v6878_v19 = vld [vmem:[#allocation8 + $0x1c8] ss:$16 sps:$4 sm:$0xff]   ;;  %v6883_v5 = vld [vmem:[#allocation8 + $0x1e4] ss:$16 sps:$4 sm:$0xff]  }
0x121a   : > { %5708 = vmatprep.subr.bf16.mxu0 %v6793_v57  ;;  %5749 = vmatprep.subr.bf16.mxu1 %v6796_v6  ;;  %v6881_v57 = vld [vmem:[#allocation8 + $0x1e0] ss:$16 sps:$4 sm:$0xff]  }
0x121c   : > { %5214 = vmatmul.mubr.bf16.vlgmr.msra.gmra.mrb[56].mxu0 %v9752_v32  ;;  %5255 = vmatmul.mubr.bf16.vlgmr.msra.gmra.mrb[56].mxu1 %v9752_v32  ;;  %v6833_v32 = vld [vmem:[#allocation8 + $0xe0] ss:$16 sps:$4 sm:$0xff]  }
0x121d   : > { %5709 = vmatpush1.bf16.msra.mxu0 %v6791_v33  ;;  %5750 = vmatpush1.bf16.msra.mxu1 %v6794_v22  ;;  %v6886_v33 = vld [vmem:[#allocation8 + $0x1ec] ss:$16 sps:$4 sm:$0xff]   ;;  %v6884_v22 = vld [vmem:[#allocation8 + $0x1e8] ss:$16 sps:$4 sm:$0xff]  }
0x121e   : > { %5710 = vmatprep.subr.bf16.mxu0 %v6799_v42  ;;  %5751 = vmatprep.subr.bf16.mxu1 %v6802_v59 }
0x1221   : > { %5711 = vmatpush1.bf16.msra.mxu0 %v6797_v10  ;;  %5752 = vmatpush1.bf16.msra.mxu1 %v6800_v34 }
0x1222   : > { %5712 = vmatprep.subr.bf16.mxu0 %v6805_v12  ;;  %5753 = vmatprep.subr.bf16.mxu1 %v6808_v49 }
0x1225   : > { %5713 = vmatpush1.bf16.msra.mxu0 %v6803_v63  ;;  %5754 = vmatpush1.bf16.msra.mxu1 %v6806_v46  ;;  %v10870_v46 = vld [vmem:[#allocation12_spill] sm:$0xff] }
0x1226   : > { %5714 = vmatprep.subr.bf16.mxu0 %v6811_v36  ;;  %5755 = vmatprep.subr.bf16.mxu1 %v6814_v18  ;;  %v5263_v36 = vrot.slane %v10870_v46, 6  ;;  %v10871_v18 = vld [vmem:[#allocation84_spill] sm:$0xff] }
0x1229   : > { %5715 = vmatpush1.bf16.msra.mxu0 %v6809_v43  ;;  %5756 = vmatpush1.bf16.msra.mxu1 %v6812_v62  ;;  %v5265_v43 = vrot.slane %v10871_v18, 6  ;;  %v10872_v62 = vld [vmem:[#allocation79_spill] sm:$0xff] }
0x122a   : > { %5716 = vmatprep.subr.bf16.mxu0 %v6817_v11  ;;  %5757 = vmatprep.subr.bf16.mxu1 %v6820_v38  ;;  %v5264_v11 = vrot.slane %v10872_v62, 6  ;;  %v10873_v38 = vld [vmem:[#allocation85_spill] sm:$0xff] }
0x122d   : > { %5717 = vmatpush1.bf16.msra.mxu0 %v6815_v39  ;;  %5758 = vmatpush1.bf16.msra.mxu1 %v6818_v51  ;;  %v5266_v39 = vrot.slane %v10873_v38, 6 }
0x122e   : > { %5718 = vmatprep.subr.bf16.mxu0 %v6823_v9  ;;  %5759 = vmatprep.subr.bf16.mxu1 %v6826_v16  ;;  %v10874_v16 = vld [vmem:[#allocation145_spill] sm:$0xff] }
0x1231   : > { %5719 = vmatpush1.bf16.msra.mxu0 %v6821_v35  ;;  %5760 = vmatpush1.bf16.msra.mxu1 %v6824_v30  ;;  %v10875_v30 = vld [vmem:[#allocation146_spill] sm:$0xff] }
0x1232   : > { %5720 = vmatprep.subr.bf16.mxu0 %v6829_v7  ;;  %5761 = vmatprep.subr.bf16.mxu1 %v6832_v23 }
0x1235   : > { %5721 = vmatpush1.bf16.msra.mxu0 %v6827_v48  ;;  %5762 = vmatpush1.bf16.msra.mxu1 %v6830_v27 }
0x1236   : > { %5722 = vmatprep.subr.bf16.mxu0 %v6835_v40  ;;  %5763 = vmatprep.subr.bf16.mxu1 %v6838_v3 }
0x1239   : > { %5723 = vmatpush1.bf16.msra.mxu0 %v6833_v32  ;;  %5764 = vmatpush1.bf16.msra.mxu1 %v6836_v37 }
0x123a   : > { %5724 = vmatprep.subr.bf16.mxu0 %v6841_v26  ;;  %5765 = vmatprep.subr.bf16.mxu1 %v6844_v60 }
0x123d   : > { %5725 = vmatpush1.bf16.msra.mxu0 %v6839_v55  ;;  %5766 = vmatpush1.bf16.msra.mxu1 %v6842_v4 }
0x123e   : > { %5726 = vmatprep.subr.bf16.mxu0 %v6847_v53  ;;  %5767 = vmatprep.subr.bf16.mxu1 %v6850_v58 }
0x1241   : > { %5727 = vmatpush1.bf16.msra.mxu0 %v6845_v21  ;;  %5768 = vmatpush1.bf16.msra.mxu1 %v6848_v45 }
0x1242   : > { %5728 = vmatprep.subr.bf16.mxu0 %v6853_v47  ;;  %5769 = vmatprep.subr.bf16.mxu1 %v6856_v1 }
0x1245   : > { %5729 = vmatpush1.bf16.msra.mxu0 %v6851_v56  ;;  %5770 = vmatpush1.bf16.msra.mxu1 %v6854_v29 }
0x1246   : > { %5730 = vmatprep.subr.bf16.mxu0 %v6859_v41  ;;  %5771 = vmatprep.subr.bf16.mxu1 %v6862_v13 }
0x1249   : > { %5731 = vmatpush1.bf16.msra.mxu0 %v6857_v52  ;;  %5772 = vmatpush1.bf16.msra.mxu1 %v6860_v24 }
0x124a   : > { %5732 = vmatprep.subr.bf16.mxu0 %v6865_v44  ;;  %5773 = vmatprep.subr.bf16.mxu1 %v6868_v17 }
0x124d   : > { %5733 = vmatpush1.bf16.msra.mxu0 %v6863_v54  ;;  %5774 = vmatpush1.bf16.msra.mxu1 %v6866_v61 }
0x124e   : > { %5734 = vmatprep.subr.bf16.mxu0 %v6871_v50  ;;  %5775 = vmatprep.subr.bf16.mxu1 %v6874_v20 }
0x1251   : > { %5735 = vmatpush1.bf16.msra.mxu0 %v6869_v2  ;;  %5776 = vmatpush1.bf16.msra.mxu1 %v6872_v0 }
0x1252   : > { %5736 = vmatprep.subr.bf16.mxu0 %v6877_v15  ;;  %5777 = vmatprep.subr.bf16.mxu1 %v6880_v31 }
0x1255   : > { %5737 = vmatpush1.bf16.msra.mxu0 %v6875_v14  ;;  %5778 = vmatpush1.bf16.msra.mxu1 %v6878_v19 }
0x1256   : > { %5738 = vmatprep.subr.bf16.mxu0 %v6883_v5  ;;  %5779 = vmatprep.subr.bf16.mxu1 %v6886_v33 }
0x1259   : > { %5739 = vmatpush1.bf16.msra.mxu0 %v6881_v57  ;;  %5780 = vmatpush1.bf16.msra.mxu1 %v6884_v22 }
0x12af   : > { %v5133_v6 = vpop.f32.mrb[52].mxu0  ;;  %v5174_v42 = vpop.f32.mrb[52].mxu1 }
0x12b0   : > { %v5135_v59 = vpop.f32.mrb[53].mxu0  ;;  %v5176_v10 = vpop.f32.mrb[53].mxu1  ;;  %v5271_v37 = vadd.f32 %v5263_v36, %v5133_v6  ;;  %v5273_v26 = vadd.f32 %v5265_v43, %v5174_v42 }
0x12b1   : > { %v5137_v34 = vpop.f32.mrb[54].mxu0  ;;  %v5178_v12 = vpop.f32.mrb[54].mxu1  ;;  %v5272_v58 = vadd.f32 %v5264_v11, %v5135_v59  ;;  %v5274_v21 = vadd.f32 %v5266_v39, %v5176_v10 }
0x12b2   : > { %v5138_v49 = vpop.f32.mrb[55].mxu0  ;;  %v5179_v63 = vpop.f32.mrb[55].mxu1 }
0x12ef   : > { %v5215_v51 = vpop.f32.mrb[56].mxu0  ;;  %v5256_v9 = vpop.f32.mrb[56].mxu1 }
0x12f0   : > { %v5275_v35 = vadd.f32 %v5215_v51, %v10874_v16  ;;  %v5277_v7 = vadd.f32 %v5256_v9, %v10875_v30  ;;  %v5217_v23 = vpop.f32.mrb[57].mxu0  ;;  %v5258_v48 = vpop.f32.mrb[57].mxu1 }
0x12f1   : > { %v5276_v27 = vadd.f32 %v5217_v23, %v8966_v25  ;;  %v5278_v40 = vadd.f32 %v5258_v48, %v8970_v28  ;;  %v5219_v3 = vpop.f32.mrb[58].mxu0  ;;  %v5260_v32 = vpop.f32.mrb[58].mxu1 }
0x12f2   : > { %v5283_v60 = vrot.slane %v5275_v35, 6  ;;  %v5285_v55 = vrot.slane %v5277_v7, 6  ;;  %v5220_v4 = vpop.f32.mrb[59].mxu0  ;;  %v5261_v53 = vpop.f32.mrb[59].mxu1 }
0x12f3   : > { %v5284_v45 = vrot.slane %v5276_v27, 6  ;;  %v5286_v47 = vrot.slane %v5278_v40, 6  ;;  %v6224_v4 = vld [vmem:[#allocation3] ss:$0 sm:$0xff] (%p2612_p10) }
0x12f4   : > { %v5291_v1 = vsel %vm486_vm1, %v5271_v37, %v5283_v60  ;;  %v5293_v56 = vsel %vm486_vm1, %v5273_v26, %v5285_v55  ;;  %v6223_v26 = vld [vmem:[%s9868_s13] ss:$0 sm:$0xff] (%p2612_p10) }
0x12f5   : > { %v6153_v29 = vmul.f32 -1.442695, %v5291_v1  ;;  %v5292_v52 = vsel %vm486_vm1, %v5272_v58, %v5284_v45  ;;  %v5294_v41 = vsel %vm486_vm1, %v5274_v21, %v5286_v47 }
0x12f6   : > { %v6154_v24 = vmul.f32 -1.442695, %v5292_v52  ;;  %v6155_v13 = vmul.f32 -1.442695, %v5294_v41 }
0x12f7   : > { %6999 = vpow2.f32 %v6153_v29 }
0x12f8   : > { %7001 = vpow2.f32 %v6154_v24 }
0x12f9   : > { %7003 = vpow2.f32 %v6155_v13 }
0x12fa   : > { %7005 = vtanh.f32 %v5293_v56 }
0x1301   : > { %v7000_v44 = vpop.eup %6999 }
0x1302   : > { %v7002_v17 = vpop.eup %7001  ;;  %v5298_v54 = vadd.f32 1.0, %v7000_v44 }
0x1303   : > { %v5304_v61 = vadd.f32 1.0, %v7002_v17  ;;  %v7004_v50 = vpop.eup %7003 }
0x1304   : > { %7007 = vrcp.f32 %v5298_v54  ;;  %v7006_v20 = vpop.eup %7005  ;;  %v5311_v31 = vadd.f32 1.0, %v7004_v50 }
0x1305   : > { %7009 = vrcp.f32 %v5304_v61 }
0x1306   : > { %7011 = vrcp.f32 %v5311_v31 }
0x130e   : > { %v7008_v2 = vpop.eup %7007 }
0x130f   : > { %v7010_v0 = vpop.eup %7009  ;;  %v5315_v15 = vmul.f32 %v7008_v2, %v7006_v20 }
0x1310   : > { %v5314_v14 = vmul.f32 %v7010_v0, %v9749_v8  ;;  %v7012_v19 = vpop.eup %7011 }
0x1312   : > { %v5316_v6 = vadd.f32 %v5315_v15, %v5314_v14  }
0x1314   : > { %7013 = vtanh.f32 %v5316_v6  ;;  %v5810_v48 = vrot.slane %v5316_v6, 2 }
0x131e   : > { %v7014_v5 = vpop.eup %7013 }
0x131f   : > { %v5318_v10 = vmul.f32 %v7014_v5, %v7012_v19  }
0x1321   : > { %v5320_v33 = vrot.slane %v5318_v10, 2  ;;  %v5322_v22 = vpack.c.bf16 %v5318_v10, %v5318_v10 }
0x1323   : > { %v5323_v57 = vpack.c.bf16 %v5320_v33, %v5320_v33 }
0x1325   : > { %5740 = vmatprep.mubr.bf16.mxu0 %v5323_v57  ;;  %5781 = vmatprep.mubr.bf16.mxu1 %v5323_v57 }
0x1326   : > { %5741 = vmatmul.mubr.bf16.vlgmr.msra.gmra.mrb[60].mxu0 %v5322_v22  ;;  %5782 = vmatmul.mubr.bf16.vlgmr.msra.gmra.mrb[60].mxu1 %v5322_v22 }
0x13f9   : > { %v5742_v42 = vpop.f32.mrb[60].mxu0  ;;  %v5783_v59 = vpop.f32.mrb[60].mxu1 }
0x13fa   : > { %v5743_v34 = vadd.f32 %v5742_v42, %v10874_v16  ;;  %v5744_v12 = vpop.f32.mrb[61].mxu0  ;;  %v5785_v49 = vpop.f32.mrb[61].mxu1  ;;  %v5784_v39 = vadd.f32 %v5783_v59, %v10875_v30 }
0x13fb   : > { %v5745_v8 = vadd.f32 %v5744_v12, %v8966_v25  ;;  %v5746_v63 = vpop.f32.mrb[62].mxu0  ;;  %v5787_v46 = vpop.f32.mrb[62].mxu1  ;;  %v5786_v11 = vadd.f32 %v5785_v49, %v8970_v28 }
0x13fc   : > { %v6220_v36 = vmul.f32 -1.442695, %v5743_v34  ;;  %v5747_v18 = vpop.f32.mrb[63].mxu0  ;;  %v5788_v43 = vpop.f32.mrb[63].mxu1 }
0x13fd   : > { %v6221_v62 = vmul.f32 -1.442695, %v5745_v8  ;;  %v6222_v38 = vmul.f32 -1.442695, %v5786_v11 }
0x13fe   : > { %7015 = vpow2.f32 %v6220_v36 }
0x13ff   : > { %7017 = vpow2.f32 %v6221_v62 }
0x1400   : > { %7019 = vpow2.f32 %v6222_v38 }
0x1401   : > { %7021 = vtanh.f32 %v5784_v39 }
0x1408   : > { %v7016_v51 = vpop.eup %7015 }
0x1409   : > { %v7018_v9 = vpop.eup %7017  ;;  %v5793_v16 = vadd.f32 1.0, %v7016_v51 }
0x140a   : > { %v5799_v35 = vadd.f32 1.0, %v7018_v9  ;;  %v7020_v25 = vpop.eup %7019 }
0x140b   : > { %7023 = vrcp.f32 %v5793_v16  ;;  %v7022_v7 = vpop.eup %7021  ;;  %v5806_v3 = vadd.f32 1.0, %v7020_v25 }
0x140c   : > { %7025 = vrcp.f32 %v5799_v35 }
0x140d   : > { %7027 = vrcp.f32 %v5806_v3 }
0x1415   : > { %v7024_v23 = vpop.eup %7023 }
0x1416   : > { %v7026_v27 = vpop.eup %7025  ;;  %v5813_v40 = vmul.f32 %v7024_v23, %v7022_v7 }
0x1417   : > { %v5812_v32 = vmul.f32 %v7026_v27, %v5810_v48  ;;  %v7028_v28 = vpop.eup %7027 }
0x1419   : > { %v5814_v1 = vadd.f32 %v5813_v40, %v5812_v32  }
0x141b   : > { %7029 = vtanh.f32 %v5814_v1 }
0x1422   :  { %2614 = sbr.rel (!%p2612_p10) target bundleno = 2298 (0x8fa), region = 108 }
0x1425   : > { %v7030_v30 = vpop.eup %7029 }
0x1426   : > { %v5816_v37 = vmul.f32 %v7030_v30, %v7028_v28  }
0x1428   : > { %v10876_v62 = vmov %v5816_v37  ;;  %v5824_v60 = vmul.f32 (%p2612_p10), %v6223_v26, %v5816_v37 }
0x142a   :  { %v5825_v55 = vsel %vm486_vm1, %v5824_v60, 0.0 }
0x142b   :  { %5826 = vadd.xlane.f32.xlu0 %v5825_v55 }
0x14b8   :  { %v5827_v53 = vpop.xlane.xlu0 %5826 }
0x14b9   :  { %v5835_v58 = vadd.f32 %v6224_v4, %v5827_v53 }
0x14bb   :  { %5837 = vst.msk [vmem:[%s9870_s15] sm:$0x3] %vm5836_vm6, %v5835_v58 }
0x14bc   :  { %5842 = vsyncpa [#allocation5], 1 }
0x14bd   :  { %5843 = vsyncpa [#allocation7], 1 }

</bundles_post_ra>
